<compile_context>
chip_gen: v5e
topology: v5e:2x2
jax: 0.10.0
libtpu: 0.0.40
codegen_flags: <defaults>
</compile_context>

<pallas_src>
import numpy as np
import jax
import jax.numpy as jnp
from jax.experimental import pallas as pl
from jax.experimental.pallas import tpu as pltpu


# ----------------------------------------------------------------------------
# Structural constants for the lane-major vector layout [m, 3*C]
# ----------------------------------------------------------------------------
def _plane_sum(h):
    """P [3h, h]:  (x @ P)[:, j] = sum_plane x[:, plane*h + j]."""
    return jnp.kron(jnp.ones((3, 1), jnp.float32), jnp.eye(h, dtype=jnp.float32))


def _plane_bcast(vo):
    """B [vo, 3vo]:  (g @ B)[:, plane*vo + j] = g[:, j]."""
    return jnp.kron(jnp.ones((1, 3), jnp.float32), jnp.eye(vo, dtype=jnp.float32))


def _block_diag3(w):
    """kron(I3, w): apply w independently to each of the 3 vector planes."""
    return jnp.kron(jnp.eye(3, dtype=jnp.float32), w.astype(jnp.float32))


def _compiler_params():
    if hasattr(pltpu, "CompilerParams"):
        return pltpu.CompilerParams(dimension_semantics=("arbitrary",))
    if hasattr(pltpu, "TPUCompilerParams"):
        return pltpu.TPUCompilerParams(dimension_semantics=("arbitrary",))
    return None


# ----------------------------------------------------------------------------
# In-kernel math helpers (traced inside the fused Pallas kernel)
# ----------------------------------------------------------------------------
def _recip(x):
    """1/x for positive x: EUP approximate reciprocal + one Newton step
    (full f32 precision, negligible VPU cost on the tiny [N,1] counts)."""
    if hasattr(pl, "reciprocal"):
        r = pl.reciprocal(x, approx=True)
        return r * (2.0 - x * r)
    return 1.0 / x


def _layernorm(mm, s, v, g, b, P):
    """GVP LayerNorm.  s: [m, si], v: [m, 3*vi] lane-major, P: [3vi, vi]."""
    mu = jnp.mean(s, axis=-1, keepdims=True)
    var = jnp.mean(jnp.square(s - mu), axis=-1, keepdims=True)
    s_ln = (s - mu) * jax.lax.rsqrt(var + 1e-5) * g + b
    vn_sq = jnp.maximum(mm(v * v, P), 1e-8)                    # [m, vi]
    inv = jax.lax.rsqrt(jnp.mean(vn_sq, axis=-1, keepdims=True))
    return s_ln, v * inv


def _gvp(mm, s, v, p, scalar_relu):
    """GVP with vector output (vector_gate=True, vector_act=None).

    s: [m, si], v: [m, 3*vi] lane-major.  p holds pre-transposed /
    block-diagonal weights (refs):
      whT [3vi,3h], P [3h,h], wsT_s [si,so], wsT_vn [h,so], bs [1,so],
      wvT [3h,3vo], B [vo,3vo], wsvT [so,vo], bsv [1,vo].
    """
    vh = mm(v, p['whT'][...])                                  # [m, 3h]
    vn = jnp.sqrt(jnp.maximum(mm(vh * vh, p['P'][...]), 1e-8))
    s_lin = mm(s, p['wsT_s'][...]) + mm(vn, p['wsT_vn'][...]) + p['bs'][...]
    gate = jax.nn.sigmoid(mm(s_lin, p['wsvT'][...]) + p['bsv'][...])
    v_out = mm(vh, p['wvT'][...]) * mm(gate, p['B'][...])      # [m, 3vo]
    s_out = jnp.maximum(s_lin, 0.0) if scalar_relu else s_lin
    return s_out, v_out


def _gvp_scalar(mm, s, v, p, scalar_relu):
    """GVP with scalar-only output (vo = 0)."""
    vh = mm(v, p['whT'][...])
    vn = jnp.sqrt(jnp.maximum(mm(vh * vh, p['P'][...]), 1e-8))
    s_lin = mm(s, p['wsT_s'][...]) + mm(vn, p['wsT_vn'][...]) + p['bs'][...]
    return jnp.maximum(s_lin, 0.0) if scalar_relu else s_lin


# ----------------------------------------------------------------------------
# GVP_encoder forward: ONE fused pallas_call, grid = (num_layers,)
# ----------------------------------------------------------------------------
def gvp_encoder_forward(packed, h_V_s, h_V_v, edge_index, h_E_s, h_E_v):
    f32 = jnp.float32
    mxu_dtype = packed['head']['dwT'].dtype
    num_layers = packed['layers_s']['m1']['whT'].shape[0]

    n = h_V_s.shape[0]
    e = h_E_s.shape[0]
    ns = packed['head']['dwT'].shape[1]
    nv3 = packed['layers_s']['m1']['wvT'].shape[-1]            # 3 * nv
    se = packed['We']['wsT_s'].shape[1]
    ve3 = packed['We']['wvT'].shape[-1]                        # 3 * ve

    # PyTorch vector layout [m, C, 3]  ->  lane-major [m, 3*C]
    hv_v = jnp.transpose(h_V_v, (0, 2, 1)).reshape(n, -1).astype(f32)
    he_v = jnp.transpose(h_E_v, (0, 2, 1)).reshape(e, -1).astype(f32)

    # Graph constants: built once per forward (depend only on edge_index),
    # re-used by every layer from VMEM (constant index maps).
    src = edge_index[0].astype(jnp.int32)
    dst = edge_index[1].astype(jnp.int32)
    iota_n = jnp.arange(n, dtype=jnp.int32)
    oh_src = (src[:, None] == iota_n[None, :]).astype(mxu_dtype)    # [e, n]
    oh_dst = (dst[:, None] == iota_n[None, :]).astype(mxu_dtype)    # [e, n]
    oh_scat = (iota_n[:, None] == dst[None, :]).astype(mxu_dtype)   # [n, e]
    cnt = jnp.maximum(
        jnp.sum((iota_n[:, None] == dst[None, :]).astype(f32),
                axis=1, keepdims=True), 1.0)                        # [n, 1]

    const = {
        'hv_s': h_V_s.astype(f32), 'hv_v': hv_v,
        'he_s': h_E_s.astype(f32), 'he_v': he_v,
        'oh_src': oh_src, 'oh_dst': oh_dst, 'oh_scat': oh_scat, 'cnt': cnt,
        'Wv': packed['Wv'], 'We': packed['We'], 'head': packed['head'],
    }
    c_flat, c_def = jax.tree_util.tree_flatten(const)
    l_flat, l_def = jax.tree_util.tree_flatten(packed['layers_s'])
    n_c, n_l = len(c_flat), len(l_flat)

    def _const_spec(x):                      # whole-array block, revisited
        nd = x.ndim

        def imap(l):
            return (0,) * nd
        return pl.BlockSpec(tuple(x.shape), imap)

    def _layer_spec(x):                      # stacked [L, ...]; pick layer l
        nd = x.ndim

        def imap(l):
            return (l,) + (0,) * (nd - 1)
        return pl.BlockSpec((None,) + tuple(x.shape[1:]), imap)

    in_specs = ([_const_spec(x) for x in c_flat]
                + [_layer_spec(x) for x in l_flat])

    def _mm(a, b):
        # bf16-at-MXU-boundary when packed with mxu_dtype=bfloat16 (v5e/v6e);
        # accumulation is always f32, elementwise math stays f32.
        return jnp.dot(a.astype(mxu_dtype), b.astype(mxu_dtype),
                       preferred_element_type=jnp.float32)

    def fused_kernel(*refs):
        c = jax.tree_util.tree_unflatten(c_def, refs[:n_c])
        w = jax.tree_util.tree_unflatten(l_def, refs[n_c:n_c + n_l])
        out_ref = refs[n_c + n_l]
        s_scr, v_scr, es_scr, ev_scr = refs[n_c + n_l + 1:]

        step = pl.program_id(0)

        # ---- step 0: W_v / W_e input embeddings (LayerNorm + GVP) ----------
        @pl.when(step == 0)
        def _embed():
            pv = c['Wv']
            s0, v0 = _layernorm(_mm, c['hv_s'][...], c['hv_v'][...],
                                pv['ln_g'][...], pv['ln_b'][...],
                                pv['ln_P'][...])
            s1, v1 = _gvp(_mm, s0, v0, pv, scalar_relu=False)
            s_scr[...] = s1
            v_scr[...] = v1

            pe = c['We']
            es0, ev0 = _layernorm(_mm, c['he_s'][...], c['he_v'][...],
                                  pe['ln_g'][...], pe['ln_b'][...],
                                  pe['ln_P'][...])
            es1, ev1 = _gvp(_mm, es0, ev0, pe, scalar_relu=False)
            es_scr[...] = es1
            ev_scr[...] = ev1

        s = s_scr[...]                       # [n, ns]
        v = v_scr[...]                       # [n, 3nv]
        es = es_scr[...]                     # [e, se]
        ev = ev_scr[...]                     # [e, 3ve]
        oh_src_ = c['oh_src'][...]
        oh_dst_ = c['oh_dst'][...]
        oh_scat_ = c['oh_scat'][...]
        inv_cnt = _recip(c['cnt'][...])      # EUP approx reciprocal (+1 NR)

        # ---- GVPConv: gather + 3 message GVPs + scatter-mean ---------------
        m0 = w['m0']
        vh = (_mm(oh_src_, _mm(v, m0['whT_vs'][...]))
              + _mm(ev, m0['whT_ev'][...])
              + _mm(oh_dst_, _mm(v, m0['whT_vd'][...])))       # [e, 3h0]
        vn = jnp.sqrt(jnp.maximum(_mm(vh * vh, m0['P'][...]), 1e-8))
        ms = (_mm(oh_src_, _mm(s, m0['wsT_ss'][...]))
              + _mm(es, m0['wsT_es'][...])
              + _mm(oh_dst_, _mm(s, m0['wsT_sd'][...]))
              + _mm(vn, m0['wsT_vn'][...]) + m0['bs'][...])    # [e, ns]
        gate = jax.nn.sigmoid(_mm(ms, m0['wsvT'][...]) + m0['bsv'][...])
        mv = _mm(vh, m0['wvT'][...]) * _mm(gate, m0['B'][...])  # [e, 3nv]
        ms = jnp.maximum(ms, 0.0)

        ms, mv = _gvp(_mm, ms, mv, w['m1'], scalar_relu=True)
        ms, mv = _gvp(_mm, ms, mv, w['m2'], scalar_relu=False)

        dh_s = _mm(oh_scat_, ms) * inv_cnt                     # [n, ns]
        dh_v = _mm(oh_scat_, mv) * inv_cnt                     # [n, 3nv]
        s, v = _layernorm(_mm, s + dh_s, v + dh_v,
                          w['n0_g'][...], w['n0_b'][...], w['n0_P'][...])

        # ---- feed-forward (2 GVPs) + residual + LayerNorm -------------------
        fs, fv = _gvp(_mm, s, v, w['f0'], scalar_relu=True)
        fs, fv = _gvp(_mm, fs, fv, w['f1'], scalar_relu=False)
        s, v = _layernorm(_mm, s + fs, v + fv,
                          w['n1_g'][...], w['n1_b'][...], w['n1_P'][...])

        s_scr[...] = s
        v_scr[...] = v

        # ---- last step: W_out head + mean pool (ones-matmul) + dense --------
        @pl.when(step == pl.num_programs(0) - 1)
        def _head():
            ph = c['head']
            hs, hv = _layernorm(_mm, s, v, ph['ln_g'][...], ph['ln_b'][...],
                                ph['ln_P'][...])
            feats = _gvp_scalar(_mm, hs, hv, ph, scalar_relu=True)  # [n, ns]
            ones_row = jnp.full((1, feats.shape[0]), 1.0 / feats.shape[0],
                                dtype=jnp.float32)
            pooled = _mm(ones_row, feats)                           # [1, ns]
            out_ref[...] = jnp.maximum(
                _mm(pooled, ph['dwT'][...]) + ph['db'][...], 0.0)

    call_kwargs = {}
    cp = _compiler_params()
    if cp is not None:
        call_kwargs['compiler_params'] = cp

    return pl.pallas_call(
        fused_kernel,
        out_shape=jax.ShapeDtypeStruct((1, ns), jnp.float32),
        grid=(num_layers,),
        in_specs=in_specs,
        out_specs=pl.BlockSpec((1, ns), lambda l: (0, 0)),
        scratch_shapes=[
            pltpu.VMEM((n, ns), f32),      # node scalar features (resident)
            pltpu.VMEM((n, nv3), f32),     # node vector features [n, 3*nv]
            pltpu.VMEM((e, se), f32),      # edge scalar features
            pltpu.VMEM((e, ve3), f32),     # edge vector features [e, 3*ve]
        ],
        **call_kwargs,
    )(*(c_flat + l_flat))


# ----------------------------------------------------------------------------
# One-time weight packing: torch layout -> lane-major kernel layout
# (pre-transposed, block-diagonalized, concat blocks pre-split, biases [1,d],
#  MXU operands optionally pre-cast to bf16)
# ----------------------------------------------------------------------------
def _pack_gvp(p, mxu_dtype):
    h = p['wh'].shape[0]
    wsT = p['ws'].T
    si = wsT.shape[0] - h
    d = {
        'whT': _block_diag3(p['wh'].T).astype(mxu_dtype),      # [3vi, 3h]
        'P': _plane_sum(h).astype(mxu_dtype),                  # [3h, h]
        'wsT_s': wsT[:si].astype(mxu_dtype),                   # [si, so]
        'wsT_vn': wsT[si:].astype(mxu_dtype),                  # [h, so]
        'bs': p['bs'].reshape(1, -1).astype(jnp.float32),
    }
    if 'wv' in p:
        vo = p['wv'].shape[0]
        d['wvT'] = _block_diag3(p['wv'].T).astype(mxu_dtype)   # [3h, 3vo]
        d['B'] = _plane_bcast(vo).astype(mxu_dtype)            # [vo, 3vo]
        d['wsvT'] = p['wsv'].T.astype(mxu_dtype)
        d['bsv'] = p['bsv'].reshape(1, -1).astype(jnp.float32)
    return d


def _pack_msg0(p, ns, se, nv, ve, mxu_dtype):
    d = _pack_gvp(p, mxu_dtype)
    del d['whT'], d['wsT_s']
    whT = p['wh'].T                       # [2nv+ve, h0]
    wsT = p['ws'].T
    h0 = p['wh'].shape[0]
    si = wsT.shape[0] - h0                # 2ns + se
    d['whT_vs'] = _block_diag3(whT[:nv]).astype(mxu_dtype)
    d['whT_ev'] = _block_diag3(whT[nv:nv + ve]).astype(mxu_dtype)
    d['whT_vd'] = _block_diag3(whT[nv + ve:]).astype(mxu_dtype)
    wsT_s = wsT[:si]
    d['wsT_ss'] = wsT_s[:ns].astype(mxu_dtype)
    d['wsT_es'] = wsT_s[ns:ns + se].astype(mxu_dtype)
    d['wsT_sd'] = wsT_s[ns + se:].astype(mxu_dtype)
    return d


def _pack_ln(ln, vi, mxu_dtype):
    return {'ln_g': ln['g'].reshape(1, -1).astype(jnp.float32),
            'ln_b': ln['b'].reshape(1, -1).astype(jnp.float32),
            'ln_P': _plane_sum(vi).astype(mxu_dtype)}


def pack_params(params, mxu_dtype=jnp.float32):
    ns = params['W_v']['ws'].shape[0]
    nv = params['W_v']['wv'].shape[0]
    se = params['W_e']['ws'].shape[0]
    ve = params['W_e']['wv'].shape[0]
    vi_node = params['W_v']['wh'].shape[1]
    vi_edge = params['W_e']['wh'].shape[1]

    Wv = dict(_pack_gvp(params['W_v'], mxu_dtype),
              **_pack_ln(params['ln_v'], vi_node, mxu_dtype))
    We = dict(_pack_gvp(params['W_e'], mxu_dtype),
              **_pack_ln(params['ln_e'], vi_edge, mxu_dtype))

    per_layer = []
    for lp in params['layers']:
        per_layer.append({
            'm0': _pack_msg0(lp['conv_message'][0], ns, se, nv, ve, mxu_dtype),
            'm1': _pack_gvp(lp['conv_message'][1], mxu_dtype),
            'm2': _pack_gvp(lp['conv_message'][2], mxu_dtype),
            'n0_g': lp['norm0']['g'].reshape(1, -1).astype(jnp.float32),
            'n0_b': lp['norm0']['b'].reshape(1, -1).astype(jnp.float32),
            'n0_P': _plane_sum(nv).astype(mxu_dtype),
            'f0': _pack_gvp(lp['ff'][0], mxu_dtype),
            'f1': _pack_gvp(lp['ff'][1], mxu_dtype),
            'n1_g': lp['norm1']['g'].reshape(1, -1).astype(jnp.float32),
            'n1_b': lp['norm1']['b'].reshape(1, -1).astype(jnp.float32),
            'n1_P': _plane_sum(nv).astype(mxu_dtype),
        })
    layers_s = jax.tree_util.tree_map(lambda *xs: jnp.stack(xs, axis=0),
                                      *per_layer)

    head = dict(_pack_gvp(params['W_out'], mxu_dtype),
                **_pack_ln(params['ln_out'], nv, mxu_dtype))
    head['dwT'] = params['dense']['w'].T.astype(mxu_dtype)
    head['db'] = params['dense']['b'].reshape(1, -1).astype(jnp.float32)

    return {'Wv': Wv, 'We': We, 'layers_s': layers_s, 'head': head}


# ----------------------------------------------------------------------------
# Pure-JAX reference (same math, torch-layout params) for validation
# ----------------------------------------------------------------------------
def _ref_ln(p, s, v):
    mu = jnp.mean(s, -1, keepdims=True)
    var = jnp.mean((s - mu) ** 2, -1, keepdims=True)
    s_out = (s - mu) / jnp.sqrt(var + 1e-5) * p['g'] + p['b']
    vn_sq = jnp.maximum(jnp.sum(v * v, axis=0), 1e-8)
    denom = jnp.sqrt(jnp.mean(vn_sq, -1, keepdims=True))
    return s_out, v / denom[None]


def _ref_gvp(p, s, v, scalar_relu):
    vh = jnp.einsum('cni,ih->cnh', v, p['wh'].T)
    vn = jnp.sqrt(jnp.maximum(jnp.sum(vh * vh, axis=0), 1e-8))
    s_out = jnp.concatenate([s, vn], -1) @ p['ws'].T + p['bs']
    if 'wv' in p:
        gate = jax.nn.sigmoid(s_out @ p['wsv'].T + p['bsv'])
        vout = jnp.einsum('cnh,ho->cno', vh, p['wv'].T) * gate[None]
    if scalar_relu:
        s_out = jnp.maximum(s_out, 0.0)
    return (s_out, vout) if 'wv' in p else s_out


def _ref_scatter_mean(dst, msg, N):
    sums = jax.ops.segment_sum(msg, dst, num_segments=N)
    counts = jax.ops.segment_sum(jnp.ones((msg.shape[0],), jnp.float32), dst,
                                 num_segments=N)
    return sums / jnp.maximum(counts, 1.0)[:, None]


def ref_forward(params, h_V_s, h_V_v, edge_index, h_E_s, h_E_v):
    v = jnp.transpose(h_V_v, (2, 0, 1))
    ev = jnp.transpose(h_E_v, (2, 0, 1))
    s, v = _ref_ln(params['ln_v'], h_V_s, v)
    s, v = _ref_gvp(params['W_v'], s, v, False)
    es, ev = _ref_ln(params['ln_e'], h_E_s, ev)
    es, ev = _ref_gvp(params['W_e'], es, ev, False)
    src, dst = edge_index[0], edge_index[1]
    N = s.shape[0]
    for lp in params['layers']:
        ms = jnp.concatenate([s[src], es, s[dst]], -1)
        mv = jnp.concatenate([v[:, src, :], ev, v[:, dst, :]], -1)
        ms, mv = _ref_gvp(lp['conv_message'][0], ms, mv, True)
        ms, mv = _ref_gvp(lp['conv_message'][1], ms, mv, True)
        ms, mv = _ref_gvp(lp['conv_message'][2], ms, mv, False)
        nsd, nvd = ms.shape[-1], mv.shape[-1]
        merged = jnp.concatenate([ms, mv[0], mv[1], mv[2]], -1)
        agg = _ref_scatter_mean(dst, merged, N)
        dh_s = agg[:, :nsd]
        dh_v = jnp.stack(
            [agg[:, nsd + c * nvd: nsd + (c + 1) * nvd] for c in range(3)], 0)
        s, v = _ref_ln(lp['norm0'], s + dh_s, v + dh_v)
        fs, fv = _ref_gvp(lp['ff'][0], s, v, True)
        fs, fv = _ref_gvp(lp['ff'][1], fs, fv, False)
        s, v = _ref_ln(lp['norm1'], s + fs, v + fv)
    so_, vo_ = _ref_ln(params['ln_out'], s, v)
    out = _ref_gvp(params['W_out'], so_, vo_, True)
    mean = jnp.mean(out, axis=0, keepdims=True)
    return jnp.maximum(mean @ params['dense']['w'].T + params['dense']['b'],
                       0.0)


# ----------------------------------------------------------------------------
# Deterministic parameter init (synthetic weights, torch layout [out, in])
# ----------------------------------------------------------------------------
def _init_gvp_params(key, si, vi, so, vo):
    h = max(vi, vo) if vo > 0 else vi
    keys = jax.random.split(key, 6)
    p = {
        'wh': (jax.random.normal(keys[0], (h, vi)) / np.sqrt(vi)).astype(jnp.float32),
        'ws': (jax.random.normal(keys[1], (so, si + h)) / np.sqrt(si + h)).astype(jnp.float32),
        'bs': (0.01 * jax.random.normal(keys[2], (so,))).astype(jnp.float32),
    }
    if vo > 0:
        p['wv'] = (jax.random.normal(keys[3], (vo, h)) / np.sqrt(h)).astype(jnp.float32)
        p['wsv'] = (jax.random.normal(keys[4], (vo, so)) / np.sqrt(so)).astype(jnp.float32)
        p['bsv'] = (0.01 * jax.random.normal(keys[5], (vo,))).astype(jnp.float32)
    return p


def _ln_params(si):
    return {'g': jnp.ones((si,), jnp.float32), 'b': jnp.zeros((si,), jnp.float32)}


def init_encoder_params(key, node_in, node_h, edge_in, edge_h, num_layers):
    ns, nv = node_h
    se, ve = edge_h
    keys = iter(jax.random.split(key, 8 + 8 * num_layers))
    params = {
        'ln_v': _ln_params(node_in[0]),
        'W_v': _init_gvp_params(next(keys), node_in[0], node_in[1], ns, nv),
        'ln_e': _ln_params(edge_in[0]),
        'W_e': _init_gvp_params(next(keys), edge_in[0], edge_in[1], se, ve),
    }
    layers = []
    for _ in range(num_layers):
        msg = [
            _init_gvp_params(next(keys), 2 * ns + se, 2 * nv + ve, ns, nv),
            _init_gvp_params(next(keys), ns, nv, ns, nv),
            _init_gvp_params(next(keys), ns, nv, ns, nv),
        ]
        ff = [
            _init_gvp_params(next(keys), ns, nv, 4 * ns, 2 * nv),
            _init_gvp_params(next(keys), 4 * ns, 2 * nv, ns, nv),
        ]
        layers.append({'conv_message': msg, 'norm0': _ln_params(ns),
                       'ff': ff, 'norm1': _ln_params(ns)})
    params['layers'] = layers
    params['ln_out'] = _ln_params(ns)
    params['W_out'] = _init_gvp_params(next(keys), ns, nv, ns, 0)
    params['dense'] = {
        'w': (jax.random.normal(next(keys), (ns, ns)) / np.sqrt(ns)).astype(jnp.float32),
        'b': jnp.zeros((ns,), jnp.float32),
    }
    return params


# ----------------------------------------------------------------------------
if __name__ == "__main__":
    key = jax.random.PRNGKey(0)
    k1, k2, k3, k4, k5, k6 = jax.random.split(key, 6)

    # module hyperparameters (small but consistent with GVP conventions)
    node_in_dim = (6, 3)
    node_h_dim = (32, 4)
    edge_in_dim = (32, 1)
    edge_h_dim = (16, 1)
    num_layers = 3

    N, E = 8, 24
    h_V_s = jax.random.normal(k1, (N, node_in_dim[0]), jnp.float32)
    h_V_v = jax.random.normal(k2, (N, node_in_dim[1], 3), jnp.float32)   # [N, C, 3]
    h_E_s = jax.random.normal(k3, (E, edge_in_dim[0]), jnp.float32)
    h_E_v = jax.random.normal(k4, (E, edge_in_dim[1], 3), jnp.float32)   # [E, C, 3]
    edge_index = jax.random.randint(k5, (2, E), 0, N, dtype=jnp.int32)

    params = init_encoder_params(k6, node_in_dim, node_h_dim, edge_in_dim,
                                 edge_h_dim, num_layers)
    ref = ref_forward(params, h_V_s, h_V_v, edge_index, h_E_s, h_E_v)

    fwd = jax.jit(gvp_encoder_forward)

    # 1) strict f32 MXU path
    packed_f32 = pack_params(params, mxu_dtype=jnp.float32)
    out = jax.block_until_ready(
        fwd(packed_f32, h_V_s, h_V_v, edge_index, h_E_s, h_E_v))
    assert out.shape == (1, node_h_dim[0])
    np.testing.assert_allclose(np.asarray(out), np.asarray(ref),
                               rtol=2e-3, atol=2e-3)

    # 2) bf16-at-MXU-boundary path (v5e/v6e perf mode; f32 accumulation,
    #    f32 elementwise math) — validated at a documented looser tolerance.
    packed_bf16 = pack_params(params, mxu_dtype=jnp.bfloat16)
    out_bf16 = jax.block_until_ready(
        fwd(packed_bf16, h_V_s, h_V_v, edge_index, h_E_s, h_E_v))
    np.testing.assert_allclose(np.asarray(out_bf16), np.asarray(ref),
                               rtol=5e-2, atol=5e-2)

    print("KERNEL_OK")
</pallas_src>

<mosaic_0001>
module attributes {stable_mosaic.version = 11 : i64} {
  func.func @fused_kernel(%arg0: i32, %arg1: memref<1x3xf32, #tpu.memory_space<vmem>>, %arg2: memref<3x1xf32, #tpu.memory_space<vmem>>, %arg3: memref<1x16xf32, #tpu.memory_space<vmem>>, %arg4: memref<1x1xf32, #tpu.memory_space<vmem>>, %arg5: memref<3x1xf32, #tpu.memory_space<vmem>>, %arg6: memref<1x32xf32, #tpu.memory_space<vmem>>, %arg7: memref<1x32xf32, #tpu.memory_space<vmem>>, %arg8: memref<3x3xf32, #tpu.memory_space<vmem>>, %arg9: memref<32x16xf32, #tpu.memory_space<vmem>>, %arg10: memref<1x16xf32, #tpu.memory_space<vmem>>, %arg11: memref<16x1xf32, #tpu.memory_space<vmem>>, %arg12: memref<3x3xf32, #tpu.memory_space<vmem>>, %arg13: memref<4x12xf32, #tpu.memory_space<vmem>>, %arg14: memref<12x4xf32, #tpu.memory_space<vmem>>, %arg15: memref<1x32xf32, #tpu.memory_space<vmem>>, %arg16: memref<1x4xf32, #tpu.memory_space<vmem>>, %arg17: memref<9x3xf32, #tpu.memory_space<vmem>>, %arg18: memref<1x6xf32, #tpu.memory_space<vmem>>, %arg19: memref<1x6xf32, #tpu.memory_space<vmem>>, %arg20: memref<9x12xf32, #tpu.memory_space<vmem>>, %arg21: memref<6x32xf32, #tpu.memory_space<vmem>>, %arg22: memref<4x32xf32, #tpu.memory_space<vmem>>, %arg23: memref<32x4xf32, #tpu.memory_space<vmem>>, %arg24: memref<12x12xf32, #tpu.memory_space<vmem>>, %arg25: memref<8x1xf32, #tpu.memory_space<vmem>>, %arg26: memref<24x32xf32, #tpu.memory_space<vmem>>, %arg27: memref<24x3xf32, #tpu.memory_space<vmem>>, %arg28: memref<12x4xf32, #tpu.memory_space<vmem>>, %arg29: memref<1x32xf32, #tpu.memory_space<vmem>>, %arg30: memref<1x32xf32, #tpu.memory_space<vmem>>, %arg31: memref<32x32xf32, #tpu.memory_space<vmem>>, %arg32: memref<12x4xf32, #tpu.memory_space<vmem>>, %arg33: memref<1x32xf32, #tpu.memory_space<vmem>>, %arg34: memref<1x32xf32, #tpu.memory_space<vmem>>, %arg35: memref<12x12xf32, #tpu.memory_space<vmem>>, %arg36: memref<32x32xf32, #tpu.memory_space<vmem>>, %arg37: memref<4x32xf32, #tpu.memory_space<vmem>>, %arg38: memref<8x6xf32, #tpu.memory_space<vmem>>, %arg39: memref<8x9xf32, #tpu.memory_space<vmem>>, %arg40: memref<24x8xf32, #tpu.memory_space<vmem>>, %arg41: memref<8x24xf32, #tpu.memory_space<vmem>>, %arg42: memref<24x8xf32, #tpu.memory_space<vmem>>, %arg43: memref<1x8x24xf32, #tpu.memory_space<vmem>>, %arg44: memref<1x24x8xf32, #tpu.memory_space<vmem>>, %arg45: memref<1x1x128xf32, #tpu.memory_space<vmem>>, %arg46: memref<1x1x8xf32, #tpu.memory_space<vmem>>, %arg47: memref<1x12x24xf32, #tpu.memory_space<vmem>>, %arg48: memref<1x32x128xf32, #tpu.memory_space<vmem>>, %arg49: memref<1x8x128xf32, #tpu.memory_space<vmem>>, %arg50: memref<1x128x8xf32, #tpu.memory_space<vmem>>, %arg51: memref<1x24x24xf32, #tpu.memory_space<vmem>>, %arg52: memref<1x4x12xf32, #tpu.memory_space<vmem>>, %arg53: memref<1x24x8xf32, #tpu.memory_space<vmem>>, %arg54: memref<1x1x32xf32, #tpu.memory_space<vmem>>, %arg55: memref<1x1x4xf32, #tpu.memory_space<vmem>>, %arg56: memref<1x24x24xf32, #tpu.memory_space<vmem>>, %arg57: memref<1x128x32xf32, #tpu.memory_space<vmem>>, %arg58: memref<1x8x32xf32, #tpu.memory_space<vmem>>, %arg59: memref<1x32x4xf32, #tpu.memory_space<vmem>>, %arg60: memref<1x24x12xf32, #tpu.memory_space<vmem>>, %arg61: memref<1x4x12xf32, #tpu.memory_space<vmem>>, %arg62: memref<1x27x9xf32, #tpu.memory_space<vmem>>, %arg63: memref<1x1x32xf32, #tpu.memory_space<vmem>>, %arg64: memref<1x1x4xf32, #tpu.memory_space<vmem>>, %arg65: memref<1x3x27xf32, #tpu.memory_space<vmem>>, %arg66: memref<1x12x27xf32, #tpu.memory_space<vmem>>, %arg67: memref<1x12x27xf32, #tpu.memory_space<vmem>>, %arg68: memref<1x16x32xf32, #tpu.memory_space<vmem>>, %arg69: memref<1x32x32xf32, #tpu.memory_space<vmem>>, %arg70: memref<1x32x32xf32, #tpu.memory_space<vmem>>, %arg71: memref<1x9x32xf32, #tpu.memory_space<vmem>>, %arg72: memref<1x32x4xf32, #tpu.memory_space<vmem>>, %arg73: memref<1x27x12xf32, #tpu.memory_space<vmem>>, %arg74: memref<1x4x12xf32, #tpu.memory_space<vmem>>, %arg75: memref<1x12x4xf32, #tpu.memory_space<vmem>>, %arg76: memref<1x1x32xf32, #tpu.memory_space<vmem>>, %arg77: memref<1x1x4xf32, #tpu.memory_space<vmem>>, %arg78: memref<1x12x12xf32, #tpu.memory_space<vmem>>, %arg79: memref<1x32x32xf32, #tpu.memory_space<vmem>>, %arg80: memref<1x4x32xf32, #tpu.memory_space<vmem>>, %arg81: memref<1x32x4xf32, #tpu.memory_space<vmem>>, %arg82: memref<1x12x12xf32, #tpu.memory_space<vmem>>, %arg83: memref<1x4x12xf32, #tpu.memory_space<vmem>>, %arg84: memref<1x12x4xf32, #tpu.memory_space<vmem>>, %arg85: memref<1x1x32xf32, #tpu.memory_space<vmem>>, %arg86: memref<1x1x4xf32, #tpu.memory_space<vmem>>, %arg87: memref<1x12x12xf32, #tpu.memory_space<vmem>>, %arg88: memref<1x32x32xf32, #tpu.memory_space<vmem>>, %arg89: memref<1x4x32xf32, #tpu.memory_space<vmem>>, %arg90: memref<1x32x4xf32, #tpu.memory_space<vmem>>, %arg91: memref<1x12x12xf32, #tpu.memory_space<vmem>>, %arg92: memref<1x12x4xf32, #tpu.memory_space<vmem>>, %arg93: memref<1x1x32xf32, #tpu.memory_space<vmem>>, %arg94: memref<1x1x32xf32, #tpu.memory_space<vmem>>, %arg95: memref<1x12x4xf32, #tpu.memory_space<vmem>>, %arg96: memref<1x1x32xf32, #tpu.memory_space<vmem>>, %arg97: memref<1x1x32xf32, #tpu.memory_space<vmem>>, %arg98: memref<1x32xf32, #tpu.memory_space<vmem>>, %arg99: memref<8x32xf32, #tpu.memory_space<vmem>>, %arg100: memref<8x12xf32, #tpu.memory_space<vmem>>, %arg101: memref<24x16xf32, #tpu.memory_space<vmem>>, %arg102: memref<24x3xf32, #tpu.memory_space<vmem>>) attributes {dimension_semantics = [#tpu.dimension_semantics<arbitrary>], iteration_bounds = array<i64: 3>, scalar_prefetch = 0 : i64, scratch_operands = 4 : i64, tpu.core_type = #tpu.core_type<tc>, window_params = [{pipeline_mode = #tpu.pipeline_mode<synchronous>, transform_indices = @transform_0, window_bounds = array<i64: 1, 3>}, {pipeline_mode = #tpu.pipeline_mode<synchronous>, transform_indices = @transform_1, window_bounds = array<i64: 3, 1>}, {pipeline_mode = #tpu.pipeline_mode<synchronous>, transform_indices = @transform_2, window_bounds = array<i64: 1, 16>}, {pipeline_mode = #tpu.pipeline_mode<synchronous>, transform_indices = @transform_3, window_bounds = array<i64: 1, 1>}, {pipeline_mode = #tpu.pipeline_mode<synchronous>, transform_indices = @transform_4, window_bounds = array<i64: 3, 1>}, {pipeline_mode = #tpu.pipeline_mode<synchronous>, transform_indices = @transform_5, window_bounds = array<i64: 1, 32>}, {pipeline_mode = #tpu.pipeline_mode<synchronous>, transform_indices = @transform_6, window_bounds = array<i64: 1, 32>}, {pipeline_mode = #tpu.pipeline_mode<synchronous>, transform_indices = @transform_7, window_bounds = array<i64: 3, 3>}, {pipeline_mode = #tpu.pipeline_mode<synchronous>, transform_indices = @transform_8, window_bounds = array<i64: 32, 16>}, {pipeline_mode = #tpu.pipeline_mode<synchronous>, transform_indices = @transform_9, window_bounds = array<i64: 1, 16>}, {pipeline_mode = #tpu.pipeline_mode<synchronous>, transform_indices = @transform_10, window_bounds = array<i64: 16, 1>}, {pipeline_mode = #tpu.pipeline_mode<synchronous>, transform_indices = @transform_11, window_bounds = array<i64: 3, 3>}, {pipeline_mode = #tpu.pipeline_mode<synchronous>, transform_indices = @transform_12, window_bounds = array<i64: 4, 12>}, {pipeline_mode = #tpu.pipeline_mode<synchronous>, transform_indices = @transform_13, window_bounds = array<i64: 12, 4>}, {pipeline_mode = #tpu.pipeline_mode<synchronous>, transform_indices = @transform_14, window_bounds = array<i64: 1, 32>}, {pipeline_mode = #tpu.pipeline_mode<synchronous>, transform_indices = @transform_15, window_bounds = array<i64: 1, 4>}, {pipeline_mode = #tpu.pipeline_mode<synchronous>, transform_indices = @transform_16, window_bounds = array<i64: 9, 3>}, {pipeline_mode = #tpu.pipeline_mode<synchronous>, transform_indices = @transform_17, window_bounds = array<i64: 1, 6>}, {pipeline_mode = #tpu.pipeline_mode<synchronous>, transform_indices = @transform_18, window_bounds = array<i64: 1, 6>}, {pipeline_mode = #tpu.pipeline_mode<synchronous>, transform_indices = @transform_19, window_bounds = array<i64: 9, 12>}, {pipeline_mode = #tpu.pipeline_mode<synchronous>, transform_indices = @transform_20, window_bounds = array<i64: 6, 32>}, {pipeline_mode = #tpu.pipeline_mode<synchronous>, transform_indices = @transform_21, window_bounds = array<i64: 4, 32>}, {pipeline_mode = #tpu.pipeline_mode<synchronous>, transform_indices = @transform_22, window_bounds = array<i64: 32, 4>}, {pipeline_mode = #tpu.pipeline_mode<synchronous>, transform_indices = @transform_23, window_bounds = array<i64: 12, 12>}, {pipeline_mode = #tpu.pipeline_mode<synchronous>, transform_indices = @transform_24, window_bounds = array<i64: 8, 1>}, {pipeline_mode = #tpu.pipeline_mode<synchronous>, transform_indices = @transform_25, window_bounds = array<i64: 24, 32>}, {pipeline_mode = #tpu.pipeline_mode<synchronous>, transform_indices = @transform_26, window_bounds = array<i64: 24, 3>}, {pipeline_mode = #tpu.pipeline_mode<synchronous>, transform_indices = @transform_27, window_bounds = array<i64: 12, 4>}, {pipeline_mode = #tpu.pipeline_mode<synchronous>, transform_indices = @transform_28, window_bounds = array<i64: 1, 32>}, {pipeline_mode = #tpu.pipeline_mode<synchronous>, transform_indices = @transform_29, window_bounds = array<i64: 1, 32>}, {pipeline_mode = #tpu.pipeline_mode<synchronous>, transform_indices = @transform_30, window_bounds = array<i64: 32, 32>}, {pipeline_mode = #tpu.pipeline_mode<synchronous>, transform_indices = @transform_31, window_bounds = array<i64: 12, 4>}, {pipeline_mode = #tpu.pipeline_mode<synchronous>, transform_indices = @transform_32, window_bounds = array<i64: 1, 32>}, {pipeline_mode = #tpu.pipeline_mode<synchronous>, transform_indices = @transform_33, window_bounds = array<i64: 1, 32>}, {pipeline_mode = #tpu.pipeline_mode<synchronous>, transform_indices = @transform_34, window_bounds = array<i64: 12, 12>}, {pipeline_mode = #tpu.pipeline_mode<synchronous>, transform_indices = @transform_35, window_bounds = array<i64: 32, 32>}, {pipeline_mode = #tpu.pipeline_mode<synchronous>, transform_indices = @transform_36, window_bounds = array<i64: 4, 32>}, {pipeline_mode = #tpu.pipeline_mode<synchronous>, transform_indices = @transform_37, window_bounds = array<i64: 8, 6>}, {pipeline_mode = #tpu.pipeline_mode<synchronous>, transform_indices = @transform_38, window_bounds = array<i64: 8, 9>}, {pipeline_mode = #tpu.pipeline_mode<synchronous>, transform_indices = @transform_39, window_bounds = array<i64: 24, 8>}, {pipeline_mode = #tpu.pipeline_mode<synchronous>, transform_indices = @transform_40, window_bounds = array<i64: 8, 24>}, {pipeline_mode = #tpu.pipeline_mode<synchronous>, transform_indices = @transform_41, window_bounds = array<i64: 24, 8>}, {transform_indices = @transform_42, window_bounds = array<i64: 1, 8, 24>}, {transform_indices = @transform_43, window_bounds = array<i64: 1, 24, 8>}, {transform_indices = @transform_44, window_bounds = array<i64: 1, 1, 128>}, {transform_indices = @transform_45, window_bounds = array<i64: 1, 1, 8>}, {transform_indices = @transform_46, window_bounds = array<i64: 1, 12, 24>}, {transform_indices = @transform_47, window_bounds = array<i64: 1, 32, 128>}, {transform_indices = @transform_48, window_bounds = array<i64: 1, 8, 128>}, {transform_indices = @transform_49, window_bounds = array<i64: 1, 128, 8>}, {transform_indices = @transform_50, window_bounds = array<i64: 1, 24, 24>}, {transform_indices = @transform_51, window_bounds = array<i64: 1, 4, 12>}, {transform_indices = @transform_52, window_bounds = array<i64: 1, 24, 8>}, {transform_indices = @transform_53, window_bounds = array<i64: 1, 1, 32>}, {transform_indices = @transform_54, window_bounds = array<i64: 1, 1, 4>}, {transform_indices = @transform_55, window_bounds = array<i64: 1, 24, 24>}, {transform_indices = @transform_56, window_bounds = array<i64: 1, 128, 32>}, {transform_indices = @transform_57, window_bounds = array<i64: 1, 8, 32>}, {transform_indices = @transform_58, window_bounds = array<i64: 1, 32, 4>}, {transform_indices = @transform_59, window_bounds = array<i64: 1, 24, 12>}, {transform_indices = @transform_60, window_bounds = array<i64: 1, 4, 12>}, {transform_indices = @transform_61, window_bounds = array<i64: 1, 27, 9>}, {transform_indices = @transform_62, window_bounds = array<i64: 1, 1, 32>}, {transform_indices = @transform_63, window_bounds = array<i64: 1, 1, 4>}, {transform_indices = @transform_64, window_bounds = array<i64: 1, 3, 27>}, {transform_indices = @transform_65, window_bounds = array<i64: 1, 12, 27>}, {transform_indices = @transform_66, window_bounds = array<i64: 1, 12, 27>}, {transform_indices = @transform_67, window_bounds = array<i64: 1, 16, 32>}, {transform_indices = @transform_68, window_bounds = array<i64: 1, 32, 32>}, {transform_indices = @transform_69, window_bounds = array<i64: 1, 32, 32>}, {transform_indices = @transform_70, window_bounds = array<i64: 1, 9, 32>}, {transform_indices = @transform_71, window_bounds = array<i64: 1, 32, 4>}, {transform_indices = @transform_72, window_bounds = array<i64: 1, 27, 12>}, {transform_indices = @transform_73, window_bounds = array<i64: 1, 4, 12>}, {transform_indices = @transform_74, window_bounds = array<i64: 1, 12, 4>}, {transform_indices = @transform_75, window_bounds = array<i64: 1, 1, 32>}, {transform_indices = @transform_76, window_bounds = array<i64: 1, 1, 4>}, {transform_indices = @transform_77, window_bounds = array<i64: 1, 12, 12>}, {transform_indices = @transform_78, window_bounds = array<i64: 1, 32, 32>}, {transform_indices = @transform_79, window_bounds = array<i64: 1, 4, 32>}, {transform_indices = @transform_80, window_bounds = array<i64: 1, 32, 4>}, {transform_indices = @transform_81, window_bounds = array<i64: 1, 12, 12>}, {transform_indices = @transform_82, window_bounds = array<i64: 1, 4, 12>}, {transform_indices = @transform_83, window_bounds = array<i64: 1, 12, 4>}, {transform_indices = @transform_84, window_bounds = array<i64: 1, 1, 32>}, {transform_indices = @transform_85, window_bounds = array<i64: 1, 1, 4>}, {transform_indices = @transform_86, window_bounds = array<i64: 1, 12, 12>}, {transform_indices = @transform_87, window_bounds = array<i64: 1, 32, 32>}, {transform_indices = @transform_88, window_bounds = array<i64: 1, 4, 32>}, {transform_indices = @transform_89, window_bounds = array<i64: 1, 32, 4>}, {transform_indices = @transform_90, window_bounds = array<i64: 1, 12, 12>}, {transform_indices = @transform_91, window_bounds = array<i64: 1, 12, 4>}, {transform_indices = @transform_92, window_bounds = array<i64: 1, 1, 32>}, {transform_indices = @transform_93, window_bounds = array<i64: 1, 1, 32>}, {transform_indices = @transform_94, window_bounds = array<i64: 1, 12, 4>}, {transform_indices = @transform_95, window_bounds = array<i64: 1, 1, 32>}, {transform_indices = @transform_96, window_bounds = array<i64: 1, 1, 32>}, {pipeline_mode = #tpu.pipeline_mode<synchronous>, transform_indices = @transform_97, window_bounds = array<i64: 1, 32>}]} {
    %c0_i32 = arith.constant 0 : i32
    %0 = arith.cmpi eq, %arg0, %c0_i32 : i32
    %1 = arith.extui %0 : i1 to i32
    %c0_i32_0 = arith.constant 0 : i32
    %2 = arith.cmpi ne, %1, %c0_i32_0 : i32
    scf.if %2 {
      %c0_262 = arith.constant 0 : index
      %c0_263 = arith.constant 0 : index
      %335 = vector.load %arg38[%c0_262, %c0_263] : memref<8x6xf32, #tpu.memory_space<vmem>>, vector<8x6xf32>
      %c0_264 = arith.constant 0 : index
      %c0_265 = arith.constant 0 : index
      %336 = vector.load %arg39[%c0_264, %c0_265] : memref<8x9xf32, #tpu.memory_space<vmem>>, vector<8x9xf32>
      %c0_266 = arith.constant 0 : index
      %c0_267 = arith.constant 0 : index
      %337 = vector.load %arg19[%c0_266, %c0_267] : memref<1x6xf32, #tpu.memory_space<vmem>>, vector<1x6xf32>
      %c0_268 = arith.constant 0 : index
      %c0_269 = arith.constant 0 : index
      %338 = vector.load %arg18[%c0_268, %c0_269] : memref<1x6xf32, #tpu.memory_space<vmem>>, vector<1x6xf32>
      %c0_270 = arith.constant 0 : index
      %c0_271 = arith.constant 0 : index
      %339 = vector.load %arg17[%c0_270, %c0_271] : memref<9x3xf32, #tpu.memory_space<vmem>>, vector<9x3xf32>
      %cst_272 = arith.constant dense<0.000000e+00> : vector<8xf32>
      %340 = vector.multi_reduction <add>, %335, %cst_272 [1] : vector<8x6xf32> to vector<8xf32>
      %341 = vector.shape_cast %340 : vector<8xf32> to vector<8x1xf32>
      %cst_273 = arith.constant 6.000000e+00 : f32
      %342 = vector.broadcast %cst_273 : f32 to vector<8x1xf32>
      %343 = arith.divf %341, %342 : vector<8x1xf32>
      %344 = vector.broadcast %343 : vector<8x1xf32> to vector<8x6xf32>
      %345 = arith.subf %335, %344 : vector<8x6xf32>
      %346 = arith.mulf %345, %345 : vector<8x6xf32>
      %cst_274 = arith.constant dense<0.000000e+00> : vector<8xf32>
      %347 = vector.multi_reduction <add>, %346, %cst_274 [1] : vector<8x6xf32> to vector<8xf32>
      %348 = vector.shape_cast %347 : vector<8xf32> to vector<8x1xf32>
      %cst_275 = arith.constant 6.000000e+00 : f32
      %349 = vector.broadcast %cst_275 : f32 to vector<8x1xf32>
      %350 = arith.divf %348, %349 : vector<8x1xf32>
      %351 = vector.broadcast %343 : vector<8x1xf32> to vector<8x6xf32>
      %352 = arith.subf %335, %351 : vector<8x6xf32>
      %cst_276 = arith.constant 9.99999974E-6 : f32
      %353 = vector.broadcast %cst_276 : f32 to vector<8x1xf32>
      %354 = arith.addf %350, %353 : vector<8x1xf32>
      %355 = math.rsqrt %354 : vector<8x1xf32>
      %356 = vector.broadcast %355 : vector<8x1xf32> to vector<8x6xf32>
      %357 = arith.mulf %352, %356 : vector<8x6xf32>
      %358 = vector.broadcast %337 : vector<1x6xf32> to vector<8x6xf32>
      %359 = arith.mulf %357, %358 : vector<8x6xf32>
      %360 = vector.broadcast %338 : vector<1x6xf32> to vector<8x6xf32>
      %361 = arith.addf %359, %360 : vector<8x6xf32>
      %362 = arith.mulf %336, %336 : vector<8x9xf32>
      %cst_277 = arith.constant dense<0.000000e+00> : vector<8x3xf32>
      %363 = tpu.matmul %362, %339, %cst_277 {dimension_numbers = #tpu.dot_dimension_numbers<[1], [0], [0], [1], [0, 0, 1, 1], [], []>} : vector<8x9xf32>, vector<9x3xf32>, vector<8x3xf32> -> vector<8x3xf32>
      %cst_278 = arith.constant 9.99999993E-9 : f32
      %364 = vector.broadcast %cst_278 : f32 to vector<8x3xf32>
      %365 = arith.maximumf %363, %364 : vector<8x3xf32>
      %cst_279 = arith.constant dense<0.000000e+00> : vector<8xf32>
      %366 = vector.multi_reduction <add>, %365, %cst_279 [1] : vector<8x3xf32> to vector<8xf32>
      %367 = vector.shape_cast %366 : vector<8xf32> to vector<8x1xf32>
      %cst_280 = arith.constant 3.000000e+00 : f32
      %368 = vector.broadcast %cst_280 : f32 to vector<8x1xf32>
      %369 = arith.divf %367, %368 : vector<8x1xf32>
      %370 = math.rsqrt %369 : vector<8x1xf32>
      %371 = vector.broadcast %370 : vector<8x1xf32> to vector<8x9xf32>
      %372 = arith.mulf %336, %371 : vector<8x9xf32>
      %c0_281 = arith.constant 0 : index
      %c0_282 = arith.constant 0 : index
      %373 = vector.load %arg20[%c0_281, %c0_282] : memref<9x12xf32, #tpu.memory_space<vmem>>, vector<9x12xf32>
      %cst_283 = arith.constant dense<0.000000e+00> : vector<8x12xf32>
      %374 = tpu.matmul %372, %373, %cst_283 {dimension_numbers = #tpu.dot_dimension_numbers<[1], [0], [0], [1], [0, 0, 1, 1], [], []>} : vector<8x9xf32>, vector<9x12xf32>, vector<8x12xf32> -> vector<8x12xf32>
      %375 = arith.mulf %374, %374 : vector<8x12xf32>
      %c0_284 = arith.constant 0 : index
      %c0_285 = arith.constant 0 : index
      %376 = vector.load %arg14[%c0_284, %c0_285] : memref<12x4xf32, #tpu.memory_space<vmem>>, vector<12x4xf32>
      %cst_286 = arith.constant dense<0.000000e+00> : vector<8x4xf32>
      %377 = tpu.matmul %375, %376, %cst_286 {dimension_numbers = #tpu.dot_dimension_numbers<[1], [0], [0], [1], [0, 0, 1, 1], [], []>} : vector<8x12xf32>, vector<12x4xf32>, vector<8x4xf32> -> vector<8x4xf32>
      %cst_287 = arith.constant 9.99999993E-9 : f32
      %378 = vector.broadcast %cst_287 : f32 to vector<8x4xf32>
      %379 = arith.maximumf %377, %378 : vector<8x4xf32>
      %380 = math.sqrt %379 : vector<8x4xf32>
      %c0_288 = arith.constant 0 : index
      %c0_289 = arith.constant 0 : index
      %381 = vector.load %arg21[%c0_288, %c0_289] : memref<6x32xf32, #tpu.memory_space<vmem>>, vector<6x32xf32>
      %cst_290 = arith.constant dense<0.000000e+00> : vector<8x32xf32>
      %382 = tpu.matmul %361, %381, %cst_290 {dimension_numbers = #tpu.dot_dimension_numbers<[1], [0], [0], [1], [0, 0, 1, 1], [], []>} : vector<8x6xf32>, vector<6x32xf32>, vector<8x32xf32> -> vector<8x32xf32>
      %c0_291 = arith.constant 0 : index
      %c0_292 = arith.constant 0 : index
      %383 = vector.load %arg22[%c0_291, %c0_292] : memref<4x32xf32, #tpu.memory_space<vmem>>, vector<4x32xf32>
      %cst_293 = arith.constant dense<0.000000e+00> : vector<8x32xf32>
      %384 = tpu.matmul %380, %383, %cst_293 {dimension_numbers = #tpu.dot_dimension_numbers<[1], [0], [0], [1], [0, 0, 1, 1], [], []>} : vector<8x4xf32>, vector<4x32xf32>, vector<8x32xf32> -> vector<8x32xf32>
      %385 = arith.addf %382, %384 : vector<8x32xf32>
      %c0_294 = arith.constant 0 : index
      %c0_295 = arith.constant 0 : index
      %386 = vector.load %arg15[%c0_294, %c0_295] : memref<1x32xf32, #tpu.memory_space<vmem>>, vector<1x32xf32>
      %387 = vector.broadcast %386 : vector<1x32xf32> to vector<8x32xf32>
      %388 = arith.addf %385, %387 : vector<8x32xf32>
      %c0_296 = arith.constant 0 : index
      %c0_297 = arith.constant 0 : index
      %389 = vector.load %arg23[%c0_296, %c0_297] : memref<32x4xf32, #tpu.memory_space<vmem>>, vector<32x4xf32>
      %cst_298 = arith.constant dense<0.000000e+00> : vector<8x4xf32>
      %390 = tpu.matmul %388, %389, %cst_298 {dimension_numbers = #tpu.dot_dimension_numbers<[1], [0], [0], [1], [0, 0, 1, 1], [], []>} : vector<8x32xf32>, vector<32x4xf32>, vector<8x4xf32> -> vector<8x4xf32>
      %c0_299 = arith.constant 0 : index
      %c0_300 = arith.constant 0 : index
      %391 = vector.load %arg16[%c0_299, %c0_300] : memref<1x4xf32, #tpu.memory_space<vmem>>, vector<1x4xf32>
      %392 = vector.broadcast %391 : vector<1x4xf32> to vector<8x4xf32>
      %393 = arith.addf %390, %392 : vector<8x4xf32>
      %394 = arith.negf %393 : vector<8x4xf32>
      %395 = math.exp %394 : vector<8x4xf32>
      %cst_301 = arith.constant 1.000000e+00 : f32
      %396 = vector.broadcast %cst_301 : f32 to vector<8x4xf32>
      %397 = arith.addf %396, %395 : vector<8x4xf32>
      %398 = arith.divf %396, %397 : vector<8x4xf32>
      %c0_302 = arith.constant 0 : index
      %c0_303 = arith.constant 0 : index
      %399 = vector.load %arg24[%c0_302, %c0_303] : memref<12x12xf32, #tpu.memory_space<vmem>>, vector<12x12xf32>
      %cst_304 = arith.constant dense<0.000000e+00> : vector<8x12xf32>
      %400 = tpu.matmul %374, %399, %cst_304 {dimension_numbers = #tpu.dot_dimension_numbers<[1], [0], [0], [1], [0, 0, 1, 1], [], []>} : vector<8x12xf32>, vector<12x12xf32>, vector<8x12xf32> -> vector<8x12xf32>
      %c0_305 = arith.constant 0 : index
      %c0_306 = arith.constant 0 : index
      %401 = vector.load %arg13[%c0_305, %c0_306] : memref<4x12xf32, #tpu.memory_space<vmem>>, vector<4x12xf32>
      %cst_307 = arith.constant dense<0.000000e+00> : vector<8x12xf32>
      %402 = tpu.matmul %398, %401, %cst_307 {dimension_numbers = #tpu.dot_dimension_numbers<[1], [0], [0], [1], [0, 0, 1, 1], [], []>} : vector<8x4xf32>, vector<4x12xf32>, vector<8x12xf32> -> vector<8x12xf32>
      %403 = arith.mulf %400, %402 : vector<8x12xf32>
      %c0_308 = arith.constant 0 : index
      %c0_309 = arith.constant 0 : index
      %404 = vector.load %arg99[%c0_308, %c0_309] : memref<8x32xf32, #tpu.memory_space<vmem>>, vector<8x32xf32>
      tpu.vector_store %arg99[%c0_308, %c0_309], %388 {strides = array<i32>} : memref<8x32xf32, #tpu.memory_space<vmem>>, vector<8x32xf32>,
      %c0_310 = arith.constant 0 : index
      %c0_311 = arith.constant 0 : index
      %405 = vector.load %arg100[%c0_310, %c0_311] : memref<8x12xf32, #tpu.memory_space<vmem>>, vector<8x12xf32>
      tpu.vector_store %arg100[%c0_310, %c0_311], %403 {strides = array<i32>} : memref<8x12xf32, #tpu.memory_space<vmem>>, vector<8x12xf32>,
      %c0_312 = arith.constant 0 : index
      %c0_313 = arith.constant 0 : index
      %406 = vector.load %arg26[%c0_312, %c0_313] : memref<24x32xf32, #tpu.memory_space<vmem>>, vector<24x32xf32>
      %c0_314 = arith.constant 0 : index
      %c0_315 = arith.constant 0 : index
      %407 = vector.load %arg27[%c0_314, %c0_315] : memref<24x3xf32, #tpu.memory_space<vmem>>, vector<24x3xf32>
      %c0_316 = arith.constant 0 : index
      %c0_317 = arith.constant 0 : index
      %408 = vector.load %arg7[%c0_316, %c0_317] : memref<1x32xf32, #tpu.memory_space<vmem>>, vector<1x32xf32>
      %c0_318 = arith.constant 0 : index
      %c0_319 = arith.constant 0 : index
      %409 = vector.load %arg6[%c0_318, %c0_319] : memref<1x32xf32, #tpu.memory_space<vmem>>, vector<1x32xf32>
      %c0_320 = arith.constant 0 : index
      %c0_321 = arith.constant 0 : index
      %410 = vector.load %arg5[%c0_320, %c0_321] : memref<3x1xf32, #tpu.memory_space<vmem>>, vector<3x1xf32>
      %cst_322 = arith.constant dense<0.000000e+00> : vector<24xf32>
      %411 = vector.multi_reduction <add>, %406, %cst_322 [1] : vector<24x32xf32> to vector<24xf32>
      %412 = vector.shape_cast %411 : vector<24xf32> to vector<24x1xf32>
      %cst_323 = arith.constant 3.200000e+01 : f32
      %413 = vector.broadcast %cst_323 : f32 to vector<24x1xf32>
      %414 = arith.divf %412, %413 : vector<24x1xf32>
      %415 = vector.broadcast %414 : vector<24x1xf32> to vector<24x32xf32>
      %416 = arith.subf %406, %415 : vector<24x32xf32>
      %417 = arith.mulf %416, %416 : vector<24x32xf32>
      %cst_324 = arith.constant dense<0.000000e+00> : vector<24xf32>
      %418 = vector.multi_reduction <add>, %417, %cst_324 [1] : vector<24x32xf32> to vector<24xf32>
      %419 = vector.shape_cast %418 : vector<24xf32> to vector<24x1xf32>
      %cst_325 = arith.constant 3.200000e+01 : f32
      %420 = vector.broadcast %cst_325 : f32 to vector<24x1xf32>
      %421 = arith.divf %419, %420 : vector<24x1xf32>
      %422 = vector.broadcast %414 : vector<24x1xf32> to vector<24x32xf32>
      %423 = arith.subf %406, %422 : vector<24x32xf32>
      %cst_326 = arith.constant 9.99999974E-6 : f32
      %424 = vector.broadcast %cst_326 : f32 to vector<24x1xf32>
      %425 = arith.addf %421, %424 : vector<24x1xf32>
      %426 = math.rsqrt %425 : vector<24x1xf32>
      %427 = vector.broadcast %426 : vector<24x1xf32> to vector<24x32xf32>
      %428 = arith.mulf %423, %427 : vector<24x32xf32>
      %429 = vector.broadcast %408 : vector<1x32xf32> to vector<24x32xf32>
      %430 = arith.mulf %428, %429 : vector<24x32xf32>
      %431 = vector.broadcast %409 : vector<1x32xf32> to vector<24x32xf32>
      %432 = arith.addf %430, %431 : vector<24x32xf32>
      %433 = arith.mulf %407, %407 : vector<24x3xf32>
      %cst_327 = arith.constant dense<0.000000e+00> : vector<24x1xf32>
      %434 = tpu.matmul %433, %410, %cst_327 {dimension_numbers = #tpu.dot_dimension_numbers<[1], [0], [0], [1], [0, 0, 1, 1], [], []>} : vector<24x3xf32>, vector<3x1xf32>, vector<24x1xf32> -> vector<24x1xf32>
      %cst_328 = arith.constant 9.99999993E-9 : f32
      %435 = vector.broadcast %cst_328 : f32 to vector<24x1xf32>
      %436 = arith.maximumf %434, %435 : vector<24x1xf32>
      %cst_329 = arith.constant dense<0.000000e+00> : vector<24xf32>
      %437 = vector.multi_reduction <add>, %436, %cst_329 [1] : vector<24x1xf32> to vector<24xf32>
      %438 = vector.shape_cast %437 : vector<24xf32> to vector<24x1xf32>
      %cst_330 = arith.constant 1.000000e+00 : f32
      %439 = vector.broadcast %cst_330 : f32 to vector<24x1xf32>
      %440 = arith.divf %438, %439 : vector<24x1xf32>
      %441 = math.rsqrt %440 : vector<24x1xf32>
      %442 = vector.broadcast %441 : vector<24x1xf32> to vector<24x3xf32>
      %443 = arith.mulf %407, %442 : vector<24x3xf32>
      %c0_331 = arith.constant 0 : index
      %c0_332 = arith.constant 0 : index
      %444 = vector.load %arg8[%c0_331, %c0_332] : memref<3x3xf32, #tpu.memory_space<vmem>>, vector<3x3xf32>
      %cst_333 = arith.constant dense<0.000000e+00> : vector<24x3xf32>
      %445 = tpu.matmul %443, %444, %cst_333 {dimension_numbers = #tpu.dot_dimension_numbers<[1], [0], [0], [1], [0, 0, 1, 1], [], []>} : vector<24x3xf32>, vector<3x3xf32>, vector<24x3xf32> -> vector<24x3xf32>
      %446 = arith.mulf %445, %445 : vector<24x3xf32>
      %c0_334 = arith.constant 0 : index
      %c0_335 = arith.constant 0 : index
      %447 = vector.load %arg2[%c0_334, %c0_335] : memref<3x1xf32, #tpu.memory_space<vmem>>, vector<3x1xf32>
      %cst_336 = arith.constant dense<0.000000e+00> : vector<24x1xf32>
      %448 = tpu.matmul %446, %447, %cst_336 {dimension_numbers = #tpu.dot_dimension_numbers<[1], [0], [0], [1], [0, 0, 1, 1], [], []>} : vector<24x3xf32>, vector<3x1xf32>, vector<24x1xf32> -> vector<24x1xf32>
      %cst_337 = arith.constant 9.99999993E-9 : f32
      %449 = vector.broadcast %cst_337 : f32 to vector<24x1xf32>
      %450 = arith.maximumf %448, %449 : vector<24x1xf32>
      %451 = math.sqrt %450 : vector<24x1xf32>
      %c0_338 = arith.constant 0 : index
      %c0_339 = arith.constant 0 : index
      %452 = vector.load %arg9[%c0_338, %c0_339] : memref<32x16xf32, #tpu.memory_space<vmem>>, vector<32x16xf32>
      %cst_340 = arith.constant dense<0.000000e+00> : vector<24x16xf32>
      %453 = tpu.matmul %432, %452, %cst_340 {dimension_numbers = #tpu.dot_dimension_numbers<[1], [0], [0], [1], [0, 0, 1, 1], [], []>} : vector<24x32xf32>, vector<32x16xf32>, vector<24x16xf32> -> vector<24x16xf32>
      %c0_341 = arith.constant 0 : index
      %c0_342 = arith.constant 0 : index
      %454 = vector.load %arg10[%c0_341, %c0_342] : memref<1x16xf32, #tpu.memory_space<vmem>>, vector<1x16xf32>
      %cst_343 = arith.constant dense<0.000000e+00> : vector<24x16xf32>
      %455 = tpu.matmul %451, %454, %cst_343 {dimension_numbers = #tpu.dot_dimension_numbers<[1], [0], [0], [1], [0, 0, 1, 1], [], []>} : vector<24x1xf32>, vector<1x16xf32>, vector<24x16xf32> -> vector<24x16xf32>
      %456 = arith.addf %453, %455 : vector<24x16xf32>
      %c0_344 = arith.constant 0 : index
      %c0_345 = arith.constant 0 : index
      %457 = vector.load %arg3[%c0_344, %c0_345] : memref<1x16xf32, #tpu.memory_space<vmem>>, vector<1x16xf32>
      %458 = vector.broadcast %457 : vector<1x16xf32> to vector<24x16xf32>
      %459 = arith.addf %456, %458 : vector<24x16xf32>
      %c0_346 = arith.constant 0 : index
      %c0_347 = arith.constant 0 : index
      %460 = vector.load %arg11[%c0_346, %c0_347] : memref<16x1xf32, #tpu.memory_space<vmem>>, vector<16x1xf32>
      %cst_348 = arith.constant dense<0.000000e+00> : vector<24x1xf32>
      %461 = tpu.matmul %459, %460, %cst_348 {dimension_numbers = #tpu.dot_dimension_numbers<[1], [0], [0], [1], [0, 0, 1, 1], [], []>} : vector<24x16xf32>, vector<16x1xf32>, vector<24x1xf32> -> vector<24x1xf32>
      %c0_349 = arith.constant 0 : index
      %c0_350 = arith.constant 0 : index
      %462 = vector.load %arg4[%c0_349, %c0_350] : memref<1x1xf32, #tpu.memory_space<vmem>>, vector<1x1xf32>
      %463 = vector.broadcast %462 : vector<1x1xf32> to vector<24x1xf32>
      %464 = arith.addf %461, %463 : vector<24x1xf32>
      %465 = arith.negf %464 : vector<24x1xf32>
      %466 = math.exp %465 : vector<24x1xf32>
      %cst_351 = arith.constant 1.000000e+00 : f32
      %467 = vector.broadcast %cst_351 : f32 to vector<24x1xf32>
      %468 = arith.addf %467, %466 : vector<24x1xf32>
      %469 = arith.divf %467, %468 : vector<24x1xf32>
      %c0_352 = arith.constant 0 : index
      %c0_353 = arith.constant 0 : index
      %470 = vector.load %arg12[%c0_352, %c0_353] : memref<3x3xf32, #tpu.memory_space<vmem>>, vector<3x3xf32>
      %cst_354 = arith.constant dense<0.000000e+00> : vector<24x3xf32>
      %471 = tpu.matmul %445, %470, %cst_354 {dimension_numbers = #tpu.dot_dimension_numbers<[1], [0], [0], [1], [0, 0, 1, 1], [], []>} : vector<24x3xf32>, vector<3x3xf32>, vector<24x3xf32> -> vector<24x3xf32>
      %c0_355 = arith.constant 0 : index
      %c0_356 = arith.constant 0 : index
      %472 = vector.load %arg1[%c0_355, %c0_356] : memref<1x3xf32, #tpu.memory_space<vmem>>, vector<1x3xf32>
      %cst_357 = arith.constant dense<0.000000e+00> : vector<24x3xf32>
      %473 = tpu.matmul %469, %472, %cst_357 {dimension_numbers = #tpu.dot_dimension_numbers<[1], [0], [0], [1], [0, 0, 1, 1], [], []>} : vector<24x1xf32>, vector<1x3xf32>, vector<24x3xf32> -> vector<24x3xf32>
      %474 = arith.mulf %471, %473 : vector<24x3xf32>
      %c0_358 = arith.constant 0 : index
      %c0_359 = arith.constant 0 : index
      %475 = vector.load %arg101[%c0_358, %c0_359] : memref<24x16xf32, #tpu.memory_space<vmem>>, vector<24x16xf32>
      tpu.vector_store %arg101[%c0_358, %c0_359], %459 {strides = array<i32>} : memref<24x16xf32, #tpu.memory_space<vmem>>, vector<24x16xf32>,
      %c0_360 = arith.constant 0 : index
      %c0_361 = arith.constant 0 : index
      %476 = vector.load %arg102[%c0_360, %c0_361] : memref<24x3xf32, #tpu.memory_space<vmem>>, vector<24x3xf32>
      tpu.vector_store %arg102[%c0_360, %c0_361], %474 {strides = array<i32>} : memref<24x3xf32, #tpu.memory_space<vmem>>, vector<24x3xf32>,
    } else {
    }
    %c0 = arith.constant 0 : index
    %c0_1 = arith.constant 0 : index
    %3 = vector.load %arg99[%c0, %c0_1] : memref<8x32xf32, #tpu.memory_space<vmem>>, vector<8x32xf32>
    %c0_2 = arith.constant 0 : index
    %c0_3 = arith.constant 0 : index
    %4 = vector.load %arg100[%c0_2, %c0_3] : memref<8x12xf32, #tpu.memory_space<vmem>>, vector<8x12xf32>
    %c0_4 = arith.constant 0 : index
    %c0_5 = arith.constant 0 : index
    %5 = vector.load %arg101[%c0_4, %c0_5] : memref<24x16xf32, #tpu.memory_space<vmem>>, vector<24x16xf32>
    %c0_6 = arith.constant 0 : index
    %c0_7 = arith.constant 0 : index
    %6 = vector.load %arg102[%c0_6, %c0_7] : memref<24x3xf32, #tpu.memory_space<vmem>>, vector<24x3xf32>
    %c0_8 = arith.constant 0 : index
    %c0_9 = arith.constant 0 : index
    %7 = vector.load %arg42[%c0_8, %c0_9] : memref<24x8xf32, #tpu.memory_space<vmem>>, vector<24x8xf32>
    %c0_10 = arith.constant 0 : index
    %c0_11 = arith.constant 0 : index
    %8 = vector.load %arg40[%c0_10, %c0_11] : memref<24x8xf32, #tpu.memory_space<vmem>>, vector<24x8xf32>
    %c0_12 = arith.constant 0 : index
    %c0_13 = arith.constant 0 : index
    %9 = vector.load %arg41[%c0_12, %c0_13] : memref<8x24xf32, #tpu.memory_space<vmem>>, vector<8x24xf32>
    %c0_14 = arith.constant 0 : index
    %c0_15 = arith.constant 0 : index
    %10 = vector.load %arg25[%c0_14, %c0_15] : memref<8x1xf32, #tpu.memory_space<vmem>>, vector<8x1xf32>
    %11 = tpu.reciprocal %10 {approx = true} : vector<8x1xf32> -> vector<8x1xf32>
    %12 = arith.mulf %10, %11 : vector<8x1xf32>
    %cst = arith.constant 2.000000e+00 : f32
    %13 = vector.broadcast %cst : f32 to vector<8x1xf32>
    %14 = arith.subf %13, %12 : vector<8x1xf32>
    %15 = arith.mulf %11, %14 : vector<8x1xf32>
    %c0_16 = arith.constant 0 : index
    %c0_17 = arith.constant 0 : index
    %c0_18 = arith.constant 0 : index
    %16 = vector.load %arg67[%c0_16, %c0_17, %c0_18] : memref<1x12x27xf32, #tpu.memory_space<vmem>>, vector<1x12x27xf32>
    %17 = vector.shape_cast %16 : vector<1x12x27xf32> to vector<12x27xf32>
    %cst_19 = arith.constant dense<0.000000e+00> : vector<8x27xf32>
    %18 = tpu.matmul %4, %17, %cst_19 {dimension_numbers = #tpu.dot_dimension_numbers<[1], [0], [0], [1], [0, 0, 1, 1], [], []>} : vector<8x12xf32>, vector<12x27xf32>, vector<8x27xf32> -> vector<8x27xf32>
    %cst_20 = arith.constant dense<0.000000e+00> : vector<24x27xf32>
    %19 = tpu.matmul %7, %18, %cst_20 {dimension_numbers = #tpu.dot_dimension_numbers<[1], [0], [0], [1], [0, 0, 1, 1], [], []>} : vector<24x8xf32>, vector<8x27xf32>, vector<24x27xf32> -> vector<24x27xf32>
    %c0_21 = arith.constant 0 : index
    %c0_22 = arith.constant 0 : index
    %c0_23 = arith.constant 0 : index
    %20 = vector.load %arg65[%c0_21, %c0_22, %c0_23] : memref<1x3x27xf32, #tpu.memory_space<vmem>>, vector<1x3x27xf32>
    %21 = vector.shape_cast %20 : vector<1x3x27xf32> to vector<3x27xf32>
    %cst_24 = arith.constant dense<0.000000e+00> : vector<24x27xf32>
    %22 = tpu.matmul %6, %21, %cst_24 {dimension_numbers = #tpu.dot_dimension_numbers<[1], [0], [0], [1], [0, 0, 1, 1], [], []>} : vector<24x3xf32>, vector<3x27xf32>, vector<24x27xf32> -> vector<24x27xf32>
    %23 = arith.addf %19, %22 : vector<24x27xf32>
    %c0_25 = arith.constant 0 : index
    %c0_26 = arith.constant 0 : index
    %c0_27 = arith.constant 0 : index
    %24 = vector.load %arg66[%c0_25, %c0_26, %c0_27] : memref<1x12x27xf32, #tpu.memory_space<vmem>>, vector<1x12x27xf32>
    %25 = vector.shape_cast %24 : vector<1x12x27xf32> to vector<12x27xf32>
    %cst_28 = arith.constant dense<0.000000e+00> : vector<8x27xf32>
    %26 = tpu.matmul %4, %25, %cst_28 {dimension_numbers = #tpu.dot_dimension_numbers<[1], [0], [0], [1], [0, 0, 1, 1], [], []>} : vector<8x12xf32>, vector<12x27xf32>, vector<8x27xf32> -> vector<8x27xf32>
    %cst_29 = arith.constant dense<0.000000e+00> : vector<24x27xf32>
    %27 = tpu.matmul %8, %26, %cst_29 {dimension_numbers = #tpu.dot_dimension_numbers<[1], [0], [0], [1], [0, 0, 1, 1], [], []>} : vector<24x8xf32>, vector<8x27xf32>, vector<24x27xf32> -> vector<24x27xf32>
    %28 = arith.addf %23, %27 : vector<24x27xf32>
    %29 = arith.mulf %28, %28 : vector<24x27xf32>
    %c0_30 = arith.constant 0 : index
    %c0_31 = arith.constant 0 : index
    %c0_32 = arith.constant 0 : index
    %30 = vector.load %arg62[%c0_30, %c0_31, %c0_32] : memref<1x27x9xf32, #tpu.memory_space<vmem>>, vector<1x27x9xf32>
    %31 = vector.shape_cast %30 : vector<1x27x9xf32> to vector<27x9xf32>
    %cst_33 = arith.constant dense<0.000000e+00> : vector<24x9xf32>
    %32 = tpu.matmul %29, %31, %cst_33 {dimension_numbers = #tpu.dot_dimension_numbers<[1], [0], [0], [1], [0, 0, 1, 1], [], []>} : vector<24x27xf32>, vector<27x9xf32>, vector<24x9xf32> -> vector<24x9xf32>
    %cst_34 = arith.constant 9.99999993E-9 : f32
    %33 = vector.broadcast %cst_34 : f32 to vector<24x9xf32>
    %34 = arith.maximumf %32, %33 : vector<24x9xf32>
    %35 = math.sqrt %34 : vector<24x9xf32>
    %c0_35 = arith.constant 0 : index
    %c0_36 = arith.constant 0 : index
    %c0_37 = arith.constant 0 : index
    %36 = vector.load %arg70[%c0_35, %c0_36, %c0_37] : memref<1x32x32xf32, #tpu.memory_space<vmem>>, vector<1x32x32xf32>
    %37 = vector.shape_cast %36 : vector<1x32x32xf32> to vector<32x32xf32>
    %cst_38 = arith.constant dense<0.000000e+00> : vector<8x32xf32>
    %38 = tpu.matmul %3, %37, %cst_38 {dimension_numbers = #tpu.dot_dimension_numbers<[1], [0], [0], [1], [0, 0, 1, 1], [], []>} : vector<8x32xf32>, vector<32x32xf32>, vector<8x32xf32> -> vector<8x32xf32>
    %cst_39 = arith.constant dense<0.000000e+00> : vector<24x32xf32>
    %39 = tpu.matmul %7, %38, %cst_39 {dimension_numbers = #tpu.dot_dimension_numbers<[1], [0], [0], [1], [0, 0, 1, 1], [], []>} : vector<24x8xf32>, vector<8x32xf32>, vector<24x32xf32> -> vector<24x32xf32>
    %c0_40 = arith.constant 0 : index
    %c0_41 = arith.constant 0 : index
    %c0_42 = arith.constant 0 : index
    %40 = vector.load %arg68[%c0_40, %c0_41, %c0_42] : memref<1x16x32xf32, #tpu.memory_space<vmem>>, vector<1x16x32xf32>
    %41 = vector.shape_cast %40 : vector<1x16x32xf32> to vector<16x32xf32>
    %cst_43 = arith.constant dense<0.000000e+00> : vector<24x32xf32>
    %42 = tpu.matmul %5, %41, %cst_43 {dimension_numbers = #tpu.dot_dimension_numbers<[1], [0], [0], [1], [0, 0, 1, 1], [], []>} : vector<24x16xf32>, vector<16x32xf32>, vector<24x32xf32> -> vector<24x32xf32>
    %43 = arith.addf %39, %42 : vector<24x32xf32>
    %c0_44 = arith.constant 0 : index
    %c0_45 = arith.constant 0 : index
    %c0_46 = arith.constant 0 : index
    %44 = vector.load %arg69[%c0_44, %c0_45, %c0_46] : memref<1x32x32xf32, #tpu.memory_space<vmem>>, vector<1x32x32xf32>
    %45 = vector.shape_cast %44 : vector<1x32x32xf32> to vector<32x32xf32>
    %cst_47 = arith.constant dense<0.000000e+00> : vector<8x32xf32>
    %46 = tpu.matmul %3, %45, %cst_47 {dimension_numbers = #tpu.dot_dimension_numbers<[1], [0], [0], [1], [0, 0, 1, 1], [], []>} : vector<8x32xf32>, vector<32x32xf32>, vector<8x32xf32> -> vector<8x32xf32>
    %cst_48 = arith.constant dense<0.000000e+00> : vector<24x32xf32>
    %47 = tpu.matmul %8, %46, %cst_48 {dimension_numbers = #tpu.dot_dimension_numbers<[1], [0], [0], [1], [0, 0, 1, 1], [], []>} : vector<24x8xf32>, vector<8x32xf32>, vector<24x32xf32> -> vector<24x32xf32>
    %48 = arith.addf %43, %47 : vector<24x32xf32>
    %c0_49 = arith.constant 0 : index
    %c0_50 = arith.constant 0 : index
    %c0_51 = arith.constant 0 : index
    %49 = vector.load %arg71[%c0_49, %c0_50, %c0_51] : memref<1x9x32xf32, #tpu.memory_space<vmem>>, vector<1x9x32xf32>
    %50 = vector.shape_cast %49 : vector<1x9x32xf32> to vector<9x32xf32>
    %cst_52 = arith.constant dense<0.000000e+00> : vector<24x32xf32>
    %51 = tpu.matmul %35, %50, %cst_52 {dimension_numbers = #tpu.dot_dimension_numbers<[1], [0], [0], [1], [0, 0, 1, 1], [], []>} : vector<24x9xf32>, vector<9x32xf32>, vector<24x32xf32> -> vector<24x32xf32>
    %52 = arith.addf %48, %51 : vector<24x32xf32>
    %c0_53 = arith.constant 0 : index
    %c0_54 = arith.constant 0 : index
    %c0_55 = arith.constant 0 : index
    %53 = vector.load %arg63[%c0_53, %c0_54, %c0_55] : memref<1x1x32xf32, #tpu.memory_space<vmem>>, vector<1x1x32xf32>
    %54 = vector.shape_cast %53 : vector<1x1x32xf32> to vector<1x32xf32>
    %55 = vector.broadcast %54 : vector<1x32xf32> to vector<24x32xf32>
    %56 = arith.addf %52, %55 : vector<24x32xf32>
    %c0_56 = arith.constant 0 : index
    %c0_57 = arith.constant 0 : index
    %c0_58 = arith.constant 0 : index
    %57 = vector.load %arg72[%c0_56, %c0_57, %c0_58] : memref<1x32x4xf32, #tpu.memory_space<vmem>>, vector<1x32x4xf32>
    %58 = vector.shape_cast %57 : vector<1x32x4xf32> to vector<32x4xf32>
    %cst_59 = arith.constant dense<0.000000e+00> : vector<24x4xf32>
    %59 = tpu.matmul %56, %58, %cst_59 {dimension_numbers = #tpu.dot_dimension_numbers<[1], [0], [0], [1], [0, 0, 1, 1], [], []>} : vector<24x32xf32>, vector<32x4xf32>, vector<24x4xf32> -> vector<24x4xf32>
    %c0_60 = arith.constant 0 : index
    %c0_61 = arith.constant 0 : index
    %c0_62 = arith.constant 0 : index
    %60 = vector.load %arg64[%c0_60, %c0_61, %c0_62] : memref<1x1x4xf32, #tpu.memory_space<vmem>>, vector<1x1x4xf32>
    %61 = vector.shape_cast %60 : vector<1x1x4xf32> to vector<1x4xf32>
    %62 = vector.broadcast %61 : vector<1x4xf32> to vector<24x4xf32>
    %63 = arith.addf %59, %62 : vector<24x4xf32>
    %64 = arith.negf %63 : vector<24x4xf32>
    %65 = math.exp %64 : vector<24x4xf32>
    %cst_63 = arith.constant 1.000000e+00 : f32
    %66 = vector.broadcast %cst_63 : f32 to vector<24x4xf32>
    %67 = arith.addf %66, %65 : vector<24x4xf32>
    %68 = arith.divf %66, %67 : vector<24x4xf32>
    %c0_64 = arith.constant 0 : index
    %c0_65 = arith.constant 0 : index
    %c0_66 = arith.constant 0 : index
    %69 = vector.load %arg73[%c0_64, %c0_65, %c0_66] : memref<1x27x12xf32, #tpu.memory_space<vmem>>, vector<1x27x12xf32>
    %70 = vector.shape_cast %69 : vector<1x27x12xf32> to vector<27x12xf32>
    %cst_67 = arith.constant dense<0.000000e+00> : vector<24x12xf32>
    %71 = tpu.matmul %28, %70, %cst_67 {dimension_numbers = #tpu.dot_dimension_numbers<[1], [0], [0], [1], [0, 0, 1, 1], [], []>} : vector<24x27xf32>, vector<27x12xf32>, vector<24x12xf32> -> vector<24x12xf32>
    %c0_68 = arith.constant 0 : index
    %c0_69 = arith.constant 0 : index
    %c0_70 = arith.constant 0 : index
    %72 = vector.load %arg61[%c0_68, %c0_69, %c0_70] : memref<1x4x12xf32, #tpu.memory_space<vmem>>, vector<1x4x12xf32>
    %73 = vector.shape_cast %72 : vector<1x4x12xf32> to vector<4x12xf32>
    %cst_71 = arith.constant dense<0.000000e+00> : vector<24x12xf32>
    %74 = tpu.matmul %68, %73, %cst_71 {dimension_numbers = #tpu.dot_dimension_numbers<[1], [0], [0], [1], [0, 0, 1, 1], [], []>} : vector<24x4xf32>, vector<4x12xf32>, vector<24x12xf32> -> vector<24x12xf32>
    %75 = arith.mulf %71, %74 : vector<24x12xf32>
    %cst_72 = arith.constant 0.000000e+00 : f32
    %76 = vector.broadcast %cst_72 : f32 to vector<24x32xf32>
    %77 = arith.maximumf %56, %76 : vector<24x32xf32>
    %c0_73 = arith.constant 0 : index
    %c0_74 = arith.constant 0 : index
    %c0_75 = arith.constant 0 : index
    %78 = vector.load %arg78[%c0_73, %c0_74, %c0_75] : memref<1x12x12xf32, #tpu.memory_space<vmem>>, vector<1x12x12xf32>
    %79 = vector.shape_cast %78 : vector<1x12x12xf32> to vector<12x12xf32>
    %cst_76 = arith.constant dense<0.000000e+00> : vector<24x12xf32>
    %80 = tpu.matmul %75, %79, %cst_76 {dimension_numbers = #tpu.dot_dimension_numbers<[1], [0], [0], [1], [0, 0, 1, 1], [], []>} : vector<24x12xf32>, vector<12x12xf32>, vector<24x12xf32> -> vector<24x12xf32>
    %81 = arith.mulf %80, %80 : vector<24x12xf32>
    %c0_77 = arith.constant 0 : index
    %c0_78 = arith.constant 0 : index
    %c0_79 = arith.constant 0 : index
    %82 = vector.load %arg75[%c0_77, %c0_78, %c0_79] : memref<1x12x4xf32, #tpu.memory_space<vmem>>, vector<1x12x4xf32>
    %83 = vector.shape_cast %82 : vector<1x12x4xf32> to vector<12x4xf32>
    %cst_80 = arith.constant dense<0.000000e+00> : vector<24x4xf32>
    %84 = tpu.matmul %81, %83, %cst_80 {dimension_numbers = #tpu.dot_dimension_numbers<[1], [0], [0], [1], [0, 0, 1, 1], [], []>} : vector<24x12xf32>, vector<12x4xf32>, vector<24x4xf32> -> vector<24x4xf32>
    %cst_81 = arith.constant 9.99999993E-9 : f32
    %85 = vector.broadcast %cst_81 : f32 to vector<24x4xf32>
    %86 = arith.maximumf %84, %85 : vector<24x4xf32>
    %87 = math.sqrt %86 : vector<24x4xf32>
    %c0_82 = arith.constant 0 : index
    %c0_83 = arith.constant 0 : index
    %c0_84 = arith.constant 0 : index
    %88 = vector.load %arg79[%c0_82, %c0_83, %c0_84] : memref<1x32x32xf32, #tpu.memory_space<vmem>>, vector<1x32x32xf32>
    %89 = vector.shape_cast %88 : vector<1x32x32xf32> to vector<32x32xf32>
    %cst_85 = arith.constant dense<0.000000e+00> : vector<24x32xf32>
    %90 = tpu.matmul %77, %89, %cst_85 {dimension_numbers = #tpu.dot_dimension_numbers<[1], [0], [0], [1], [0, 0, 1, 1], [], []>} : vector<24x32xf32>, vector<32x32xf32>, vector<24x32xf32> -> vector<24x32xf32>
    %c0_86 = arith.constant 0 : index
    %c0_87 = arith.constant 0 : index
    %c0_88 = arith.constant 0 : index
    %91 = vector.load %arg80[%c0_86, %c0_87, %c0_88] : memref<1x4x32xf32, #tpu.memory_space<vmem>>, vector<1x4x32xf32>
    %92 = vector.shape_cast %91 : vector<1x4x32xf32> to vector<4x32xf32>
    %cst_89 = arith.constant dense<0.000000e+00> : vector<24x32xf32>
    %93 = tpu.matmul %87, %92, %cst_89 {dimension_numbers = #tpu.dot_dimension_numbers<[1], [0], [0], [1], [0, 0, 1, 1], [], []>} : vector<24x4xf32>, vector<4x32xf32>, vector<24x32xf32> -> vector<24x32xf32>
    %94 = arith.addf %90, %93 : vector<24x32xf32>
    %c0_90 = arith.constant 0 : index
    %c0_91 = arith.constant 0 : index
    %c0_92 = arith.constant 0 : index
    %95 = vector.load %arg76[%c0_90, %c0_91, %c0_92] : memref<1x1x32xf32, #tpu.memory_space<vmem>>, vector<1x1x32xf32>
    %96 = vector.shape_cast %95 : vector<1x1x32xf32> to vector<1x32xf32>
    %97 = vector.broadcast %96 : vector<1x32xf32> to vector<24x32xf32>
    %98 = arith.addf %94, %97 : vector<24x32xf32>
    %c0_93 = arith.constant 0 : index
    %c0_94 = arith.constant 0 : index
    %c0_95 = arith.constant 0 : index
    %99 = vector.load %arg81[%c0_93, %c0_94, %c0_95] : memref<1x32x4xf32, #tpu.memory_space<vmem>>, vector<1x32x4xf32>
    %100 = vector.shape_cast %99 : vector<1x32x4xf32> to vector<32x4xf32>
    %cst_96 = arith.constant dense<0.000000e+00> : vector<24x4xf32>
    %101 = tpu.matmul %98, %100, %cst_96 {dimension_numbers = #tpu.dot_dimension_numbers<[1], [0], [0], [1], [0, 0, 1, 1], [], []>} : vector<24x32xf32>, vector<32x4xf32>, vector<24x4xf32> -> vector<24x4xf32>
    %c0_97 = arith.constant 0 : index
    %c0_98 = arith.constant 0 : index
    %c0_99 = arith.constant 0 : index
    %102 = vector.load %arg77[%c0_97, %c0_98, %c0_99] : memref<1x1x4xf32, #tpu.memory_space<vmem>>, vector<1x1x4xf32>
    %103 = vector.shape_cast %102 : vector<1x1x4xf32> to vector<1x4xf32>
    %104 = vector.broadcast %103 : vector<1x4xf32> to vector<24x4xf32>
    %105 = arith.addf %101, %104 : vector<24x4xf32>
    %106 = arith.negf %105 : vector<24x4xf32>
    %107 = math.exp %106 : vector<24x4xf32>
    %cst_100 = arith.constant 1.000000e+00 : f32
    %108 = vector.broadcast %cst_100 : f32 to vector<24x4xf32>
    %109 = arith.addf %108, %107 : vector<24x4xf32>
    %110 = arith.divf %108, %109 : vector<24x4xf32>
    %c0_101 = arith.constant 0 : index
    %c0_102 = arith.constant 0 : index
    %c0_103 = arith.constant 0 : index
    %111 = vector.load %arg82[%c0_101, %c0_102, %c0_103] : memref<1x12x12xf32, #tpu.memory_space<vmem>>, vector<1x12x12xf32>
    %112 = vector.shape_cast %111 : vector<1x12x12xf32> to vector<12x12xf32>
    %cst_104 = arith.constant dense<0.000000e+00> : vector<24x12xf32>
    %113 = tpu.matmul %80, %112, %cst_104 {dimension_numbers = #tpu.dot_dimension_numbers<[1], [0], [0], [1], [0, 0, 1, 1], [], []>} : vector<24x12xf32>, vector<12x12xf32>, vector<24x12xf32> -> vector<24x12xf32>
    %c0_105 = arith.constant 0 : index
    %c0_106 = arith.constant 0 : index
    %c0_107 = arith.constant 0 : index
    %114 = vector.load %arg74[%c0_105, %c0_106, %c0_107] : memref<1x4x12xf32, #tpu.memory_space<vmem>>, vector<1x4x12xf32>
    %115 = vector.shape_cast %114 : vector<1x4x12xf32> to vector<4x12xf32>
    %cst_108 = arith.constant dense<0.000000e+00> : vector<24x12xf32>
    %116 = tpu.matmul %110, %115, %cst_108 {dimension_numbers = #tpu.dot_dimension_numbers<[1], [0], [0], [1], [0, 0, 1, 1], [], []>} : vector<24x4xf32>, vector<4x12xf32>, vector<24x12xf32> -> vector<24x12xf32>
    %117 = arith.mulf %113, %116 : vector<24x12xf32>
    %cst_109 = arith.constant 0.000000e+00 : f32
    %118 = vector.broadcast %cst_109 : f32 to vector<24x32xf32>
    %119 = arith.maximumf %98, %118 : vector<24x32xf32>
    %c0_110 = arith.constant 0 : index
    %c0_111 = arith.constant 0 : index
    %c0_112 = arith.constant 0 : index
    %120 = vector.load %arg87[%c0_110, %c0_111, %c0_112] : memref<1x12x12xf32, #tpu.memory_space<vmem>>, vector<1x12x12xf32>
    %121 = vector.shape_cast %120 : vector<1x12x12xf32> to vector<12x12xf32>
    %cst_113 = arith.constant dense<0.000000e+00> : vector<24x12xf32>
    %122 = tpu.matmul %117, %121, %cst_113 {dimension_numbers = #tpu.dot_dimension_numbers<[1], [0], [0], [1], [0, 0, 1, 1], [], []>} : vector<24x12xf32>, vector<12x12xf32>, vector<24x12xf32> -> vector<24x12xf32>
    %123 = arith.mulf %122, %122 : vector<24x12xf32>
    %c0_114 = arith.constant 0 : index
    %c0_115 = arith.constant 0 : index
    %c0_116 = arith.constant 0 : index
    %124 = vector.load %arg84[%c0_114, %c0_115, %c0_116] : memref<1x12x4xf32, #tpu.memory_space<vmem>>, vector<1x12x4xf32>
    %125 = vector.shape_cast %124 : vector<1x12x4xf32> to vector<12x4xf32>
    %cst_117 = arith.constant dense<0.000000e+00> : vector<24x4xf32>
    %126 = tpu.matmul %123, %125, %cst_117 {dimension_numbers = #tpu.dot_dimension_numbers<[1], [0], [0], [1], [0, 0, 1, 1], [], []>} : vector<24x12xf32>, vector<12x4xf32>, vector<24x4xf32> -> vector<24x4xf32>
    %cst_118 = arith.constant 9.99999993E-9 : f32
    %127 = vector.broadcast %cst_118 : f32 to vector<24x4xf32>
    %128 = arith.maximumf %126, %127 : vector<24x4xf32>
    %129 = math.sqrt %128 : vector<24x4xf32>
    %c0_119 = arith.constant 0 : index
    %c0_120 = arith.constant 0 : index
    %c0_121 = arith.constant 0 : index
    %130 = vector.load %arg88[%c0_119, %c0_120, %c0_121] : memref<1x32x32xf32, #tpu.memory_space<vmem>>, vector<1x32x32xf32>
    %131 = vector.shape_cast %130 : vector<1x32x32xf32> to vector<32x32xf32>
    %cst_122 = arith.constant dense<0.000000e+00> : vector<24x32xf32>
    %132 = tpu.matmul %119, %131, %cst_122 {dimension_numbers = #tpu.dot_dimension_numbers<[1], [0], [0], [1], [0, 0, 1, 1], [], []>} : vector<24x32xf32>, vector<32x32xf32>, vector<24x32xf32> -> vector<24x32xf32>
    %c0_123 = arith.constant 0 : index
    %c0_124 = arith.constant 0 : index
    %c0_125 = arith.constant 0 : index
    %133 = vector.load %arg89[%c0_123, %c0_124, %c0_125] : memref<1x4x32xf32, #tpu.memory_space<vmem>>, vector<1x4x32xf32>
    %134 = vector.shape_cast %133 : vector<1x4x32xf32> to vector<4x32xf32>
    %cst_126 = arith.constant dense<0.000000e+00> : vector<24x32xf32>
    %135 = tpu.matmul %129, %134, %cst_126 {dimension_numbers = #tpu.dot_dimension_numbers<[1], [0], [0], [1], [0, 0, 1, 1], [], []>} : vector<24x4xf32>, vector<4x32xf32>, vector<24x32xf32> -> vector<24x32xf32>
    %136 = arith.addf %132, %135 : vector<24x32xf32>
    %c0_127 = arith.constant 0 : index
    %c0_128 = arith.constant 0 : index
    %c0_129 = arith.constant 0 : index
    %137 = vector.load %arg85[%c0_127, %c0_128, %c0_129] : memref<1x1x32xf32, #tpu.memory_space<vmem>>, vector<1x1x32xf32>
    %138 = vector.shape_cast %137 : vector<1x1x32xf32> to vector<1x32xf32>
    %139 = vector.broadcast %138 : vector<1x32xf32> to vector<24x32xf32>
    %140 = arith.addf %136, %139 : vector<24x32xf32>
    %c0_130 = arith.constant 0 : index
    %c0_131 = arith.constant 0 : index
    %c0_132 = arith.constant 0 : index
    %141 = vector.load %arg90[%c0_130, %c0_131, %c0_132] : memref<1x32x4xf32, #tpu.memory_space<vmem>>, vector<1x32x4xf32>
    %142 = vector.shape_cast %141 : vector<1x32x4xf32> to vector<32x4xf32>
    %cst_133 = arith.constant dense<0.000000e+00> : vector<24x4xf32>
    %143 = tpu.matmul %140, %142, %cst_133 {dimension_numbers = #tpu.dot_dimension_numbers<[1], [0], [0], [1], [0, 0, 1, 1], [], []>} : vector<24x32xf32>, vector<32x4xf32>, vector<24x4xf32> -> vector<24x4xf32>
    %c0_134 = arith.constant 0 : index
    %c0_135 = arith.constant 0 : index
    %c0_136 = arith.constant 0 : index
    %144 = vector.load %arg86[%c0_134, %c0_135, %c0_136] : memref<1x1x4xf32, #tpu.memory_space<vmem>>, vector<1x1x4xf32>
    %145 = vector.shape_cast %144 : vector<1x1x4xf32> to vector<1x4xf32>
    %146 = vector.broadcast %145 : vector<1x4xf32> to vector<24x4xf32>
    %147 = arith.addf %143, %146 : vector<24x4xf32>
    %148 = arith.negf %147 : vector<24x4xf32>
    %149 = math.exp %148 : vector<24x4xf32>
    %cst_137 = arith.constant 1.000000e+00 : f32
    %150 = vector.broadcast %cst_137 : f32 to vector<24x4xf32>
    %151 = arith.addf %150, %149 : vector<24x4xf32>
    %152 = arith.divf %150, %151 : vector<24x4xf32>
    %c0_138 = arith.constant 0 : index
    %c0_139 = arith.constant 0 : index
    %c0_140 = arith.constant 0 : index
    %153 = vector.load %arg91[%c0_138, %c0_139, %c0_140] : memref<1x12x12xf32, #tpu.memory_space<vmem>>, vector<1x12x12xf32>
    %154 = vector.shape_cast %153 : vector<1x12x12xf32> to vector<12x12xf32>
    %cst_141 = arith.constant dense<0.000000e+00> : vector<24x12xf32>
    %155 = tpu.matmul %122, %154, %cst_141 {dimension_numbers = #tpu.dot_dimension_numbers<[1], [0], [0], [1], [0, 0, 1, 1], [], []>} : vector<24x12xf32>, vector<12x12xf32>, vector<24x12xf32> -> vector<24x12xf32>
    %c0_142 = arith.constant 0 : index
    %c0_143 = arith.constant 0 : index
    %c0_144 = arith.constant 0 : index
    %156 = vector.load %arg83[%c0_142, %c0_143, %c0_144] : memref<1x4x12xf32, #tpu.memory_space<vmem>>, vector<1x4x12xf32>
    %157 = vector.shape_cast %156 : vector<1x4x12xf32> to vector<4x12xf32>
    %cst_145 = arith.constant dense<0.000000e+00> : vector<24x12xf32>
    %158 = tpu.matmul %152, %157, %cst_145 {dimension_numbers = #tpu.dot_dimension_numbers<[1], [0], [0], [1], [0, 0, 1, 1], [], []>} : vector<24x4xf32>, vector<4x12xf32>, vector<24x12xf32> -> vector<24x12xf32>
    %159 = arith.mulf %155, %158 : vector<24x12xf32>
    %cst_146 = arith.constant dense<0.000000e+00> : vector<8x32xf32>
    %160 = tpu.matmul %9, %140, %cst_146 {dimension_numbers = #tpu.dot_dimension_numbers<[1], [0], [0], [1], [0, 0, 1, 1], [], []>} : vector<8x24xf32>, vector<24x32xf32>, vector<8x32xf32> -> vector<8x32xf32>
    %161 = vector.broadcast %15 : vector<8x1xf32> to vector<8x32xf32>
    %162 = arith.mulf %160, %161 : vector<8x32xf32>
    %cst_147 = arith.constant dense<0.000000e+00> : vector<8x12xf32>
    %163 = tpu.matmul %9, %159, %cst_147 {dimension_numbers = #tpu.dot_dimension_numbers<[1], [0], [0], [1], [0, 0, 1, 1], [], []>} : vector<8x24xf32>, vector<24x12xf32>, vector<8x12xf32> -> vector<8x12xf32>
    %164 = vector.broadcast %15 : vector<8x1xf32> to vector<8x12xf32>
    %165 = arith.mulf %163, %164 : vector<8x12xf32>
    %166 = arith.addf %3, %162 : vector<8x32xf32>
    %167 = arith.addf %4, %165 : vector<8x12xf32>
    %c0_148 = arith.constant 0 : index
    %c0_149 = arith.constant 0 : index
    %c0_150 = arith.constant 0 : index
    %168 = vector.load %arg94[%c0_148, %c0_149, %c0_150] : memref<1x1x32xf32, #tpu.memory_space<vmem>>, vector<1x1x32xf32>
    %169 = vector.shape_cast %168 : vector<1x1x32xf32> to vector<1x32xf32>
    %c0_151 = arith.constant 0 : index
    %c0_152 = arith.constant 0 : index
    %c0_153 = arith.constant 0 : index
    %170 = vector.load %arg93[%c0_151, %c0_152, %c0_153] : memref<1x1x32xf32, #tpu.memory_space<vmem>>, vector<1x1x32xf32>
    %171 = vector.shape_cast %170 : vector<1x1x32xf32> to vector<1x32xf32>
    %c0_154 = arith.constant 0 : index
    %c0_155 = arith.constant 0 : index
    %c0_156 = arith.constant 0 : index
    %172 = vector.load %arg92[%c0_154, %c0_155, %c0_156] : memref<1x12x4xf32, #tpu.memory_space<vmem>>, vector<1x12x4xf32>
    %173 = vector.shape_cast %172 : vector<1x12x4xf32> to vector<12x4xf32>
    %cst_157 = arith.constant dense<0.000000e+00> : vector<8xf32>
    %174 = vector.multi_reduction <add>, %166, %cst_157 [1] : vector<8x32xf32> to vector<8xf32>
    %175 = vector.shape_cast %174 : vector<8xf32> to vector<8x1xf32>
    %cst_158 = arith.constant 3.200000e+01 : f32
    %176 = vector.broadcast %cst_158 : f32 to vector<8x1xf32>
    %177 = arith.divf %175, %176 : vector<8x1xf32>
    %178 = vector.broadcast %177 : vector<8x1xf32> to vector<8x32xf32>
    %179 = arith.subf %166, %178 : vector<8x32xf32>
    %180 = arith.mulf %179, %179 : vector<8x32xf32>
    %cst_159 = arith.constant dense<0.000000e+00> : vector<8xf32>
    %181 = vector.multi_reduction <add>, %180, %cst_159 [1] : vector<8x32xf32> to vector<8xf32>
    %182 = vector.shape_cast %181 : vector<8xf32> to vector<8x1xf32>
    %cst_160 = arith.constant 3.200000e+01 : f32
    %183 = vector.broadcast %cst_160 : f32 to vector<8x1xf32>
    %184 = arith.divf %182, %183 : vector<8x1xf32>
    %185 = vector.broadcast %177 : vector<8x1xf32> to vector<8x32xf32>
    %186 = arith.subf %166, %185 : vector<8x32xf32>
    %cst_161 = arith.constant 9.99999974E-6 : f32
    %187 = vector.broadcast %cst_161 : f32 to vector<8x1xf32>
    %188 = arith.addf %184, %187 : vector<8x1xf32>
    %189 = math.rsqrt %188 : vector<8x1xf32>
    %190 = vector.broadcast %189 : vector<8x1xf32> to vector<8x32xf32>
    %191 = arith.mulf %186, %190 : vector<8x32xf32>
    %192 = vector.broadcast %169 : vector<1x32xf32> to vector<8x32xf32>
    %193 = arith.mulf %191, %192 : vector<8x32xf32>
    %194 = vector.broadcast %171 : vector<1x32xf32> to vector<8x32xf32>
    %195 = arith.addf %193, %194 : vector<8x32xf32>
    %196 = arith.mulf %167, %167 : vector<8x12xf32>
    %cst_162 = arith.constant dense<0.000000e+00> : vector<8x4xf32>
    %197 = tpu.matmul %196, %173, %cst_162 {dimension_numbers = #tpu.dot_dimension_numbers<[1], [0], [0], [1], [0, 0, 1, 1], [], []>} : vector<8x12xf32>, vector<12x4xf32>, vector<8x4xf32> -> vector<8x4xf32>
    %cst_163 = arith.constant 9.99999993E-9 : f32
    %198 = vector.broadcast %cst_163 : f32 to vector<8x4xf32>
    %199 = arith.maximumf %197, %198 : vector<8x4xf32>
    %cst_164 = arith.constant dense<0.000000e+00> : vector<8xf32>
    %200 = vector.multi_reduction <add>, %199, %cst_164 [1] : vector<8x4xf32> to vector<8xf32>
    %201 = vector.shape_cast %200 : vector<8xf32> to vector<8x1xf32>
    %cst_165 = arith.constant 4.000000e+00 : f32
    %202 = vector.broadcast %cst_165 : f32 to vector<8x1xf32>
    %203 = arith.divf %201, %202 : vector<8x1xf32>
    %204 = math.rsqrt %203 : vector<8x1xf32>
    %205 = vector.broadcast %204 : vector<8x1xf32> to vector<8x12xf32>
    %206 = arith.mulf %167, %205 : vector<8x12xf32>
    %c0_166 = arith.constant 0 : index
    %c0_167 = arith.constant 0 : index
    %c0_168 = arith.constant 0 : index
    %207 = vector.load %arg47[%c0_166, %c0_167, %c0_168] : memref<1x12x24xf32, #tpu.memory_space<vmem>>, vector<1x12x24xf32>
    %208 = vector.shape_cast %207 : vector<1x12x24xf32> to vector<12x24xf32>
    %cst_169 = arith.constant dense<0.000000e+00> : vector<8x24xf32>
    %209 = tpu.matmul %206, %208, %cst_169 {dimension_numbers = #tpu.dot_dimension_numbers<[1], [0], [0], [1], [0, 0, 1, 1], [], []>} : vector<8x12xf32>, vector<12x24xf32>, vector<8x24xf32> -> vector<8x24xf32>
    %210 = arith.mulf %209, %209 : vector<8x24xf32>
    %c0_170 = arith.constant 0 : index
    %c0_171 = arith.constant 0 : index
    %c0_172 = arith.constant 0 : index
    %211 = vector.load %arg44[%c0_170, %c0_171, %c0_172] : memref<1x24x8xf32, #tpu.memory_space<vmem>>, vector<1x24x8xf32>
    %212 = vector.shape_cast %211 : vector<1x24x8xf32> to vector<24x8xf32>
    %cst_173 = arith.constant dense<0.000000e+00> : vector<8x8xf32>
    %213 = tpu.matmul %210, %212, %cst_173 {dimension_numbers = #tpu.dot_dimension_numbers<[1], [0], [0], [1], [0, 0, 1, 1], [], []>} : vector<8x24xf32>, vector<24x8xf32>, vector<8x8xf32> -> vector<8x8xf32>
    %cst_174 = arith.constant 9.99999993E-9 : f32
    %214 = vector.broadcast %cst_174 : f32 to vector<8x8xf32>
    %215 = arith.maximumf %213, %214 : vector<8x8xf32>
    %216 = math.sqrt %215 : vector<8x8xf32>
    %c0_175 = arith.constant 0 : index
    %c0_176 = arith.constant 0 : index
    %c0_177 = arith.constant 0 : index
    %217 = vector.load %arg48[%c0_175, %c0_176, %c0_177] : memref<1x32x128xf32, #tpu.memory_space<vmem>>, vector<1x32x128xf32>
    %218 = vector.shape_cast %217 : vector<1x32x128xf32> to vector<32x128xf32>
    %cst_178 = arith.constant dense<0.000000e+00> : vector<8x128xf32>
    %219 = tpu.matmul %195, %218, %cst_178 {dimension_numbers = #tpu.dot_dimension_numbers<[1], [0], [0], [1], [0, 0, 1, 1], [], []>} : vector<8x32xf32>, vector<32x128xf32>, vector<8x128xf32> -> vector<8x128xf32>
    %c0_179 = arith.constant 0 : index
    %c0_180 = arith.constant 0 : index
    %c0_181 = arith.constant 0 : index
    %220 = vector.load %arg49[%c0_179, %c0_180, %c0_181] : memref<1x8x128xf32, #tpu.memory_space<vmem>>, vector<1x8x128xf32>
    %221 = vector.shape_cast %220 : vector<1x8x128xf32> to vector<8x128xf32>
    %cst_182 = arith.constant dense<0.000000e+00> : vector<8x128xf32>
    %222 = tpu.matmul %216, %221, %cst_182 {dimension_numbers = #tpu.dot_dimension_numbers<[1], [0], [0], [1], [0, 0, 1, 1], [], []>} : vector<8x8xf32>, vector<8x128xf32>, vector<8x128xf32> -> vector<8x128xf32>
    %223 = arith.addf %219, %222 : vector<8x128xf32>
    %c0_183 = arith.constant 0 : index
    %c0_184 = arith.constant 0 : index
    %c0_185 = arith.constant 0 : index
    %224 = vector.load %arg45[%c0_183, %c0_184, %c0_185] : memref<1x1x128xf32, #tpu.memory_space<vmem>>, vector<1x1x128xf32>
    %225 = vector.shape_cast %224 : vector<1x1x128xf32> to vector<1x128xf32>
    %226 = vector.broadcast %225 : vector<1x128xf32> to vector<8x128xf32>
    %227 = arith.addf %223, %226 : vector<8x128xf32>
    %c0_186 = arith.constant 0 : index
    %c0_187 = arith.constant 0 : index
    %c0_188 = arith.constant 0 : index
    %228 = vector.load %arg50[%c0_186, %c0_187, %c0_188] : memref<1x128x8xf32, #tpu.memory_space<vmem>>, vector<1x128x8xf32>
    %229 = vector.shape_cast %228 : vector<1x128x8xf32> to vector<128x8xf32>
    %cst_189 = arith.constant dense<0.000000e+00> : vector<8x8xf32>
    %230 = tpu.matmul %227, %229, %cst_189 {dimension_numbers = #tpu.dot_dimension_numbers<[1], [0], [0], [1], [0, 0, 1, 1], [], []>} : vector<8x128xf32>, vector<128x8xf32>, vector<8x8xf32> -> vector<8x8xf32>
    %c0_190 = arith.constant 0 : index
    %c0_191 = arith.constant 0 : index
    %c0_192 = arith.constant 0 : index
    %231 = vector.load %arg46[%c0_190, %c0_191, %c0_192] : memref<1x1x8xf32, #tpu.memory_space<vmem>>, vector<1x1x8xf32>
    %232 = vector.shape_cast %231 : vector<1x1x8xf32> to vector<1x8xf32>
    %233 = vector.broadcast %232 : vector<1x8xf32> to vector<8x8xf32>
    %234 = arith.addf %230, %233 : vector<8x8xf32>
    %235 = arith.negf %234 : vector<8x8xf32>
    %236 = math.exp %235 : vector<8x8xf32>
    %cst_193 = arith.constant 1.000000e+00 : f32
    %237 = vector.broadcast %cst_193 : f32 to vector<8x8xf32>
    %238 = arith.addf %237, %236 : vector<8x8xf32>
    %239 = arith.divf %237, %238 : vector<8x8xf32>
    %c0_194 = arith.constant 0 : index
    %c0_195 = arith.constant 0 : index
    %c0_196 = arith.constant 0 : index
    %240 = vector.load %arg51[%c0_194, %c0_195, %c0_196] : memref<1x24x24xf32, #tpu.memory_space<vmem>>, vector<1x24x24xf32>
    %241 = vector.shape_cast %240 : vector<1x24x24xf32> to vector<24x24xf32>
    %cst_197 = arith.constant dense<0.000000e+00> : vector<8x24xf32>
    %242 = tpu.matmul %209, %241, %cst_197 {dimension_numbers = #tpu.dot_dimension_numbers<[1], [0], [0], [1], [0, 0, 1, 1], [], []>} : vector<8x24xf32>, vector<24x24xf32>, vector<8x24xf32> -> vector<8x24xf32>
    %c0_198 = arith.constant 0 : index
    %c0_199 = arith.constant 0 : index
    %c0_200 = arith.constant 0 : index
    %243 = vector.load %arg43[%c0_198, %c0_199, %c0_200] : memref<1x8x24xf32, #tpu.memory_space<vmem>>, vector<1x8x24xf32>
    %244 = vector.shape_cast %243 : vector<1x8x24xf32> to vector<8x24xf32>
    %cst_201 = arith.constant dense<0.000000e+00> : vector<8x24xf32>
    %245 = tpu.matmul %239, %244, %cst_201 {dimension_numbers = #tpu.dot_dimension_numbers<[1], [0], [0], [1], [0, 0, 1, 1], [], []>} : vector<8x8xf32>, vector<8x24xf32>, vector<8x24xf32> -> vector<8x24xf32>
    %246 = arith.mulf %242, %245 : vector<8x24xf32>
    %cst_202 = arith.constant 0.000000e+00 : f32
    %247 = vector.broadcast %cst_202 : f32 to vector<8x128xf32>
    %248 = arith.maximumf %227, %247 : vector<8x128xf32>
    %c0_203 = arith.constant 0 : index
    %c0_204 = arith.constant 0 : index
    %c0_205 = arith.constant 0 : index
    %249 = vector.load %arg56[%c0_203, %c0_204, %c0_205] : memref<1x24x24xf32, #tpu.memory_space<vmem>>, vector<1x24x24xf32>
    %250 = vector.shape_cast %249 : vector<1x24x24xf32> to vector<24x24xf32>
    %cst_206 = arith.constant dense<0.000000e+00> : vector<8x24xf32>
    %251 = tpu.matmul %246, %250, %cst_206 {dimension_numbers = #tpu.dot_dimension_numbers<[1], [0], [0], [1], [0, 0, 1, 1], [], []>} : vector<8x24xf32>, vector<24x24xf32>, vector<8x24xf32> -> vector<8x24xf32>
    %252 = arith.mulf %251, %251 : vector<8x24xf32>
    %c0_207 = arith.constant 0 : index
    %c0_208 = arith.constant 0 : index
    %c0_209 = arith.constant 0 : index
    %253 = vector.load %arg53[%c0_207, %c0_208, %c0_209] : memref<1x24x8xf32, #tpu.memory_space<vmem>>, vector<1x24x8xf32>
    %254 = vector.shape_cast %253 : vector<1x24x8xf32> to vector<24x8xf32>
    %cst_210 = arith.constant dense<0.000000e+00> : vector<8x8xf32>
    %255 = tpu.matmul %252, %254, %cst_210 {dimension_numbers = #tpu.dot_dimension_numbers<[1], [0], [0], [1], [0, 0, 1, 1], [], []>} : vector<8x24xf32>, vector<24x8xf32>, vector<8x8xf32> -> vector<8x8xf32>
    %cst_211 = arith.constant 9.99999993E-9 : f32
    %256 = vector.broadcast %cst_211 : f32 to vector<8x8xf32>
    %257 = arith.maximumf %255, %256 : vector<8x8xf32>
    %258 = math.sqrt %257 : vector<8x8xf32>
    %c0_212 = arith.constant 0 : index
    %c0_213 = arith.constant 0 : index
    %c0_214 = arith.constant 0 : index
    %259 = vector.load %arg57[%c0_212, %c0_213, %c0_214] : memref<1x128x32xf32, #tpu.memory_space<vmem>>, vector<1x128x32xf32>
    %260 = vector.shape_cast %259 : vector<1x128x32xf32> to vector<128x32xf32>
    %cst_215 = arith.constant dense<0.000000e+00> : vector<8x32xf32>
    %261 = tpu.matmul %248, %260, %cst_215 {dimension_numbers = #tpu.dot_dimension_numbers<[1], [0], [0], [1], [0, 0, 1, 1], [], []>} : vector<8x128xf32>, vector<128x32xf32>, vector<8x32xf32> -> vector<8x32xf32>
    %c0_216 = arith.constant 0 : index
    %c0_217 = arith.constant 0 : index
    %c0_218 = arith.constant 0 : index
    %262 = vector.load %arg58[%c0_216, %c0_217, %c0_218] : memref<1x8x32xf32, #tpu.memory_space<vmem>>, vector<1x8x32xf32>
    %263 = vector.shape_cast %262 : vector<1x8x32xf32> to vector<8x32xf32>
    %cst_219 = arith.constant dense<0.000000e+00> : vector<8x32xf32>
    %264 = tpu.matmul %258, %263, %cst_219 {dimension_numbers = #tpu.dot_dimension_numbers<[1], [0], [0], [1], [0, 0, 1, 1], [], []>} : vector<8x8xf32>, vector<8x32xf32>, vector<8x32xf32> -> vector<8x32xf32>
    %265 = arith.addf %261, %264 : vector<8x32xf32>
    %c0_220 = arith.constant 0 : index
    %c0_221 = arith.constant 0 : index
    %c0_222 = arith.constant 0 : index
    %266 = vector.load %arg54[%c0_220, %c0_221, %c0_222] : memref<1x1x32xf32, #tpu.memory_space<vmem>>, vector<1x1x32xf32>
    %267 = vector.shape_cast %266 : vector<1x1x32xf32> to vector<1x32xf32>
    %268 = vector.broadcast %267 : vector<1x32xf32> to vector<8x32xf32>
    %269 = arith.addf %265, %268 : vector<8x32xf32>
    %c0_223 = arith.constant 0 : index
    %c0_224 = arith.constant 0 : index
    %c0_225 = arith.constant 0 : index
    %270 = vector.load %arg59[%c0_223, %c0_224, %c0_225] : memref<1x32x4xf32, #tpu.memory_space<vmem>>, vector<1x32x4xf32>
    %271 = vector.shape_cast %270 : vector<1x32x4xf32> to vector<32x4xf32>
    %cst_226 = arith.constant dense<0.000000e+00> : vector<8x4xf32>
    %272 = tpu.matmul %269, %271, %cst_226 {dimension_numbers = #tpu.dot_dimension_numbers<[1], [0], [0], [1], [0, 0, 1, 1], [], []>} : vector<8x32xf32>, vector<32x4xf32>, vector<8x4xf32> -> vector<8x4xf32>
    %c0_227 = arith.constant 0 : index
    %c0_228 = arith.constant 0 : index
    %c0_229 = arith.constant 0 : index
    %273 = vector.load %arg55[%c0_227, %c0_228, %c0_229] : memref<1x1x4xf32, #tpu.memory_space<vmem>>, vector<1x1x4xf32>
    %274 = vector.shape_cast %273 : vector<1x1x4xf32> to vector<1x4xf32>
    %275 = vector.broadcast %274 : vector<1x4xf32> to vector<8x4xf32>
    %276 = arith.addf %272, %275 : vector<8x4xf32>
    %277 = arith.negf %276 : vector<8x4xf32>
    %278 = math.exp %277 : vector<8x4xf32>
    %cst_230 = arith.constant 1.000000e+00 : f32
    %279 = vector.broadcast %cst_230 : f32 to vector<8x4xf32>
    %280 = arith.addf %279, %278 : vector<8x4xf32>
    %281 = arith.divf %279, %280 : vector<8x4xf32>
    %c0_231 = arith.constant 0 : index
    %c0_232 = arith.constant 0 : index
    %c0_233 = arith.constant 0 : index
    %282 = vector.load %arg60[%c0_231, %c0_232, %c0_233] : memref<1x24x12xf32, #tpu.memory_space<vmem>>, vector<1x24x12xf32>
    %283 = vector.shape_cast %282 : vector<1x24x12xf32> to vector<24x12xf32>
    %cst_234 = arith.constant dense<0.000000e+00> : vector<8x12xf32>
    %284 = tpu.matmul %251, %283, %cst_234 {dimension_numbers = #tpu.dot_dimension_numbers<[1], [0], [0], [1], [0, 0, 1, 1], [], []>} : vector<8x24xf32>, vector<24x12xf32>, vector<8x12xf32> -> vector<8x12xf32>
    %c0_235 = arith.constant 0 : index
    %c0_236 = arith.constant 0 : index
    %c0_237 = arith.constant 0 : index
    %285 = vector.load %arg52[%c0_235, %c0_236, %c0_237] : memref<1x4x12xf32, #tpu.memory_space<vmem>>, vector<1x4x12xf32>
    %286 = vector.shape_cast %285 : vector<1x4x12xf32> to vector<4x12xf32>
    %cst_238 = arith.constant dense<0.000000e+00> : vector<8x12xf32>
    %287 = tpu.matmul %281, %286, %cst_238 {dimension_numbers = #tpu.dot_dimension_numbers<[1], [0], [0], [1], [0, 0, 1, 1], [], []>} : vector<8x4xf32>, vector<4x12xf32>, vector<8x12xf32> -> vector<8x12xf32>
    %288 = arith.mulf %284, %287 : vector<8x12xf32>
    %289 = arith.addf %195, %269 : vector<8x32xf32>
    %290 = arith.addf %206, %288 : vector<8x12xf32>
    %c0_239 = arith.constant 0 : index
    %c0_240 = arith.constant 0 : index
    %c0_241 = arith.constant 0 : index
    %291 = vector.load %arg97[%c0_239, %c0_240, %c0_241] : memref<1x1x32xf32, #tpu.memory_space<vmem>>, vector<1x1x32xf32>
    %292 = vector.shape_cast %291 : vector<1x1x32xf32> to vector<1x32xf32>
    %c0_242 = arith.constant 0 : index
    %c0_243 = arith.constant 0 : index
    %c0_244 = arith.constant 0 : index
    %293 = vector.load %arg96[%c0_242, %c0_243, %c0_244] : memref<1x1x32xf32, #tpu.memory_space<vmem>>, vector<1x1x32xf32>
    %294 = vector.shape_cast %293 : vector<1x1x32xf32> to vector<1x32xf32>
    %c0_245 = arith.constant 0 : index
    %c0_246 = arith.constant 0 : index
    %c0_247 = arith.constant 0 : index
    %295 = vector.load %arg95[%c0_245, %c0_246, %c0_247] : memref<1x12x4xf32, #tpu.memory_space<vmem>>, vector<1x12x4xf32>
    %296 = vector.shape_cast %295 : vector<1x12x4xf32> to vector<12x4xf32>
    %cst_248 = arith.constant dense<0.000000e+00> : vector<8xf32>
    %297 = vector.multi_reduction <add>, %289, %cst_248 [1] : vector<8x32xf32> to vector<8xf32>
    %298 = vector.shape_cast %297 : vector<8xf32> to vector<8x1xf32>
    %cst_249 = arith.constant 3.200000e+01 : f32
    %299 = vector.broadcast %cst_249 : f32 to vector<8x1xf32>
    %300 = arith.divf %298, %299 : vector<8x1xf32>
    %301 = vector.broadcast %300 : vector<8x1xf32> to vector<8x32xf32>
    %302 = arith.subf %289, %301 : vector<8x32xf32>
    %303 = arith.mulf %302, %302 : vector<8x32xf32>
    %cst_250 = arith.constant dense<0.000000e+00> : vector<8xf32>
    %304 = vector.multi_reduction <add>, %303, %cst_250 [1] : vector<8x32xf32> to vector<8xf32>
    %305 = vector.shape_cast %304 : vector<8xf32> to vector<8x1xf32>
    %cst_251 = arith.constant 3.200000e+01 : f32
    %306 = vector.broadcast %cst_251 : f32 to vector<8x1xf32>
    %307 = arith.divf %305, %306 : vector<8x1xf32>
    %308 = vector.broadcast %300 : vector<8x1xf32> to vector<8x32xf32>
    %309 = arith.subf %289, %308 : vector<8x32xf32>
    %cst_252 = arith.constant 9.99999974E-6 : f32
    %310 = vector.broadcast %cst_252 : f32 to vector<8x1xf32>
    %311 = arith.addf %307, %310 : vector<8x1xf32>
    %312 = math.rsqrt %311 : vector<8x1xf32>
    %313 = vector.broadcast %312 : vector<8x1xf32> to vector<8x32xf32>
    %314 = arith.mulf %309, %313 : vector<8x32xf32>
    %315 = vector.broadcast %292 : vector<1x32xf32> to vector<8x32xf32>
    %316 = arith.mulf %314, %315 : vector<8x32xf32>
    %317 = vector.broadcast %294 : vector<1x32xf32> to vector<8x32xf32>
    %318 = arith.addf %316, %317 : vector<8x32xf32>
    %319 = arith.mulf %290, %290 : vector<8x12xf32>
    %cst_253 = arith.constant dense<0.000000e+00> : vector<8x4xf32>
    %320 = tpu.matmul %319, %296, %cst_253 {dimension_numbers = #tpu.dot_dimension_numbers<[1], [0], [0], [1], [0, 0, 1, 1], [], []>} : vector<8x12xf32>, vector<12x4xf32>, vector<8x4xf32> -> vector<8x4xf32>
    %cst_254 = arith.constant 9.99999993E-9 : f32
    %321 = vector.broadcast %cst_254 : f32 to vector<8x4xf32>
    %322 = arith.maximumf %320, %321 : vector<8x4xf32>
    %cst_255 = arith.constant dense<0.000000e+00> : vector<8xf32>
    %323 = vector.multi_reduction <add>, %322, %cst_255 [1] : vector<8x4xf32> to vector<8xf32>
    %324 = vector.shape_cast %323 : vector<8xf32> to vector<8x1xf32>
    %cst_256 = arith.constant 4.000000e+00 : f32
    %325 = vector.broadcast %cst_256 : f32 to vector<8x1xf32>
    %326 = arith.divf %324, %325 : vector<8x1xf32>
    %327 = math.rsqrt %326 : vector<8x1xf32>
    %328 = vector.broadcast %327 : vector<8x1xf32> to vector<8x12xf32>
    %329 = arith.mulf %290, %328 : vector<8x12xf32>
    %c0_257 = arith.constant 0 : index
    %c0_258 = arith.constant 0 : index
    %330 = vector.load %arg99[%c0_257, %c0_258] : memref<8x32xf32, #tpu.memory_space<vmem>>, vector<8x32xf32>
    tpu.vector_store %arg99[%c0_257, %c0_258], %318 {strides = array<i32>} : memref<8x32xf32, #tpu.memory_space<vmem>>, vector<8x32xf32>,
    %c0_259 = arith.constant 0 : index
    %c0_260 = arith.constant 0 : index
    %331 = vector.load %arg100[%c0_259, %c0_260] : memref<8x12xf32, #tpu.memory_space<vmem>>, vector<8x12xf32>
    tpu.vector_store %arg100[%c0_259, %c0_260], %329 {strides = array<i32>} : memref<8x12xf32, #tpu.memory_space<vmem>>, vector<8x12xf32>,
    %c2_i32 = arith.constant 2 : i32
    %332 = arith.cmpi eq, %arg0, %c2_i32 : i32
    %333 = arith.extui %332 : i1 to i32
    %c0_i32_261 = arith.constant 0 : i32
    %334 = arith.cmpi ne, %333, %c0_i32_261 : i32
    scf.if %334 {
      %c0_262 = arith.constant 0 : index
      %c0_263 = arith.constant 0 : index
      %335 = vector.load %arg34[%c0_262, %c0_263] : memref<1x32xf32, #tpu.memory_space<vmem>>, vector<1x32xf32>
      %c0_264 = arith.constant 0 : index
      %c0_265 = arith.constant 0 : index
      %336 = vector.load %arg33[%c0_264, %c0_265] : memref<1x32xf32, #tpu.memory_space<vmem>>, vector<1x32xf32>
      %c0_266 = arith.constant 0 : index
      %c0_267 = arith.constant 0 : index
      %337 = vector.load %arg32[%c0_266, %c0_267] : memref<12x4xf32, #tpu.memory_space<vmem>>, vector<12x4xf32>
      %cst_268 = arith.constant dense<0.000000e+00> : vector<8xf32>
      %338 = vector.multi_reduction <add>, %318, %cst_268 [1] : vector<8x32xf32> to vector<8xf32>
      %339 = vector.shape_cast %338 : vector<8xf32> to vector<8x1xf32>
      %cst_269 = arith.constant 3.200000e+01 : f32
      %340 = vector.broadcast %cst_269 : f32 to vector<8x1xf32>
      %341 = arith.divf %339, %340 : vector<8x1xf32>
      %342 = vector.broadcast %341 : vector<8x1xf32> to vector<8x32xf32>
      %343 = arith.subf %318, %342 : vector<8x32xf32>
      %344 = arith.mulf %343, %343 : vector<8x32xf32>
      %cst_270 = arith.constant dense<0.000000e+00> : vector<8xf32>
      %345 = vector.multi_reduction <add>, %344, %cst_270 [1] : vector<8x32xf32> to vector<8xf32>
      %346 = vector.shape_cast %345 : vector<8xf32> to vector<8x1xf32>
      %cst_271 = arith.constant 3.200000e+01 : f32
      %347 = vector.broadcast %cst_271 : f32 to vector<8x1xf32>
      %348 = arith.divf %346, %347 : vector<8x1xf32>
      %349 = vector.broadcast %341 : vector<8x1xf32> to vector<8x32xf32>
      %350 = arith.subf %318, %349 : vector<8x32xf32>
      %cst_272 = arith.constant 9.99999974E-6 : f32
      %351 = vector.broadcast %cst_272 : f32 to vector<8x1xf32>
      %352 = arith.addf %348, %351 : vector<8x1xf32>
      %353 = math.rsqrt %352 : vector<8x1xf32>
      %354 = vector.broadcast %353 : vector<8x1xf32> to vector<8x32xf32>
      %355 = arith.mulf %350, %354 : vector<8x32xf32>
      %356 = vector.broadcast %335 : vector<1x32xf32> to vector<8x32xf32>
      %357 = arith.mulf %355, %356 : vector<8x32xf32>
      %358 = vector.broadcast %336 : vector<1x32xf32> to vector<8x32xf32>
      %359 = arith.addf %357, %358 : vector<8x32xf32>
      %360 = arith.mulf %329, %329 : vector<8x12xf32>
      %cst_273 = arith.constant dense<0.000000e+00> : vector<8x4xf32>
      %361 = tpu.matmul %360, %337, %cst_273 {dimension_numbers = #tpu.dot_dimension_numbers<[1], [0], [0], [1], [0, 0, 1, 1], [], []>} : vector<8x12xf32>, vector<12x4xf32>, vector<8x4xf32> -> vector<8x4xf32>
      %cst_274 = arith.constant 9.99999993E-9 : f32
      %362 = vector.broadcast %cst_274 : f32 to vector<8x4xf32>
      %363 = arith.maximumf %361, %362 : vector<8x4xf32>
      %cst_275 = arith.constant dense<0.000000e+00> : vector<8xf32>
      %364 = vector.multi_reduction <add>, %363, %cst_275 [1] : vector<8x4xf32> to vector<8xf32>
      %365 = vector.shape_cast %364 : vector<8xf32> to vector<8x1xf32>
      %cst_276 = arith.constant 4.000000e+00 : f32
      %366 = vector.broadcast %cst_276 : f32 to vector<8x1xf32>
      %367 = arith.divf %365, %366 : vector<8x1xf32>
      %368 = math.rsqrt %367 : vector<8x1xf32>
      %369 = vector.broadcast %368 : vector<8x1xf32> to vector<8x12xf32>
      %370 = arith.mulf %329, %369 : vector<8x12xf32>
      %c0_277 = arith.constant 0 : index
      %c0_278 = arith.constant 0 : index
      %371 = vector.load %arg35[%c0_277, %c0_278] : memref<12x12xf32, #tpu.memory_space<vmem>>, vector<12x12xf32>
      %cst_279 = arith.constant dense<0.000000e+00> : vector<8x12xf32>
      %372 = tpu.matmul %370, %371, %cst_279 {dimension_numbers = #tpu.dot_dimension_numbers<[1], [0], [0], [1], [0, 0, 1, 1], [], []>} : vector<8x12xf32>, vector<12x12xf32>, vector<8x12xf32> -> vector<8x12xf32>
      %373 = arith.mulf %372, %372 : vector<8x12xf32>
      %c0_280 = arith.constant 0 : index
      %c0_281 = arith.constant 0 : index
      %374 = vector.load %arg28[%c0_280, %c0_281] : memref<12x4xf32, #tpu.memory_space<vmem>>, vector<12x4xf32>
      %cst_282 = arith.constant dense<0.000000e+00> : vector<8x4xf32>
      %375 = tpu.matmul %373, %374, %cst_282 {dimension_numbers = #tpu.dot_dimension_numbers<[1], [0], [0], [1], [0, 0, 1, 1], [], []>} : vector<8x12xf32>, vector<12x4xf32>, vector<8x4xf32> -> vector<8x4xf32>
      %cst_283 = arith.constant 9.99999993E-9 : f32
      %376 = vector.broadcast %cst_283 : f32 to vector<8x4xf32>
      %377 = arith.maximumf %375, %376 : vector<8x4xf32>
      %378 = math.sqrt %377 : vector<8x4xf32>
      %c0_284 = arith.constant 0 : index
      %c0_285 = arith.constant 0 : index
      %379 = vector.load %arg36[%c0_284, %c0_285] : memref<32x32xf32, #tpu.memory_space<vmem>>, vector<32x32xf32>
      %cst_286 = arith.constant dense<0.000000e+00> : vector<8x32xf32>
      %380 = tpu.matmul %359, %379, %cst_286 {dimension_numbers = #tpu.dot_dimension_numbers<[1], [0], [0], [1], [0, 0, 1, 1], [], []>} : vector<8x32xf32>, vector<32x32xf32>, vector<8x32xf32> -> vector<8x32xf32>
      %c0_287 = arith.constant 0 : index
      %c0_288 = arith.constant 0 : index
      %381 = vector.load %arg37[%c0_287, %c0_288] : memref<4x32xf32, #tpu.memory_space<vmem>>, vector<4x32xf32>
      %cst_289 = arith.constant dense<0.000000e+00> : vector<8x32xf32>
      %382 = tpu.matmul %378, %381, %cst_289 {dimension_numbers = #tpu.dot_dimension_numbers<[1], [0], [0], [1], [0, 0, 1, 1], [], []>} : vector<8x4xf32>, vector<4x32xf32>, vector<8x32xf32> -> vector<8x32xf32>
      %383 = arith.addf %380, %382 : vector<8x32xf32>
      %c0_290 = arith.constant 0 : index
      %c0_291 = arith.constant 0 : index
      %384 = vector.load %arg29[%c0_290, %c0_291] : memref<1x32xf32, #tpu.memory_space<vmem>>, vector<1x32xf32>
      %385 = vector.broadcast %384 : vector<1x32xf32> to vector<8x32xf32>
      %386 = arith.addf %383, %385 : vector<8x32xf32>
      %cst_292 = arith.constant 0.000000e+00 : f32
      %387 = vector.broadcast %cst_292 : f32 to vector<8x32xf32>
      %388 = arith.maximumf %386, %387 : vector<8x32xf32>
      %cst_293 = arith.constant 1.250000e-01 : f32
      %389 = vector.broadcast %cst_293 : f32 to vector<1x8xf32>
      %cst_294 = arith.constant dense<0.000000e+00> : vector<1x32xf32>
      %390 = tpu.matmul %389, %388, %cst_294 {dimension_numbers = #tpu.dot_dimension_numbers<[1], [0], [0], [1], [0, 0, 1, 1], [], []>} : vector<1x8xf32>, vector<8x32xf32>, vector<1x32xf32> -> vector<1x32xf32>
      %c0_295 = arith.constant 0 : index
      %c0_296 = arith.constant 0 : index
      %391 = vector.load %arg31[%c0_295, %c0_296] : memref<32x32xf32, #tpu.memory_space<vmem>>, vector<32x32xf32>
      %cst_297 = arith.constant dense<0.000000e+00> : vector<1x32xf32>
      %392 = tpu.matmul %390, %391, %cst_297 {dimension_numbers = #tpu.dot_dimension_numbers<[1], [0], [0], [1], [0, 0, 1, 1], [], []>} : vector<1x32xf32>, vector<32x32xf32>, vector<1x32xf32> -> vector<1x32xf32>
      %c0_298 = arith.constant 0 : index
      %c0_299 = arith.constant 0 : index
      %393 = vector.load %arg30[%c0_298, %c0_299] : memref<1x32xf32, #tpu.memory_space<vmem>>, vector<1x32xf32>
      %394 = arith.addf %392, %393 : vector<1x32xf32>
      %cst_300 = arith.constant 0.000000e+00 : f32
      %395 = vector.broadcast %cst_300 : f32 to vector<1x32xf32>
      %396 = arith.maximumf %394, %395 : vector<1x32xf32>
      %c0_301 = arith.constant 0 : index
      %c0_302 = arith.constant 0 : index
      %397 = vector.load %arg98[%c0_301, %c0_302] : memref<1x32xf32, #tpu.memory_space<vmem>>, vector<1x32xf32>
      tpu.vector_store %arg98[%c0_301, %c0_302], %396 {strides = array<i32>} : memref<1x32xf32, #tpu.memory_space<vmem>>, vector<1x32xf32>,
    } else {
    }
    return
  }
  func.func @transform_0(%arg0: i32) -> (i32, i32) {
    %c0_i32 = arith.constant 0 : i32
    %c0_i32_0 = arith.constant 0 : i32
    %c0_i32_1 = arith.constant 0 : i32
    return %c0_i32, %c0_i32_0 : i32, i32
  }
  func.func @transform_1(%arg0: i32) -> (i32, i32) {
    %c0_i32 = arith.constant 0 : i32
    %c0_i32_0 = arith.constant 0 : i32
    %c0_i32_1 = arith.constant 0 : i32
    return %c0_i32, %c0_i32_0 : i32, i32
  }
  func.func @transform_2(%arg0: i32) -> (i32, i32) {
    %c0_i32 = arith.constant 0 : i32
    %c0_i32_0 = arith.constant 0 : i32
    %c0_i32_1 = arith.constant 0 : i32
    return %c0_i32, %c0_i32_0 : i32, i32
  }
  func.func @transform_3(%arg0: i32) -> (i32, i32) {
    %c0_i32 = arith.constant 0 : i32
    %c0_i32_0 = arith.constant 0 : i32
    %c0_i32_1 = arith.constant 0 : i32
    return %c0_i32, %c0_i32_0 : i32, i32
  }
  func.func @transform_4(%arg0: i32) -> (i32, i32) {
    %c0_i32 = arith.constant 0 : i32
    %c0_i32_0 = arith.constant 0 : i32
    %c0_i32_1 = arith.constant 0 : i32
    return %c0_i32, %c0_i32_0 : i32, i32
  }
  func.func @transform_5(%arg0: i32) -> (i32, i32) {
    %c0_i32 = arith.constant 0 : i32
    %c0_i32_0 = arith.constant 0 : i32
    %c0_i32_1 = arith.constant 0 : i32
    return %c0_i32, %c0_i32_0 : i32, i32
  }
  func.func @transform_6(%arg0: i32) -> (i32, i32) {
    %c0_i32 = arith.constant 0 : i32
    %c0_i32_0 = arith.constant 0 : i32
    %c0_i32_1 = arith.constant 0 : i32
    return %c0_i32, %c0_i32_0 : i32, i32
  }
  func.func @transform_7(%arg0: i32) -> (i32, i32) {
    %c0_i32 = arith.constant 0 : i32
    %c0_i32_0 = arith.constant 0 : i32
    %c0_i32_1 = arith.constant 0 : i32
    return %c0_i32, %c0_i32_0 : i32, i32
  }
  func.func @transform_8(%arg0: i32) -> (i32, i32) {
    %c0_i32 = arith.constant 0 : i32
    %c0_i32_0 = arith.constant 0 : i32
    %c0_i32_1 = arith.constant 0 : i32
    return %c0_i32, %c0_i32_0 : i32, i32
  }
  func.func @transform_9(%arg0: i32) -> (i32, i32) {
    %c0_i32 = arith.constant 0 : i32
    %c0_i32_0 = arith.constant 0 : i32
    %c0_i32_1 = arith.constant 0 : i32
    return %c0_i32, %c0_i32_0 : i32, i32
  }
  func.func @transform_10(%arg0: i32) -> (i32, i32) {
    %c0_i32 = arith.constant 0 : i32
    %c0_i32_0 = arith.constant 0 : i32
    %c0_i32_1 = arith.constant 0 : i32
    return %c0_i32, %c0_i32_0 : i32, i32
  }
  func.func @transform_11(%arg0: i32) -> (i32, i32) {
    %c0_i32 = arith.constant 0 : i32
    %c0_i32_0 = arith.constant 0 : i32
    %c0_i32_1 = arith.constant 0 : i32
    return %c0_i32, %c0_i32_0 : i32, i32
  }
  func.func @transform_12(%arg0: i32) -> (i32, i32) {
    %c0_i32 = arith.constant 0 : i32
    %c0_i32_0 = arith.constant 0 : i32
    %c0_i32_1 = arith.constant 0 : i32
    return %c0_i32, %c0_i32_0 : i32, i32
  }
  func.func @transform_13(%arg0: i32) -> (i32, i32) {
    %c0_i32 = arith.constant 0 : i32
    %c0_i32_0 = arith.constant 0 : i32
    %c0_i32_1 = arith.constant 0 : i32
    return %c0_i32, %c0_i32_0 : i32, i32
  }
  func.func @transform_14(%arg0: i32) -> (i32, i32) {
    %c0_i32 = arith.constant 0 : i32
    %c0_i32_0 = arith.constant 0 : i32
    %c0_i32_1 = arith.constant 0 : i32
    return %c0_i32, %c0_i32_0 : i32, i32
  }
  func.func @transform_15(%arg0: i32) -> (i32, i32) {
    %c0_i32 = arith.constant 0 : i32
    %c0_i32_0 = arith.constant 0 : i32
    %c0_i32_1 = arith.constant 0 : i32
    return %c0_i32, %c0_i32_0 : i32, i32
  }
  func.func @transform_16(%arg0: i32) -> (i32, i32) {
    %c0_i32 = arith.constant 0 : i32
    %c0_i32_0 = arith.constant 0 : i32
    %c0_i32_1 = arith.constant 0 : i32
    return %c0_i32, %c0_i32_0 : i32, i32
  }
  func.func @transform_17(%arg0: i32) -> (i32, i32) {
    %c0_i32 = arith.constant 0 : i32
    %c0_i32_0 = arith.constant 0 : i32
    %c0_i32_1 = arith.constant 0 : i32
    return %c0_i32, %c0_i32_0 : i32, i32
  }
  func.func @transform_18(%arg0: i32) -> (i32, i32) {
    %c0_i32 = arith.constant 0 : i32
    %c0_i32_0 = arith.constant 0 : i32
    %c0_i32_1 = arith.constant 0 : i32
    return %c0_i32, %c0_i32_0 : i32, i32
  }
  func.func @transform_19(%arg0: i32) -> (i32, i32) {
    %c0_i32 = arith.constant 0 : i32
    %c0_i32_0 = arith.constant 0 : i32
    %c0_i32_1 = arith.constant 0 : i32
    return %c0_i32, %c0_i32_0 : i32, i32
  }
  func.func @transform_20(%arg0: i32) -> (i32, i32) {
    %c0_i32 = arith.constant 0 : i32
    %c0_i32_0 = arith.constant 0 : i32
    %c0_i32_1 = arith.constant 0 : i32
    return %c0_i32, %c0_i32_0 : i32, i32
  }
  func.func @transform_21(%arg0: i32) -> (i32, i32) {
    %c0_i32 = arith.constant 0 : i32
    %c0_i32_0 = arith.constant 0 : i32
    %c0_i32_1 = arith.constant 0 : i32
    return %c0_i32, %c0_i32_0 : i32, i32
  }
  func.func @transform_22(%arg0: i32) -> (i32, i32) {
    %c0_i32 = arith.constant 0 : i32
    %c0_i32_0 = arith.constant 0 : i32
    %c0_i32_1 = arith.constant 0 : i32
    return %c0_i32, %c0_i32_0 : i32, i32
  }
  func.func @transform_23(%arg0: i32) -> (i32, i32) {
    %c0_i32 = arith.constant 0 : i32
    %c0_i32_0 = arith.constant 0 : i32
    %c0_i32_1 = arith.constant 0 : i32
    return %c0_i32, %c0_i32_0 : i32, i32
  }
  func.func @transform_24(%arg0: i32) -> (i32, i32) {
    %c0_i32 = arith.constant 0 : i32
    %c0_i32_0 = arith.constant 0 : i32
    %c0_i32_1 = arith.constant 0 : i32
    return %c0_i32, %c0_i32_0 : i32, i32
  }
  func.func @transform_25(%arg0: i32) -> (i32, i32) {
    %c0_i32 = arith.constant 0 : i32
    %c0_i32_0 = arith.constant 0 : i32
    %c0_i32_1 = arith.constant 0 : i32
    return %c0_i32, %c0_i32_0 : i32, i32
  }
  func.func @transform_26(%arg0: i32) -> (i32, i32) {
    %c0_i32 = arith.constant 0 : i32
    %c0_i32_0 = arith.constant 0 : i32
    %c0_i32_1 = arith.constant 0 : i32
    return %c0_i32, %c0_i32_0 : i32, i32
  }
  func.func @transform_27(%arg0: i32) -> (i32, i32) {
    %c0_i32 = arith.constant 0 : i32
    %c0_i32_0 = arith.constant 0 : i32
    %c0_i32_1 = arith.constant 0 : i32
    return %c0_i32, %c0_i32_0 : i32, i32
  }
  func.func @transform_28(%arg0: i32) -> (i32, i32) {
    %c0_i32 = arith.constant 0 : i32
    %c0_i32_0 = arith.constant 0 : i32
    %c0_i32_1 = arith.constant 0 : i32
    return %c0_i32, %c0_i32_0 : i32, i32
  }
  func.func @transform_29(%arg0: i32) -> (i32, i32) {
    %c0_i32 = arith.constant 0 : i32
    %c0_i32_0 = arith.constant 0 : i32
    %c0_i32_1 = arith.constant 0 : i32
    return %c0_i32, %c0_i32_0 : i32, i32
  }
  func.func @transform_30(%arg0: i32) -> (i32, i32) {
    %c0_i32 = arith.constant 0 : i32
    %c0_i32_0 = arith.constant 0 : i32
    %c0_i32_1 = arith.constant 0 : i32
    return %c0_i32, %c0_i32_0 : i32, i32
  }
  func.func @transform_31(%arg0: i32) -> (i32, i32) {
    %c0_i32 = arith.constant 0 : i32
    %c0_i32_0 = arith.constant 0 : i32
    %c0_i32_1 = arith.constant 0 : i32
    return %c0_i32, %c0_i32_0 : i32, i32
  }
  func.func @transform_32(%arg0: i32) -> (i32, i32) {
    %c0_i32 = arith.constant 0 : i32
    %c0_i32_0 = arith.constant 0 : i32
    %c0_i32_1 = arith.constant 0 : i32
    return %c0_i32, %c0_i32_0 : i32, i32
  }
  func.func @transform_33(%arg0: i32) -> (i32, i32) {
    %c0_i32 = arith.constant 0 : i32
    %c0_i32_0 = arith.constant 0 : i32
    %c0_i32_1 = arith.constant 0 : i32
    return %c0_i32, %c0_i32_0 : i32, i32
  }
  func.func @transform_34(%arg0: i32) -> (i32, i32) {
    %c0_i32 = arith.constant 0 : i32
    %c0_i32_0 = arith.constant 0 : i32
    %c0_i32_1 = arith.constant 0 : i32
    return %c0_i32, %c0_i32_0 : i32, i32
  }
  func.func @transform_35(%arg0: i32) -> (i32, i32) {
    %c0_i32 = arith.constant 0 : i32
    %c0_i32_0 = arith.constant 0 : i32
    %c0_i32_1 = arith.constant 0 : i32
    return %c0_i32, %c0_i32_0 : i32, i32
  }
  func.func @transform_36(%arg0: i32) -> (i32, i32) {
    %c0_i32 = arith.constant 0 : i32
    %c0_i32_0 = arith.constant 0 : i32
    %c0_i32_1 = arith.constant 0 : i32
    return %c0_i32, %c0_i32_0 : i32, i32
  }
  func.func @transform_37(%arg0: i32) -> (i32, i32) {
    %c0_i32 = arith.constant 0 : i32
    %c0_i32_0 = arith.constant 0 : i32
    %c0_i32_1 = arith.constant 0 : i32
    return %c0_i32, %c0_i32_0 : i32, i32
  }
  func.func @transform_38(%arg0: i32) -> (i32, i32) {
    %c0_i32 = arith.constant 0 : i32
    %c0_i32_0 = arith.constant 0 : i32
    %c0_i32_1 = arith.constant 0 : i32
    return %c0_i32, %c0_i32_0 : i32, i32
  }
  func.func @transform_39(%arg0: i32) -> (i32, i32) {
    %c0_i32 = arith.constant 0 : i32
    %c0_i32_0 = arith.constant 0 : i32
    %c0_i32_1 = arith.constant 0 : i32
    return %c0_i32, %c0_i32_0 : i32, i32
  }
  func.func @transform_40(%arg0: i32) -> (i32, i32) {
    %c0_i32 = arith.constant 0 : i32
    %c0_i32_0 = arith.constant 0 : i32
    %c0_i32_1 = arith.constant 0 : i32
    return %c0_i32, %c0_i32_0 : i32, i32
  }
  func.func @transform_41(%arg0: i32) -> (i32, i32) {
    %c0_i32 = arith.constant 0 : i32
    %c0_i32_0 = arith.constant 0 : i32
    %c0_i32_1 = arith.constant 0 : i32
    return %c0_i32, %c0_i32_0 : i32, i32
  }
  func.func @transform_42(%arg0: i32) -> (i32, i32, i32) {
    %c0_i32 = arith.constant 0 : i32
    %c0_i32_0 = arith.constant 0 : i32
    %c0_i32_1 = arith.constant 0 : i32
    return %arg0, %c0_i32, %c0_i32_0 : i32, i32, i32
  }
  func.func @transform_43(%arg0: i32) -> (i32, i32, i32) {
    %c0_i32 = arith.constant 0 : i32
    %c0_i32_0 = arith.constant 0 : i32
    %c0_i32_1 = arith.constant 0 : i32
    return %arg0, %c0_i32, %c0_i32_0 : i32, i32, i32
  }
  func.func @transform_44(%arg0: i32) -> (i32, i32, i32) {
    %c0_i32 = arith.constant 0 : i32
    %c0_i32_0 = arith.constant 0 : i32
    %c0_i32_1 = arith.constant 0 : i32
    return %arg0, %c0_i32, %c0_i32_0 : i32, i32, i32
  }
  func.func @transform_45(%arg0: i32) -> (i32, i32, i32) {
    %c0_i32 = arith.constant 0 : i32
    %c0_i32_0 = arith.constant 0 : i32
    %c0_i32_1 = arith.constant 0 : i32
    return %arg0, %c0_i32, %c0_i32_0 : i32, i32, i32
  }
  func.func @transform_46(%arg0: i32) -> (i32, i32, i32) {
    %c0_i32 = arith.constant 0 : i32
    %c0_i32_0 = arith.constant 0 : i32
    %c0_i32_1 = arith.constant 0 : i32
    return %arg0, %c0_i32, %c0_i32_0 : i32, i32, i32
  }
  func.func @transform_47(%arg0: i32) -> (i32, i32, i32) {
    %c0_i32 = arith.constant 0 : i32
    %c0_i32_0 = arith.constant 0 : i32
    %c0_i32_1 = arith.constant 0 : i32
    return %arg0, %c0_i32, %c0_i32_0 : i32, i32, i32
  }
  func.func @transform_48(%arg0: i32) -> (i32, i32, i32) {
    %c0_i32 = arith.constant 0 : i32
    %c0_i32_0 = arith.constant 0 : i32
    %c0_i32_1 = arith.constant 0 : i32
    return %arg0, %c0_i32, %c0_i32_0 : i32, i32, i32
  }
  func.func @transform_49(%arg0: i32) -> (i32, i32, i32) {
    %c0_i32 = arith.constant 0 : i32
    %c0_i32_0 = arith.constant 0 : i32
    %c0_i32_1 = arith.constant 0 : i32
    return %arg0, %c0_i32, %c0_i32_0 : i32, i32, i32
  }
  func.func @transform_50(%arg0: i32) -> (i32, i32, i32) {
    %c0_i32 = arith.constant 0 : i32
    %c0_i32_0 = arith.constant 0 : i32
    %c0_i32_1 = arith.constant 0 : i32
    return %arg0, %c0_i32, %c0_i32_0 : i32, i32, i32
  }
  func.func @transform_51(%arg0: i32) -> (i32, i32, i32) {
    %c0_i32 = arith.constant 0 : i32
    %c0_i32_0 = arith.constant 0 : i32
    %c0_i32_1 = arith.constant 0 : i32
    return %arg0, %c0_i32, %c0_i32_0 : i32, i32, i32
  }
  func.func @transform_52(%arg0: i32) -> (i32, i32, i32) {
    %c0_i32 = arith.constant 0 : i32
    %c0_i32_0 = arith.constant 0 : i32
    %c0_i32_1 = arith.constant 0 : i32
    return %arg0, %c0_i32, %c0_i32_0 : i32, i32, i32
  }
  func.func @transform_53(%arg0: i32) -> (i32, i32, i32) {
    %c0_i32 = arith.constant 0 : i32
    %c0_i32_0 = arith.constant 0 : i32
    %c0_i32_1 = arith.constant 0 : i32
    return %arg0, %c0_i32, %c0_i32_0 : i32, i32, i32
  }
  func.func @transform_54(%arg0: i32) -> (i32, i32, i32) {
    %c0_i32 = arith.constant 0 : i32
    %c0_i32_0 = arith.constant 0 : i32
    %c0_i32_1 = arith.constant 0 : i32
    return %arg0, %c0_i32, %c0_i32_0 : i32, i32, i32
  }
  func.func @transform_55(%arg0: i32) -> (i32, i32, i32) {
    %c0_i32 = arith.constant 0 : i32
    %c0_i32_0 = arith.constant 0 : i32
    %c0_i32_1 = arith.constant 0 : i32
    return %arg0, %c0_i32, %c0_i32_0 : i32, i32, i32
  }
  func.func @transform_56(%arg0: i32) -> (i32, i32, i32) {
    %c0_i32 = arith.constant 0 : i32
    %c0_i32_0 = arith.constant 0 : i32
    %c0_i32_1 = arith.constant 0 : i32
    return %arg0, %c0_i32, %c0_i32_0 : i32, i32, i32
  }
  func.func @transform_57(%arg0: i32) -> (i32, i32, i32) {
    %c0_i32 = arith.constant 0 : i32
    %c0_i32_0 = arith.constant 0 : i32
    %c0_i32_1 = arith.constant 0 : i32
    return %arg0, %c0_i32, %c0_i32_0 : i32, i32, i32
  }
  func.func @transform_58(%arg0: i32) -> (i32, i32, i32) {
    %c0_i32 = arith.constant 0 : i32
    %c0_i32_0 = arith.constant 0 : i32
    %c0_i32_1 = arith.constant 0 : i32
    return %arg0, %c0_i32, %c0_i32_0 : i32, i32, i32
  }
  func.func @transform_59(%arg0: i32) -> (i32, i32, i32) {
    %c0_i32 = arith.constant 0 : i32
    %c0_i32_0 = arith.constant 0 : i32
    %c0_i32_1 = arith.constant 0 : i32
    return %arg0, %c0_i32, %c0_i32_0 : i32, i32, i32
  }
  func.func @transform_60(%arg0: i32) -> (i32, i32, i32) {
    %c0_i32 = arith.constant 0 : i32
    %c0_i32_0 = arith.constant 0 : i32
    %c0_i32_1 = arith.constant 0 : i32
    return %arg0, %c0_i32, %c0_i32_0 : i32, i32, i32
  }
  func.func @transform_61(%arg0: i32) -> (i32, i32, i32) {
    %c0_i32 = arith.constant 0 : i32
    %c0_i32_0 = arith.constant 0 : i32
    %c0_i32_1 = arith.constant 0 : i32
    return %arg0, %c0_i32, %c0_i32_0 : i32, i32, i32
  }
  func.func @transform_62(%arg0: i32) -> (i32, i32, i32) {
    %c0_i32 = arith.constant 0 : i32
    %c0_i32_0 = arith.constant 0 : i32
    %c0_i32_1 = arith.constant 0 : i32
    return %arg0, %c0_i32, %c0_i32_0 : i32, i32, i32
  }
  func.func @transform_63(%arg0: i32) -> (i32, i32, i32) {
    %c0_i32 = arith.constant 0 : i32
    %c0_i32_0 = arith.constant 0 : i32
    %c0_i32_1 = arith.constant 0 : i32
    return %arg0, %c0_i32, %c0_i32_0 : i32, i32, i32
  }
  func.func @transform_64(%arg0: i32) -> (i32, i32, i32) {
    %c0_i32 = arith.constant 0 : i32
    %c0_i32_0 = arith.constant 0 : i32
    %c0_i32_1 = arith.constant 0 : i32
    return %arg0, %c0_i32, %c0_i32_0 : i32, i32, i32
  }
  func.func @transform_65(%arg0: i32) -> (i32, i32, i32) {
    %c0_i32 = arith.constant 0 : i32
    %c0_i32_0 = arith.constant 0 : i32
    %c0_i32_1 = arith.constant 0 : i32
    return %arg0, %c0_i32, %c0_i32_0 : i32, i32, i32
  }
  func.func @transform_66(%arg0: i32) -> (i32, i32, i32) {
    %c0_i32 = arith.constant 0 : i32
    %c0_i32_0 = arith.constant 0 : i32
    %c0_i32_1 = arith.constant 0 : i32
    return %arg0, %c0_i32, %c0_i32_0 : i32, i32, i32
  }
  func.func @transform_67(%arg0: i32) -> (i32, i32, i32) {
    %c0_i32 = arith.constant 0 : i32
    %c0_i32_0 = arith.constant 0 : i32
    %c0_i32_1 = arith.constant 0 : i32
    return %arg0, %c0_i32, %c0_i32_0 : i32, i32, i32
  }
  func.func @transform_68(%arg0: i32) -> (i32, i32, i32) {
    %c0_i32 = arith.constant 0 : i32
    %c0_i32_0 = arith.constant 0 : i32
    %c0_i32_1 = arith.constant 0 : i32
    return %arg0, %c0_i32, %c0_i32_0 : i32, i32, i32
  }
  func.func @transform_69(%arg0: i32) -> (i32, i32, i32) {
    %c0_i32 = arith.constant 0 : i32
    %c0_i32_0 = arith.constant 0 : i32
    %c0_i32_1 = arith.constant 0 : i32
    return %arg0, %c0_i32, %c0_i32_0 : i32, i32, i32
  }
  func.func @transform_70(%arg0: i32) -> (i32, i32, i32) {
    %c0_i32 = arith.constant 0 : i32
    %c0_i32_0 = arith.constant 0 : i32
    %c0_i32_1 = arith.constant 0 : i32
    return %arg0, %c0_i32, %c0_i32_0 : i32, i32, i32
  }
  func.func @transform_71(%arg0: i32) -> (i32, i32, i32) {
    %c0_i32 = arith.constant 0 : i32
    %c0_i32_0 = arith.constant 0 : i32
    %c0_i32_1 = arith.constant 0 : i32
    return %arg0, %c0_i32, %c0_i32_0 : i32, i32, i32
  }
  func.func @transform_72(%arg0: i32) -> (i32, i32, i32) {
    %c0_i32 = arith.constant 0 : i32
    %c0_i32_0 = arith.constant 0 : i32
    %c0_i32_1 = arith.constant 0 : i32
    return %arg0, %c0_i32, %c0_i32_0 : i32, i32, i32
  }
  func.func @transform_73(%arg0: i32) -> (i32, i32, i32) {
    %c0_i32 = arith.constant 0 : i32
    %c0_i32_0 = arith.constant 0 : i32
    %c0_i32_1 = arith.constant 0 : i32
    return %arg0, %c0_i32, %c0_i32_0 : i32, i32, i32
  }
  func.func @transform_74(%arg0: i32) -> (i32, i32, i32) {
    %c0_i32 = arith.constant 0 : i32
    %c0_i32_0 = arith.constant 0 : i32
    %c0_i32_1 = arith.constant 0 : i32
    return %arg0, %c0_i32, %c0_i32_0 : i32, i32, i32
  }
  func.func @transform_75(%arg0: i32) -> (i32, i32, i32) {
    %c0_i32 = arith.constant 0 : i32
    %c0_i32_0 = arith.constant 0 : i32
    %c0_i32_1 = arith.constant 0 : i32
    return %arg0, %c0_i32, %c0_i32_0 : i32, i32, i32
  }
  func.func @transform_76(%arg0: i32) -> (i32, i32, i32) {
    %c0_i32 = arith.constant 0 : i32
    %c0_i32_0 = arith.constant 0 : i32
    %c0_i32_1 = arith.constant 0 : i32
    return %arg0, %c0_i32, %c0_i32_0 : i32, i32, i32
  }
  func.func @transform_77(%arg0: i32) -> (i32, i32, i32) {
    %c0_i32 = arith.constant 0 : i32
    %c0_i32_0 = arith.constant 0 : i32
    %c0_i32_1 = arith.constant 0 : i32
    return %arg0, %c0_i32, %c0_i32_0 : i32, i32, i32
  }
  func.func @transform_78(%arg0: i32) -> (i32, i32, i32) {
    %c0_i32 = arith.constant 0 : i32
    %c0_i32_0 = arith.constant 0 : i32
    %c0_i32_1 = arith.constant 0 : i32
    return %arg0, %c0_i32, %c0_i32_0 : i32, i32, i32
  }
  func.func @transform_79(%arg0: i32) -> (i32, i32, i32) {
    %c0_i32 = arith.constant 0 : i32
    %c0_i32_0 = arith.constant 0 : i32
    %c0_i32_1 = arith.constant 0 : i32
    return %arg0, %c0_i32, %c0_i32_0 : i32, i32, i32
  }
  func.func @transform_80(%arg0: i32) -> (i32, i32, i32) {
    %c0_i32 = arith.constant 0 : i32
    %c0_i32_0 = arith.constant 0 : i32
    %c0_i32_1 = arith.constant 0 : i32
    return %arg0, %c0_i32, %c0_i32_0 : i32, i32, i32
  }
  func.func @transform_81(%arg0: i32) -> (i32, i32, i32) {
    %c0_i32 = arith.constant 0 : i32
    %c0_i32_0 = arith.constant 0 : i32
    %c0_i32_1 = arith.constant 0 : i32
    return %arg0, %c0_i32, %c0_i32_0 : i32, i32, i32
  }
  func.func @transform_82(%arg0: i32) -> (i32, i32, i32) {
    %c0_i32 = arith.constant 0 : i32
    %c0_i32_0 = arith.constant 0 : i32
    %c0_i32_1 = arith.constant 0 : i32
    return %arg0, %c0_i32, %c0_i32_0 : i32, i32, i32
  }
  func.func @transform_83(%arg0: i32) -> (i32, i32, i32) {
    %c0_i32 = arith.constant 0 : i32
    %c0_i32_0 = arith.constant 0 : i32
    %c0_i32_1 = arith.constant 0 : i32
    return %arg0, %c0_i32, %c0_i32_0 : i32, i32, i32
  }
  func.func @transform_84(%arg0: i32) -> (i32, i32, i32) {
    %c0_i32 = arith.constant 0 : i32
    %c0_i32_0 = arith.constant 0 : i32
    %c0_i32_1 = arith.constant 0 : i32
    return %arg0, %c0_i32, %c0_i32_0 : i32, i32, i32
  }
  func.func @transform_85(%arg0: i32) -> (i32, i32, i32) {
    %c0_i32 = arith.constant 0 : i32
    %c0_i32_0 = arith.constant 0 : i32
    %c0_i32_1 = arith.constant 0 : i32
    return %arg0, %c0_i32, %c0_i32_0 : i32, i32, i32
  }
  func.func @transform_86(%arg0: i32) -> (i32, i32, i32) {
    %c0_i32 = arith.constant 0 : i32
    %c0_i32_0 = arith.constant 0 : i32
    %c0_i32_1 = arith.constant 0 : i32
    return %arg0, %c0_i32, %c0_i32_0 : i32, i32, i32
  }
  func.func @transform_87(%arg0: i32) -> (i32, i32, i32) {
    %c0_i32 = arith.constant 0 : i32
    %c0_i32_0 = arith.constant 0 : i32
    %c0_i32_1 = arith.constant 0 : i32
    return %arg0, %c0_i32, %c0_i32_0 : i32, i32, i32
  }
  func.func @transform_88(%arg0: i32) -> (i32, i32, i32) {
    %c0_i32 = arith.constant 0 : i32
    %c0_i32_0 = arith.constant 0 : i32
    %c0_i32_1 = arith.constant 0 : i32
    return %arg0, %c0_i32, %c0_i32_0 : i32, i32, i32
  }
  func.func @transform_89(%arg0: i32) -> (i32, i32, i32) {
    %c0_i32 = arith.constant 0 : i32
    %c0_i32_0 = arith.constant 0 : i32
    %c0_i32_1 = arith.constant 0 : i32
    return %arg0, %c0_i32, %c0_i32_0 : i32, i32, i32
  }
  func.func @transform_90(%arg0: i32) -> (i32, i32, i32) {
    %c0_i32 = arith.constant 0 : i32
    %c0_i32_0 = arith.constant 0 : i32
    %c0_i32_1 = arith.constant 0 : i32
    return %arg0, %c0_i32, %c0_i32_0 : i32, i32, i32
  }
  func.func @transform_91(%arg0: i32) -> (i32, i32, i32) {
    %c0_i32 = arith.constant 0 : i32
    %c0_i32_0 = arith.constant 0 : i32
    %c0_i32_1 = arith.constant 0 : i32
    return %arg0, %c0_i32, %c0_i32_0 : i32, i32, i32
  }
  func.func @transform_92(%arg0: i32) -> (i32, i32, i32) {
    %c0_i32 = arith.constant 0 : i32
    %c0_i32_0 = arith.constant 0 : i32
    %c0_i32_1 = arith.constant 0 : i32
    return %arg0, %c0_i32, %c0_i32_0 : i32, i32, i32
  }
  func.func @transform_93(%arg0: i32) -> (i32, i32, i32) {
    %c0_i32 = arith.constant 0 : i32
    %c0_i32_0 = arith.constant 0 : i32
    %c0_i32_1 = arith.constant 0 : i32
    return %arg0, %c0_i32, %c0_i32_0 : i32, i32, i32
  }
  func.func @transform_94(%arg0: i32) -> (i32, i32, i32) {
    %c0_i32 = arith.constant 0 : i32
    %c0_i32_0 = arith.constant 0 : i32
    %c0_i32_1 = arith.constant 0 : i32
    return %arg0, %c0_i32, %c0_i32_0 : i32, i32, i32
  }
  func.func @transform_95(%arg0: i32) -> (i32, i32, i32) {
    %c0_i32 = arith.constant 0 : i32
    %c0_i32_0 = arith.constant 0 : i32
    %c0_i32_1 = arith.constant 0 : i32
    return %arg0, %c0_i32, %c0_i32_0 : i32, i32, i32
  }
  func.func @transform_96(%arg0: i32) -> (i32, i32, i32) {
    %c0_i32 = arith.constant 0 : i32
    %c0_i32_0 = arith.constant 0 : i32
    %c0_i32_1 = arith.constant 0 : i32
    return %arg0, %c0_i32, %c0_i32_0 : i32, i32, i32
  }
  func.func @transform_97(%arg0: i32) -> (i32, i32) {
    %c0_i32 = arith.constant 0 : i32
    %c0_i32_0 = arith.constant 0 : i32
    %c0_i32_1 = arith.constant 0 : i32
    return %c0_i32, %c0_i32_0 : i32, i32
  }
}

</mosaic_0001>

<bundles_post_ra>
// kernel: gvp_encoder_forward.1
= control target key start
LH: loop header
LB: loop body
LE: loop exit
PB: predicated region body
PF: predicated region fallthrough
CT: control target
= control target key end

     0   :  { %s10639_s6 = smov 1   ;;  %s10640_s10 = smov 2   ;;  %s12501_s0 = inlined_call_operand.smem [shape: u32[98], index: -1, kind: input, shape index: {}] }
   0x1   :  { %s10772_s5 = sld [smem:[%s12501_s0]]   ;;  %s10641_s14 = smov 3  }
   0x2   :  { %s10777_s9 = sld [smem:[%s12501_s0 + %s10639_s6]]   ;;  %s10642_s18 = smov 4  }
   0x3   :  { %s10782_s13 = sld [smem:[%s12501_s0 + %s10640_s10]]   ;;  %s10643_s22 = smov 5  }
   0x4   :  { %s10787_s17 = sld [smem:[%s12501_s0 + %s10641_s14]]   ;;  %s10644_s26 = smov 6  }
   0x5   :  { %s10792_s21 = sld [smem:[%s12501_s0 + %s10642_s18]]   ;;  %s10645_s30 = smov 7  }
   0x6   :  { %s10797_s25 = sld [smem:[%s12501_s0 + %s10643_s22]]   ;;  %s10646_s4 = smov 8  }
   0x7   :  { %12610 = sst [smem:[#allocation77_spill]] %s10772_s5  ;;  %s10647_s10 = smov 9  }
   0x8   :  { %12611 = sst [smem:[#allocation78_spill]] %s10777_s9  ;;  %s10648_s15 = smov 10  }
   0x9   :  { %12612 = sst [smem:[#allocation79_spill]] %s10782_s13  ;;  %s10649_s20 = smov 11  }
   0xa   :  { %s10802_s29 = sld [smem:[%s12501_s0 + %s10644_s26]]   ;;  %s10650_s26 = smov 12   ;;  %v200_v0 = vstv %s10787_s17 }
   0xb   :  { %12613 = sst [smem:[#allocation80_spill]] %s10792_s21  ;;  %s10651_s1 = smov 13   ;;  %201 = vst [vmem:[#allocation6] sm:$0x1] %v200_v0 }
   0xc   :  { %12614 = sst [smem:[#allocation81_spill]] %s10797_s25  ;;  %s10652_s7 = smov 14  }
   0xd   :  { %s10807_s3 = sld [smem:[%s12501_s0 + %s10645_s30]]   ;;  %s10654_s22 = smov 16  }
   0xe   :  { %s10812_s8 = sld [smem:[%s12501_s0 + %s10646_s4]]   ;;  %s10655_s28 = smov 17  }
   0xf   :  { %s10817_s14 = sld [smem:[%s12501_s0 + %s10647_s10]]   ;;  %s10706_s17 = smov 68  }
  0x10   :  { %12615 = sst [smem:[#allocation82_spill]] %s10802_s29 }
  0x11   :  { %s10822_s19 = sld [smem:[%s12501_s0 + %s10648_s15]]   ;;  %s10653_s15 = smov 15  }
  0x12   :  { %s10827_s24 = sld [smem:[%s12501_s0 + %s10649_s20]]  }
  0x13   :  { %12616 = sst [smem:[#allocation83_spill]] %s10807_s3 }
  0x14   :  { %12617 = sst [smem:[#allocation84_spill]] %s10812_s8 }
  0x15   :  { %12618 = sst [smem:[#allocation85_spill]] %s10817_s14 }
  0x16   :  { %s10832_s30 = sld [smem:[%s12501_s0 + %s10650_s26]]  }
  0x17   :  { %12619 = sst [smem:[#allocation86_spill]] %s10822_s19 }
  0x18   :  { %12620 = sst [smem:[#allocation87_spill]] %s10827_s24 }
  0x19   :  { %s10837_s6 = sld [smem:[%s12501_s0 + %s10651_s1]]  }
  0x1a   :  { %s10842_s12 = sld [smem:[%s12501_s0 + %s10652_s7]]   ;;  %s10656_s7 = smov 18  }
  0x1b   :  { %s10847_s20 = sld [smem:[%s12501_s0 + %s10653_s15]]   ;;  %s10657_s15 = smov 19  }
  0x1c   :  { %12621 = sst [smem:[#allocation88_spill]] %s10832_s30 }
  0x1d   :  { %s10852_s27 = sld [smem:[%s12501_s0 + %s10654_s22]]   ;;  %s10658_s22 = smov 20  }
  0x1e   :  { %s10857_s4 = sld [smem:[%s12501_s0 + %s10655_s28]]   ;;  %s10659_s28 = smov 21  }
  0x1f   :  { %12622 = sst [smem:[#allocation89_spill]] %s10837_s6 }
  0x20   :  { %12623 = sst [smem:[#allocation90_spill]] %s10842_s12 }
  0x21   :  { %12624 = sst [smem:[#allocation91_spill]] %s10847_s20 }
  0x22   :  { %s10862_s19 = sld [smem:[%s12501_s0 + %s10656_s7]]   ;;  %s10660_s7 = smov 22  }
  0x23   :  { %12625 = sst [smem:[#allocation92_spill]] %s10852_s27 }
  0x24   :  { %12626 = sst [smem:[#allocation93_spill]] %s10857_s4 }
  0x25   :  { %s10867_s8 = sld [smem:[%s12501_s0 + %s10657_s15]]   ;;  %s10661_s15 = smov 23  }
  0x26   :  { %s10872_s9 = sld [smem:[%s12501_s0 + %s10658_s22]]   ;;  %s10662_s22 = smov 24  }
  0x27   :  { %s10877_s21 = sld [smem:[%s12501_s0 + %s10659_s28]]   ;;  %s10663_s28 = smov 25  }
  0x28   :  { %12627 = sst [smem:[#allocation94_spill]] %s10862_s19 }
  0x29   :  { %s10882_s6 = sld [smem:[%s12501_s0 + %s10660_s7]]   ;;  %s10664_s7 = smov 26  }
  0x2a   :  { %s10897_s27 = sld [smem:[%s12501_s0 + %s10663_s28]]   ;;  %s10667_s28 = smov 29  }
  0x2b   :  { %12628 = sst [smem:[#allocation95_spill]] %s10867_s8 }
  0x2c   :  { %12629 = sst [smem:[#allocation96_spill]] %s10872_s9 }
  0x2d   :  { %12630 = sst [smem:[#allocation97_spill]] %s10877_s21 }
  0x2e   :  { %s10887_s8 = sld [smem:[%s12501_s0 + %s10661_s15]]   ;;  %s10665_s15 = smov 27  }
  0x2f   :  { %12631 = sst [smem:[#allocation98_spill]] %s10882_s6 }
  0x30   :  { %s10892_s9 = sld [smem:[%s12501_s0 + %s10662_s22]]   ;;  %s10666_s22 = smov 28  }
  0x31   :  { %12634 = sst [smem:[#allocation101_spill]] %s10897_s27 }
  0x32   :  { %s10902_s6 = sld [smem:[%s12501_s0 + %s10664_s7]]   ;;  %s10668_s7 = smov 30  }
  0x33   :  { %s10917_s27 = sld [smem:[%s12501_s0 + %s10667_s28]]   ;;  %s10671_s28 = smov 33  }
  0x34   :  { %12632 = sst [smem:[#allocation99_spill]] %s10887_s8 }
  0x35   :  { %s10907_s8 = sld [smem:[%s12501_s0 + %s10665_s15]]   ;;  %s10669_s15 = smov 31  }
  0x36   :  { %12633 = sst [smem:[#allocation100_spill]] %s10892_s9 }
  0x37   :  { %s10912_s9 = sld [smem:[%s12501_s0 + %s10666_s22]]   ;;  %s10670_s22 = smov 32  }
  0x38   :  { %12635 = sst [smem:[#allocation102_spill]] %s10902_s6 }
  0x39   :  { %12638 = sst [smem:[#allocation105_spill]] %s10917_s27 }
  0x3a   :  { %s10922_s6 = sld [smem:[%s12501_s0 + %s10668_s7]]   ;;  %s10672_s7 = smov 34  }
  0x3b   :  { %12636 = sst [smem:[#allocation103_spill]] %s10907_s8 }
  0x3c   :  { %s10927_s8 = sld [smem:[%s12501_s0 + %s10669_s15]]   ;;  %s10673_s15 = smov 35  }
  0x3d   :  { %12637 = sst [smem:[#allocation104_spill]] %s10912_s9 }
  0x3e   :  { %s10932_s21 = sld [smem:[%s12501_s0 + %s10670_s22]]   ;;  %s10674_s22 = smov 36  }
  0x3f   :  { %s10937_s27 = sld [smem:[%s12501_s0 + %s10671_s28]]   ;;  %s10675_s28 = smov 37  }
  0x40   :  { %12639 = sst [smem:[#allocation106_spill]] %s10922_s6 }
  0x41   :  { %s10942_s6 = sld [smem:[%s12501_s0 + %s10672_s7]]   ;;  %s10676_s7 = smov 38  }
  0x42   :  { %12640 = sst [smem:[#allocation107_spill]] %s10927_s8 }
  0x43   :  { %s10947_s8 = sld [smem:[%s12501_s0 + %s10673_s15]]   ;;  %s10677_s15 = smov 39  }
  0x44   :  { %12641 = sst [smem:[#allocation108_spill]] %s10932_s21 }
  0x45   :  { %12642 = sst [smem:[#allocation109_spill]] %s10937_s27 }
  0x46   :  { %s10952_s4 = sld [smem:[%s12501_s0 + %s10674_s22]]   ;;  %s10678_s22 = smov 40  }
  0x47   :  { %12643 = sst [smem:[#allocation110_spill]] %s10942_s6 }
  0x48   :  { %s10957_s27 = sld [smem:[%s12501_s0 + %s10675_s28]]   ;;  %s10679_s28 = smov 41  }
  0x49   :  { %12644 = sst [smem:[#allocation111_spill]] %s10947_s8 }
  0x4a   :  { %s10962_s6 = sld [smem:[%s12501_s0 + %s10676_s7]]   ;;  %s10680_s7 = smov 42  }
  0x4b   :  { %s10967_s8 = sld [smem:[%s12501_s0 + %s10677_s15]]   ;;  %s10681_s15 = smov 43  }
  0x4c   :  { %12645 = sst [smem:[#allocation112_spill]] %s10952_s4 }
  0x4d   :  { %s10972_s12 = sld [smem:[%s12501_s0 + %s10678_s22]]   ;;  %s10682_s22 = smov 44  }
  0x4e   :  { %12646 = sst [smem:[#allocation113_spill]] %s10957_s27 }
  0x4f   :  { %s10977_s27 = sld [smem:[%s12501_s0 + %s10679_s28]]   ;;  %s10683_s28 = smov 45  }
  0x50   :  { %12647 = sst [smem:[#allocation114_spill]] %s10962_s6 }
  0x51   :  { %12648 = sst [smem:[#allocation115_spill]] %s10967_s8 }
  0x52   :  { %s10982_s6 = sld [smem:[%s12501_s0 + %s10680_s7]]   ;;  %s10684_s7 = smov 46  }
  0x53   :  { %12649 = sst [smem:[#allocation116_spill]] %s10972_s12 }
  0x54   :  { %s10987_s8 = sld [smem:[%s12501_s0 + %s10681_s15]]   ;;  %s10685_s15 = smov 47  }
  0x55   :  { %12650 = sst [smem:[#allocation117_spill]] %s10977_s27 }
  0x56   :  { %s10992_s12 = sld [smem:[%s12501_s0 + %s10682_s22]]   ;;  %s10686_s22 = smov 48  }
  0x57   :  { %s10997_s27 = sld [smem:[%s12501_s0 + %s10683_s28]]   ;;  %s10687_s28 = smov 49  }
  0x58   :  { %12651 = sst [smem:[#allocation118_spill]] %s10982_s6 }
  0x59   :  { %s11002_s6 = sld [smem:[%s12501_s0 + %s10684_s7]]   ;;  %s10688_s7 = smov 50  }
  0x5a   :  { %12652 = sst [smem:[#allocation119_spill]] %s10987_s8 }
  0x5b   :  { %s11007_s8 = sld [smem:[%s12501_s0 + %s10685_s15]]   ;;  %s10689_s15 = smov 51  }
  0x5c   :  { %12653 = sst [smem:[#allocation120_spill]] %s10992_s12 }
  0x5d   :  { %12654 = sst [smem:[#allocation121_spill]] %s10997_s27 }
  0x5e   :  { %s11012_s12 = sld [smem:[%s12501_s0 + %s10686_s22]]   ;;  %s10690_s22 = smov 52  }
  0x5f   :  { %12655 = sst [smem:[#allocation122_spill]] %s11002_s6 }
  0x60   :  { %s11017_s27 = sld [smem:[%s12501_s0 + %s10687_s28]]   ;;  %s10691_s28 = smov 53  }
  0x61   :  { %12656 = sst [smem:[#allocation123_spill]] %s11007_s8 }
  0x62   :  { %s11022_s6 = sld [smem:[%s12501_s0 + %s10688_s7]]   ;;  %s10692_s7 = smov 54  }
  0x63   :  { %s11027_s8 = sld [smem:[%s12501_s0 + %s10689_s15]]   ;;  %s10693_s15 = smov 55  }
  0x64   :  { %12657 = sst [smem:[#allocation124_spill]] %s11012_s12 }
  0x65   :  { %s11032_s12 = sld [smem:[%s12501_s0 + %s10690_s22]]   ;;  %s10694_s22 = smov 56  }
  0x66   :  { %12658 = sst [smem:[#allocation125_spill]] %s11017_s27 }
  0x67   :  { %s11037_s27 = sld [smem:[%s12501_s0 + %s10691_s28]]   ;;  %s10695_s28 = smov 57  }
  0x68   :  { %12659 = sst [smem:[#allocation126_spill]] %s11022_s6 }
  0x69   :  { %12660 = sst [smem:[#allocation127_spill]] %s11027_s8 }
  0x6a   :  { %s11042_s6 = sld [smem:[%s12501_s0 + %s10692_s7]]   ;;  %s10696_s7 = smov 58  }
  0x6b   :  { %12661 = sst [smem:[#allocation128_spill]] %s11032_s12 }
  0x6c   :  { %s11047_s8 = sld [smem:[%s12501_s0 + %s10693_s15]]   ;;  %s10697_s15 = smov 59  }
  0x6d   :  { %12662 = sst [smem:[#allocation129_spill]] %s11037_s27 }
  0x6e   :  { %s11052_s12 = sld [smem:[%s12501_s0 + %s10694_s22]]   ;;  %s10698_s22 = smov 60  }
  0x6f   :  { %s11057_s10 = sld [smem:[%s12501_s0 + %s10695_s28]]   ;;  %s10699_s28 = smov 61  }
  0x70   :  { %12663 = sst [smem:[#allocation130_spill]] %s11042_s6  ;;  %s10700_s6 = smov 62  }
  0x71   :  { %s11062_s16 = sld [smem:[%s12501_s0 + %s10696_s7]]  }
  0x72   :  { %12664 = sst [smem:[#allocation131_spill]] %s11047_s8  ;;  %s10701_s8 = smov 63  }
  0x73   :  { %s11067_s23 = sld [smem:[%s12501_s0 + %s10697_s15]]   ;;  %s10705_s15 = smov 67  }
  0x74   :  { %12665 = sst [smem:[#allocation132_spill]] %s11052_s12  ;;  %s10702_s12 = smov 64  }
  0x75   :  { %12666 = sst [smem:[#allocation133_spill]] %s11057_s10  ;;  %s10703_s10 = smov 65  }
  0x76   :  { %s11072_s1 = sld [smem:[%s12501_s0 + %s10698_s22]]  }
  0x77   :  { %12667 = sst [smem:[#allocation134_spill]] %s11062_s16 }
  0x78   :  { %s11077_s27 = sld [smem:[%s12501_s0 + %s10699_s28]]  }
  0x79   :  { %12668 = sst [smem:[#allocation135_spill]] %s11067_s23 }
  0x7a   :  { %s11082_s16 = sld [smem:[%s12501_s0 + %s10700_s6]]   ;;  %s10704_s6 = smov 66  }
  0x7b   :  { %s11087_s23 = sld [smem:[%s12501_s0 + %s10701_s8]]  }
  0x7c   :  { %12669 = sst [smem:[#allocation136_spill]] %s11072_s1 }
  0x7d   :  { %s11092_s1 = sld [smem:[%s12501_s0 + %s10702_s12]]  }
  0x7e   :  { %12670 = sst [smem:[#allocation137_spill]] %s11077_s27  ;;  %s10708_s27 = smov 70  }
  0x7f   :  { %s11098_s7 = sld [smem:[%s12501_s0 + %s10703_s10]]   ;;  %s10707_s10 = smov 69  }
  0x80   :  { %12671 = sst [smem:[#allocation138_spill]] %s11082_s16 }
  0x81   :  { %12672 = sst [smem:[#allocation139_spill]] %s11087_s23  ;;  %s10709_s23 = smov 71  }
  0x82   :  { %s11103_s8 = sld [smem:[%s12501_s0 + %s10704_s6]]  }
  0x83   :  { %12673 = sst [smem:[#allocation140_spill]] %s11092_s1 }
  0x84   :  { %s11108_s12 = sld [smem:[%s12501_s0 + %s10705_s15]]  }
  0x85   :  { %12674 = sst [smem:[#allocation141_spill]] %s11098_s7  ;;  %s10711_s7 = smov 73  }
  0x86   :  { %s11113_s28 = sld [smem:[%s12501_s0 + %s10706_s17]]   ;;  %s10710_s17 = smov 72  }
  0x87   :  { %s11118_s1 = sld [smem:[%s12501_s0 + %s10707_s10]]  }
  0x88   :  { %12675 = sst [smem:[#allocation142_spill]] %s11103_s8 }
  0x89   :  { %s11123_s8 = sld [smem:[%s12501_s0 + %s10708_s27]]   ;;  %s10712_s27 = smov 74  }
  0x8a   :  { %12676 = sst [smem:[#allocation143_spill]] %s11108_s12 }
  0x8b   :  { %s11128_s12 = sld [smem:[%s12501_s0 + %s10709_s23]]   ;;  %s10713_s23 = smov 75  }
  0x8c   :  { %12677 = sst [smem:[#allocation144_spill]] %s11113_s28 }
  0x8d   :  { %12678 = sst [smem:[#allocation145_spill]] %s11118_s1 }
  0x8e   :  { %s11133_s28 = sld [smem:[%s12501_s0 + %s10710_s17]]   ;;  %s10714_s17 = smov 76  }
  0x8f   :  { %12679 = sst [smem:[#allocation146_spill]] %s11123_s8 }
  0x90   :  { %s11138_s1 = sld [smem:[%s12501_s0 + %s10711_s7]]   ;;  %s10715_s7 = smov 77  }
  0x91   :  { %12680 = sst [smem:[#allocation147_spill]] %s11128_s12 }
  0x92   :  { %s11143_s8 = sld [smem:[%s12501_s0 + %s10712_s27]]   ;;  %s10716_s27 = smov 78  }
  0x93   :  { %s11148_s12 = sld [smem:[%s12501_s0 + %s10713_s23]]   ;;  %s10717_s23 = smov 79  }
  0x94   :  { %12681 = sst [smem:[#allocation148_spill]] %s11133_s28 }
  0x95   :  { %s11153_s28 = sld [smem:[%s12501_s0 + %s10714_s17]]   ;;  %s10718_s17 = smov 80  }
  0x96   :  { %12682 = sst [smem:[#allocation149_spill]] %s11138_s1 }
  0x97   :  { %s11158_s1 = sld [smem:[%s12501_s0 + %s10715_s7]]   ;;  %s10719_s7 = smov 81  }
  0x98   :  { %12683 = sst [smem:[#allocation150_spill]] %s11143_s8 }
  0x99   :  { %12684 = sst [smem:[#allocation151_spill]] %s11148_s12 }
  0x9a   :  { %s11163_s8 = sld [smem:[%s12501_s0 + %s10716_s27]]   ;;  %s10720_s27 = smov 82  }
  0x9b   :  { %12685 = sst [smem:[#allocation152_spill]] %s11153_s28 }
  0x9c   :  { %s11168_s12 = sld [smem:[%s12501_s0 + %s10717_s23]]   ;;  %s10721_s23 = smov 83  }
  0x9d   :  { %12686 = sst [smem:[#allocation153_spill]] %s11158_s1 }
  0x9e   :  { %s11173_s28 = sld [smem:[%s12501_s0 + %s10718_s17]]   ;;  %s10722_s17 = smov 84  }
  0x9f   :  { %s11178_s1 = sld [smem:[%s12501_s0 + %s10719_s7]]   ;;  %s10723_s7 = smov 85  }
  0xa0   :  { %12687 = sst [smem:[#allocation154_spill]] %s11163_s8 }
  0xa1   :  { %s11183_s8 = sld [smem:[%s12501_s0 + %s10720_s27]]   ;;  %s10724_s27 = smov 86  }
  0xa2   :  { %12688 = sst [smem:[#allocation155_spill]] %s11168_s12 }
  0xa3   :  { %s11188_s12 = sld [smem:[%s12501_s0 + %s10721_s23]]   ;;  %s10725_s23 = smov 87  }
  0xa4   :  { %12689 = sst [smem:[#allocation156_spill]] %s11173_s28 }
  0xa5   :  { %12690 = sst [smem:[#allocation157_spill]] %s11178_s1 }
  0xa6   :  { %s11193_s28 = sld [smem:[%s12501_s0 + %s10722_s17]]   ;;  %s10726_s17 = smov 88  }
  0xa7   :  { %12691 = sst [smem:[#allocation158_spill]] %s11183_s8 }
  0xa8   :  { %s11198_s1 = sld [smem:[%s12501_s0 + %s10723_s7]]   ;;  %s10727_s7 = smov 89  }
  0xa9   :  { %12692 = sst [smem:[#allocation159_spill]] %s11188_s12 }
  0xaa   :  { %s11203_s8 = sld [smem:[%s12501_s0 + %s10724_s27]]   ;;  %s10728_s27 = smov 90  }
  0xab   :  { %s11208_s12 = sld [smem:[%s12501_s0 + %s10725_s23]]   ;;  %s10729_s23 = smov 91  }
  0xac   :  { %12693 = sst [smem:[#allocation160_spill]] %s11193_s28 }
  0xad   :  { %s11213_s28 = sld [smem:[%s12501_s0 + %s10726_s17]]   ;;  %s10730_s17 = smov 92  }
  0xae   :  { %12694 = sst [smem:[#allocation161_spill]] %s11198_s1 }
  0xaf   :  { %s11218_s1 = sld [smem:[%s12501_s0 + %s10727_s7]]   ;;  %s10731_s7 = smov 93  }
  0xb0   :  { %12695 = sst [smem:[#allocation162_spill]] %s11203_s8 }
  0xb1   :  { %12696 = sst [smem:[#allocation163_spill]] %s11208_s12 }
  0xb2   :  { %s11223_s8 = sld [smem:[%s12501_s0 + %s10728_s27]]   ;;  %s10732_s27 = smov 94  }
  0xb3   :  { %12697 = sst [smem:[#allocation164_spill]] %s11213_s28 }
  0xb4   :  { %s11228_s12 = sld [smem:[%s12501_s0 + %s10729_s23]]   ;;  %s10733_s23 = smov 95  }
  0xb5   :  { %12698 = sst [smem:[#allocation165_spill]] %s11218_s1 }
  0xb6   :  { %s11233_s28 = sld [smem:[%s12501_s0 + %s10730_s17]]   ;;  %s10734_s17 = smov 96  }
  0xb7   :  { %s11238_s1 = sld [smem:[%s12501_s0 + %s10731_s7]]   ;;  %s10735_s7 = smov 97  }
  0xb8   :  { %12699 = sst [smem:[#allocation166_spill]] %s11223_s8 }
  0xb9   :  { %s11243_s8 = sld [smem:[%s12501_s0 + %s10732_s27]]  }
  0xba   :  { %12700 = sst [smem:[#allocation167_spill]] %s11228_s12 }
  0xbb   :  { %s11248_s12 = sld [smem:[%s12501_s0 + %s10733_s23]]  }
  0xbc   :  { %12701 = sst [smem:[#allocation168_spill]] %s11233_s28 }
  0xbd   :  { %12702 = sst [smem:[#allocation169_spill]] %s11238_s1 }
  0xbe   :  { %s11253_s28 = sld [smem:[%s12501_s0 + %s10734_s17]]  }
  0xbf   :  { %12703 = sst [smem:[#allocation170_spill]] %s11243_s8 }
  0xc0   :  { %s11258_s1 = sld [smem:[%s12501_s0 + %s10735_s7]]  }
  0xc1   :  { %12704 = sst [smem:[#allocation171_spill]] %s11248_s12 }
  0xc4   :  { %12705 = sst [smem:[#allocation172_spill]] %s11253_s28 }
  0xc6   :  { %12706 = sst [smem:[#allocation173_spill]] %s11258_s1 }
  0xc7   :  { %202 = vsyncpa [#allocation8], 0 }
  0xc8   :  { %203 = vsyncpa [#allocation11], 0 }
  0xc9   :  { %204 = vsyncpa [#allocation14], 0 }
  0xca   :  { %205 = vsyncpa [#allocation17], 0 }
  0xcb   :  { %206 = vsyncpa [#allocation20], 0 }
  0xcc   :  { %207 = vsyncpa [#allocation23], 0 }
  0xcd   :  { %208 = vsyncpa [#allocation26], 0 }
  0xce   :  { %209 = vsyncpa [#allocation29], 0 }
  0xcf   :  { %210 = vsyncpa [#allocation32], 0 }
  0xd0   :  { %211 = vsyncpa [#allocation35], 0 }
  0xd1   :  { %212 = vsyncpa [#allocation38], 0 }
  0xd2   :  { %214 = vsyncpa [#allocation38 + $0x1], 0 }
  0xd3   :  { %215 = vsyncpa [#allocation41], 0 }
  0xd4   :  { %217 = vsyncpa [#allocation41 + $0x1], 0 }
  0xd5   :  { %218 = vsyncpa [#allocation44], 0 }
  0xd6   :  { %220 = vsyncpa [#allocation44 + $0x1], 0 }
  0xd7   :  { %221 = vsyncpa [#allocation47], 0 }
  0xd8   :  { %223 = vsyncpa [#allocation47 + $0x1], 0 }
  0xd9   :  { %224 = vsyncpa [#allocation50], 0 }
  0xda   :  { %226 = vsyncpa [#allocation50 + $0x1], 0 }
  0xdb   :  { %227 = vsyncpa [#allocation53], 0 }
  0xdc   :  { %229 = vsyncpa [#allocation53 + $0x1], 0 }
  0xdd   :  { %230 = vsyncpa [#allocation56], 0 }
  0xde   :  { %232 = vsyncpa [#allocation56 + $0x1], 0 }
  0xdf   :  { %233 = vsyncpa [#allocation9], 0  ;;  %s11260_s0 = smov 0   ;;  %s11262_s27 = smov 0  }
  0xe0   :  { %s11264_s6 = smov 0   ;;  %s11266_s11 = smov 0  }
  0xe1 LB: > { %s12707_s30 = sld [smem:[#allocation88_spill]]  ;;  %s11279_s23 = sadd.s32 4294967295, %s10637_s11   ;;  %s10637_s11 = sphi %s11266_s11, %s12908_s11   ;;  %s10633_s6 = sphi %s11264_s6, %s12911_s6   ;;  %s10629_s27 = sphi %s11262_s27, %s12910_s27   ;;  %s10625_s0 = sphi %s11260_s0, %s12909_s0  }
  0xe2   : > { %s12708_s29 = sld [smem:[#allocation82_spill]]  ;;  %s11282_s15 = sadd.s32 1, %s10637_s11  }
  0xe3   : > { %s12709_s28 = sld [smem:[#allocation172_spill]]  ;;  %s1177_s18 = ssub.s32 %s10637_s11, %s11282_s15 }
  0xe4   : > { %s12710_s25 = sld [smem:[#allocation81_spill]]  ;;  %s1180_s17 = sadd.s32 1, %s10633_s6 }
  0xe5   : > { %s12711_s24 = sld [smem:[#allocation87_spill]]  ;;  %p1178_p0 = scmp.eq.s32.totalorder %s1177_s18, 0 }
  0xe6   : > { %s12712_s21 = sld [smem:[#allocation108_spill]]  ;;  %p1187_p1 = scmp.ne.s32.totalorder %s10633_s6, %s10629_s27 }
  0xe7   : > { %s12713_s20 = sld [smem:[#allocation91_spill]]  ;;  %p1188_p2 = scmp.eq.s32.totalorder %s10637_s11, 0 }
  0xe8   : > { %s12714_s19 = sld [smem:[#allocation94_spill]]  ;;  %p1193_p3 = scmp.ne.s32.totalorder %s10629_s27, %s10625_s0 }
  0xe9   : > { %s12715_s16 = sld [smem:[#allocation138_spill]]  ;;  %p11294_p4 = por %p1188_p2, %p1187_p1 }
  0xea   : > { %s12716_s14 = sld [smem:[#allocation85_spill]]  ;;  %p1194_p5 = scmp.eq.s32.totalorder %s11279_s23, 0 }
  0xeb   : > { %s12717_s13 = sld [smem:[#allocation79_spill]]  ;;  %p8690_p6 = scmp.ge.s32.totalorder %s10637_s11, 1 }
  0xec   : > { %s12718_s12 = sld [smem:[#allocation171_spill]]  ;;  %p2577_p7 = scmp.lt.s32.totalorder %s10637_s11, 4 }
  0xed   : > { %s12719_s9 = sld [smem:[#allocation104_spill]]  ;;  %p11303_p8 = por %p1194_p5, %p1193_p3 }
  0xee   : > { %s12720_s5 = sld [smem:[#allocation77_spill]]  ;;  %p11308_p10 = pnand %p8690_p6, %p2577_p7 }
  0xef   : > { %s12721_s4 = sld [smem:[#allocation112_spill]]  ;;  %s10736_s0 = smov [#allocation10]  }
  0xf0   : > { %s12722_s3 = sld [smem:[#allocation83_spill]]  ;;  %p9127_p11 = pneg %p11308_p10 }
  0xf1   : > { %12723 = sst [smem:[#allocation174_spill]] %s10629_s27  ;;  %s2604_s2 = sshll.u32 %s12717_s13, 4  ;;  %s2605_s2 = int_to_ptr.hbm [resolvable:$true] %s2604_s2 }
  0xf2   : > { %12724 = sst [smem:[#allocation175_spill]] %s10633_s6  ;;  %s2606_s18 = sshll.u32 %s10736_s0, 4  ;;  %s2607_s18 = int_to_ptr.vmem [resolvable:$true] %s2606_s18 }
  0xf3   : > { %12725 = sst [smem:[#allocation176_spill]] %s11279_s23  ;;  %p11318_p12 = pnand %p9127_p11, %p1194_p5 }
  0xf4   : > { %12726 = sst [smem:[#allocation177_spill]] %s11282_s15  ;;  %s2661_s15 = sshll.u32 %s12716_s14, 4  ;;  %s11340_s15 = int_to_ptr.hbm [resolvable:$true] %s2661_s15 }
  0xf5   : > { %s11292_s22 = scalar_select %p1178_p0, %s10633_s6, %s1180_s17  }
  0xf6   : > { %s12729_s7 = scalar_select %p11303_p8, 1, 0 }
  0xf7   : > { %12727 = sst [smem:[#allocation178_spill]] %s11292_s22  ;;  %s2634_s17 = sshll.u32 %s12708_s29, 4  ;;  %s11322_s17 = int_to_ptr.hbm [resolvable:$true] %s2634_s17 }
  0xf8   : > { %12730 = sst [smem:[#allocation179_spill]] %s12729_s7  ;;  %s10737_s1 = smov [#allocation13]  }
  0xf9   : > { %s12731_s10 = scalar_select %p11308_p10, 1, 0 }
  0xfa   : > { %s11325_s8 = sshll.u32 %s10737_s1, 4  ;;  %s9545_s7 = sshra.s32 %s2605_s2, 4  ;;  %s9546_s7 = int_to_ptr.hbm [resolvable:$true] %s9545_s7  ;;  %s2637_s8 = int_to_ptr.vmem [resolvable:$true] %s11325_s8 }
  0xfb   : > { %12732 = sst [smem:[#allocation180_spill]] %s12731_s10  ;;  %s9547_s27 = scalar_lea.hbm %s9546_s7, 1 }
  0xfc   : > { %p9548_p13 = scmp.ne.s32.totalorder %s9546_s7, %s9547_s27  ;;  %p11329_p0 = pneg %p11318_p12 }
  0xfd   : > { %s9552_s23 = scalar_lea.hbm %s12717_s13, 1  ;;  %p9553_p3 = scmp.lt.s32.totalorder %s9546_s7, %s12717_s13 }
  0xfe   : > { %p9550_p1 = pnand %p11329_p0, %p9548_p13  ;;  %p9554_p6 = scmp.lt.s32.totalorder %s9552_s23, %s9547_s27 }
 0x100   : > { %p9551_p2 = pneg %p9550_p1  ;;  %p9555_p7 = por %p9554_p6, %p9553_p3 }
 0x102   : > { %p9556_p11 = pnand %p9555_p7, %p9551_p2 }
 0x104   : > { %9559 = shalt.err (!%p9556_p11)
}
 0x105   : > { %9133 = dma.hbm_to_vmem [thread:$0]  (!%p11318_p12), %s2605_s2, 16, %s2607_s18, [#allocation11]  }
 0x106   : > { %s9575_s1 = sshra.s32 %s11322_s17, 4  ;;  %s9582_s27 = scalar_lea.hbm %s12708_s29, 1  ;;  %s9576_s1 = int_to_ptr.hbm [resolvable:$true] %s9575_s1 }
 0x107   : > { %s9577_s10 = scalar_lea.hbm %s9576_s1, 1  ;;  %p9583_p2 = scmp.lt.s32.totalorder %s9576_s1, %s12708_s29 }
 0x108   : > { %p9578_p13 = scmp.ne.s32.totalorder %s9576_s1, %s9577_s10  ;;  %p9584_p6 = scmp.lt.s32.totalorder %s9582_s27, %s9577_s10 }
 0x10a   : > { %p9580_p1 = pnand %p9578_p13, %p11329_p0  ;;  %p9585_p7 = por %p9584_p6, %p9583_p2 }
 0x10c   : > { %p9581_p3 = pneg %p9580_p1 }
 0x10e   : > { %p9586_p11 = pnand %p9585_p7, %p9581_p3 }
 0x110   : > { %9589 = shalt.err (!%p9586_p11)
}
 0x111   : > { %9139 = dma.hbm_to_vmem [thread:$0]  (!%p11318_p12), %s11322_s17, 16, %s2637_s8, [#allocation14]  }
 0x112   : > { %s2688_s23 = sshll.u32 %s12707_s30, 4  ;;  %s10738_s7 = smov [#allocation16]   ;;  %s11351_s23 = int_to_ptr.hbm [resolvable:$true] %s2688_s23 }
 0x113   : > { %s2663_s2 = sshll.u32 %s10738_s7, 4  ;;  %s9605_s18 = sshra.s32 %s11340_s15, 4  ;;  %s2664_s2 = int_to_ptr.vmem [resolvable:$true] %s2663_s2  ;;  %s9606_s18 = int_to_ptr.hbm [resolvable:$true] %s9605_s18 }
 0x114   : > { %s9607_s10 = scalar_lea.hbm %s9606_s18, 1  ;;  %s9612_s1 = scalar_lea.hbm %s12716_s14, 1 }
 0x115   : > { %p9608_p13 = scmp.ne.s32.totalorder %s9606_s18, %s9607_s10  ;;  %p9613_p2 = scmp.lt.s32.totalorder %s9606_s18, %s12716_s14 }
 0x116   : > { %p9614_p6 = scmp.lt.s32.totalorder %s9612_s1, %s9607_s10 }
 0x117   : > { %p9610_p1 = pnand %p9608_p13, %p11329_p0 }
 0x118   : > { %p9615_p7 = por %p9614_p6, %p9613_p2 }
 0x119   : > { %p9611_p3 = pneg %p9610_p1 }
 0x11b   : > { %p9616_p11 = pnand %p9615_p7, %p9611_p3 }
 0x11d   : > { %9619 = shalt.err (!%p9616_p11)
}
 0x11e   : > { %9145 = dma.hbm_to_vmem [thread:$0]  (!%p11318_p12), %s11340_s15, 16, %s2664_s2, [#allocation17]  }
 0x11f   : > { %s10739_s8 = smov [#allocation19]   ;;  %s2715_s27 = sshll.u32 %s12713_s20, 4  ;;  %s11362_s27 = int_to_ptr.hbm [resolvable:$true] %s2715_s27 }
 0x120   : > { %s2690_s17 = sshll.u32 %s10739_s8, 4  ;;  %s9635_s7 = sshra.s32 %s11351_s23, 4  ;;  %s2691_s17 = int_to_ptr.vmem [resolvable:$true] %s2690_s17  ;;  %s9636_s7 = int_to_ptr.hbm [resolvable:$true] %s9635_s7 }
 0x121   : > { %s9637_s18 = scalar_lea.hbm %s9636_s7, 4  ;;  %s9642_s10 = scalar_lea.hbm %s12707_s30, 4 }
 0x122   : > { %p9638_p13 = scmp.ne.s32.totalorder %s9636_s7, %s9637_s18  ;;  %p9643_p2 = scmp.lt.s32.totalorder %s9636_s7, %s12707_s30 }
 0x123   : > { %p9644_p6 = scmp.lt.s32.totalorder %s9642_s10, %s9637_s18 }
 0x124   : > { %p9640_p1 = pnand %p9638_p13, %p11329_p0 }
 0x125   : > { %p9645_p7 = por %p9644_p6, %p9643_p2 }
 0x126   : > { %p9641_p3 = pneg %p9640_p1 }
 0x128   : > { %p9646_p11 = pnand %p9645_p7, %p9641_p3 }
 0x12a   : > { %9649 = shalt.err (!%p9646_p11)
}
 0x12b   : > { %9151 = dma.hbm_to_vmem [thread:$0]  (!%p11318_p12), %s11351_s23, 64, %s2691_s17, [#allocation20]  }
 0x12c   : > { %s2742_s15 = sshll.u32 %s12714_s19, 4  ;;  %s10740_s2 = smov [#allocation22]   ;;  %s11373_s15 = int_to_ptr.hbm [resolvable:$true] %s2742_s15 }
 0x12d   : > { %s2717_s1 = sshll.u32 %s10740_s2, 4  ;;  %s9665_s8 = sshra.s32 %s11362_s27, 4  ;;  %s2718_s1 = int_to_ptr.vmem [resolvable:$true] %s2717_s1  ;;  %s9666_s8 = int_to_ptr.hbm [resolvable:$true] %s9665_s8 }
 0x12e   : > { %s9667_s7 = scalar_lea.hbm %s9666_s8, 1  ;;  %s9672_s18 = scalar_lea.hbm %s12713_s20, 1 }
 0x12f   : > { %p9668_p13 = scmp.ne.s32.totalorder %s9666_s8, %s9667_s7  ;;  %p9673_p2 = scmp.lt.s32.totalorder %s9666_s8, %s12713_s20 }
 0x130   : > { %p9674_p6 = scmp.lt.s32.totalorder %s9672_s18, %s9667_s7 }
 0x131   : > { %p9670_p1 = pnand %p9668_p13, %p11329_p0 }
 0x132   : > { %p9675_p7 = por %p9674_p6, %p9673_p2 }
 0x133   : > { %p9671_p3 = pneg %p9670_p1 }
 0x135   : > { %p9676_p11 = pnand %p9675_p7, %p9671_p3 }
 0x137   : > { %9679 = shalt.err (!%p9676_p11)
}
 0x138   : > { %9157 = dma.hbm_to_vmem [thread:$0]  (!%p11318_p12), %s11362_s27, 16, %s2718_s1, [#allocation23]  }
 0x139   : > { %s10741_s23 = smov [#allocation25]   ;;  %s2790_s10 = sshll.u32 %s12719_s9, 4  ;;  %s11384_s10 = int_to_ptr.hbm [resolvable:$true] %s2790_s10 }
 0x13a   : > { %s2744_s17 = sshll.u32 %s10741_s23, 4  ;;  %s9695_s2 = sshra.s32 %s11373_s15, 4  ;;  %s2745_s17 = int_to_ptr.vmem [resolvable:$true] %s2744_s17  ;;  %s9696_s2 = int_to_ptr.hbm [resolvable:$true] %s9695_s2 }
 0x13b   : > { %s9697_s8 = scalar_lea.hbm %s9696_s2, 1  ;;  %s9702_s7 = scalar_lea.hbm %s12714_s19, 1 }
 0x13c   : > { %p9698_p13 = scmp.ne.s32.totalorder %s9696_s2, %s9697_s8  ;;  %p9703_p2 = scmp.lt.s32.totalorder %s9696_s2, %s12714_s19 }
 0x13d   : > { %p9704_p6 = scmp.lt.s32.totalorder %s9702_s7, %s9697_s8 }
 0x13e   : > { %p9700_p1 = pnand %p9698_p13, %p11329_p0 }
 0x13f   : > { %p9705_p7 = por %p9704_p6, %p9703_p2 }
 0x140   : > { %p9701_p3 = pneg %p9700_p1 }
 0x142   : > { %p9706_p11 = pnand %p9705_p7, %p9701_p3 }
 0x144   : > { %9709 = shalt.err (!%p9706_p11)
}
 0x145   : > { %9163 = dma.hbm_to_vmem [thread:$0]  (!%p11318_p12), %s11373_s15, 16, %s2745_s17, [#allocation26]  }
 0x146   : > { %s2820_s27 = sshll.u32 %s12712_s21, 4  ;;  %s10742_s1 = smov [#allocation28]   ;;  %s11395_s27 = int_to_ptr.hbm [resolvable:$true] %s2820_s27 }
 0x147   : > { %s2792_s18 = sshll.u32 %s10742_s1, 4  ;;  %s9725_s23 = sshra.s32 %s11384_s10, 4  ;;  %s2793_s18 = int_to_ptr.vmem [resolvable:$true] %s2792_s18  ;;  %s9726_s23 = int_to_ptr.hbm [resolvable:$true] %s9725_s23 }
 0x148   : > { %s9727_s2 = scalar_lea.hbm %s9726_s23, 1  ;;  %s9732_s8 = scalar_lea.hbm %s12719_s9, 1 }
 0x149   : > { %p9728_p13 = scmp.ne.s32.totalorder %s9726_s23, %s9727_s2  ;;  %p9733_p2 = scmp.lt.s32.totalorder %s9726_s23, %s12719_s9 }
 0x14a   : > { %p9734_p6 = scmp.lt.s32.totalorder %s9732_s8, %s9727_s2 }
 0x14b   : > { %p9730_p1 = pnand %p9728_p13, %p11329_p0 }
 0x14c   : > { %p9735_p7 = por %p9734_p6, %p9733_p2 }
 0x14d   : > { %p9731_p3 = pneg %p9730_p1 }
 0x14f   : > { %p9736_p11 = pnand %p9735_p7, %p9731_p3 }
 0x151   : > { %9739 = shalt.err (!%p9736_p11)
}
 0x152   : > { %9169 = dma.hbm_to_vmem [thread:$0]  (!%p11318_p12), %s11384_s10, 16, %s2793_s18, [#allocation29]  }
 0x153   : > { %s10743_s15 = smov [#allocation31]   ;;  %s2850_s7 = sshll.u32 %s12721_s4, 4  ;;  %s11406_s7 = int_to_ptr.hbm [resolvable:$true] %s2850_s7 }
 0x154   : > { %s2822_s17 = sshll.u32 %s10743_s15, 4  ;;  %s9755_s1 = sshra.s32 %s11395_s27, 4  ;;  %s2823_s17 = int_to_ptr.vmem [resolvable:$true] %s2822_s17  ;;  %s9756_s1 = int_to_ptr.hbm [resolvable:$true] %s9755_s1 }
 0x155   : > { %s9757_s23 = scalar_lea.hbm %s9756_s1, 1  ;;  %s9762_s2 = scalar_lea.hbm %s12712_s21, 1 }
 0x156   : > { %p9758_p13 = scmp.ne.s32.totalorder %s9756_s1, %s9757_s23  ;;  %p9763_p2 = scmp.lt.s32.totalorder %s9756_s1, %s12712_s21 }
 0x157   : > { %p9764_p6 = scmp.lt.s32.totalorder %s9762_s2, %s9757_s23 }
 0x158   : > { %p9760_p1 = pnand %p9758_p13, %p11329_p0 }
 0x159   : > { %p9765_p7 = por %p9764_p6, %p9763_p2 }
 0x15a   : > { %p9761_p3 = pneg %p9760_p1 }
 0x15c   : > { %p9766_p11 = pnand %p9765_p7, %p9761_p3 }
 0x15e   : > { %9769 = shalt.err (!%p9766_p11)
}
 0x15f   : > { %9175 = dma.hbm_to_vmem [thread:$0]  (!%p11318_p12), %s11395_s27, 16, %s2823_s17, [#allocation32]  }
 0x160   : > { %s2589_s10 = sshll.u32 %s12720_s5, 4  ;;  %s10744_s18 = smov [#allocation34]   ;;  %s11417_s10 = int_to_ptr.hbm [resolvable:$true] %s2589_s10 }
 0x161   : > { %s2852_s8 = sshll.u32 %s10744_s18, 4  ;;  %s9785_s15 = sshra.s32 %s11406_s7, 4  ;;  %s2853_s8 = int_to_ptr.vmem [resolvable:$true] %s2852_s8  ;;  %s9786_s15 = int_to_ptr.hbm [resolvable:$true] %s9785_s15 }
 0x162   : > { %s9787_s1 = scalar_lea.hbm %s9786_s15, 4  ;;  %s9792_s23 = scalar_lea.hbm %s12721_s4, 4 }
 0x163   : > { %p9788_p13 = scmp.ne.s32.totalorder %s9786_s15, %s9787_s1  ;;  %p9793_p2 = scmp.lt.s32.totalorder %s9786_s15, %s12721_s4 }
 0x164   : > { %p9794_p6 = scmp.lt.s32.totalorder %s9792_s23, %s9787_s1 }
 0x165   : > { %p9790_p1 = pnand %p9788_p13, %p11329_p0 }
 0x166   : > { %p9795_p7 = por %p9794_p6, %p9793_p2 }
 0x167   : > { %p9791_p3 = pneg %p9790_p1 }
 0x169   : > { %p9796_p11 = pnand %p9795_p7, %p9791_p3 }
 0x16b   : > { %9799 = shalt.err (!%p9796_p11)
}
 0x16c   : > { %9181 = dma.hbm_to_vmem [thread:$0]  (!%p11318_p12), %s11406_s7, 64, %s2853_s8, [#allocation35]  }
 0x16d   : > { %s10745_s27 = smov [#allocation7]   ;;  %s2622_s2 = sshll.u32 %s12710_s25, 4  ;;  %s11428_s2 = int_to_ptr.hbm [resolvable:$true] %s2622_s2 }
 0x16e   : > { %s2591_s17 = sshll.u32 %s10745_s27, 4  ;;  %s9815_s18 = sshra.s32 %s11417_s10, 4  ;;  %s2592_s17 = int_to_ptr.vmem [resolvable:$true] %s2591_s17  ;;  %s9816_s18 = int_to_ptr.hbm [resolvable:$true] %s9815_s18 }
 0x16f   : > { %s9817_s15 = scalar_lea.hbm %s9816_s18, 1  ;;  %s9822_s1 = scalar_lea.hbm %s12720_s5, 1 }
 0x170   : > { %p9818_p13 = scmp.ne.s32.totalorder %s9816_s18, %s9817_s15  ;;  %p9823_p2 = scmp.lt.s32.totalorder %s9816_s18, %s12720_s5 }
 0x171   : > { %p9824_p6 = scmp.lt.s32.totalorder %s9822_s1, %s9817_s15 }
 0x172   : > { %p9820_p1 = pnand %p9818_p13, %p11329_p0 }
 0x173   : > { %p9825_p7 = por %p9824_p6, %p9823_p2 }
 0x174   : > { %p9821_p3 = pneg %p9820_p1 }
 0x176   : > { %p9826_p11 = pnand %p9825_p7, %p9821_p3 }
 0x178   : > { %9829 = shalt.err (!%p9826_p11)
}
 0x179   : > { %9130 = dma.hbm_to_vmem [thread:$0]  (!%p11318_p12), %s11417_s10, 16, %s2592_s17, [#allocation8]  }
 0x17a   : > { %s2646_s7 = sshll.u32 %s12722_s3, 4  ;;  %s10746_s8 = smov [#allocation12]   ;;  %s11439_s7 = int_to_ptr.hbm [resolvable:$true] %s2646_s7 }
 0x17b   : > { %s2624_s23 = sshll.u32 %s10746_s8, 4  ;;  %s9845_s27 = sshra.s32 %s11428_s2, 4  ;;  %s2625_s23 = int_to_ptr.vmem [resolvable:$true] %s2624_s23  ;;  %s9846_s27 = int_to_ptr.hbm [resolvable:$true] %s9845_s27 }
 0x17c   : > { %s9847_s18 = scalar_lea.hbm %s9846_s27, 1  ;;  %s9852_s15 = scalar_lea.hbm %s12710_s25, 1 }
 0x17d   : > { %p9848_p13 = scmp.ne.s32.totalorder %s9846_s27, %s9847_s18  ;;  %p9853_p2 = scmp.lt.s32.totalorder %s9846_s27, %s12710_s25 }
 0x17e   : > { %p9854_p6 = scmp.lt.s32.totalorder %s9852_s15, %s9847_s18 }
 0x17f   : > { %p9850_p1 = pnand %p9848_p13, %p11329_p0 }
 0x180   : > { %p9855_p7 = por %p9854_p6, %p9853_p2 }
 0x181   : > { %p9851_p3 = pneg %p9850_p1 }
 0x183   : > { %p9856_p11 = pnand %p9855_p7, %p9851_p3 }
 0x185   : > { %9859 = shalt.err (!%p9856_p11)
}
 0x186   : > { %9136 = dma.hbm_to_vmem [thread:$0]  (!%p11318_p12), %s11428_s2, 16, %s2625_s23, [#allocation11]  }
 0x187   : > { %s10747_s10 = smov [#allocation15]   ;;  %s2676_s1 = sshll.u32 %s12711_s24, 4  ;;  %s11450_s1 = int_to_ptr.hbm [resolvable:$true] %s2676_s1 }
 0x188   : > { %s2648_s17 = sshll.u32 %s10747_s10, 4  ;;  %s9875_s8 = sshra.s32 %s11439_s7, 4  ;;  %s2649_s17 = int_to_ptr.vmem [resolvable:$true] %s2648_s17  ;;  %s9876_s8 = int_to_ptr.hbm [resolvable:$true] %s9875_s8 }
 0x189   : > { %s9877_s27 = scalar_lea.hbm %s9876_s8, 4  ;;  %s9882_s18 = scalar_lea.hbm %s12722_s3, 4 }
 0x18a   : > { %p9878_p13 = scmp.ne.s32.totalorder %s9876_s8, %s9877_s27  ;;  %p9883_p2 = scmp.lt.s32.totalorder %s9876_s8, %s12722_s3 }
 0x18b   : > { %p9884_p6 = scmp.lt.s32.totalorder %s9882_s18, %s9877_s27 }
 0x18c   : > { %p9880_p1 = pnand %p9878_p13, %p11329_p0 }
 0x18d   : > { %p9885_p7 = por %p9884_p6, %p9883_p2 }
 0x18e   : > { %p9881_p3 = pneg %p9880_p1 }
 0x190   : > { %p9886_p11 = pnand %p9885_p7, %p9881_p3 }
 0x192   : > { %9889 = shalt.err (!%p9886_p11)
}
 0x193   : > { %s12735_s2 = sld [smem:[#allocation90_spill]]  ;;  %s10748_s15 = smov [#allocation18]  }
 0x194   : > { %9142 = dma.hbm_to_vmem [thread:$0]  (!%p11318_p12), %s11439_s7, 64, %s2649_s17, [#allocation14]  }
 0x195   : > { %s2678_s10 = sshll.u32 %s10748_s15, 4  ;;  %s9905_s8 = sshra.s32 %s11450_s1, 4  ;;  %s2679_s10 = int_to_ptr.vmem [resolvable:$true] %s2678_s10  ;;  %s9906_s8 = int_to_ptr.hbm [resolvable:$true] %s9905_s8 }
 0x196   : > { %s9907_s27 = scalar_lea.hbm %s9906_s8, 4  ;;  %s9912_s18 = scalar_lea.hbm %s12711_s24, 4 }
 0x197   : > { %p9908_p13 = scmp.ne.s32.totalorder %s9906_s8, %s9907_s27  ;;  %p9913_p2 = scmp.lt.s32.totalorder %s9906_s8, %s12711_s24 }
 0x198   : > { %p9914_p6 = scmp.lt.s32.totalorder %s9912_s18, %s9907_s27 }
 0x199   : > { %s2703_s23 = sshll.u32 %s12735_s2, 4  ;;  %p9910_p1 = pnand %p9908_p13, %p11329_p0  ;;  %s11461_s23 = int_to_ptr.hbm [resolvable:$true] %s2703_s23 }
 0x19a   : > { %p9915_p7 = por %p9914_p6, %p9913_p2 }
 0x19b   : > { %p9911_p3 = pneg %p9910_p1 }
 0x19d   : > { %p9916_p11 = pnand %p9915_p7, %p9911_p3 }
 0x19f   : > { %9919 = shalt.err (!%p9916_p11)
}
 0x1a0   : > { %s12736_s7 = sld [smem:[#allocation93_spill]]  ;;  %s10749_s17 = smov [#allocation21]  }
 0x1a1   : > { %9148 = dma.hbm_to_vmem [thread:$0]  (!%p11318_p12), %s11450_s1, 64, %s2679_s10, [#allocation17]  }
 0x1a2   : > { %s2705_s15 = sshll.u32 %s10749_s17, 4  ;;  %s9935_s8 = sshra.s32 %s11461_s23, 4  ;;  %s2706_s15 = int_to_ptr.vmem [resolvable:$true] %s2705_s15  ;;  %s9936_s8 = int_to_ptr.hbm [resolvable:$true] %s9935_s8 }
 0x1a3   : > { %s9937_s27 = scalar_lea.hbm %s9936_s8, 1  ;;  %s9942_s18 = scalar_lea.hbm %s12735_s2, 1 }
 0x1a4   : > { %p9938_p13 = scmp.ne.s32.totalorder %s9936_s8, %s9937_s27  ;;  %p9943_p2 = scmp.lt.s32.totalorder %s9936_s8, %s12735_s2 }
 0x1a5   : > { %p9944_p6 = scmp.lt.s32.totalorder %s9942_s18, %s9937_s27 }
 0x1a6   : > { %s2730_s3 = sshll.u32 %s12736_s7, 4  ;;  %p9940_p1 = pnand %p9938_p13, %p11329_p0  ;;  %s11472_s3 = int_to_ptr.hbm [resolvable:$true] %s2730_s3 }
 0x1a7   : > { %p9945_p7 = por %p9944_p6, %p9943_p2 }
 0x1a8   : > { %p9941_p3 = pneg %p9940_p1 }
 0x1aa   : > { %p9946_p11 = pnand %p9945_p7, %p9941_p3 }
 0x1ac   : > { %9949 = shalt.err (!%p9946_p11)
}
 0x1ad   : > { %s12737_s1 = sld [smem:[#allocation97_spill]]  ;;  %s10750_s17 = smov [#allocation24]  }
 0x1ae   : > { %9154 = dma.hbm_to_vmem [thread:$0]  (!%p11318_p12), %s11461_s23, 16, %s2706_s15, [#allocation20]  }
 0x1af   : > { %s2732_s4 = sshll.u32 %s10750_s17, 4  ;;  %s9965_s8 = sshra.s32 %s11472_s3, 4  ;;  %s2733_s4 = int_to_ptr.vmem [resolvable:$true] %s2732_s4  ;;  %s9966_s8 = int_to_ptr.hbm [resolvable:$true] %s9965_s8 }
 0x1b0   : > { %s9967_s27 = scalar_lea.hbm %s9966_s8, 1  ;;  %s9972_s18 = scalar_lea.hbm %s12736_s7, 1 }
 0x1b1   : > { %p9968_p13 = scmp.ne.s32.totalorder %s9966_s8, %s9967_s27  ;;  %p9973_p2 = scmp.lt.s32.totalorder %s9966_s8, %s12736_s7 }
 0x1b2   : > { %p9974_p6 = scmp.lt.s32.totalorder %s9972_s18, %s9967_s27 }
 0x1b3   : > { %s2760_s10 = sshll.u32 %s12737_s1, 4  ;;  %p9970_p1 = pnand %p9968_p13, %p11329_p0  ;;  %s11483_s10 = int_to_ptr.hbm [resolvable:$true] %s2760_s10 }
 0x1b4   : > { %p9975_p7 = por %p9974_p6, %p9973_p2 }
 0x1b5   : > { %p9971_p3 = pneg %p9970_p1 }
 0x1b7   : > { %p9976_p11 = pnand %p9975_p7, %p9971_p3 }
 0x1b9   : > { %9979 = shalt.err (!%p9976_p11)
}
 0x1ba   : > { %s12738_s23 = sld [smem:[#allocation105_spill]]  ;;  %s10751_s15 = smov [#allocation27]  }
 0x1bb   : > { %9160 = dma.hbm_to_vmem [thread:$0]  (!%p11318_p12), %s11472_s3, 16, %s2733_s4, [#allocation23]  }
 0x1bc   : > { %s2762_s17 = sshll.u32 %s10751_s15, 4  ;;  %s9995_s8 = sshra.s32 %s11483_s10, 4  ;;  %s2763_s17 = int_to_ptr.vmem [resolvable:$true] %s2762_s17  ;;  %s9996_s8 = int_to_ptr.hbm [resolvable:$true] %s9995_s8 }
 0x1bd   : > { %s9997_s27 = scalar_lea.hbm %s9996_s8, 4  ;;  %s10002_s18 = scalar_lea.hbm %s12737_s1, 4 }
 0x1be   : > { %p9998_p13 = scmp.ne.s32.totalorder %s9996_s8, %s9997_s27  ;;  %p10003_p2 = scmp.lt.s32.totalorder %s9996_s8, %s12737_s1 }
 0x1bf   : > { %p10004_p6 = scmp.lt.s32.totalorder %s10002_s18, %s9997_s27 }
 0x1c0   : > { %s2802_s2 = sshll.u32 %s12738_s23, 4  ;;  %p10000_p1 = pnand %p9998_p13, %p11329_p0  ;;  %s11494_s2 = int_to_ptr.hbm [resolvable:$true] %s2802_s2 }
 0x1c1   : > { %p10005_p7 = por %p10004_p6, %p10003_p2 }
 0x1c2   : > { %p10001_p3 = pneg %p10000_p1 }
 0x1c4   : > { %p10006_p11 = pnand %p10005_p7, %p10001_p3 }
 0x1c6   : > { %10009 = shalt.err (!%p10006_p11)
}
 0x1c7   : > { %s12739_s3 = sld [smem:[#allocation109_spill]]  ;;  %s10752_s15 = smov [#allocation30]  }
 0x1c8   : > { %9166 = dma.hbm_to_vmem [thread:$0]  (!%p11318_p12), %s11483_s10, 64, %s2763_s17, [#allocation26]  }
 0x1c9   : > { %s2804_s5 = sshll.u32 %s10752_s15, 4  ;;  %s10025_s8 = sshra.s32 %s11494_s2, 4  ;;  %s2805_s5 = int_to_ptr.vmem [resolvable:$true] %s2804_s5  ;;  %s10026_s8 = int_to_ptr.hbm [resolvable:$true] %s10025_s8 }
 0x1ca   : > { %s10027_s27 = scalar_lea.hbm %s10026_s8, 1  ;;  %s10032_s18 = scalar_lea.hbm %s12738_s23, 1 }
 0x1cb   : > { %p10028_p13 = scmp.ne.s32.totalorder %s10026_s8, %s10027_s27  ;;  %p10033_p2 = scmp.lt.s32.totalorder %s10026_s8, %s12738_s23 }
 0x1cc   : > { %p10034_p6 = scmp.lt.s32.totalorder %s10032_s18, %s10027_s27 }
 0x1cd   : > { %s2832_s4 = sshll.u32 %s12739_s3, 4  ;;  %p10030_p1 = pnand %p10028_p13, %p11329_p0  ;;  %s11505_s4 = int_to_ptr.hbm [resolvable:$true] %s2832_s4 }
 0x1ce   : > { %p10035_p7 = por %p10034_p6, %p10033_p2 }
 0x1cf   : > { %p10031_p3 = pneg %p10030_p1 }
 0x1d1   : > { %p10036_p11 = pnand %p10035_p7, %p10031_p3 }
 0x1d3   : > { %10039 = shalt.err (!%p10036_p11)
}
 0x1d4   : > { %s12740_s10 = sld [smem:[#allocation113_spill]]  ;;  %s10753_s17 = smov [#allocation33]  }
 0x1d5   : > { %9172 = dma.hbm_to_vmem [thread:$0]  (!%p11318_p12), %s11494_s2, 16, %s2805_s5, [#allocation29]  }
 0x1d6   : > { %s2834_s15 = sshll.u32 %s10753_s17, 4  ;;  %s10055_s7 = sshra.s32 %s11505_s4, 4  ;;  %s2835_s15 = int_to_ptr.vmem [resolvable:$true] %s2834_s15  ;;  %s10056_s7 = int_to_ptr.hbm [resolvable:$true] %s10055_s7 }
 0x1d7   : > { %s10057_s8 = scalar_lea.hbm %s10056_s7, 1  ;;  %s10062_s27 = scalar_lea.hbm %s12739_s3, 1 }
 0x1d8   : > { %p10058_p13 = scmp.ne.s32.totalorder %s10056_s7, %s10057_s8  ;;  %p10063_p2 = scmp.lt.s32.totalorder %s10056_s7, %s12739_s3 }
 0x1d9   : > { %p10064_p6 = scmp.lt.s32.totalorder %s10062_s27, %s10057_s8 }
 0x1da   : > { %s2862_s1 = sshll.u32 %s12740_s10, 4  ;;  %p10060_p1 = pnand %p10058_p13, %p11329_p0  ;;  %s2863_s1 = int_to_ptr.hbm [resolvable:$true] %s2862_s1 }
 0x1db   : > { %p10065_p7 = por %p10064_p6, %p10063_p2 }
 0x1dc   : > { %p10061_p3 = pneg %p10060_p1 }
 0x1de   : > { %p10066_p11 = pnand %p10065_p7, %p10061_p3 }
 0x1e0   : > { %10069 = shalt.err (!%p10066_p11)
}
 0x1e1   : > { %9178 = dma.hbm_to_vmem [thread:$0]  (!%p11318_p12), %s11505_s4, 16, %s2835_s15, [#allocation32]  }
 0x1e2   : > { %s10754_s5 = smov [#allocation36]   ;;  %s10085_s18 = sshra.s32 %s2863_s1, 4  ;;  %s10086_s18 = int_to_ptr.hbm [resolvable:$true] %s10085_s18 }
 0x1e3   : > { %s2864_s2 = sshll.u32 %s10754_s5, 4  ;;  %s10087_s17 = scalar_lea.hbm %s10086_s18, 8  ;;  %s2865_s2 = int_to_ptr.vmem [resolvable:$true] %s2864_s2 }
 0x1e4   : > { %p10088_p13 = scmp.ne.s32.totalorder %s10086_s18, %s10087_s17  ;;  %s10092_s7 = scalar_lea.hbm %s12740_s10, 8 }
 0x1e5   : > { %p10093_p3 = scmp.lt.s32.totalorder %s10086_s18, %s12740_s10  ;;  %p10094_p6 = scmp.lt.s32.totalorder %s10092_s7, %s10087_s17 }
 0x1e6   : > { %p10090_p1 = pnand %p10088_p13, %p11329_p0 }
 0x1e7   : > { %p10095_p7 = por %p10094_p6, %p10093_p3 }
 0x1e8   : > { %p10091_p2 = pneg %p10090_p1 }
 0x1ea   : > { %p10096_p11 = pnand %p10095_p7, %p10091_p2 }
 0x1ec   : > { %10099 = shalt.err (!%p10096_p11)
}
 0x1ed   : > { %9184 = dma.hbm_to_vmem [thread:$0]  (!%p11318_p12), %s2863_s1, 128, %s2865_s2, [#allocation35]  }
 0x1ee   : > { %p8710_p9 = scmp.ge.s32.totalorder %s10637_s11, 3 }
 0x1ef   : > { %s12741_s4 = sld [smem:[#allocation120_spill]] (!%p8710_p9)  ;;  %s11532_s0 = sand.u32 (!%p8710_p9), 1, %s10637_s11  }
 0x1f0   : > { %2883 = sbr.rel (%p8710_p9) target bundleno = 748 (0x2ec), region = 184  ;;  %s11535_s15 = sand.u32 (!%p8710_p9), 1, %s10633_s6  }
 0x1f1   : > { %s2905_s27 = scalar_lea.vmem (!%p8710_p9), [#allocation37], %s11535_s15  ;;  %s12554_s5 = scalar_lea.sflag (!%p8710_p9), [#allocation38], %s11532_s0 }
 0x1f2   : > { %s2912_s22 = sshll.u32 (!%p8710_p9), %s2905_s27, 4  ;;  %s2913_s22 = int_to_ptr.vmem [resolvable:$true] %s2912_s22 }
 0x1f5   : > { %s2908_s8 = scalar_lea.hbm %s12741_s4, %s10637_s11  ;;  %s10121_s17 = scalar_lea.hbm %s12741_s4, 3 }
 0x1f6   : > { %s2910_s1 = sshll.u32 %s2908_s8, 4  ;;  %s2911_s1 = int_to_ptr.hbm [resolvable:$true] %s2910_s1 }
 0x1f7   : > { %s10115_s2 = sshra.s32 %s2911_s1, 4  ;;  %s10116_s2 = int_to_ptr.hbm [resolvable:$true] %s10115_s2 }
 0x1f8   : > { %s10117_s18 = scalar_lea.hbm %s10116_s2, 1  ;;  %p10122_p13 = scmp.lt.s32.totalorder %s10116_s2, %s12741_s4 }
 0x1f9   : > { %p10118_p9 = scmp.ne.s32.totalorder %s10116_s2, %s10117_s18  ;;  %p10123_p1 = scmp.lt.s32.totalorder %s10121_s17, %s10117_s18 }
 0x1fb   : > { %p10119_p12 = pnand %p10118_p9, %p11294_p4  ;;  %p10124_p2 = por %p10123_p1, %p10122_p13 }
 0x1fd   : > { %p10120_p0 = pneg %p10119_p12 }
 0x1ff   : > { %p10125_p3 = pnand %p10124_p2, %p10120_p0 }
 0x201   : > { %10128 = shalt.err (!%p10125_p3)
}
 0x202   : > { %s12742_s7 = sld [smem:[#allocation129_spill]]  ;;  %s2993_s3 = scalar_lea.vmem [#allocation40], %s11535_s15 }
 0x203   : > { %9057 = dma.hbm_to_vmem [thread:$0]  (%p11294_p4), %s2911_s1, 16, %s2913_s22, %s12554_s5  }
 0x204   : > { %s3000_s2 = sshll.u32 %s2993_s3, 4  ;;  %s12555_s18 = scalar_lea.sflag [#allocation41], %s11532_s0  ;;  %s3001_s2 = int_to_ptr.vmem [resolvable:$true] %s3000_s2 }
 0x208   : > { %s2996_s8 = scalar_lea.hbm %s12742_s7, %s10637_s11  ;;  %s10149_s9 = scalar_lea.hbm %s12742_s7, 3 }
 0x209   : > { %s2998_s27 = sshll.u32 %s2996_s8, 4  ;;  %s2999_s27 = int_to_ptr.hbm [resolvable:$true] %s2998_s27 }
 0x20a   : > { %s10143_s17 = sshra.s32 %s2999_s27, 4  ;;  %s10144_s17 = int_to_ptr.hbm [resolvable:$true] %s10143_s17 }
 0x20b   : > { %s10145_s4 = scalar_lea.hbm %s10144_s17, 1  ;;  %p10150_p9 = scmp.lt.s32.totalorder %s10144_s17, %s12742_s7 }
 0x20c   : > { %p10146_p6 = scmp.ne.s32.totalorder %s10144_s17, %s10145_s4  ;;  %p10151_p12 = scmp.lt.s32.totalorder %s10149_s9, %s10145_s4 }
 0x20e   : > { %p10147_p7 = pnand %p10146_p6, %p11294_p4  ;;  %p10152_p0 = por %p10151_p12, %p10150_p9 }
 0x210   : > { %p10148_p11 = pneg %p10147_p7 }
 0x212   : > { %p10153_p13 = pnand %p10152_p0, %p10148_p11 }
 0x214   : > { %10156 = shalt.err (!%p10153_p13)
}
 0x215   : > { %9059 = dma.hbm_to_vmem [thread:$0]  (%p11294_p4), %s2999_s27, 16, %s3001_s2, %s12555_s18  }
 0x216   : > { %s3084_s3 = scalar_lea.hbm %s12715_s16, %s10637_s11  ;;  %s3081_s22 = scalar_lea.vmem [#allocation43], %s11535_s15 }
 0x217   : > { %s3088_s1 = sshll.u32 %s3081_s22, 4  ;;  %s3086_s8 = sshll.u32 %s3084_s3, 4  ;;  %s3089_s1 = int_to_ptr.vmem [resolvable:$true] %s3088_s1  ;;  %s3087_s8 = int_to_ptr.hbm [resolvable:$true] %s3086_s8 }
 0x218   : > { %s12558_s9 = scalar_lea.sflag [#allocation44], %s11532_s0  ;;  %s10171_s4 = sshra.s32 %s3087_s8, 4  ;;  %s10172_s4 = int_to_ptr.hbm [resolvable:$true] %s10171_s4 }
 0x219   : > { %s10173_s17 = scalar_lea.hbm %s10172_s4, 1  ;;  %s10177_s5 = scalar_lea.hbm %s12715_s16, 3 }
 0x21a   : > { %p10174_p1 = scmp.ne.s32.totalorder %s10172_s4, %s10173_s17  ;;  %p10178_p6 = scmp.lt.s32.totalorder %s10172_s4, %s12715_s16 }
 0x21b   : > { %p10179_p7 = scmp.lt.s32.totalorder %s10177_s5, %s10173_s17 }
 0x21c   : > { %p10175_p2 = pnand %p10174_p1, %p11294_p4 }
 0x21d   : > { %p10180_p11 = por %p10179_p7, %p10178_p6 }
 0x21e   : > { %p10176_p3 = pneg %p10175_p2 }
 0x220   : > { %p10181_p9 = pnand %p10180_p11, %p10176_p3 }
 0x222   : > { %10184 = shalt.err (!%p10181_p9)
}
 0x223   : > { %s12743_s27 = sld [smem:[#allocation151_spill]]  ;;  %s3201_s18 = scalar_lea.vmem [#allocation46], %s11535_s15 }
 0x224   : > { %9061 = dma.hbm_to_vmem [thread:$0]  (%p11294_p4), %s3087_s8, 16, %s3089_s1, %s12558_s9  }
 0x225   : > { %s3208_s4 = sshll.u32 %s3201_s18, 4  ;;  %s12559_s5 = scalar_lea.sflag [#allocation47], %s11532_s0  ;;  %s3209_s4 = int_to_ptr.vmem [resolvable:$true] %s3208_s4 }
 0x229   : > { %s12744_s2 = smov %s12743_s27  ;;  %s3204_s3 = scalar_lea.hbm %s12743_s27, %s10637_s11 }
 0x22a   : > { %s3206_s22 = sshll.u32 %s3204_s3, 4  ;;  %s10205_s10 = scalar_lea.hbm %s12744_s2, 3  ;;  %s3207_s22 = int_to_ptr.hbm [resolvable:$true] %s3206_s22 }
 0x22b   : > { %s10199_s17 = sshra.s32 %s3207_s22, 4  ;;  %s10200_s17 = int_to_ptr.hbm [resolvable:$true] %s10199_s17 }
 0x22c   : > { %s10201_s7 = scalar_lea.hbm %s10200_s17, 1  ;;  %p10206_p1 = scmp.lt.s32.totalorder %s10200_s17, %s12744_s2 }
 0x22d   : > { %p10202_p12 = scmp.ne.s32.totalorder %s10200_s17, %s10201_s7  ;;  %p10207_p2 = scmp.lt.s32.totalorder %s10205_s10, %s10201_s7 }
 0x22f   : > { %p10203_p0 = pnand %p10202_p12, %p11294_p4  ;;  %p10208_p3 = por %p10207_p2, %p10206_p1 }
 0x231   : > { %p10204_p13 = pneg %p10203_p0 }
 0x233   : > { %p10209_p6 = pnand %p10208_p3, %p10204_p13 }
 0x235   : > { %10212 = shalt.err (!%p10209_p6)
}
 0x236   : > { %s12745_s18 = sld [smem:[#allocation160_spill]]  ;;  %s3289_s8 = scalar_lea.vmem [#allocation49], %s11535_s15 }
 0x237   : > { %9063 = dma.hbm_to_vmem [thread:$0]  (%p11294_p4), %s3207_s22, 16, %s3209_s4, %s12559_s5  }
 0x238   : > { %s3296_s27 = sshll.u32 %s3289_s8, 4  ;;  %s12561_s10 = scalar_lea.sflag [#allocation50], %s11532_s0  ;;  %s3297_s27 = int_to_ptr.vmem [resolvable:$true] %s3296_s27 }
 0x23c   : > { %s3292_s1 = scalar_lea.hbm %s12745_s18, %s10637_s11  ;;  %s10233_s9 = scalar_lea.hbm %s12745_s18, 3 }
 0x23d   : > { %s3294_s3 = sshll.u32 %s3292_s1, 4  ;;  %s3295_s3 = int_to_ptr.hbm [resolvable:$true] %s3294_s3 }
 0x23e   : > { %s10227_s7 = sshra.s32 %s3295_s3, 4  ;;  %s10228_s7 = int_to_ptr.hbm [resolvable:$true] %s10227_s7 }
 0x23f   : > { %s10229_s17 = scalar_lea.hbm %s10228_s7, 1  ;;  %p10234_p12 = scmp.lt.s32.totalorder %s10228_s7, %s12745_s18 }
 0x240   : > { %p10230_p7 = scmp.ne.s32.totalorder %s10228_s7, %s10229_s17  ;;  %p10235_p0 = scmp.lt.s32.totalorder %s10233_s9, %s10229_s17 }
 0x242   : > { %p10231_p11 = pnand %p10230_p7, %p11294_p4  ;;  %p10236_p13 = por %p10235_p0, %p10234_p12 }
 0x244   : > { %p10232_p9 = pneg %p10231_p11 }
 0x246   : > { %p10237_p1 = pnand %p10236_p13, %p10232_p9 }
 0x248   : > { %10240 = shalt.err (!%p10237_p1)
}
 0x249   : > { %s12746_s22 = sld [smem:[#allocation168_spill]]  ;;  %s3370_s8 = scalar_lea.vmem [#allocation52], %s11535_s15 }
 0x24a   : > { %9065 = dma.hbm_to_vmem [thread:$0]  (%p11294_p4), %s3295_s3, 16, %s3297_s27, %s12561_s10  }
 0x24b   : > { %s3377_s7 = sshll.u32 %s3370_s8, 4  ;;  %s12562_s9 = scalar_lea.sflag [#allocation53], %s11532_s0  ;;  %s3378_s7 = int_to_ptr.vmem [resolvable:$true] %s3377_s7 }
 0x24f   : > { %s3373_s4 = scalar_lea.hbm %s12746_s22, %s10637_s11  ;;  %s10261_s2 = scalar_lea.hbm %s12746_s22, 3 }
 0x250   : > { %s3375_s1 = sshll.u32 %s3373_s4, 4  ;;  %s3376_s1 = int_to_ptr.hbm [resolvable:$true] %s3375_s1 }
 0x251   : > { %s10255_s17 = sshra.s32 %s3376_s1, 4  ;;  %s10256_s17 = int_to_ptr.hbm [resolvable:$true] %s10255_s17 }
 0x252   : > { %s10257_s5 = scalar_lea.hbm %s10256_s17, 1  ;;  %p10262_p7 = scmp.lt.s32.totalorder %s10256_s17, %s12746_s22 }
 0x253   : > { %p10258_p2 = scmp.ne.s32.totalorder %s10256_s17, %s10257_s5  ;;  %p10263_p11 = scmp.lt.s32.totalorder %s10261_s2, %s10257_s5 }
 0x255   : > { %p10259_p3 = pnand %p10258_p2, %p11294_p4  ;;  %p10264_p9 = por %p10263_p11, %p10262_p7 }
 0x257   : > { %p10260_p6 = pneg %p10259_p3 }
 0x259   : > { %p10265_p12 = pnand %p10264_p9, %p10260_p6 }
 0x25b   : > { %10268 = shalt.err (!%p10265_p12)
}
 0x25c   : > { %9067 = dma.hbm_to_vmem [thread:$0]  (%p11294_p4), %s3376_s1, 16, %s3378_s7, %s12562_s9  }
 0x25d   : > { %s3415_s27 = scalar_lea.hbm %s12718_s12, %s10637_s11  ;;  %s3412_s3 = scalar_lea.vmem [#allocation55], %s11535_s15 }
 0x25e   : > { %s3419_s4 = sshll.u32 %s3412_s3, 4  ;;  %s3417_s8 = sshll.u32 %s3415_s27, 4  ;;  %s3420_s4 = int_to_ptr.vmem [resolvable:$true] %s3419_s4  ;;  %s3418_s8 = int_to_ptr.hbm [resolvable:$true] %s3417_s8 }
 0x25f   : > { %s12563_s2 = scalar_lea.sflag [#allocation56], %s11532_s0  ;;  %s10283_s5 = sshra.s32 %s3418_s8, 4  ;;  %s10284_s5 = int_to_ptr.hbm [resolvable:$true] %s10283_s5 }
 0x260   : > { %s10285_s17 = scalar_lea.hbm %s10284_s5, 1  ;;  %s10289_s10 = scalar_lea.hbm %s12718_s12, 3 }
 0x261   : > { %p10286_p0 = scmp.ne.s32.totalorder %s10284_s5, %s10285_s17  ;;  %p10290_p2 = scmp.lt.s32.totalorder %s10284_s5, %s12718_s12 }
 0x262   : > { %p10291_p3 = scmp.lt.s32.totalorder %s10289_s10, %s10285_s17 }
 0x263   : > { %p10287_p13 = pnand %p10286_p0, %p11294_p4 }
 0x264   : > { %p10292_p6 = por %p10291_p3, %p10290_p2 }
 0x265   : > { %p10288_p1 = pneg %p10287_p13 }
 0x267   : > { %p10293_p7 = pnand %p10292_p6, %p10288_p1 }
 0x269   : > { %10296 = shalt.err (!%p10293_p7)
}
 0x26a   : > { %s12747_s1 = sld [smem:[#allocation121_spill]]  ;;  %s2922_s27 = scalar_lea.vmem [#allocation39], %s11535_s15 }
 0x26b   : > { %9069 = dma.hbm_to_vmem [thread:$0]  (%p11294_p4), %s3418_s8, 16, %s3420_s4, %s12563_s2  }
 0x26c   : > { %s2929_s3 = sshll.u32 %s2922_s27, 4  ;;  %s2930_s3 = int_to_ptr.vmem [resolvable:$true] %s2929_s3 }
 0x270   : > { %s2925_s7 = scalar_lea.hbm %s12747_s1, %s10637_s11  ;;  %s10317_s17 = scalar_lea.hbm %s12747_s1, 3 }
 0x271   : > { %s2927_s9 = sshll.u32 %s2925_s7, 4  ;;  %s2928_s9 = int_to_ptr.hbm [resolvable:$true] %s2927_s9 }
 0x272   : > { %s10311_s10 = sshra.s32 %s2928_s9, 4  ;;  %s10312_s10 = int_to_ptr.hbm [resolvable:$true] %s10311_s10 }
 0x273   : > { %s10313_s5 = scalar_lea.hbm %s10312_s10, 1  ;;  %p10318_p0 = scmp.lt.s32.totalorder %s10312_s10, %s12747_s1 }
 0x274   : > { %p10314_p11 = scmp.ne.s32.totalorder %s10312_s10, %s10313_s5  ;;  %p10319_p13 = scmp.lt.s32.totalorder %s10317_s17, %s10313_s5 }
 0x276   : > { %p10315_p9 = pnand %p10314_p11, %p11294_p4  ;;  %p10320_p1 = por %p10319_p13, %p10318_p0 }
 0x278   : > { %p10316_p12 = pneg %p10315_p9 }
 0x27a   : > { %p10321_p2 = pnand %p10320_p1, %p10316_p12 }
 0x27c   : > { %10324 = shalt.err (!%p10321_p2)
}
 0x27d   : > { %s12748_s4 = scalar_lea.sflag [#allocation38], %s11532_s0  ;;  %s12749_s8 = sld [smem:[#allocation130_spill]] }
 0x27e   : > { %9058 = dma.hbm_to_vmem [thread:$0]  (%p11294_p4), %s2928_s9, 16, %s2930_s3, %s12748_s4  }
 0x27f   : > { %s3010_s27 = scalar_lea.vmem [#allocation42], %s11535_s15 }
 0x280   : > { %s3017_s2 = sshll.u32 %s3010_s27, 4  ;;  %s3018_s2 = int_to_ptr.vmem [resolvable:$true] %s3017_s2 }
 0x283   : > { %s3013_s7 = scalar_lea.hbm %s12749_s8, %s10637_s11  ;;  %s10345_s17 = scalar_lea.hbm %s12749_s8, 3 }
 0x284   : > { %s3015_s12 = sshll.u32 %s3013_s7, 4  ;;  %s3016_s12 = int_to_ptr.hbm [resolvable:$true] %s3015_s12 }
 0x285   : > { %s10339_s10 = sshra.s32 %s3016_s12, 4  ;;  %s10340_s10 = int_to_ptr.hbm [resolvable:$true] %s10339_s10 }
 0x286   : > { %s10341_s5 = scalar_lea.hbm %s10340_s10, 1  ;;  %p10346_p11 = scmp.lt.s32.totalorder %s10340_s10, %s12749_s8 }
 0x287   : > { %p10342_p3 = scmp.ne.s32.totalorder %s10340_s10, %s10341_s5  ;;  %p10347_p9 = scmp.lt.s32.totalorder %s10345_s17, %s10341_s5 }
 0x289   : > { %p10343_p6 = pnand %p10342_p3, %p11294_p4  ;;  %p10348_p12 = por %p10347_p9, %p10346_p11 }
 0x28b   : > { %p10344_p7 = pneg %p10343_p6 }
 0x28d   : > { %p10349_p0 = pnand %p10348_p12, %p10344_p7 }
 0x28f   : > { %10352 = shalt.err (!%p10349_p0)
}
 0x290   : > { %s12750_s9 = scalar_lea.sflag [#allocation41], %s11532_s0  ;;  %s12751_s3 = sld [smem:[#allocation139_spill]] }
 0x291   : > { %9060 = dma.hbm_to_vmem [thread:$0]  (%p11294_p4), %s3016_s12, 16, %s3018_s2, %s12750_s9  }
 0x292   : > { %s3098_s7 = scalar_lea.vmem [#allocation45], %s11535_s15 }
 0x293   : > { %s3105_s27 = sshll.u32 %s3098_s7, 4  ;;  %s3106_s27 = int_to_ptr.vmem [resolvable:$true] %s3105_s27 }
 0x296   : > { %s3101_s4 = scalar_lea.hbm %s12751_s3, %s10637_s11  ;;  %s10373_s17 = scalar_lea.hbm %s12751_s3, 3 }
 0x297   : > { %s3103_s1 = sshll.u32 %s3101_s4, 4  ;;  %s3104_s1 = int_to_ptr.hbm [resolvable:$true] %s3103_s1 }
 0x298   : > { %s10367_s10 = sshra.s32 %s3104_s1, 4  ;;  %s10368_s10 = int_to_ptr.hbm [resolvable:$true] %s10367_s10 }
 0x299   : > { %s10369_s5 = scalar_lea.hbm %s10368_s10, 1  ;;  %p10374_p3 = scmp.lt.s32.totalorder %s10368_s10, %s12751_s3 }
 0x29a   : > { %p10370_p13 = scmp.ne.s32.totalorder %s10368_s10, %s10369_s5  ;;  %p10375_p6 = scmp.lt.s32.totalorder %s10373_s17, %s10369_s5 }
 0x29c   : > { %p10371_p1 = pnand %p10370_p13, %p11294_p4  ;;  %p10376_p7 = por %p10375_p6, %p10374_p3 }
 0x29e   : > { %p10372_p2 = pneg %p10371_p1 }
 0x2a0   : > { %p10377_p11 = pnand %p10376_p7, %p10372_p2 }
 0x2a2   : > { %10380 = shalt.err (!%p10377_p11)
}
 0x2a3   : > { %s12752_s12 = scalar_lea.sflag [#allocation44], %s11532_s0  ;;  %s12753_s2 = sld [smem:[#allocation152_spill]] }
 0x2a4   : > { %9062 = dma.hbm_to_vmem [thread:$0]  (%p11294_p4), %s3104_s1, 16, %s3106_s27, %s12752_s12  }
 0x2a5   : > { %s3218_s4 = scalar_lea.vmem [#allocation48], %s11535_s15 }
 0x2a6   : > { %s3225_s7 = sshll.u32 %s3218_s4, 4  ;;  %s3226_s7 = int_to_ptr.vmem [resolvable:$true] %s3225_s7 }
 0x2a9   : > { %s3221_s9 = scalar_lea.hbm %s12753_s2, %s10637_s11  ;;  %s10401_s17 = scalar_lea.hbm %s12753_s2, 3 }
 0x2aa   : > { %s3223_s8 = sshll.u32 %s3221_s9, 4  ;;  %s3224_s8 = int_to_ptr.hbm [resolvable:$true] %s3223_s8 }
 0x2ab   : > { %s10395_s10 = sshra.s32 %s3224_s8, 4  ;;  %s10396_s10 = int_to_ptr.hbm [resolvable:$true] %s10395_s10 }
 0x2ac   : > { %s10397_s5 = scalar_lea.hbm %s10396_s10, 1  ;;  %p10402_p13 = scmp.lt.s32.totalorder %s10396_s10, %s12753_s2 }
 0x2ad   : > { %p10398_p9 = scmp.ne.s32.totalorder %s10396_s10, %s10397_s5  ;;  %p10403_p1 = scmp.lt.s32.totalorder %s10401_s17, %s10397_s5 }
 0x2af   : > { %p10399_p12 = pnand %p10398_p9, %p11294_p4  ;;  %p10404_p2 = por %p10403_p1, %p10402_p13 }
 0x2b1   : > { %p10400_p0 = pneg %p10399_p12 }
 0x2b3   : > { %p10405_p3 = pnand %p10404_p2, %p10400_p0 }
 0x2b5   : > { %10408 = shalt.err (!%p10405_p3)
}
 0x2b6   : > { %s12754_s1 = scalar_lea.sflag [#allocation47], %s11532_s0  ;;  %s12755_s27 = sld [smem:[#allocation161_spill]] }
 0x2b7   : > { %9064 = dma.hbm_to_vmem [thread:$0]  (%p11294_p4), %s3224_s8, 16, %s3226_s7, %s12754_s1  }
 0x2b8   : > { %s3306_s4 = scalar_lea.vmem [#allocation51], %s11535_s15 }
 0x2b9   : > { %s3313_s3 = sshll.u32 %s3306_s4, 4  ;;  %s3314_s3 = int_to_ptr.vmem [resolvable:$true] %s3313_s3 }
 0x2bc   : > { %s12756_s12 = smov %s12755_s27  ;;  %s3309_s9 = scalar_lea.hbm %s12755_s27, %s10637_s11 }
 0x2bd   : > { %s3311_s13 = sshll.u32 %s3309_s9, 4  ;;  %s10429_s17 = scalar_lea.hbm %s12756_s12, 3  ;;  %s3312_s13 = int_to_ptr.hbm [resolvable:$true] %s3311_s13 }
 0x2be   : > { %s10423_s10 = sshra.s32 %s3312_s13, 4  ;;  %s10424_s10 = int_to_ptr.hbm [resolvable:$true] %s10423_s10 }
 0x2bf   : > { %s10425_s5 = scalar_lea.hbm %s10424_s10, 1  ;;  %p10430_p9 = scmp.lt.s32.totalorder %s10424_s10, %s12756_s12 }
 0x2c0   : > { %p10426_p6 = scmp.ne.s32.totalorder %s10424_s10, %s10425_s5  ;;  %p10431_p12 = scmp.lt.s32.totalorder %s10429_s17, %s10425_s5 }
 0x2c2   : > { %p10427_p7 = pnand %p10426_p6, %p11294_p4  ;;  %p10432_p0 = por %p10431_p12, %p10430_p9 }
 0x2c4   : > { %p10428_p11 = pneg %p10427_p7 }
 0x2c6   : > { %p10433_p13 = pnand %p10432_p0, %p10428_p11 }
 0x2c8   : > { %10436 = shalt.err (!%p10433_p13)
}
 0x2c9   : > { %s12757_s8 = scalar_lea.sflag [#allocation50], %s11532_s0  ;;  %s12758_s7 = sld [smem:[#allocation169_spill]] }
 0x2ca   : > { %9066 = dma.hbm_to_vmem [thread:$0]  (%p11294_p4), %s3312_s13, 16, %s3314_s3, %s12757_s8  }
 0x2cb   : > { %s3387_s27 = scalar_lea.vmem [#allocation54], %s11535_s15 }
 0x2cc   : > { %s3394_s9 = sshll.u32 %s3387_s27, 4  ;;  %s3395_s9 = int_to_ptr.vmem [resolvable:$true] %s3394_s9 }
 0x2cf   : > { %s3390_s1 = scalar_lea.hbm %s12758_s7, %s10637_s11  ;;  %s10457_s17 = scalar_lea.hbm %s12758_s7, 3 }
 0x2d0   : > { %s3392_s4 = sshll.u32 %s3390_s1, 4  ;;  %s3393_s4 = int_to_ptr.hbm [resolvable:$true] %s3392_s4 }
 0x2d1   : > { %s10451_s10 = sshra.s32 %s3393_s4, 4  ;;  %s10452_s10 = int_to_ptr.hbm [resolvable:$true] %s10451_s10 }
 0x2d2   : > { %s10453_s5 = scalar_lea.hbm %s10452_s10, 1  ;;  %p10458_p6 = scmp.lt.s32.totalorder %s10452_s10, %s12758_s7 }
 0x2d3   : > { %p10454_p1 = scmp.ne.s32.totalorder %s10452_s10, %s10453_s5  ;;  %p10459_p7 = scmp.lt.s32.totalorder %s10457_s17, %s10453_s5 }
 0x2d5   : > { %p10455_p2 = pnand %p10454_p1, %p11294_p4  ;;  %p10460_p11 = por %p10459_p7, %p10458_p6 }
 0x2d7   : > { %p10456_p3 = pneg %p10455_p2 }
 0x2d9   : > { %p10461_p9 = pnand %p10460_p11, %p10456_p3 }
 0x2db   : > { %10464 = shalt.err (!%p10461_p9)
}
 0x2dc   : > { %s12759_s13 = scalar_lea.sflag [#allocation53], %s11532_s0  ;;  %s3432_s3 = scalar_lea.hbm %s12709_s28, %s10637_s11 }
 0x2dd   : > { %9068 = dma.hbm_to_vmem [thread:$0]  (%p11294_p4), %s3393_s4, 16, %s3395_s9, %s12759_s13  }
 0x2de   : > { %s3429_s8 = scalar_lea.vmem [#allocation57], %s11535_s15  ;;  %s3434_s27 = sshll.u32 %s3432_s3, 4  ;;  %s3435_s27 = int_to_ptr.hbm [resolvable:$true] %s3434_s27 }
 0x2df   : > { %s3436_s1 = sshll.u32 %s3429_s8, 4  ;;  %s10479_s10 = sshra.s32 %s3435_s27, 4  ;;  %s3437_s1 = int_to_ptr.vmem [resolvable:$true] %s3436_s1  ;;  %s10480_s10 = int_to_ptr.hbm [resolvable:$true] %s10479_s10 }
 0x2e0   : > { %s10481_s5 = scalar_lea.hbm %s10480_s10, 1  ;;  %s10485_s17 = scalar_lea.hbm %s12709_s28, 3 }
 0x2e1   : > { %p10482_p12 = scmp.ne.s32.totalorder %s10480_s10, %s10481_s5  ;;  %p10486_p1 = scmp.lt.s32.totalorder %s10480_s10, %s12709_s28 }
 0x2e2   : > { %p10487_p2 = scmp.lt.s32.totalorder %s10485_s17, %s10481_s5 }
 0x2e3   : > { %p10483_p0 = pnand %p10482_p12, %p11294_p4 }
 0x2e4   : > { %p10488_p3 = por %p10487_p2, %p10486_p1 }
 0x2e5   : > { %p10484_p13 = pneg %p10483_p0 }
 0x2e7   : > { %p10489_p6 = pnand %p10488_p3, %p10484_p13 }
 0x2e9   : > { %10492 = shalt.err (!%p10489_p6)
}
 0x2ea   : > { %s12760_s11 = scalar_lea.sflag [#allocation56], %s11532_s0 }
 0x2eb   : > { %9070 = dma.hbm_to_vmem [thread:$0]  (%p11294_p4), %s3435_s27, 16, %s3437_s1, %s12760_s11  }
 0x2ec PF: > { %3445 = sbr.rel (%p11308_p10) target bundleno = 7907 (0x1ee3), region = 408 }
 0x2f1   : > { %s12762_s9 = sld [smem:[#allocation176_spill]] }
 0x2f2   : > { %10552 = dma.done.wait (%p1194_p5), [#allocation8], 16  }
 0x2f3   : > { %10554 = vsyncadd (%p1194_p5), [#allocation8], 4294967280 }
 0x2f4   : > { %10556 = dma.done.wait (%p1194_p5), [#allocation11], 32  }
 0x2f5   : > { %10558 = vsyncadd (%p1194_p5), [#allocation11], 4294967264 }
 0x2f6   : > { %10560 = dma.done.wait (%p1194_p5), [#allocation14], 80  }
 0x2f7   : > { %10562 = vsyncadd (%p1194_p5), [#allocation14], 4294967216 }
 0x2f8   : > { %10564 = dma.done.wait (%p1194_p5), [#allocation17], 80  }
 0x2f9   : > { %10566 = vsyncadd (%p1194_p5), [#allocation17], 4294967216 }
 0x2fa   : > { %10568 = dma.done.wait (%p1194_p5), [#allocation20], 80  }
 0x2fb   : > { %10570 = vsyncadd (%p1194_p5), [#allocation20], 4294967216 }
 0x2fc   : > { %10572 = dma.done.wait (%p1194_p5), [#allocation23], 32  }
 0x2fd   : > { %10574 = vsyncadd (%p1194_p5), [#allocation23], 4294967264 }
 0x2fe   : > { %10576 = dma.done.wait (%p1194_p5), [#allocation26], 80  }
 0x2ff   : > { %10578 = vsyncadd (%p1194_p5), [#allocation26], 4294967216 }
 0x300   : > { %10580 = dma.done.wait (%p1194_p5), [#allocation29], 32  }
 0x301   : > { %10582 = vsyncadd (%p1194_p5), [#allocation29], 4294967264 }
 0x302   : > { %10584 = dma.done.wait (%p1194_p5), [#allocation32], 32  }
 0x303   : > { %10586 = vsyncadd (%p1194_p5), [#allocation32], 4294967264 }
 0x304   : > { %10588 = dma.done.wait (%p1194_p5), [#allocation35], 192  }
 0x305   : > { %10590 = vsyncadd (%p1194_p5), [#allocation35], 4294967104  ;;  %s12763_s26 = sld [smem:[#allocation174_spill]]  ;;  %s11741_s4 = sand.u32 1, %s12762_s9  }
 0x306   : > { %s3543_s3 = scalar_lea.sflag [#allocation38], %s11741_s4 }
 0x30b   : > { %s11744_s13 = sand.u32 1, %s12763_s26  }
 0x30c   : > { %12765 = sst [smem:[#allocation181_spill]] %s11744_s13 }
 0x30d   : > { %10592 = dma.done.wait (%p11303_p8), %s3543_s3, 32  }
 0x30e   : > { %10594 = vsyncadd (%p11303_p8), %s3543_s3, 4294967264  ;;  %s3561_s27 = scalar_lea.sflag [#allocation41], %s11741_s4 }
 0x30f   : > { %10596 = dma.done.wait (%p11303_p8), %s3561_s27, 32  }
 0x310   : > { %10598 = vsyncadd (%p11303_p8), %s3561_s27, 4294967264  ;;  %s3579_s17 = scalar_lea.sflag [#allocation44], %s11741_s4 }
 0x311   : > { %10600 = dma.done.wait (%p11303_p8), %s3579_s17, 32  }
 0x312   : > { %10602 = vsyncadd (%p11303_p8), %s3579_s17, 4294967264  ;;  %s3597_s26 = scalar_lea.sflag [#allocation47], %s11741_s4 }
 0x313   : > { %10604 = dma.done.wait (%p11303_p8), %s3597_s26, 32  }
 0x314   : > { %10606 = vsyncadd (%p11303_p8), %s3597_s26, 4294967264  ;;  %s3615_s5 = scalar_lea.sflag [#allocation50], %s11741_s4 }
 0x315   : > { %10608 = dma.done.wait (%p11303_p8), %s3615_s5, 32  }
 0x316   : > { %10610 = vsyncadd (%p11303_p8), %s3615_s5, 4294967264  ;;  %s3633_s1 = scalar_lea.sflag [#allocation53], %s11741_s4 }
 0x317   : > { %10612 = dma.done.wait (%p11303_p8), %s3633_s1, 32  }
 0x318   : > { %10614 = vsyncadd (%p11303_p8), %s3633_s1, 4294967264  ;;  %s3651_s10 = scalar_lea.sflag [#allocation56], %s11741_s4 }
 0x319   : > { %10616 = dma.done.wait (%p11303_p8), %s3651_s10, 32  }
 0x31a   : > { %10618 = vsyncadd (%p11303_p8), %s3651_s10, 4294967264  ;;  %s12767_s8 = sld [smem:[#allocation119_spill]]  ;;  %p4115_p4 = scmp.lt.s32.totalorder %s12762_s9, 2 }
 0x31b   : > { %s12768_s17 = sld [smem:[#allocation122_spill]] }
 0x31c   : > { %s12770_s15 = sld [smem:[#allocation123_spill]] }
 0x31d   : > { %s12771_s1 = sld [smem:[#allocation125_spill]] }
 0x31e   : > { %s12772_s11 = sld [smem:[#allocation126_spill]] }
 0x31f   : > { %s12773_s2 = sld [smem:[#allocation128_spill]] }
 0x320   : > { %s4116_s26 = scalar_select %p4115_p4, %s12762_s9, 2 }
 0x321   : > { %s12775_s4 = sld [smem:[#allocation131_spill]] }
 0x322   : > { %s11796_s27 = sshll.u32 %s4116_s26, 3  ;;  %s12777_s0 = sld [smem:[#allocation132_spill]] }
 0x323   : > { %12776 = sst [smem:[#allocation182_spill]] %s11796_s27  ;;  %s9018_s10 = smul.u32 24, %s4116_s26 }
 0x324   : > { %s12779_s16 = sld [smem:[#allocation134_spill]]  ;;  %s11800_s18 = sshll.u32 %s4116_s26, 4 }
 0x325   : > { %s12780_s19 = sld [smem:[#allocation135_spill]]  ;;  %s11803_s20 = scalar_lea.vmem %s12767_s8, %s9018_s10 }
 0x326   : > { %12781 = sst [smem:[#allocation183_spill]] %s11803_s20  ;;  %s11807_s22 = scalar_lea.vmem %s12768_s17, %s11800_s18 }
 0x327   : > { %12783 = sst [smem:[#allocation184_spill]] %s11807_s22  ;;  %s11809_s24 = sshll.u32 %s4116_s26, 5 }
 0x328   : > { %s12784_s23 = sld [smem:[#allocation137_spill]]  ;;  %s11815_s14 = scalar_lea.vmem %s12770_s15, %s11809_s24 }
 0x329   : > { %s12786_s5 = sld [smem:[#allocation141_spill]]  ;;  %s8993_s30 = sshll.u32 %s4116_s26, 7 }
 0x32a   : > { %12787 = sst [smem:[#allocation185_spill]] %s11815_s14  ;;  %s11818_s6 = scalar_lea.vmem %s12771_s1, %s8993_s30 }
 0x32b   : > { %s12788_s29 = sld [smem:[#allocation142_spill]]  ;;  %s11821_s20 = scalar_lea.vmem %s12772_s11, %s9018_s10 }
 0x32c   : > { %s12789_s8 = sld [smem:[#allocation143_spill]]  ;;  %s11823_s9 = sshll.u32 %s4116_s26, 2 }
 0x32d   : > { %12790 = sst [smem:[#allocation186_spill]] %s11818_s6  ;;  %s11826_s15 = scalar_lea.vmem %s12773_s2, %s9018_s10 }
 0x32e   : > { %s12791_s17 = sld [smem:[#allocation144_spill]]  ;;  %s11831_s1 = scalar_lea.vmem %s12775_s4, %s9018_s10 }
 0x32f   : > { %12792 = sst [smem:[#allocation187_spill]] %s11821_s20  ;;  %s11834_s6 = scalar_lea.vmem %s12777_s0, %s8993_s30 }
 0x330   : > { %s12793_s22 = sld [smem:[#allocation145_spill]]  ;;  %s11840_s13 = scalar_lea.vmem %s12779_s16, %s11809_s24 }
 0x331   : > { %12794 = sst [smem:[#allocation188_spill]] %s11826_s15  ;;  %s11843_s15 = scalar_lea.vmem %s12780_s19, %s9018_s10 }
 0x332   : > { %s12795_s3 = sld [smem:[#allocation146_spill]]  ;;  %s11855_s20 = scalar_lea.vmem %s12786_s5, %s11800_s18 }
 0x333   : > { %s12796_s14 = sld [smem:[#allocation147_spill]]  ;;  %s11863_s10 = scalar_lea.vmem %s12789_s8, %s11800_s18 }
 0x334   : > { %12797 = sst [smem:[#allocation189_spill]] %s11831_s1  ;;  %s11849_s1 = scalar_lea.vmem %s12784_s23, %s11809_s24 }
 0x335   : > { %12798 = sst [smem:[#allocation190_spill]] %s11834_s6  ;;  %s11867_s28 = scalar_lea.vmem %s12791_s17, %s11809_s24 }
 0x336   : > { %s12799_s11 = sld [smem:[#allocation148_spill]] }
 0x337   : > { %12801 = sst [smem:[#allocation191_spill]] %s11840_s13  ;;  %s11859_s13 = scalar_lea.vmem %s12788_s29, %s11800_s18 }
 0x338   : > { %s12802_s2 = sld [smem:[#allocation150_spill]]  ;;  %s11875_s0 = scalar_lea.vmem %s12795_s3, %s11800_s18 }
 0x339   : > { %12803 = sst [smem:[#allocation192_spill]] %s11843_s15  ;;  %s11871_s15 = scalar_lea.vmem %s12793_s22, %s11809_s24 }
 0x33a   : > { %s12804_s7 = sld [smem:[#allocation153_spill]]  ;;  %s11879_s29 = scalar_lea.vmem %s12796_s14, %s11809_s24 }
 0x33b   : > { %s12805_s4 = sld [smem:[#allocation154_spill]] }
 0x33c   : > { %12806 = sst [smem:[#allocation193_spill]] %s11849_s1  ;;  %s11883_s8 = scalar_lea.vmem %s12799_s11, %s11809_s24 }
 0x33d   : > { %s12807_s30 = sld [smem:[#allocation155_spill]] }
 0x33e   : > { %s12808_s12 = sld [smem:[#allocation156_spill]]  ;;  %s11889_s22 = scalar_lea.vmem %s12802_s2, %s11800_s18 }
 0x33f   : > { %12809 = sst [smem:[#allocation194_spill]] %s11855_s20 }
 0x340   : > { %s12810_s16 = sld [smem:[#allocation157_spill]]  ;;  %s11893_s1 = scalar_lea.vmem %s12804_s7, %s11800_s18 }
 0x341   : > { %s12811_s19 = sld [smem:[#allocation158_spill]] }
 0x342   : > { %12812 = sst [smem:[#allocation195_spill]] %s11863_s10 }
 0x343   : > { %s12813_s21 = sld [smem:[#allocation159_spill]]  ;;  %s4256_s14 = scalar_lea.vmem %s12807_s30, %s11823_s9 }
 0x344   : > { %12814 = sst [smem:[#allocation196_spill]] %s11867_s28 }
 0x345   : > { %s12815_s23 = sld [smem:[#allocation162_spill]] }
 0x346   : > { %s12816_s25 = sld [smem:[#allocation163_spill]]  ;;  %s11907_s20 = scalar_lea.vmem %s12810_s16, %s11800_s18 }
 0x347   : > { %12817 = sst [smem:[#allocation197_spill]] %s11875_s0  ;;  %s11897_s0 = scalar_lea.vmem %s12805_s4, %s11809_s24 }
 0x348   : > { %s12818_s5 = sld [smem:[#allocation164_spill]]  ;;  %s4270_s11 = scalar_lea.vmem %s12811_s19, %s11823_s9 }
 0x349   : > { %12819 = sst [smem:[#allocation198_spill]] %s11879_s29  ;;  %s11903_s29 = scalar_lea.vmem %s12808_s12, %s11809_s24 }
 0x34a   : > { %s12820_s6 = sld [smem:[#allocation165_spill]] }
 0x34b   : > { %12821 = sst [smem:[#allocation199_spill]] %s11883_s8  ;;  %s11913_s8 = scalar_lea.vmem %s12813_s21, %s11800_s18 }
 0x34c   : > { %s12822_s27 = sld [smem:[#allocation166_spill]]  ;;  %s11917_s26 = scalar_lea.vmem %s12815_s23, %s11800_s18 }
 0x34d   : > { %s12823_s10 = sld [smem:[#allocation167_spill]]  ;;  %s11921_s17 = scalar_lea.vmem %s12816_s25, %s11809_s24 }
 0x34e   : > { %12824 = sst [smem:[#allocation200_spill]] %s11889_s22  ;;  %s4289_s2 = scalar_lea.vmem %s12818_s5, %s11823_s9 }
 0x34f   : > { %s12825_s28 = sld [smem:[#allocation170_spill]] }
 0x350   : > { %12826 = sst [smem:[#allocation201_spill]] %s11893_s1  ;;  %s11927_s22 = scalar_lea.vmem %s12820_s6, %s11809_s24 }
 0x351   : > { %s12827_s3 = sld [smem:[#allocation181_spill]] }
 0x352   : > { %s11931_s7 = scalar_lea.vmem %s12822_s27, %s11800_s18  ;;  %s12828_s12 = sld [smem:[#allocation176_spill]] }
 0x353   : > { %s11935_s1 = scalar_lea.vmem %s12823_s10, %s11800_s18 }
 0x355   : > { %s11939_s4 = scalar_lea.vmem %s12825_s28, %s11800_s18 }
 0x357   : > { %s3662_s30 = scalar_lea.vmem [#allocation57], %s12827_s3 }
 0x358   : > { %p12829_p5 = scmp.ne.s32.totalorder %s12828_s12, 0 }
 0x359   : > { %s12830_s16 = sld [smem:[#allocation92_spill]] (!%p12829_p5) }
 0x35a   : > { %4313 = sbr.rel (%p12829_p5) target bundleno = 2422 (0x976), region = 544  ;;  %s12831_s19 = sld [smem:[#allocation114_spill]] (!%p12829_p5) }
 0x35b   : > { %s12832_s24 = sld [smem:[#allocation95_spill]] (!%p12829_p5) }
 0x35c   : > { %s12833_s28 = sld [smem:[#allocation99_spill]] (!%p12829_p5) }
 0x35d   : > { %s12834_s6 = sld [smem:[#allocation89_spill]] (!%p12829_p5) }
 0x35e   : > { %s12836_s27 = sld [smem:[#allocation96_spill]] (!%p12829_p5) }
 0x35f   : > { %v4319_v1 = vld [vmem:[%s12830_s16 + $0x8] sm:$0x1]  ;;  %vm4363_vm0 = vcmask 1040384   ;;  %v4318_v2 = vld [vmem:[%s12830_s16] sm:$0xff]  ;;  %vm4359_vm1 = vcmask 72704   ;;  %vm4388_vm2 = vcmask 23552  }
 0x360   : > { %v4315_v3 = vld [vmem:[%s12831_s19] sm:$0xff]  ;;  %8799 = vmatpush.msk.msra.mxu0 %vm4363_vm0, %v4319_v1  ;;  %v4314_v8 = vld [vmem:[#allocation36] sm:$0xff]  ;;  %vm4320_vm3 = vcmask 48128   ;;  %v10755_v10 = vmov 3.0   ;;  %v10756_v12 = vmov 6.0   ;;  %vm4446_vm9 = vcmask 1043456  }
 0x361   : > { %v4358_v4 = vmul.f32 %v4315_v3, %v4315_v3  ;;  %v4321_v9 = vsel %vm4320_vm3, %v4314_v8, 0.0  ;;  %9393 = vrcp.f32 %v10755_v10  ;;  %v4412_v14 = vld [vmem:[%s12832_s24 + $0x8] sm:$0x1]  ;;  %v4411_v15 = vld [vmem:[%s12832_s24] sm:$0xff]  ;;  %vm4442_vm10 = vcmask 97280   ;;  %s12837_s10 = sld [smem:[#allocation80_spill]] }
 0x362   : > { %4382 = vmatpush.msra.mxu0 %v4318_v2  ;;  %9395 = vrcp.f32 %v10756_v12  ;;  %8801 = vmatpush.msk.msra.mxu1 %vm4363_vm0, %v4412_v14  ;;  %v4596_v41 = vld [vmem:[%s12833_s28 + $0x8] sm:$0xf]  ;;  %v4595_v43 = vld [vmem:[%s12833_s28] sm:$0xff]  ;;  %vm4515_vm11 = vcmask 1045504   ;;  %s12838_s21 = sld [smem:[#allocation102_spill]] }
 0x363   : > { %8800 = vmatmul.msk.f32.vlgmr.msra.gmra.mxu0 %vm4359_vm1, %v4358_v4  ;;  %s12835_s18 = smov %s12834_s6  ;;  %v4441_v42 = vld [vmem:[%s12834_s6 + $0x8] sm:$0xf]  ;;  %v4484_v47 = vld [vmem:[#allocation27] sm:$0xf]  ;;  %s12839_s23 = sld [smem:[#allocation98_spill]] }
 0x364   : > { %4434 = vmatpush.msra.mxu1 %v4411_v15  ;;  %8803 = vmatpush.msk.msra.mxu2 %vm4446_vm9, %v4441_v42  ;;  %v4440_v44 = vld [vmem:[%s12835_s18] sm:$0xff]  ;;  %s12840_s25 = sld [smem:[#allocation101_spill]] }
 0x365   : > { %8805 = vmatpush.msk.msra.mxu3 %vm4446_vm9, %v4484_v47  ;;  %v4483_v51 = vld [vmem:[%s12836_s27] sm:$0x3f]  ;;  %s12841_s5 = sld [smem:[#allocation78_spill]] }
 0x366   : > { %8811 = vmatpush.msk.msrb.mxu1 %vm4446_vm9, %v4596_v41  ;;  %4465 = vmatpush.msra.mxu2 %v4440_v44  ;;  %s12842_s3 = sld [smem:[#allocation84_spill]] }
 0x367   : > { %v9394_v11 = vpop.eup %9393  ;;  %8807 = vmatpush.msk.msrb.mxu3 %vm4515_vm11, %v4483_v51  ;;  %s12843_s12 = sld [smem:[#allocation86_spill]] }
 0x368   : > { %v4393_v13 = vmul.f32 3.0, %v9394_v11  ;;  %v9396_v17 = vpop.eup %9395  ;;  %vm4397_vm4 = vweird.f32 %v9394_v11  ;;  %4618 = vmatpush.msrb.mxu1 %v4595_v43  ;;  %v11977_v15 = vld [vmem:[%s12838_s21 + $0x8] sm:$0xff] }
 0x369   : > { %v4325_v19 = vmul.f32 6.0, %v9396_v17  ;;  %vm4329_vm5 = vweird.f32 %v9396_v17 }
 0x36a   : > { %v4394_v16 = vsub.f32 1.0, %v4393_v13  ;;  %v11971_v13 = vld [vmem:[%s12838_s21] sm:$0xff] }
 0x36b   : > { %v4326_v21 = vsub.f32 1.0, %v4325_v19  ;;  %v4747_v14 = vmul.f32 %v11971_v13, %v11971_v13  ;;  %v4547_v19 = vld [vmem:[%s12839_s23 + $0x18] sm:$0xff] }
 0x36c   : > { %v4395_v18 = vmul.f32 %v9394_v11, %v4394_v16  ;;  %v4748_v16 = vmul.f32 %v11977_v15, %v11977_v15  ;;  %4568 = vmatpush.msrb.mxu0 %v4547_v19  ;;  %v4623_v19 = vld [vmem:[#allocation19] sm:$0xf] }
 0x36d   : > { %v4327_v23 = vmul.f32 %v9396_v17, %v4326_v21  ;;  %v4545_v21 = vld [vmem:[%s12839_s23 + $0x8] sm:$0xff]  ;;  %8813 = vmatpush.msk.msrb.mxu2 %vm4446_vm9, %v4623_v19 }
 0x36e   : > { %v4396_v20 = vadd.f32 %v9394_v11, %v4395_v18 }
 0x36f   : > { %v4328_v26 = vadd.f32 %v9396_v17, %v4327_v23  ;;  %v11993_v23 = vld [vmem:[%s12840_s25] sm:$0xff] }
 0x370   : > { %v4398_v22 = vsel %vm4397_vm4, %v9394_v11, %v4396_v20  ;;  %v9386_v11 = vld [vmem:[#allocation24] ss:$0 sm:$0xff]  ;;  %v4546_v20 = vld [vmem:[%s12839_s23 + $0x10] sm:$0xff] }
 0x371   : > { %v4330_v27 = vsel %vm4329_vm5, %v9396_v17, %v4328_v26  ;;  %vm4759_vm5 = vcmask 1042432   ;;  %v11983_v17 = vld [vmem:[%s12838_s21 + $0x10] sm:$0xff]  ;;  %4569 = vmatpush.msrb.mxu0 %v4546_v20  ;;  %v10757_v26 = vmov 0   ;;  %v9388_v20 = vld [vmem:[#allocation22] ss:$0 sm:$0xff] }
 0x372   : > { %v4749_v18 = vmul.f32 %v11983_v17, %v11983_v17  ;;  %9382 = vset.pattern.permute.xlu1 %v10757_v26  ;;  %9383 = vset.pattern.permute.xlu2 %v10757_v26 }
 0x373   : > { %4570 = vmatpush.msrb.mxu0 %v4545_v21  ;;  %9384 = vset.pattern.permute.xlu0 %v10757_v26 }
 0x3e0   : > { %v4384_v5 = vpop.f32.mrf.mxu0 }
 0x3e1   : > { %v4387_v6 = vmax.f32 %v4384_v5, 1e-08 }
 0x3e3   : > { %v4389_v7 = vsel %vm4388_vm2, %v4387_v6, 0.0 }
 0x3e4   : > { %4390 = vadd.xlane.f32.xlu0 %v4389_v7  ;;  %v9385_v7 = vld [vmem:[#allocation25] ss:$0 sm:$0xff] }
 0x3ec   : > { %4322 = vadd.xlane.f32.xlu0 %v4321_v9 }
 0x457   : > { %v4391_v24 = vpop.xlane.xlu0 %4390 }
 0x458   : > { %v4399_v25 = vmul.f32 %v4398_v22, %v4391_v24  ;;  %v4544_v22 = vld [vmem:[%s12839_s23] sm:$0xff] }
 0x459   : > { %4571 = vmatpush.msrb.mxu0 %v4544_v22 }
 0x45a   : > { %9397 = vrsqrt.f32 %v4399_v25  ;;  %vm4406_vm7 = vweird.f32 %v4399_v25 }
 0x45f   : > { %v4323_v28 = vpop.xlane.xlu0 %4322 }
 0x460   : > { %v9398_v29 = vpop.eup %9397  ;;  %v4331_v30 = vmul.f32 %v4330_v27, %v4323_v28 }
 0x461   : > { %v4401_v31 = vmul.f32 %v9398_v29, %v4399_v25  ;;  %vm4407_vm6 = vweird.f32 %v9398_v29 }
 0x462   : > { %v4332_v32 = vsub.f32 %v4314_v8, %v4331_v30  ;;  %vm4408_vm8 = vmor %vm4406_vm7, %vm4407_vm6  ;;  %v4661_v8 = vld [vmem:[%s12837_s10] sm:$0x7] }
 0x463   : > { %v4402_v33 = vmul.f32 %v9398_v29, %v4401_v31 }
 0x464   : > { %v4333_v34 = vmul.f32 %v4332_v32, %v4332_v32 }
 0x465   : > { %v4403_v35 = vmul.f32 0.5, %v4402_v33 }
 0x466   : > { %v4334_v36 = vsel %vm4320_vm3, %v4333_v34, 0.0 }
 0x467   : > { %v4404_v37 = vsub.f32 1.5, %v4403_v35  ;;  %4335 = vadd.xlane.f32.xlu1 %v4334_v36 }
 0x469   : > { %v4405_v38 = vmul.f32 %v9398_v29, %v4404_v37 }
 0x46b   : > { %v4409_v39 = vsel %vm4408_vm8, %v9398_v29, %v4405_v38  ;;  %v9387_v29 = vld [vmem:[#allocation21] ss:$0 sm:$0xff] }
 0x46c   : > { %v4410_v40 = vmul.f32 %v4409_v39, %v4315_v3 }
 0x46e   : > { %8802 = vmatmul.msk.f32.vlgmr.msra.gmra.mxu1 %vm4359_vm1, %v4410_v40  ;;  %vm4485_vm1 = vcmask 31744  }
 0x4da   : > { %v4336_v48 = vpop.xlane.xlu1 %4335 }
 0x4db   : > { %v4337_v49 = vmul.f32 %v4336_v48, %v4330_v27  ;;  %v11998_v27 = vld [vmem:[%s12840_s25 + $0x10] sm:$0xff] }
 0x4dd   : > { %v4338_v50 = vadd.f32 1e-05, %v4337_v49 }
 0x4df   : > { %9399 = vrsqrt.f32 %v4338_v50  ;;  %vm4345_vm12 = vweird.f32 %v4338_v50 }
 0x4e5   : > { %v9400_v52 = vpop.eup %9399 }
 0x4e6   : > { %v4340_v53 = vmul.f32 %v9400_v52, %v4338_v50  ;;  %vm4346_vm13 = vweird.f32 %v9400_v52 }
 0x4e7   : > { %vm4347_vm14 = vmor %vm4345_vm12, %vm4346_vm13 }
 0x4e8   : > { %v4341_v56 = vmul.f32 %v9400_v52, %v4340_v53 }
 0x4ea   : > { %v4342_v57 = vmul.f32 0.5, %v4341_v56 }
 0x4eb   : > { %v4436_v45 = vpop.f32.mrf.mxu1 }
 0x4ec   : > { %v4439_v46 = vmul.f32 %v4436_v45, %v4436_v45  ;;  %8812 = vmatmul.msk.f32.vlgmr.msrb.gmra.mxu1 %vm4442_vm10, %v4436_v45  ;;  %v4343_v60 = vsub.f32 1.5, %v4342_v57 }
 0x4ee   : > { %8804 = vmatmul.msk.f32.vlgmr.msra.gmra.mxu2 %vm4442_vm10, %v4439_v46  ;;  %v4344_v63 = vmul.f32 %v9400_v52, %v4343_v60  ;;  %v4654_v60 = vld [vmem:[%s12840_s25 + $0x8] sm:$0xff] }
 0x4f0   : > { %v4348_v2 = vsel %vm4347_vm14, %v9400_v52, %v4344_v63 }
 0x4f1   : > { %v4349_v5 = vmul.f32 %v4348_v2, %v4332_v32 }
 0x4f3   : > { %v4353_v10 = vmul.f32 %v9385_v7, %v4349_v5 }
 0x4f5   : > { %v4357_v12 = vadd.f32 %v9386_v11, %v4353_v10  ;;  %v4843_v10 = vld [vmem:[#allocation15] sm:$0x7] }
 0x4f6   : > { %8819 = vmatpush.msk.msra.mxu0 %vm4759_vm5, %v4843_v10 }
 0x571   : > { %v4467_v54 = vpop.f32.mrf.mxu2 }
 0x572   : > { %v4470_v55 = vmax.f32 %v4467_v54, 1e-08 }
 0x574   : > { %9401 = vrsqrt.f32 %v4470_v55  ;;  %vm4478_vm15 = vcmp.eq.f32.partialorder %v4470_v55, inf  ;;  %v4481_v4 = vand.u32 2147483648, %v4470_v55  ;;  %vm4480_vm4 = vcmp.eq.f32.partialorder %v4470_v55, 0.0 }
 0x57a   : > { %v9402_v58 = vpop.eup %9401 }
 0x57b   : > { %v4472_v59 = vmul.f32 %v9402_v58, %v4470_v55 }
 0x57d   : > { %v4473_v61 = vmul.f32 %v9402_v58, %v4472_v59 }
 0x57f   : > { %v4474_v62 = vmul.f32 0.5, %v4473_v61 }
 0x581   : > { %v4475_v0 = vsub.f32 1.5, %v4474_v62  ;;  %v10758_v62 = vmov 32.0  }
 0x583   : > { %v4476_v1 = vmul.f32 %v9402_v58, %v4475_v0 }
 0x585   : > { %v4477_v3 = vmul.f32 %v4476_v1, %v4470_v55 }
 0x587   : > { %v4479_v6 = vsel %vm4478_vm15, %v4470_v55, %v4477_v3 }
 0x588   : > { %v4482_v9 = vsel %vm4480_vm4, %v4481_v4, %v4479_v6 }
 0x589   : > { %8806 = vmatmul.msk.f32.vlgmr.msra.gmra.mxu3 %vm4485_vm1, %v4482_v9 }
 0x58a   : > { %8815 = vmatpush.msk.msra.mxu3 %vm4759_vm5, %v4661_v8 }
 0x591   : > { %8808 = vmatmul.msk.f32.vlgmr.msrb.gmra.mxu3 %vm4320_vm3, %v4357_v12  ;;  %vm4552_vm3 = vcmask 261120  }
 0x592   : > { %v4662_v24 = vsel %vm4552_vm3, %v11993_v23, 0.0  ;;  %v4668_v28 = vsel %vm4552_vm3, %v11998_v27, 0.0  ;;  %v4665_v61 = vsel %vm4552_vm3, %v4654_v60, 0.0 }
 0x593   : > { %4663 = vadd.xlane.f32.xlu0 %v4662_v24 }
 0x599   : > { %8816 = vmatmul.msk.f32.vlgmr.msra.gmra.mxu3 %vm4388_vm2, %v4747_v14 }
 0x59b   : > { %4669 = vadd.xlane.f32.xlu0 %v4668_v28 }
 0x5a1   : > { %8817 = vmatmul.msk.f32.gmra.mxu3 %vm4388_vm2, %v4748_v16 }
 0x5a9   : > { %8818 = vmatmul.msk.f32.gmra.mxu3 %vm4388_vm2, %v4749_v18 }
 0x606   : > { %v4664_v5 = vpop.xlane.xlu0 %4663 }
 0x60c   : > { %v4509_v25 = vpop.f32.mrf.mxu3 }
 0x60e   : > { %v4670_v11 = vpop.xlane.xlu0 %4669 }
 0x614   : > { %v4536_v30 = vpop.f32.mrf.mxu3 }
 0x615   : > { %v4537_v31 = vadd.f32 %v4536_v30, %v4509_v25 }
 0x617   : > { %v4543_v32 = vadd.f32 %v9387_v29, %v4537_v31 }
 0x619   : > { %4651 = vst.msk [vmem:[#allocation2] sm:$0xff] %vm4552_vm3, %v4543_v32  ;;  %8809 = vmatmul.msk.f32.vlgmr.msrb.gmra.mxu0 %vm4552_vm3, %v4543_v32 }
 0x61c   : > { %v4780_v33 = vpop.f32.mrf.mxu3 }
 0x61d   : > { %v4789_v34 = vmax.f32 %v4780_v33, 1e-08 }
 0x61f   : > { %9403 = vrsqrt.f32 %v4789_v34  ;;  %vm4801_vm7 = vweird.f32 %v4789_v34 }
 0x624   : > { %v4783_v35 = vpop.f32.mrf.mxu3 }
 0x625   : > { %v9404_v36 = vpop.eup %9403  ;;  %v4790_v37 = vmax.f32 %v4783_v35, 1e-08 }
 0x626   : > { %v4796_v38 = vmul.f32 %v9404_v36, %v4789_v34  ;;  %vm4802_vm6 = vweird.f32 %v9404_v36 }
 0x627   : > { %9405 = vrsqrt.f32 %v4790_v37  ;;  %vm4803_vm8 = vmor %vm4801_vm7, %vm4802_vm6  ;;  %vm4811_vm11 = vweird.f32 %v4790_v37 }
 0x628   : > { %v4797_v39 = vmul.f32 %v9404_v36, %v4796_v38 }
 0x62a   : > { %v4798_v40 = vmul.f32 0.5, %v4797_v39 }
 0x62c   : > { %v4799_v41 = vsub.f32 1.5, %v4798_v40  ;;  %v4786_v42 = vpop.f32.mrf.mxu3 }
 0x62d   : > { %v9406_v43 = vpop.eup %9405  ;;  %v4791_v44 = vmax.f32 %v4786_v42, 1e-08 }
 0x62e   : > { %v4806_v45 = vmul.f32 %v9406_v43, %v4790_v37  ;;  %v4800_v46 = vmul.f32 %v9404_v36, %v4799_v41  ;;  %vm4812_vm12 = vweird.f32 %v9406_v43 }
 0x62f   : > { %9407 = vrsqrt.f32 %v4791_v44  ;;  %vm4813_vm13 = vmor %vm4811_vm11, %vm4812_vm12  ;;  %vm4821_vm14 = vweird.f32 %v4791_v44 }
 0x630   : > { %v4807_v47 = vmul.f32 %v9406_v43, %v4806_v45  ;;  %v4804_v48 = vsel %vm4803_vm8, %v9404_v36, %v4800_v46  ;;  %9409 = vrcp.f32 %v10758_v62  ;;  %v4885_v45 = vld [vmem:[%s12841_s5] sm:$0x7] }
 0x631   : > { %4827 = vperm.xlu1 %9382, %v4804_v48   ;;  %8823 = vmatpush.msk.msra.mxu1 %vm4759_vm5, %v4885_v45  ;;  %v4963_v62 = vld [vmem:[%s12842_s3] sm:$0xff] }
 0x632   : > { %v4808_v49 = vmul.f32 0.5, %v4807_v47 }
 0x634   : > { %v4809_v50 = vsub.f32 1.5, %v4808_v49 }
 0x635   : > { %v9408_v51 = vpop.eup %9407 }
 0x636   : > { %v4816_v52 = vmul.f32 %v9408_v51, %v4791_v44  ;;  %v4810_v53 = vmul.f32 %v9406_v43, %v4809_v50  ;;  %vm4822_vm15 = vweird.f32 %v9408_v51  ;;  %v9410_v63 = vpop.eup %9409 }
 0x637   : > { %vm4823_vm4 = vmor %vm4821_vm14, %vm4822_vm15  ;;  %v4672_v0 = vmul.f32 32.0, %v9410_v63  ;;  %vm4676_vm6 = vweird.f32 %v9410_v63 }
 0x638   : > { %v4817_v54 = vmul.f32 %v9408_v51, %v4816_v52  ;;  %v4814_v55 = vsel %vm4813_vm13, %v9406_v43, %v4810_v53 }
 0x639   : > { %4832 = vperm.xlu2 %9383, %v4814_v55   ;;  %v4673_v1 = vsub.f32 1.0, %v4672_v0  ;;  %v4966_v55 = vld [vmem:[%s12842_s3 + $0x18] sm:$0xff]  ;;  %v5148_v0 = vld [vmem:[#allocation18] sm:$0x7] }
 0x63a   : > { %v4818_v56 = vmul.f32 0.5, %v4817_v54  ;;  %v12040_v54 = vld [vmem:[#allocation13] ss:$0 sm:$0xff]  ;;  %5028 = vmatpush.msrb.mxu3 %v4966_v55  ;;  %8840 = vmatpush.msk.msrb.mxu1 %vm4759_vm5, %v5148_v0 }
 0x63b   : > { %v4674_v2 = vmul.f32 %v9410_v63, %v4673_v1 }
 0x63c   : > { %v4819_v57 = vsub.f32 1.5, %v4818_v56  ;;  %v4965_v56 = vld [vmem:[%s12842_s3 + $0x10] sm:$0xff] }
 0x63d   : > { %v4675_v3 = vadd.f32 %v9410_v63, %v4674_v2  ;;  %5029 = vmatpush.msrb.mxu3 %v4965_v56 }
 0x63e   : > { %v4820_v58 = vmul.f32 %v9408_v51, %v4819_v57 }
 0x63f   : > { %v12006_v4 = vsel %vm4676_vm6, %v9410_v63, %v4675_v3 }
 0x640   : > { %v4824_v59 = vsel %vm4823_vm4, %v9408_v51, %v4820_v58  ;;  %v4678_v6 = vmul.f32 %v12006_v4, %v4664_v5  ;;  %v4680_v12 = vmul.f32 %v12006_v4, %v4670_v11 }
 0x641   : > { %4837 = vperm.xlu2 %9383, %v4824_v59  }
 0x642   : > { %v12010_v7 = vsub.f32 %v11993_v23, %v4678_v6  ;;  %v12018_v14 = vsub.f32 %v11998_v27, %v4680_v12 }
 0x644   : > { %v4684_v8 = vmul.f32 %v12010_v7, %v12010_v7  ;;  %v4686_v16 = vmul.f32 %v12018_v14, %v12018_v14 }
 0x646   : > { %v4687_v9 = vsel %vm4552_vm3, %v4684_v8, 0.0  ;;  %v4693_v18 = vsel %vm4552_vm3, %v4686_v16, 0.0  ;;  %v4620_v8 = vpop.f32.mrf.mxu1 }
 0x647   : > { %4688 = vadd.xlane.f32.xlu0 %v4687_v9 }
 0x64f   : > { %4694 = vadd.xlane.f32.xlu0 %v4693_v18 }
 0x66a   : > { %4666 = vadd.xlane.f32.xlu2 %v4665_v61  ;;  %v9390_v61 = vld [vmem:[#allocation12] ss:$0 sm:$0xff] }
 0x693   : > { %v4833_v28 = vpop.permute.xlu2 %4832 }
 0x694   : > { %v4841_v31 = vmul.f32 %v4833_v28, %v11977_v15 }
 0x696   : > { %v4573_v21 = vpop.f32.mrf.mxu0 }
 0x697   : > { %v4574_v22 = vadd.f32 %v9388_v20, %v4573_v21 }
 0x699   : > { %v8810_v23 = vmul.f32 -1.442695, %v4574_v22 }
 0x69b   : > { %9411 = vpow2.f32 %v8810_v23  ;;  %v4838_v36 = vpop.permute.xlu2 %4837 }
 0x69c   : > { %v4842_v39 = vmul.f32 %v4838_v36, %v11983_v17 }
 0x6a1   : > { %v9412_v24 = vpop.eup %9411 }
 0x6a2   : > { %v4579_v25 = vadd.f32 1.0, %v9412_v24 }
 0x6a3   : > { %v4828_v26 = vpop.permute.xlu1 %4827 }
 0x6a4   : > { %9413 = vrcp.f32 %v4579_v25  ;;  %v4840_v27 = vmul.f32 %v4828_v26, %v11971_v13  ;;  %v4591_v33 = vand.u32 2147483648, %v4579_v25  ;;  %v4589_v35 = vand.u32 2147483647, %v4579_v25 }
 0x6a5   : > { %vm4585_vm7 = vweird.f32 %v4579_v25 }
 0x6a6   : > { %8820 = vmatmul.msk.f32.vlgmr.msra.gmra.mxu0 %vm4388_vm2, %v4840_v27  ;;  %v4592_v13 = vor.u32 1.1754944e-38, %v4591_v33  ;;  %vm4590_vm11 = vcmp.eq.f32.partialorder %v4589_v35, 8.507059e+37 }
 0x6aa   : > { %v9414_v29 = vpop.eup %9413 }
 0x6ab   : > { %v4581_v30 = vmul.f32 %v9414_v29, %v4579_v25  ;;  %vm4586_vm9 = vweird.f32 %v9414_v29 }
 0x6ac   : > { %vm4587_vm8 = vmor %vm4585_vm7, %vm4586_vm9  ;;  %vm4968_vm9 = vcmask 7168  }
 0x6ad   : > { %v4582_v32 = vsub.f32 1.0, %v4581_v30 }
 0x6ae   : > { %8821 = vmatmul.msk.f32.gmra.mxu0 %vm4388_vm2, %v4841_v31 }
 0x6af   : > { %v4583_v34 = vmul.f32 %v9414_v29, %v4582_v32 }
 0x6b1   : > { %v4584_v37 = vadd.f32 %v9414_v29, %v4583_v34 }
 0x6b3   : > { %v4588_v38 = vsel %vm4587_vm8, %v9414_v29, %v4584_v37 }
 0x6b4   : > { %v4593_v40 = vsel %vm4590_vm11, %v4592_v13, %v4588_v38 }
 0x6b5   : > { %8814 = vmatmul.msk.f32.vlgmr.msrb.gmra.mxu2 %vm4485_vm1, %v4593_v40 }
 0x6b6   : > { %8822 = vmatmul.msk.f32.gmra.mxu0 %vm4388_vm2, %v4842_v39  ;;  %v4967_v39 = vld [vmem:[#allocation16] sm:$0x1] }
 0x6b7   : > { %8827 = vmatpush.msk.msra.mxu2 %vm4363_vm0, %v4967_v39 }
 0x6ba   : > { %v4689_v17 = vpop.xlane.xlu0 %4688 }
 0x6bb   : > { %v4696_v46 = vmul.f32 %v4689_v17, %v12006_v4 }
 0x6bd   : > { %v4699_v47 = vadd.f32 1e-05, %v4696_v46 }
 0x6bf   : > { %9415 = vrsqrt.f32 %v4699_v47  ;;  %vm4708_vm1 = vweird.f32 %v4699_v47 }
 0x6c2   : > { %v4695_v11 = vpop.xlane.xlu0 %4694 }
 0x6c3   : > { %v4698_v12 = vmul.f32 %v4695_v11, %v12006_v4  ;;  %v5049_v11 = vld [vmem:[%s12843_s12] sm:$0xff] }
 0x6c5   : > { %v9416_v48 = vpop.eup %9415  ;;  %v4701_v16 = vadd.f32 1e-05, %v4698_v12 }
 0x6c6   : > { %v4703_v49 = vmul.f32 %v9416_v48, %v4699_v47  ;;  %vm4709_vm12 = vweird.f32 %v9416_v48 }
 0x6c7   : > { %vm4710_vm13 = vmor %vm4708_vm1, %vm4709_vm12  ;;  %9417 = vrsqrt.f32 %v4701_v16  ;;  %vm4728_vm14 = vweird.f32 %v4701_v16 }
 0x6c8   : > { %v4704_v50 = vmul.f32 %v9416_v48, %v4703_v49 }
 0x6ca   : > { %v4705_v51 = vmul.f32 0.5, %v4704_v50 }
 0x6cc   : > { %v4706_v52 = vsub.f32 1.5, %v4705_v51 }
 0x6cd   : > { %v9418_v19 = vpop.eup %9417 }
 0x6ce   : > { %v4707_v53 = vmul.f32 %v9416_v48, %v4706_v52  ;;  %v4723_v22 = vmul.f32 %v9418_v19, %v4701_v16  ;;  %vm4729_vm15 = vweird.f32 %v9418_v19  ;;  %v9391_v16 = vld [vmem:[#allocation10] ss:$0 sm:$0xff] }
 0x6cf   : > { %vm4730_vm6 = vmor %vm4728_vm14, %vm4729_vm15 }
 0x6d0   : > { %v4711_v57 = vsel %vm4710_vm13, %v9416_v48, %v4707_v53  ;;  %v4724_v23 = vmul.f32 %v9418_v19, %v4723_v22  ;;  %vm5055_vm13 = vcmask 130048  }
 0x6d1   : > { %v4732_v58 = vmul.f32 %v4711_v57, %v12010_v7 }
 0x6d2   : > { %v4725_v25 = vmul.f32 0.5, %v4724_v23 }
 0x6d3   : > { %v4738_v59 = vmul.f32 %v12040_v54, %v4732_v58 }
 0x6d4   : > { %v4726_v28 = vsub.f32 1.5, %v4725_v25 }
 0x6d5   : > { %v4744_v63 = vadd.f32 %v9390_v61, %v4738_v59 }
 0x6d6   : > { %v4727_v31 = vmul.f32 %v9418_v19, %v4726_v28 }
 0x6d8   : > { %v4731_v34 = vsel %vm4730_vm6, %v9418_v19, %v4727_v31 }
 0x6d9   : > { %v4734_v37 = vmul.f32 %v4731_v34, %v12018_v14 }
 0x6db   : > { %v4740_v13 = vmul.f32 %v12040_v54, %v4734_v37 }
 0x6dd   : > { %v4667_v15 = vpop.xlane.xlu2 %4666  ;;  %v4746_v38 = vadd.f32 %v9390_v61, %v4740_v13 }
 0x6de   : > { %v4679_v41 = vmul.f32 %v12006_v4, %v4667_v15 }
 0x6e0   : > { %v12032_v42 = vsub.f32 %v4654_v60, %v4679_v41  ;;  %v4964_v60 = vld [vmem:[%s12842_s3 + $0x8] sm:$0xff] }
 0x6e1   : > { %5030 = vmatpush.msrb.mxu3 %v4964_v60 }
 0x6e2   : > { %v4685_v43 = vmul.f32 %v12032_v42, %v12032_v42 }
 0x6e3   : > { %5031 = vmatpush.msrb.mxu3 %v4963_v62 }
 0x6e4   : > { %v4690_v44 = vsel %vm4552_vm3, %v4685_v43, 0.0  ;;  %8831 = vmatmul.msk.f32.vlgmr.msrb.gmra.mxu3 %vm4552_vm3, %v4744_v63 }
 0x6e5   : > { %4691 = vadd.xlane.f32.xlu1 %v4690_v44 }
 0x723   : > { %v4873_v1 = vpop.f32.mrf.mxu0 }
 0x724   : > { %v4882_v2 = vmul.f32 %v4873_v1, %v4873_v1 }
 0x726   : > { %8824 = vmatmul.msk.f32.vlgmr.msra.gmra.mxu1 %vm4388_vm2, %v4882_v2 }
 0x72b   : > { %v4876_v3 = vpop.f32.mrf.mxu0 }
 0x72c   : > { %v4883_v5 = vmul.f32 %v4876_v3, %v4876_v3 }
 0x72e   : > { %8825 = vmatmul.msk.f32.gmra.mxu1 %vm4388_vm2, %v4883_v5 }
 0x733   : > { %v4879_v6 = vpop.f32.mrf.mxu0 }
 0x734   : > { %v4884_v7 = vmul.f32 %v4879_v6, %v4879_v6 }
 0x736   : > { %8826 = vmatmul.msk.f32.gmra.mxu1 %vm4388_vm2, %v4884_v7 }
 0x738   : > { %v4647_v9 = vpop.f32.mrf.mxu2 }
 0x739   : > { %v4650_v10 = vmul.f32 %v4647_v9, %v4620_v8 }
 0x73b   : > { %4652 = vst.msk [vmem:[#allocation3] sm:$0xff] %vm4442_vm10, %v4650_v10  ;;  %v5050_v10 = vld [vmem:[%s12843_s12 + $0x8] sm:$0xff] }
 0x73c   : > { %5079 = vmatpush.msrb.mxu0 %v5050_v10 }
 0x73e   : > { %8841 = vmatmul.msk.f32.vlgmr.msrb.gmra.mxu1 %vm4388_vm2, %v4873_v1  ;;  %5080 = vmatpush.msrb.mxu0 %v5049_v11 }
 0x746   : > { %8842 = vmatmul.msk.f32.gmra.mxu1 %vm4388_vm2, %v4876_v3 }
 0x74e   : > { %8843 = vmatmul.msk.f32.gmra.mxu1 %vm4388_vm2, %v4879_v6 }
 0x758   : > { %v4692_v18 = vpop.xlane.xlu1 %4691 }
 0x759   : > { %v4697_v20 = vmul.f32 %v4692_v18, %v12006_v4 }
 0x75b   : > { %v4700_v21 = vadd.f32 1e-05, %v4697_v20 }
 0x75d   : > { %9419 = vrsqrt.f32 %v4700_v21  ;;  %vm4718_vm10 = vweird.f32 %v4700_v21 }
 0x763   : > { %v9420_v24 = vpop.eup %9419 }
 0x764   : > { %v4713_v26 = vmul.f32 %v9420_v24, %v4700_v21  ;;  %vm4719_vm5 = vweird.f32 %v9420_v24 }
 0x765   : > { %vm4720_vm4 = vmor %vm4718_vm10, %vm4719_vm5 }
 0x766   : > { %v4714_v27 = vmul.f32 %v9420_v24, %v4713_v26 }
 0x767   : > { %v5033_v12 = vpop.f32.mrf.mxu3 }
 0x768   : > { %v4715_v29 = vmul.f32 0.5, %v4714_v27 }
 0x76a   : > { %v4716_v30 = vsub.f32 1.5, %v4715_v29  ;;  %v5187_v29 = vld [vmem:[#allocation7] sm:$0x1] }
 0x76b   : > { %8844 = vmatpush.msk.msrb.mxu2 %vm4363_vm0, %v5187_v29 }
 0x76c   : > { %v4717_v32 = vmul.f32 %v9420_v24, %v4716_v30  ;;  %v9392_v30 = vld [vmem:[#allocation6] ss:$0 sm:$0xff] }
 0x76e   : > { %v4721_v4 = vsel %vm4720_vm4, %v9420_v24, %v4717_v32 }
 0x76f   : > { %v4733_v33 = vmul.f32 %v4721_v4, %v12032_v42 }
 0x771   : > { %v4739_v35 = vmul.f32 %v12040_v54, %v4733_v33 }
 0x773   : > { %v4745_v36 = vadd.f32 %v9390_v61, %v4739_v35 }
 0x775   : > { %8832 = vmatmul.msk.f32.gmra.mxu3 %vm4552_vm3, %v4745_v36 }
 0x77d   : > { %8833 = vmatmul.msk.f32.gmra.mxu3 %vm4552_vm3, %v4746_v38 }
 0x7a3   : > { %v4915_v40 = vpop.f32.mrf.mxu1 }
 0x7a4   : > { %v4924_v15 = vmax.f32 %v4915_v40, 1e-08 }
 0x7a6   : > { %9421 = vrsqrt.f32 %v4924_v15  ;;  %vm4934_vm3 = vcmp.eq.f32.partialorder %v4924_v15, inf  ;;  %v4937_v53 = vand.u32 2147483648, %v4924_v15  ;;  %vm4936_vm7 = vcmp.eq.f32.partialorder %v4924_v15, 0.0 }
 0x7ab   : > { %v4918_v41 = vpop.f32.mrf.mxu1 }
 0x7ac   : > { %v9422_v42 = vpop.eup %9421  ;;  %v4925_v43 = vmax.f32 %v4918_v41, 1e-08 }
 0x7ad   : > { %v4928_v44 = vmul.f32 %v9422_v42, %v4924_v15 }
 0x7ae   : > { %9423 = vrsqrt.f32 %v4925_v43  ;;  %vm4946_vm8 = vcmp.eq.f32.partialorder %v4925_v43, inf  ;;  %v4949_v63 = vand.u32 2147483648, %v4925_v43  ;;  %vm4948_vm11 = vcmp.eq.f32.partialorder %v4925_v43, 0.0 }
 0x7af   : > { %v4929_v45 = vmul.f32 %v9422_v42, %v4928_v44 }
 0x7b1   : > { %v4930_v14 = vmul.f32 0.5, %v4929_v45 }
 0x7b3   : > { %v4921_v17 = vpop.f32.mrf.mxu1  ;;  %v4931_v46 = vsub.f32 1.5, %v4930_v14 }
 0x7b4   : > { %v9424_v47 = vpop.eup %9423  ;;  %v4926_v48 = vmax.f32 %v4921_v17, 1e-08 }
 0x7b5   : > { %v4932_v49 = vmul.f32 %v9422_v42, %v4931_v46  ;;  %v4940_v50 = vmul.f32 %v9424_v47, %v4925_v43 }
 0x7b6   : > { %9425 = vrsqrt.f32 %v4926_v48  ;;  %vm4958_vm1 = vcmp.eq.f32.partialorder %v4926_v48, inf  ;;  %v4961_v7 = vand.u32 2147483648, %v4926_v48  ;;  %vm4960_vm12 = vcmp.eq.f32.partialorder %v4926_v48, 0.0 }
 0x7b7   : > { %v4933_v51 = vmul.f32 %v4932_v49, %v4924_v15  ;;  %v4941_v52 = vmul.f32 %v9424_v47, %v4940_v50 }
 0x7b9   : > { %v4935_v54 = vsel %vm4934_vm3, %v4924_v15, %v4933_v51  ;;  %v4942_v55 = vmul.f32 0.5, %v4941_v52 }
 0x7ba   : > { %v4938_v56 = vsel %vm4936_vm7, %v4937_v53, %v4935_v54 }
 0x7bb   : > { %8828 = vmatmul.msk.f32.vlgmr.msra.gmra.mxu2 %vm4968_vm9, %v4938_v56  ;;  %v4943_v57 = vsub.f32 1.5, %v4942_v55 }
 0x7bc   : > { %v9426_v58 = vpop.eup %9425 }
 0x7bd   : > { %v4944_v59 = vmul.f32 %v9424_v47, %v4943_v57  ;;  %v4952_v60 = vmul.f32 %v9426_v58, %v4926_v48 }
 0x7bf   : > { %v4945_v61 = vmul.f32 %v4944_v59, %v4925_v43  ;;  %v4953_v62 = vmul.f32 %v9426_v58, %v4952_v60 }
 0x7c1   : > { %v4947_v0 = vsel %vm4946_vm8, %v4925_v43, %v4945_v61  ;;  %v4954_v1 = vmul.f32 0.5, %v4953_v62 }
 0x7c2   : > { %v4950_v2 = vsel %vm4948_vm11, %v4949_v63, %v4947_v0 }
 0x7c3   : > { %8829 = vmatmul.msk.f32.gmra.mxu2 %vm4968_vm9, %v4950_v2  ;;  %v4955_v3 = vsub.f32 1.5, %v4954_v1 }
 0x7c5   : > { %v4956_v5 = vmul.f32 %v9426_v58, %v4955_v3 }
 0x7c7   : > { %v4957_v6 = vmul.f32 %v4956_v5, %v4926_v48 }
 0x7c9   : > { %v4959_v8 = vsel %vm4958_vm1, %v4926_v48, %v4957_v6 }
 0x7ca   : > { %v4962_v9 = vsel %vm4960_vm12, %v4961_v7, %v4959_v8  ;;  %v5178_v8 = vpop.f32.mrf.mxu1 }
 0x7cb   : > { %8830 = vmatmul.msk.f32.gmra.mxu2 %vm4968_vm9, %v4962_v9 }
 0x7d2   : > { %v5181_v11 = vpop.f32.mrf.mxu1 }
 0x7f8   : > { %v5036_v21 = vpop.f32.mrf.mxu3 }
 0x800   : > { %v5039_v25 = vpop.f32.mrf.mxu3 }
 0x83e   : > { %v4998_v18 = vpop.f32.mrf.mxu2 }
 0x83f   : > { %v5034_v19 = vadd.f32 %v5033_v12, %v4998_v18  ;;  %v5184_v18 = vpop.f32.mrf.mxu1 }
 0x841   : > { %v5046_v20 = vadd.f32 %v9391_v16, %v5034_v19 }
 0x843   : > { %5229 = vst.msk [vmem:[#allocation4] sm:$0xff] %vm5055_vm13, %v5046_v20  ;;  %8834 = vmatmul.msk.f32.vlgmr.msrb.gmra.mxu0 %vm5055_vm13, %v5046_v20 }
 0x846   : > { %v5001_v22 = vpop.f32.mrf.mxu2 }
 0x847   : > { %v5037_v23 = vadd.f32 %v5036_v21, %v5001_v22 }
 0x849   : > { %v5047_v24 = vadd.f32 %v9391_v16, %v5037_v23 }
 0x84b   : > { %5230 = vst.msk [vmem:[#allocation4 + $0x8] sm:$0xff] %vm5055_vm13, %v5047_v24  ;;  %8835 = vmatmul.msk.f32.gmra.mxu0 %vm5055_vm13, %v5047_v24 }
 0x84e   : > { %v5004_v26 = vpop.f32.mrf.mxu2 }
 0x84f   : > { %v5040_v27 = vadd.f32 %v5039_v25, %v5004_v26 }
 0x851   : > { %v5048_v28 = vadd.f32 %v9391_v16, %v5040_v27 }
 0x853   : > { %5231 = vst.msk [vmem:[#allocation4 + $0x10] sm:$0xff] %vm5055_vm13, %v5048_v28  ;;  %8836 = vmatmul.msk.f32.gmra.mxu0 %vm5055_vm13, %v5048_v28 }
 0x8c0   : > { %v5082_v31 = vpop.f32.mrf.mxu0 }
 0x8c1   : > { %v5083_v32 = vadd.f32 %v9392_v30, %v5082_v31 }
 0x8c3   : > { %v8837_v4 = vmul.f32 -1.442695, %v5083_v32 }
 0x8c5   : > { %9427 = vpow2.f32 %v8837_v4 }
 0x8c8   : > { %v5085_v33 = vpop.f32.mrf.mxu0 }
 0x8c9   : > { %v5086_v34 = vadd.f32 %v9392_v30, %v5085_v33 }
 0x8cb   : > { %v9428_v35 = vpop.eup %9427  ;;  %v8838_v36 = vmul.f32 -1.442695, %v5086_v34 }
 0x8cc   : > { %v5100_v37 = vadd.f32 1.0, %v9428_v35 }
 0x8cd   : > { %9429 = vpow2.f32 %v8838_v36 }
 0x8ce   : > { %9431 = vrcp.f32 %v5100_v37  ;;  %v5114_v44 = vand.u32 2147483648, %v5100_v37  ;;  %v5112_v14 = vand.u32 2147483647, %v5100_v37  ;;  %vm5108_vm10 = vweird.f32 %v5100_v37 }
 0x8d0   : > { %v5088_v13 = vpop.f32.mrf.mxu0  ;;  %v5115_v49 = vor.u32 1.1754944e-38, %v5114_v44  ;;  %vm5113_vm14 = vcmp.eq.f32.partialorder %v5112_v14, 8.507059e+37 }
 0x8d1   : > { %v5089_v38 = vadd.f32 %v9392_v30, %v5088_v13 }
 0x8d3   : > { %v9430_v39 = vpop.eup %9429  ;;  %v8839_v40 = vmul.f32 -1.442695, %v5089_v38 }
 0x8d4   : > { %v9432_v15 = vpop.eup %9431  ;;  %v5101_v41 = vadd.f32 1.0, %v9430_v39 }
 0x8d5   : > { %v5104_v42 = vmul.f32 %v9432_v15, %v5100_v37  ;;  %9433 = vpow2.f32 %v8839_v40  ;;  %vm5109_vm0 = vweird.f32 %v9432_v15 }
 0x8d6   : > { %9435 = vrcp.f32 %v5101_v41  ;;  %vm5110_vm5 = vmor %vm5108_vm10, %vm5109_vm0  ;;  %v5129_v54 = vand.u32 2147483648, %v5101_v41  ;;  %v5127_v56 = vand.u32 2147483647, %v5101_v41  ;;  %vm5123_vm4 = vweird.f32 %v5101_v41 }
 0x8d7   : > { %v5105_v43 = vsub.f32 1.0, %v5104_v42 }
 0x8d8   : > { %v5130_v59 = vor.u32 1.1754944e-38, %v5129_v54  ;;  %vm5128_vm3 = vcmp.eq.f32.partialorder %v5127_v56, 8.507059e+37 }
 0x8d9   : > { %v5106_v45 = vmul.f32 %v9432_v15, %v5105_v43 }
 0x8db   : > { %v9434_v17 = vpop.eup %9433  ;;  %v5107_v46 = vadd.f32 %v9432_v15, %v5106_v45 }
 0x8dc   : > { %v9436_v47 = vpop.eup %9435  ;;  %v5102_v48 = vadd.f32 1.0, %v9434_v17 }
 0x8dd   : > { %v5111_v50 = vsel %vm5110_vm5, %v9432_v15, %v5107_v46  ;;  %v5119_v51 = vmul.f32 %v9436_v47, %v5101_v41  ;;  %vm5124_vm15 = vweird.f32 %v9436_v47 }
 0x8de   : > { %9437 = vrcp.f32 %v5102_v48  ;;  %v5116_v52 = vsel %vm5113_vm14, %v5115_v49, %v5111_v50  ;;  %vm5125_vm6 = vmor %vm5123_vm4, %vm5124_vm15  ;;  %v5144_v0 = vand.u32 2147483648, %v5102_v48  ;;  %v5142_v2 = vand.u32 2147483647, %v5102_v48 }
 0x8df   : > { %8845 = vmatmul.msk.f32.vlgmr.msrb.gmra.mxu2 %vm4968_vm9, %v5116_v52  ;;  %v5120_v53 = vsub.f32 1.0, %v5119_v51  ;;  %vm5138_vm8 = vweird.f32 %v5102_v48 }
 0x8e0   : > { %v5145_v5 = vor.u32 1.1754944e-38, %v5144_v0  ;;  %vm5143_vm1 = vcmp.eq.f32.partialorder %v5142_v2, 8.507059e+37 }
 0x8e1   : > { %v5121_v55 = vmul.f32 %v9436_v47, %v5120_v53 }
 0x8e3   : > { %v5122_v57 = vadd.f32 %v9436_v47, %v5121_v55 }
 0x8e4   : > { %v9438_v58 = vpop.eup %9437 }
 0x8e5   : > { %v5126_v60 = vsel %vm5125_vm6, %v9436_v47, %v5122_v57  ;;  %v5134_v61 = vmul.f32 %v9438_v58, %v5102_v48  ;;  %vm5139_vm7 = vweird.f32 %v9438_v58 }
 0x8e6   : > { %v5131_v62 = vsel %vm5128_vm3, %v5130_v59, %v5126_v60  ;;  %vm5140_vm11 = vmor %vm5138_vm8, %vm5139_vm7 }
 0x8e7   : > { %8846 = vmatmul.msk.f32.gmra.mxu2 %vm4968_vm9, %v5131_v62  ;;  %v5135_v63 = vsub.f32 1.0, %v5134_v61 }
 0x8e9   : > { %v5136_v1 = vmul.f32 %v9438_v58, %v5135_v63 }
 0x8eb   : > { %v5137_v3 = vadd.f32 %v9438_v58, %v5136_v1 }
 0x8ed   : > { %v5141_v6 = vsel %vm5140_vm11, %v9438_v58, %v5137_v3 }
 0x8ee   : > { %v5146_v7 = vsel %vm5143_vm1, %v5145_v5, %v5141_v6 }
 0x8ef   : > { %8847 = vmatmul.msk.f32.gmra.mxu2 %vm4968_vm9, %v5146_v7 }
 0x962   : > { %v5217_v9 = vpop.f32.mrf.mxu2 }
 0x963   : > { %v5226_v10 = vmul.f32 %v5217_v9, %v5178_v8 }
 0x965   : > { %5232 = vst.msk [vmem:[#allocation5] sm:$0xff] %vm4388_vm2, %v5226_v10 }
 0x96a   : > { %v5220_v12 = vpop.f32.mrf.mxu2 }
 0x96b   : > { %v5227_v16 = vmul.f32 %v5220_v12, %v5181_v11 }
 0x96d   : > { %5233 = vst.msk [vmem:[#allocation5 + $0x8] sm:$0xff] %vm4388_vm2, %v5227_v16 }
 0x972   : > { %v5223_v19 = vpop.f32.mrf.mxu2 }
 0x973   : > { %v5228_v20 = vmul.f32 %v5223_v19, %v5184_v18 }
 0x975   : > { %5234 = vst.msk [vmem:[#allocation5 + $0x10] sm:$0xff] %vm4388_vm2, %v5228_v20 }
 0x976 PF: > { %s12844_s19 = sld [smem:[#allocation140_spill]]  ;;  %v5256_v21 = vld [vmem:[%s11859_s13 + $0x8] sm:$0xf]  ;;  %vm5261_vm9 = vcmask 1043456   ;;  %v5255_v22 = vld [vmem:[%s11859_s13] sm:$0xff]  ;;  %vm5257_vm12 = vcmask 97280  }
 0x977   : > { %v5236_v23 = vld [vmem:[#allocation3] sm:$0xff]  ;;  %8848 = vmatpush.msk.msra.mxu0 %vm5261_vm9, %v5256_v21  ;;  %vm5296_vm13 = vcmask 1042432   ;;  %vm5286_vm2 = vcmask 23552   ;;  %s12846_s13 = sld [smem:[#allocation117_spill]]  ;;  %v5241_v26 = vld [vmem:[#allocation5 + $0x8] sm:$0xff]  ;;  %v5513_v28 = vld [vmem:[%s11871_s15 + $0x18] sm:$0xff] }
 0x978   : > { %v5240_v25 = vld [vmem:[#allocation5] sm:$0xff]  ;;  %s12847_s27 = sld [smem:[#allocation194_spill]]  ;;  %v5512_v29 = vld [vmem:[%s11871_s15 + $0x10] sm:$0xff]  ;;  %v5510_v31 = vld [vmem:[%s11871_s15] sm:$0xff]  ;;  %vm5514_vm0 = vcmask 261120   ;;  %vm5326_vm10 = vcmask 64512  }
 0x979   : > { %5280 = vmatpush.msra.mxu0 %v5255_v22  ;;  %v5511_v30 = vld [vmem:[%s11871_s15 + $0x8] sm:$0xff]  ;;  %v5235_v32 = vld [vmem:[#allocation2] sm:$0xff]  ;;  %s12848_s10 = sld [smem:[#allocation199_spill]]  ;;  %vm5432_vm5 = vcmask 220160   ;;  %v5237_v8 = vld [vmem:[#allocation4] sm:$0xff]  ;;  %vm5540_vm14 = vcmask 130048  }
 0x97a   : > { %8849 = vmatmul.msk.f32.vlgmr.msra.gmra.mxu0 %vm5257_vm12, %v5236_v23  ;;  %s12849_s15 = sld [smem:[#allocation115_spill]]  ;;  %vm5667_vm15 = vcmask 1040384   ;;  %v5238_v11 = vld [vmem:[#allocation4 + $0x8] sm:$0xff]  ;;  %v5239_v16 = vld [vmem:[#allocation4 + $0x10] sm:$0xff]  ;;  %vm5657_vm6 = vcmask 72704  }
 0x97b   : > { %s12850_s5 = sld [smem:[#allocation193_spill]] }
 0x97c   : > { %s12845_s6 = scalar_lea.vmem %s12844_s19, %s11823_s9  ;;  %v5242_v27 = vld [vmem:[#allocation5 + $0x10] sm:$0xff]  ;;  %s12851_s19 = sld [smem:[#allocation196_spill]] }
 0x97d   : > { %v5285_v24 = vld [vmem:[%s12845_s6] sm:$0x7]  ;;  %v5245_v4 = vld [vmem:[%s12846_s13 + $0x10] sm:$0xff]  ;;  %v5244_v38 = vld [vmem:[%s12846_s13 + $0x8] sm:$0xff]  ;;  %s12852_s6 = sld [smem:[#allocation195_spill]] }
 0x97e   : > { %8850 = vmatpush.msk.msra.mxu1 %vm5296_vm13, %v5285_v24  ;;  %v5363_v34 = vld [vmem:[%s12847_s27 + $0x8] sm:$0xf]  ;;  %v5362_v35 = vld [vmem:[%s12847_s27] sm:$0xff]  ;;  %s12853_s27 = sld [smem:[#allocation197_spill]] }
 0x97f   : > { %8851 = vmatmul.msk.f32.vlgmr.msra.gmra.mxu1 %vm5286_vm2, %v5240_v25  ;;  %v5243_v37 = vld [vmem:[%s12846_s13] sm:$0xff]  ;;  %v5810_v15 = vld [vmem:[%s12848_s10 + $0x18] sm:$0x7]  ;;  %v5809_v17 = vld [vmem:[%s12848_s10 + $0x10] sm:$0xff] }
 0x980   : > { %5530 = vmatpush.msrb.mxu1 %v5513_v28  ;;  %v5246_v42 = vld [vmem:[%s12849_s15] sm:$0xff]  ;;  %v12109_v44 = vld [vmem:[%s12849_s15 + $0x8] sm:$0xff]  ;;  %v12114_v45 = vld [vmem:[%s12849_s15 + $0x10] sm:$0xff] }
 0x981   : > { %v5431_v14 = vld [vmem:[%s12850_s5 + $0x18] sm:$0x7]  ;;  %v5430_v46 = vld [vmem:[%s12850_s5 + $0x10] sm:$0xff]  ;;  %v5808_v47 = vld [vmem:[%s12848_s10 + $0x8] sm:$0xff] }
 0x982   : > { %5531 = vmatpush.msrb.mxu1 %v5512_v29  ;;  %v5429_v48 = vld [vmem:[%s12850_s5 + $0x8] sm:$0xff]  ;;  %v5807_v49 = vld [vmem:[%s12848_s10] sm:$0xff]  ;;  %v5605_v51 = vld [vmem:[%s12851_s19 + $0x18] sm:$0xff]  ;;  %s12854_s10 = sld [smem:[#allocation198_spill]] }
 0x983   : > { %v5428_v50 = vld [vmem:[%s12850_s5] sm:$0xff]  ;;  %v5604_v52 = vld [vmem:[%s12851_s19 + $0x10] sm:$0xff]  ;;  %v5603_v53 = vld [vmem:[%s12851_s19 + $0x8] sm:$0xff]  ;;  %s12855_s5 = sld [smem:[#allocation181_spill]] }
 0x984   : > { %5532 = vmatpush.msrb.mxu1 %v5511_v30  ;;  %v5602_v54 = vld [vmem:[%s12851_s19] sm:$0xff]  ;;  %v5539_v6 = vld [vmem:[%s12852_s6 + $0x8] sm:$0xff] }
 0x985   : > { %v5538_v7 = vld [vmem:[%s12852_s6] sm:$0xff]  ;;  %v5656_v10 = vld [vmem:[%s12853_s27 + $0x8] sm:$0x1]  ;;  %s12857_s6 = sld [smem:[#allocation136_spill]] }
 0x986   : > { %5533 = vmatpush.msrb.mxu1 %v5510_v31  ;;  %v5655_v12 = vld [vmem:[%s12853_s27] sm:$0xff] }
 0x987   : > { %8852 = vmatmul.msk.f32.gmra.mxu1 %vm5286_vm2, %v5241_v26 }
 0x989   : > { %s12856_s19 = scalar_lea.vmem [#allocation43], %s12855_s5  ;;  %s12858_s27 = scalar_lea.vmem [#allocation45], %s12855_s5 }
 0x98f   : > { %8853 = vmatmul.msk.f32.gmra.mxu1 %vm5286_vm2, %v5242_v27 }
 0x997   : > { %8866 = vmatmul.msk.f32.vlgmr.msrb.gmra.mxu1 %vm5514_vm0, %v5235_v32 }
 0x9f7   : > { %v5282_v33 = vpop.f32.mrf.mxu0 }
 0x9f8   : > { %5351 = vmatpush.msra.mxu2 %v5282_v33  ;;  %9017 = vmatpush.msra.mxu3 %v5282_v33 }
 0x9f9   : > { %8856 = vmatmul.msk.f32.vlgmr.msra.gmra.mxu3 %vm5326_vm10, %v5245_v4  ;;  %8854 = vmatmul.msk.f32.vlgmr.msra.gmra.mxu2 %vm5326_vm10, %v5243_v37 }
 0x9fa   : > { %8857 = vmatpush.msk.msrb.mxu3 %vm5261_vm9, %v5363_v34  ;;  %5564 = vmatpush.msrb.mxu2 %v5539_v6 }
 0x9fc   : > { %5382 = vmatpush.msrb.mxu3 %v5362_v35  ;;  %v5317_v36 = vpop.f32.mrf.mxu1  ;;  %5565 = vmatpush.msrb.mxu2 %v5538_v7 }
 0x9fe   : > { %8862 = vmatpush.msk.msra.mxu3 %vm5296_vm13, %v5431_v14 }
 0xa00   : > { %5458 = vmatpush.msra.mxu3 %v5430_v46 }
 0xa01   : > { %8858 = vmatmul.msk.f32.vlgmr.msrb.gmra.mxu3 %vm5257_vm12, %v5236_v23  ;;  %8855 = vmatmul.msk.f32.gmra.mxu2 %vm5326_vm10, %v5244_v38 }
 0xa02   : > { %5459 = vmatpush.msra.mxu3 %v5429_v48 }
 0xa04   : > { %v5320_v13 = vpop.f32.mrf.mxu1  ;;  %5460 = vmatpush.msra.mxu3 %v5428_v50  ;;  %v5709_v50 = vld [vmem:[%s12854_s10 + $0x10] sm:$0xff] }
 0xa09   : > { %8867 = vmatmul.msk.f32.vlgmr.msrb.gmra.mxu2 %vm5540_vm14, %v5237_v8 }
 0xa0c   : > { %v5323_v39 = vpop.f32.mrf.mxu1 }
 0xa11   : > { %8868 = vmatmul.msk.f32.gmra.mxu2 %vm5540_vm14, %v5238_v11 }
 0xa14   : > { %v5535_v40 = vpop.f32.mrf.mxu1 }
 0xa15   : > { %5591 = vmatpush.msra.mxu1 %v5535_v40 }
 0xa16   : > { %8870 = vmatmul.msk.f32.vlgmr.msra.gmra.mxu1 %vm5326_vm10, %v5243_v37 }
 0xa17   : > { %8887 = vmatpush.msk.msrb.mxu1 %vm5296_vm13, %v5810_v15 }
 0xa19   : > { %5836 = vmatpush.msrb.mxu1 %v5809_v17  ;;  %8869 = vmatmul.msk.f32.gmra.mxu2 %vm5540_vm14, %v5239_v16  ;;  %vm5850_vm14 = vcmask 31744  }
 0xa1b   : > { %5837 = vmatpush.msrb.mxu1 %v5808_v47 }
 0xa1d   : > { %5838 = vmatpush.msrb.mxu1 %v5807_v49  ;;  %v5710_v49 = vld [vmem:[%s12854_s10 + $0x18] sm:$0xff] }
 0xa1e   : > { %8871 = vmatmul.msk.f32.gmra.mxu1 %vm5326_vm10, %v5244_v38  ;;  %5736 = vmatpush.msra.mxu2 %v5710_v49 }
 0xa20   : > { %5737 = vmatpush.msra.mxu2 %v5709_v50 }
 0xa26   : > { %8872 = vmatmul.msk.f32.gmra.mxu1 %vm5326_vm10, %v5245_v4 }
 0xa7c   : > { %v5359_v41 = vpop.f32.mrf.mxu3  ;;  %v5353_v55 = vpop.f32.mrf.mxu2 }
 0xa7d   : > { %v5354_v56 = vadd.f32 %v5353_v55, %v5317_v36  ;;  %v5360_v1 = vadd.f32 %v5359_v41, %v5323_v39 }
 0xa84   : > { %v5384_v43 = vpop.f32.mrf.mxu3  ;;  %v5356_v59 = vpop.f32.mrf.mxu2 }
 0xa85   : > { %5411 = vmatpush.msrb.mxu0 %v5384_v43  ;;  %v5357_v61 = vadd.f32 %v5356_v59, %v5320_v13 }
 0xa86   : > { %8859 = vmatmul.msk.f32.vlgmr.msrb.gmra.mxu0 %vm5326_vm10, %v5246_v42 }
 0xa87   : > { %5618 = vmatpush.msra.mxu0 %v5605_v51  ;;  %v5708_v51 = vld [vmem:[%s12854_s10 + $0x8] sm:$0xff] }
 0xa88   : > { %5738 = vmatpush.msra.mxu2 %v5708_v51 }
 0xa89   : > { %5619 = vmatpush.msra.mxu0 %v5604_v52  ;;  %v5707_v52 = vld [vmem:[%s12854_s10] sm:$0xff]  ;;  %s12859_s10 = scalar_lea.vmem %s12857_s6, %s11823_s9  ;;  %s12878_s6 = sld [smem:[#allocation187_spill]] }
 0xa8a   : > { %5739 = vmatpush.msra.mxu2 %v5707_v52 }
 0xa8b   : > { %5620 = vmatpush.msra.mxu0 %v5603_v53 }
 0xa8c   : > { %v5567_v53 = vpop.f32.mrf.mxu2 }
 0xa8d   : > { %5621 = vmatpush.msra.mxu0 %v5602_v54 }
 0xa8e   : > { %8860 = vmatmul.msk.f32.gmra.mxu0 %vm5326_vm10, %v12109_v44 }
 0xa8f   : > { %8877 = vmatpush.msk.msrb.mxu0 %vm5667_vm15, %v5656_v10 }
 0xa91   : > { %5686 = vmatpush.msrb.mxu0 %v5655_v12 }
 0xa93   : > { %v5593_v54 = vpop.f32.mrf.mxu1 }
 0xa96   : > { %8861 = vmatmul.msk.f32.gmra.mxu0 %vm5326_vm10, %v12114_v45 }
 0xa9b   : > { %v5596_v59 = vpop.f32.mrf.mxu1 }
 0xa9e   : > { %8873 = vmatmul.msk.f32.vlgmr.msra.gmra.mxu0 %vm5514_vm0, %v5235_v32 }
 0xb03   : > { %v5413_v57 = vpop.f32.mrf.mxu0 }
 0xb04   : > { %v5422_v58 = vadd.f32 %v5413_v57, %v5354_v56  ;;  %v5594_v56 = vadd.f32 %v5593_v54, %v5567_v53  ;;  %v5570_v57 = vpop.f32.mrf.mxu2 }
 0xb06   : > { %v5425_v60 = vmul.f32 %v5422_v58, %v5422_v58  ;;  %8888 = vmatmul.msk.f32.vlgmr.msrb.gmra.mxu1 %vm5432_vm5, %v5422_v58 }
 0xb08   : > { %8863 = vmatmul.msk.f32.vlgmr.msra.gmra.mxu3 %vm5432_vm5, %v5425_v60  ;;  %v9440_v60 = vld [vmem:[%s12856_s19] ss:$0 sm:$0xff]  ;;  %s12861_s19 = sld [smem:[#allocation200_spill]] }
 0xb0b   : > { %v5416_v62 = vpop.f32.mrf.mxu0 }
 0xb0c   : > { %v5423_v63 = vadd.f32 %v5416_v62, %v5357_v61 }
 0xb0e   : > { %v5426_v0 = vmul.f32 %v5423_v63, %v5423_v63  ;;  %8889 = vmatmul.msk.f32.gmra.mxu1 %vm5432_vm5, %v5423_v63 }
 0xb10   : > { %8864 = vmatmul.msk.f32.gmra.mxu3 %vm5432_vm5, %v5426_v0  ;;  %v5597_v0 = vadd.f32 %v5596_v59, %v5570_v57 }
 0xb13   : > { %v5419_v2 = vpop.f32.mrf.mxu0 }
 0xb14   : > { %v5424_v3 = vadd.f32 %v5419_v2, %v5360_v1 }
 0xb16   : > { %v5427_v5 = vmul.f32 %v5424_v3, %v5424_v3  ;;  %8890 = vmatmul.msk.f32.gmra.mxu1 %vm5432_vm5, %v5424_v3  ;;  %v5573_v3 = vpop.f32.mrf.mxu2 }
 0xb18   : > { %8865 = vmatmul.msk.f32.gmra.mxu3 %vm5432_vm5, %v5427_v5  ;;  %v5599_v5 = vpop.f32.mrf.mxu1 }
 0xb19   : > { %v5600_v8 = vadd.f32 %v5599_v5, %v5573_v3 }
 0xb1b   : > { %v5623_v9 = vpop.f32.mrf.mxu0 }
 0xb1c   : > { %5641 = vmatpush.msrb.mxu3 %v5623_v9 }
 0xb20   : > { %8874 = vmatmul.msk.f32.vlgmr.msrb.gmra.mxu3 %vm5326_vm10, %v5246_v42 }
 0xb28   : > { %8875 = vmatmul.msk.f32.gmra.mxu3 %vm5326_vm10, %v12109_v44 }
 0xb30   : > { %8876 = vmatmul.msk.f32.gmra.mxu3 %vm5326_vm10, %v12114_v45 }
 0xb8b   : > { %v5462_v18 = vpop.f32.mrf.mxu3 }
 0xb8c   : > { %v5471_v19 = vmax.f32 %v5462_v18, 1e-08 }
 0xb8e   : > { %9454 = vrsqrt.f32 %v5471_v19  ;;  %vm5481_vm4 = vcmp.eq.f32.partialorder %v5471_v19, inf  ;;  %v5484_v33 = vand.u32 2147483648, %v5471_v19  ;;  %vm5483_vm3 = vcmp.eq.f32.partialorder %v5471_v19, 0.0 }
 0xb93   : > { %v5465_v20 = vpop.f32.mrf.mxu3 }
 0xb94   : > { %v9455_v21 = vpop.eup %9454  ;;  %v5472_v22 = vmax.f32 %v5465_v20, 1e-08  ;;  %v5849_v20 = vld [vmem:[%s12859_s10] sm:$0xf]  ;;  %s12874_s10 = scalar_lea.vmem [#allocation54], %s12855_s5 }
 0xb95   : > { %v5475_v23 = vmul.f32 %v9455_v21, %v5471_v19  ;;  %8891 = vmatpush.msk.msra.mxu3 %vm5261_vm9, %v5849_v20 }
 0xb96   : > { %9456 = vrsqrt.f32 %v5472_v22  ;;  %vm5493_vm7 = vcmp.eq.f32.partialorder %v5472_v22, inf  ;;  %v5496_v41 = vand.u32 2147483648, %v5472_v22  ;;  %vm5495_vm8 = vcmp.eq.f32.partialorder %v5472_v22, 0.0 }
 0xb97   : > { %v5476_v24 = vmul.f32 %v9455_v21, %v5475_v23 }
 0xb99   : > { %v5477_v25 = vmul.f32 0.5, %v5476_v24 }
 0xb9b   : > { %v5468_v26 = vpop.f32.mrf.mxu3  ;;  %v5478_v27 = vsub.f32 1.5, %v5477_v25 }
 0xb9c   : > { %v9457_v28 = vpop.eup %9456  ;;  %v5473_v29 = vmax.f32 %v5468_v26, 1e-08 }
 0xb9d   : > { %v5479_v30 = vmul.f32 %v9455_v21, %v5478_v27  ;;  %v5487_v31 = vmul.f32 %v9457_v28, %v5472_v22 }
 0xb9e   : > { %9458 = vrsqrt.f32 %v5473_v29  ;;  %vm5505_vm11 = vcmp.eq.f32.partialorder %v5473_v29, inf  ;;  %v5508_v46 = vand.u32 2147483648, %v5473_v29  ;;  %vm5507_vm1 = vcmp.eq.f32.partialorder %v5473_v29, 0.0 }
 0xb9f   : > { %v5480_v32 = vmul.f32 %v5479_v30, %v5471_v19  ;;  %v5488_v4 = vmul.f32 %v9457_v28, %v5487_v31  ;;  %v6019_v30 = vld [vmem:[%s11897_s0 + $0x10] sm:$0xff] }
 0xba1   : > { %v5482_v34 = vsel %vm5481_vm4, %v5471_v19, %v5480_v32  ;;  %v5489_v35 = vmul.f32 0.5, %v5488_v4  ;;  %v9441_v19 = vld [vmem:[%s12858_s27] ss:$0 sm:$0xff]  ;;  %v6018_v4 = vld [vmem:[%s11897_s0 + $0x8] sm:$0xff] }
 0xba2   : > { %v5485_v36 = vsel %vm5483_vm3, %v5484_v33, %v5482_v34 }
 0xba3   : > { %8878 = vmatmul.msk.f32.vlgmr.msrb.gmra.mxu0 %vm5657_vm6, %v5485_v36  ;;  %v5490_v37 = vsub.f32 1.5, %v5489_v35  ;;  %v5643_v55 = vpop.f32.mrf.mxu3  ;;  %v6017_v35 = vld [vmem:[%s11897_s0] sm:$0xff] }
 0xba4   : > { %v9459_v13 = vpop.eup %9458  ;;  %v5652_v58 = vadd.f32 %v5643_v55, %v5594_v56 }
 0xba5   : > { %v5491_v38 = vmul.f32 %v9457_v28, %v5490_v37  ;;  %v5499_v39 = vmul.f32 %v9459_v13, %v5473_v29 }
 0xba7   : > { %v5492_v40 = vmul.f32 %v5491_v38, %v5472_v22  ;;  %v5500_v15 = vmul.f32 %v9459_v13, %v5499_v39 }
 0xba9   : > { %v5494_v42 = vsel %vm5493_vm7, %v5472_v22, %v5492_v40  ;;  %v5501_v43 = vmul.f32 0.5, %v5500_v15 }
 0xbaa   : > { %v5497_v44 = vsel %vm5495_vm8, %v5496_v41, %v5494_v42 }
 0xbab   : > { %8879 = vmatmul.msk.f32.gmra.mxu0 %vm5657_vm6, %v5497_v44  ;;  %v5502_v45 = vsub.f32 1.5, %v5501_v43  ;;  %v5646_v62 = vpop.f32.mrf.mxu3 }
 0xbac   : > { %v5653_v2 = vadd.f32 %v5646_v62, %v5597_v0 }
 0xbad   : > { %v5503_v14 = vmul.f32 %v9459_v13, %v5502_v45 }
 0xbaf   : > { %v5504_v17 = vmul.f32 %v5503_v14, %v5473_v29 }
 0xbb1   : > { %v5506_v47 = vsel %vm5505_vm11, %v5473_v29, %v5504_v17  ;;  %v6020_v29 = vld [vmem:[%s11897_s0 + $0x18] sm:$0xff]  ;;  %s12860_s0 = sld [smem:[#allocation201_spill]] }
 0xbb2   : > { %v5509_v48 = vsel %vm5507_vm1, %v5508_v46, %v5506_v47  ;;  %6081 = vmatpush.msrb.mxu3 %v6020_v29 }
 0xbb3   : > { %8880 = vmatmul.msk.f32.gmra.mxu0 %vm5657_vm6, %v5509_v48  ;;  %v5649_v9 = vpop.f32.mrf.mxu3 }
 0xbb4   : > { %v5654_v11 = vadd.f32 %v5649_v9, %v5600_v8  ;;  %6082 = vmatpush.msrb.mxu3 %v6019_v30  ;;  %v5840_v8 = vpop.f32.mrf.mxu1  ;;  %v6021_v30 = vld [vmem:[%s4256_s14] sm:$0xf]  ;;  %s12864_s14 = sld [smem:[#allocation149_spill]] }
 0xbb5   : > { %8903 = vmatpush.msk.msra.mxu1 %vm5261_vm9, %v6021_v30  ;;  %v6412_v30 = vld [vmem:[%s11921_s17 + $0x18] sm:$0xff] }
 0xbb6   : > { %6083 = vmatpush.msrb.mxu3 %v6018_v4 }
 0xbb8   : > { %6084 = vmatpush.msrb.mxu3 %v6017_v35 }
 0xbba   : > { %s12866_s27 = scalar_lea.vmem %s12864_s14, %s11823_s9  ;;  %s12880_s14 = sld [smem:[#allocation182_spill]] }
 0xc20   : > { %v5688_v61 = vpop.f32.mrf.mxu0 }
 0xc21   : > { %v5697_v63 = vadd.f32 %v5688_v61, %v5652_v58  ;;  %v5896_v58 = vld [vmem:[%s12860_s0 + $0x8] sm:$0xf] }
 0xc22   : > { %8895 = vmatpush.msk.msra.mxu0 %vm5261_vm9, %v5896_v58 }
 0xc23   : > { %v12155_v1 = vadd.f32 %v9440_v60, %v5697_v63 }
 0xc25   : > { %8881 = vmatmul.msk.f32.vlgmr.msra.gmra.mxu2 %vm5514_vm0, %v12155_v1  ;;  %v5892_v3 = vmax.f32 %v12155_v1, 0.0  ;;  %v5843_v1 = vpop.f32.mrf.mxu1 }
 0xc28   : > { %v5691_v6 = vpop.f32.mrf.mxu0 }
 0xc29   : > { %v5698_v7 = vadd.f32 %v5691_v6, %v5653_v2 }
 0xc2b   : > { %v12159_v10 = vadd.f32 %v9440_v60, %v5698_v7  ;;  %v5895_v7 = vld [vmem:[%s12860_s0] sm:$0xff]  ;;  %s12875_s0 = scalar_lea.vmem [#allocation52], %s12855_s5 }
 0xc2c   : > { %5924 = vmatpush.msra.mxu0 %v5895_v7 }
 0xc2d   : > { %8882 = vmatmul.msk.f32.gmra.mxu2 %vm5514_vm0, %v12159_v10  ;;  %v5893_v5 = vmax.f32 %v12159_v10, 0.0 }
 0xc30   : > { %v5694_v12 = vpop.f32.mrf.mxu0 }
 0xc31   : > { %v5699_v16 = vadd.f32 %v5694_v12, %v5654_v11 }
 0xc33   : > { %v12163_v18 = vadd.f32 %v9440_v60, %v5699_v16  ;;  %v5939_v16 = vld [vmem:[%s12861_s19 + $0x8] sm:$0xf] }
 0xc34   : > { %8899 = vmatpush.msk.msrb.mxu2 %vm5261_vm9, %v5939_v16 }
 0xc35   : > { %8883 = vmatmul.msk.f32.gmra.mxu2 %vm5514_vm0, %v12163_v18  ;;  %v5894_v6 = vmax.f32 %v12163_v18, 0.0  ;;  %v5846_v18 = vpop.f32.mrf.mxu1 }
 0xca8   : > { %v5741_v21 = vpop.f32.mrf.mxu2 }
 0xca9   : > { %v5742_v22 = vadd.f32 %v9441_v19, %v5741_v21  ;;  %v5938_v21 = vld [vmem:[%s12861_s19] sm:$0xff]  ;;  %s12877_s19 = sld [smem:[#allocation183_spill]] }
 0xcaa   : > { %5967 = vmatpush.msrb.mxu2 %v5938_v21  ;;  %v6242_v21 = vld [vmem:[%s12866_s27] sm:$0xf] }
 0xcab   : > { %v8884_v23 = vmul.f32 -1.442695, %v5742_v22  ;;  %v6203_v22 = vld [vmem:[%s11907_s20 + $0x8] sm:$0xf]  ;;  %8920 = vmatpush.msk.msrb.mxu1 %vm5261_vm9, %v6242_v21 }
 0xcac   : > { %8916 = vmatpush.msk.msra.mxu2 %vm5261_vm9, %v6203_v22 }
 0xcad   : > { %9460 = vpow2.f32 %v8884_v23  ;;  %v6202_v23 = vld [vmem:[%s11907_s20] sm:$0xff]  ;;  %s12863_s20 = scalar_lea.vmem [#allocation46], %s12855_s5 }
 0xcae   : > { %6231 = vmatpush.msra.mxu2 %v6202_v23 }
 0xcb0   : > { %v5744_v24 = vpop.f32.mrf.mxu2 }
 0xcb1   : > { %v5745_v25 = vadd.f32 %v9441_v19, %v5744_v24 }
 0xcb3   : > { %v9461_v26 = vpop.eup %9460  ;;  %v8885_v27 = vmul.f32 -1.442695, %v5745_v25 }
 0xcb4   : > { %v5759_v28 = vadd.f32 1.0, %v9461_v26 }
 0xcb5   : > { %9462 = vpow2.f32 %v8885_v27 }
 0xcb6   : > { %9464 = vrcp.f32 %v5759_v28  ;;  %v5773_v39 = vand.u32 2147483648, %v5759_v28  ;;  %v5771_v15 = vand.u32 2147483647, %v5759_v28  ;;  %vm5767_vm2 = vweird.f32 %v5759_v28 }
 0xcb8   : > { %v5747_v31 = vpop.f32.mrf.mxu2  ;;  %v5774_v45 = vor.u32 1.1754944e-38, %v5773_v39  ;;  %vm5772_vm15 = vcmp.eq.f32.partialorder %v5771_v15, 8.507059e+37 }
 0xcb9   : > { %v5748_v32 = vadd.f32 %v9441_v19, %v5747_v31 }
 0xcbb   : > { %v9463_v33 = vpop.eup %9462  ;;  %v8886_v34 = vmul.f32 -1.442695, %v5748_v32 }
 0xcbc   : > { %v9465_v36 = vpop.eup %9464  ;;  %v5760_v37 = vadd.f32 1.0, %v9463_v33  ;;  %v6105_v33 = vld [vmem:[%s11903_s29 + $0x18] sm:$0xff] }
 0xcbd   : > { %v5763_v13 = vmul.f32 %v9465_v36, %v5759_v28  ;;  %9466 = vpow2.f32 %v8886_v34  ;;  %vm5768_vm13 = vweird.f32 %v9465_v36  ;;  %6131 = vmatpush.msrb.mxu0 %v6105_v33  ;;  %v6410_v33 = vld [vmem:[%s11921_s17 + $0x8] sm:$0xff] }
 0xcbe   : > { %9468 = vrcp.f32 %v5760_v37  ;;  %vm5769_vm5 = vmor %vm5767_vm2, %vm5768_vm13  ;;  %v5788_v48 = vand.u32 2147483648, %v5760_v37  ;;  %v5786_v50 = vand.u32 2147483647, %v5760_v37  ;;  %vm5782_vm6 = vweird.f32 %v5760_v37 }
 0xcbf   : > { %v5764_v38 = vsub.f32 1.0, %v5763_v13 }
 0xcc0   : > { %v5789_v53 = vor.u32 1.1754944e-38, %v5788_v48  ;;  %vm5787_vm7 = vcmp.eq.f32.partialorder %v5786_v50, 8.507059e+37 }
 0xcc1   : > { %v5765_v40 = vmul.f32 %v9465_v36, %v5764_v38 }
 0xcc3   : > { %v9467_v41 = vpop.eup %9466  ;;  %v5766_v42 = vadd.f32 %v9465_v36, %v5765_v40 }
 0xcc4   : > { %v9469_v43 = vpop.eup %9468  ;;  %v5761_v44 = vadd.f32 1.0, %v9467_v41 }
 0xcc5   : > { %v5770_v14 = vsel %vm5769_vm5, %v9465_v36, %v5766_v42  ;;  %v5778_v17 = vmul.f32 %v9469_v43, %v5760_v37  ;;  %vm5783_vm4 = vweird.f32 %v9469_v43 }
 0xcc6   : > { %9470 = vrcp.f32 %v5761_v44  ;;  %v5775_v46 = vsel %vm5772_vm15, %v5774_v45, %v5770_v14  ;;  %vm5784_vm3 = vmor %vm5782_vm6, %vm5783_vm4  ;;  %v5803_v59 = vand.u32 2147483648, %v5761_v44  ;;  %v5801_v61 = vand.u32 2147483647, %v5761_v44 }
 0xcc7   : > { %8892 = vmatmul.msk.f32.vlgmr.msra.gmra.mxu3 %vm5850_vm14, %v5775_v46  ;;  %v5779_v47 = vsub.f32 1.0, %v5778_v17  ;;  %vm5797_vm11 = vweird.f32 %v5761_v44 }
 0xcc8   : > { %v5804_v63 = vor.u32 1.1754944e-38, %v5803_v59  ;;  %vm5802_vm13 = vcmp.eq.f32.partialorder %v5801_v61, 8.507059e+37 }
 0xcc9   : > { %v5780_v49 = vmul.f32 %v9469_v43, %v5779_v47 }
 0xccb   : > { %v5781_v51 = vadd.f32 %v9469_v43, %v5780_v49 }
 0xccc   : > { %v9471_v52 = vpop.eup %9470 }
 0xccd   : > { %v5785_v54 = vsel %vm5784_vm3, %v9469_v43, %v5781_v51  ;;  %v5793_v55 = vmul.f32 %v9471_v52, %v5761_v44  ;;  %vm5798_vm8 = vweird.f32 %v9471_v52 }
 0xcce   : > { %v5790_v56 = vsel %vm5787_vm7, %v5789_v53, %v5785_v54  ;;  %vm5799_vm1 = vmor %vm5797_vm11, %vm5798_vm8 }
 0xccf   : > { %8893 = vmatmul.msk.f32.gmra.mxu3 %vm5850_vm14, %v5790_v56  ;;  %v5794_v57 = vsub.f32 1.0, %v5793_v55 }
 0xcd1   : > { %v5795_v60 = vmul.f32 %v9471_v52, %v5794_v57 }
 0xcd3   : > { %v5796_v62 = vadd.f32 %v9471_v52, %v5795_v60 }
 0xcd5   : > { %v5800_v0 = vsel %vm5799_vm1, %v9471_v52, %v5796_v62 }
 0xcd6   : > { %v5805_v2 = vsel %vm5802_vm13, %v5804_v63, %v5800_v0  ;;  %v6104_v63 = vld [vmem:[%s11903_s29 + $0x10] sm:$0xff]  ;;  %v6103_v0 = vld [vmem:[%s11903_s29 + $0x8] sm:$0xff] }
 0xcd7   : > { %8894 = vmatmul.msk.f32.gmra.mxu3 %vm5850_vm14, %v5805_v2  ;;  %6132 = vmatpush.msrb.mxu0 %v6104_v63  ;;  %v6102_v2 = vld [vmem:[%s11903_s29] sm:$0xff]  ;;  %s12865_s29 = scalar_lea.vmem [#allocation48], %s12855_s5 }
 0xcd9   : > { %6133 = vmatpush.msrb.mxu0 %v6103_v0 }
 0xcdb   : > { %6134 = vmatpush.msrb.mxu0 %v6102_v2 }
 0xcdf   : > { %8907 = vmatmul.msk.f32.vlgmr.msrb.gmra.mxu3 %vm5514_vm0, %v5892_v3 }
 0xce7   : > { %8908 = vmatmul.msk.f32.gmra.mxu3 %vm5514_vm0, %v5893_v5  ;;  %v9442_v5 = vld [vmem:[%s12863_s20] ss:$0 sm:$0xff]  ;;  %s12879_s20 = sld [smem:[#allocation124_spill]] }
 0xced   : > { %s12882_s27 = scalar_lea.vmem %s12879_s20, %s12880_s14  ;;  %s12895_s20 = scalar_lea.vmem [#allocation40], %s12855_s5 }
 0xcef   : > { %8909 = vmatmul.msk.f32.gmra.mxu3 %vm5514_vm0, %v5894_v6 }
 0xd4a   : > { %v5880_v9 = vpop.f32.mrf.mxu3 }
 0xd4b   : > { %v5889_v11 = vmul.f32 %v5880_v9, %v5840_v8 }
 0xd4d   : > { %8896 = vmatmul.msk.f32.vlgmr.msra.gmra.mxu0 %vm5257_vm12, %v5889_v11 }
 0xd52   : > { %v5883_v12 = vpop.f32.mrf.mxu3 }
 0xd53   : > { %v5890_v10 = vmul.f32 %v5883_v12, %v5843_v1 }
 0xd55   : > { %8897 = vmatmul.msk.f32.gmra.mxu0 %vm5257_vm12, %v5890_v10 }
 0xd5a   : > { %v5886_v19 = vpop.f32.mrf.mxu3 }
 0xd5b   : > { %v5891_v20 = vmul.f32 %v5886_v19, %v5846_v18 }
 0xd5d   : > { %8898 = vmatmul.msk.f32.gmra.mxu0 %vm5257_vm12, %v5891_v20  ;;  %v9443_v20 = vld [vmem:[%s12865_s29] ss:$0 sm:$0xff]  ;;  %s12881_s29 = sld [smem:[#allocation186_spill]] }
 0xd62   : > { %v6086_v3 = vpop.f32.mrf.mxu3 }
 0xd6a   : > { %v6089_v9 = vpop.f32.mrf.mxu3 }
 0xd72   : > { %v6092_v16 = vpop.f32.mrf.mxu3 }
 0xdca   : > { %v5926_v24 = vpop.f32.mrf.mxu0 }
 0xdcb   : > { %v5935_v25 = vmul.f32 %v5926_v24, %v5926_v24 }
 0xdcd   : > { %8900 = vmatmul.msk.f32.vlgmr.msrb.gmra.mxu2 %vm5257_vm12, %v5935_v25 }
 0xdd2   : > { %v5929_v26 = vpop.f32.mrf.mxu0 }
 0xdd3   : > { %v5936_v27 = vmul.f32 %v5929_v26, %v5929_v26 }
 0xdd5   : > { %8901 = vmatmul.msk.f32.gmra.mxu2 %vm5257_vm12, %v5936_v27 }
 0xdda   : > { %v5932_v28 = vpop.f32.mrf.mxu0 }
 0xddb   : > { %v5937_v29 = vmul.f32 %v5932_v28, %v5932_v28 }
 0xddd   : > { %8902 = vmatmul.msk.f32.gmra.mxu2 %vm5257_vm12, %v5937_v29 }
 0xde5   : > { %8917 = vmatmul.msk.f32.vlgmr.msra.gmra.mxu2 %vm5257_vm12, %v5926_v24 }
 0xded   : > { %8918 = vmatmul.msk.f32.gmra.mxu2 %vm5257_vm12, %v5929_v26 }
 0xdf5   : > { %8919 = vmatmul.msk.f32.gmra.mxu2 %vm5257_vm12, %v5932_v28 }
 0xe50   : > { %v5969_v31 = vpop.f32.mrf.mxu2 }
 0xe51   : > { %v5978_v32 = vmax.f32 %v5969_v31, 1e-08  ;;  %v6411_v31 = vld [vmem:[%s11921_s17 + $0x10] sm:$0xff] }
 0xe53   : > { %9472 = vrsqrt.f32 %v5978_v32  ;;  %vm5988_vm2 = vcmp.eq.f32.partialorder %v5978_v32, inf  ;;  %v5991_v45 = vand.u32 2147483648, %v5978_v32  ;;  %vm5990_vm5 = vcmp.eq.f32.partialorder %v5978_v32, 0.0 }
 0xe58   : > { %v5972_v4 = vpop.f32.mrf.mxu2 }
 0xe59   : > { %v9473_v34 = vpop.eup %9472  ;;  %v5979_v35 = vmax.f32 %v5972_v4, 1e-08 }
 0xe5a   : > { %v5982_v36 = vmul.f32 %v9473_v34, %v5978_v32 }
 0xe5b   : > { %9474 = vrsqrt.f32 %v5979_v35  ;;  %vm6000_vm15 = vcmp.eq.f32.partialorder %v5979_v35, inf  ;;  %v6003_v53 = vand.u32 2147483648, %v5979_v35  ;;  %vm6002_vm4 = vcmp.eq.f32.partialorder %v5979_v35, 0.0 }
 0xe5c   : > { %v5983_v37 = vmul.f32 %v9473_v34, %v5982_v36  ;;  %v6409_v36 = vld [vmem:[%s11921_s17] sm:$0xff]  ;;  %s12883_s17 = sld [smem:[#allocation118_spill]] }
 0xe5e   : > { %v5984_v13 = vmul.f32 0.5, %v5983_v37 }
 0xe60   : > { %v5975_v38 = vpop.f32.mrf.mxu2  ;;  %v5985_v39 = vsub.f32 1.5, %v5984_v13 }
 0xe61   : > { %v9475_v40 = vpop.eup %9474  ;;  %v5980_v15 = vmax.f32 %v5975_v38, 1e-08 }
 0xe62   : > { %v5986_v41 = vmul.f32 %v9473_v34, %v5985_v39  ;;  %v5994_v42 = vmul.f32 %v9475_v40, %v5979_v35 }
 0xe63   : > { %9476 = vrsqrt.f32 %v5980_v15  ;;  %vm6012_vm6 = vcmp.eq.f32.partialorder %v5980_v15, inf  ;;  %v6015_v60 = vand.u32 2147483648, %v5980_v15  ;;  %vm6014_vm3 = vcmp.eq.f32.partialorder %v5980_v15, 0.0 }
 0xe64   : > { %v5987_v43 = vmul.f32 %v5986_v41, %v5978_v32  ;;  %v5995_v44 = vmul.f32 %v9475_v40, %v5994_v42 }
 0xe66   : > { %v5989_v14 = vsel %vm5988_vm2, %v5978_v32, %v5987_v43  ;;  %v5996_v17 = vmul.f32 0.5, %v5995_v44 }
 0xe67   : > { %v5992_v46 = vsel %vm5990_vm5, %v5991_v45, %v5989_v14 }
 0xe68   : > { %8904 = vmatmul.msk.f32.vlgmr.msra.gmra.mxu1 %vm5850_vm14, %v5992_v46  ;;  %v5997_v47 = vsub.f32 1.5, %v5996_v17 }
 0xe69   : > { %v9477_v48 = vpop.eup %9476  ;;  %6473 = vmatpush.msra.mxu1 %v6412_v30 }
 0xe6a   : > { %v5998_v49 = vmul.f32 %v9475_v40, %v5997_v47  ;;  %v6006_v50 = vmul.f32 %v9477_v48, %v5980_v15 }
 0xe6b   : > { %6474 = vmatpush.msra.mxu1 %v6411_v31  ;;  %v6413_v31 = vld [vmem:[%s4289_s2] sm:$0xf]  ;;  %s12870_s2 = sld [smem:[#allocation116_spill]] }
 0xe6c   : > { %v5999_v51 = vmul.f32 %v5998_v49, %v5979_v35  ;;  %v6007_v52 = vmul.f32 %v9477_v48, %v6006_v50  ;;  %8932 = vmatpush.msk.msrb.mxu2 %vm5261_vm9, %v6413_v31 }
 0xe6d   : > { %6475 = vmatpush.msra.mxu1 %v6410_v33 }
 0xe6e   : > { %v6001_v54 = vsel %vm6000_vm15, %v5979_v35, %v5999_v51  ;;  %v6008_v55 = vmul.f32 0.5, %v6007_v52 }
 0xe6f   : > { %v6004_v56 = vsel %vm6002_vm4, %v6003_v53, %v6001_v54  ;;  %6476 = vmatpush.msra.mxu1 %v6409_v36 }
 0xe70   : > { %8905 = vmatmul.msk.f32.gmra.mxu1 %vm5850_vm14, %v6004_v56  ;;  %v6009_v57 = vsub.f32 1.5, %v6008_v55 }
 0xe72   : > { %v6010_v58 = vmul.f32 %v9477_v48, %v6009_v57 }
 0xe74   : > { %v6011_v59 = vmul.f32 %v6010_v58, %v5980_v15 }
 0xe76   : > { %v6013_v61 = vsel %vm6012_vm6, %v5980_v15, %v6011_v59  ;;  %v6288_v59 = vld [vmem:[%s11917_s26 + $0x8] sm:$0xf] }
 0xe77   : > { %v6016_v62 = vsel %vm6014_vm3, %v6015_v60, %v6013_v61  ;;  %8924 = vmatpush.msk.msra.mxu3 %vm5261_vm9, %v6288_v59 }
 0xe78   : > { %8906 = vmatmul.msk.f32.gmra.mxu1 %vm5850_vm14, %v6016_v62 }
 0xee5   : > { %v6051_v6 = vpop.f32.mrf.mxu1 }
 0xee6   : > { %v6087_v7 = vadd.f32 %v6086_v3, %v6051_v6 }
 0xee8   : > { %v12217_v8 = vadd.f32 %v9442_v5, %v6087_v7 }
 0xeea   : > { %8910 = vmatmul.msk.f32.vlgmr.msrb.gmra.mxu0 %vm5514_vm0, %v12217_v8 }
 0xeed   : > { %v6054_v11 = vpop.f32.mrf.mxu1 }
 0xeee   : > { %v6090_v1 = vadd.f32 %v6089_v9, %v6054_v11  ;;  %v6287_v9 = vld [vmem:[%s11917_s26] sm:$0xff]  ;;  %v6233_v11 = vpop.f32.mrf.mxu2  ;;  %s12869_s26 = scalar_lea.vmem [#allocation49], %s12855_s5 }
 0xeef   : > { %6316 = vmatpush.msra.mxu3 %v6287_v9  ;;  %v9444_v9 = vld [vmem:[%s12869_s26] ss:$0 sm:$0xff]  ;;  %s12885_s26 = scalar_lea.vmem [#allocation37], %s12855_s5 }
 0xef0   : > { %v12221_v12 = vadd.f32 %v9442_v5, %v6090_v1 }
 0xef2   : > { %8911 = vmatmul.msk.f32.gmra.mxu0 %vm5514_vm0, %v12221_v12  ;;  %v6285_v6 = vmax.f32 %v12221_v12, 0.0 }
 0xef5   : > { %v6057_v10 = vpop.f32.mrf.mxu1 }
 0xef6   : > { %v6093_v18 = vadd.f32 %v6092_v16, %v6057_v10 }
 0xef8   : > { %v12225_v19 = vadd.f32 %v9442_v5, %v6093_v18  ;;  %v6284_v5 = vmax.f32 %v12217_v8, 0.0  ;;  %v6236_v8 = vpop.f32.mrf.mxu2  ;;  %v6331_v18 = vld [vmem:[%s11913_s8 + $0x8] sm:$0xf] }
 0xef9   : > { %8928 = vmatpush.msk.msra.mxu0 %vm5261_vm9, %v6331_v18 }
 0xefa   : > { %8912 = vmatmul.msk.f32.gmra.mxu0 %vm5514_vm0, %v12225_v19  ;;  %v6286_v7 = vmax.f32 %v12225_v19, 0.0 }
 0xf00   : > { %v6239_v19 = vpop.f32.mrf.mxu2 }
 0xf67   : > { %v6136_v22 = vpop.f32.mrf.mxu0 }
 0xf68   : > { %v6137_v23 = vadd.f32 %v9443_v20, %v6136_v22  ;;  %v6330_v22 = vld [vmem:[%s11913_s8] sm:$0xff]  ;;  %s12868_s8 = sld [smem:[#allocation100_spill]] }
 0xf69   : > { %6359 = vmatpush.msra.mxu0 %v6330_v22 }
 0xf6a   : > { %v8913_v24 = vmul.f32 -1.442695, %v6137_v23  ;;  %v6595_v23 = vld [vmem:[%s11931_s7 + $0x8] sm:$0xf] }
 0xf6b   : > { %8945 = vmatpush.msk.msrb.mxu0 %vm5261_vm9, %v6595_v23 }
 0xf6c   : > { %9478 = vpow2.f32 %v8913_v24  ;;  %v6594_v24 = vld [vmem:[%s11931_s7] sm:$0xff]  ;;  %s12872_s7 = scalar_lea.vmem [#allocation51], %s12855_s5 }
 0xf6d   : > { %6623 = vmatpush.msrb.mxu0 %v6594_v24 }
 0xf6f   : > { %v6139_v25 = vpop.f32.mrf.mxu0 }
 0xf70   : > { %v6140_v26 = vadd.f32 %v9443_v20, %v6139_v25 }
 0xf72   : > { %v9479_v27 = vpop.eup %9478  ;;  %v8914_v28 = vmul.f32 -1.442695, %v6140_v26 }
 0xf73   : > { %v6154_v29 = vadd.f32 1.0, %v9479_v27 }
 0xf74   : > { %9480 = vpow2.f32 %v8914_v28 }
 0xf75   : > { %9482 = vrcp.f32 %v6154_v29  ;;  %v6168_v40 = vand.u32 2147483648, %v6154_v29  ;;  %v6166_v41 = vand.u32 2147483647, %v6154_v29  ;;  %vm6162_vm8 = vweird.f32 %v6154_v29 }
 0xf77   : > { %v6142_v32 = vpop.f32.mrf.mxu0  ;;  %v6169_v14 = vor.u32 1.1754944e-38, %v6168_v40  ;;  %vm6167_vm1 = vcmp.eq.f32.partialorder %v6166_v41, 8.507059e+37 }
 0xf78   : > { %v6143_v4 = vadd.f32 %v9443_v20, %v6142_v32 }
 0xf7a   : > { %v9481_v34 = vpop.eup %9480  ;;  %v8915_v35 = vmul.f32 -1.442695, %v6143_v4 }
 0xf7b   : > { %v9483_v37 = vpop.eup %9482  ;;  %v6155_v13 = vadd.f32 1.0, %v9481_v34  ;;  %v6497_v34 = vld [vmem:[%s11927_s22 + $0x18] sm:$0xff] }
 0xf7c   : > { %v6158_v38 = vmul.f32 %v9483_v37, %v6154_v29  ;;  %9484 = vpow2.f32 %v8915_v35  ;;  %vm6163_vm7 = vweird.f32 %v9483_v37  ;;  %6523 = vmatpush.msrb.mxu3 %v6497_v34 }
 0xf7d   : > { %9486 = vrcp.f32 %v6155_v13  ;;  %vm6164_vm11 = vmor %vm6162_vm8, %vm6163_vm7  ;;  %v6183_v49 = vand.u32 2147483648, %v6155_v13  ;;  %v6181_v51 = vand.u32 2147483647, %v6155_v13  ;;  %vm6177_vm2 = vweird.f32 %v6155_v13 }
 0xf7e   : > { %v6159_v39 = vsub.f32 1.0, %v6158_v38 }
 0xf7f   : > { %v6184_v54 = vor.u32 1.1754944e-38, %v6183_v49  ;;  %vm6182_vm15 = vcmp.eq.f32.partialorder %v6181_v51, 8.507059e+37 }
 0xf80   : > { %v6160_v15 = vmul.f32 %v9483_v37, %v6159_v39 }
 0xf82   : > { %v9485_v42 = vpop.eup %9484  ;;  %v6161_v43 = vadd.f32 %v9483_v37, %v6160_v15 }
 0xf83   : > { %v9487_v44 = vpop.eup %9486  ;;  %v6156_v45 = vadd.f32 1.0, %v9485_v42 }
 0xf84   : > { %v6165_v17 = vsel %vm6164_vm11, %v9483_v37, %v6161_v43  ;;  %v6173_v46 = vmul.f32 %v9487_v44, %v6155_v13  ;;  %vm6178_vm13 = vweird.f32 %v9487_v44 }
 0xf85   : > { %9488 = vrcp.f32 %v6156_v45  ;;  %v6170_v47 = vsel %vm6167_vm1, %v6169_v14, %v6165_v17  ;;  %vm6179_vm5 = vmor %vm6177_vm2, %vm6178_vm13  ;;  %v6198_v60 = vand.u32 2147483648, %v6156_v45  ;;  %v6196_v62 = vand.u32 2147483647, %v6156_v45 }
 0xf86   : > { %8921 = vmatmul.msk.f32.vlgmr.msrb.gmra.mxu1 %vm5850_vm14, %v6170_v47  ;;  %v6174_v48 = vsub.f32 1.0, %v6173_v46  ;;  %vm6192_vm6 = vweird.f32 %v6156_v45 }
 0xf87   : > { %v6199_v0 = vor.u32 1.1754944e-38, %v6198_v60  ;;  %vm6197_vm7 = vcmp.eq.f32.partialorder %v6196_v62, 8.507059e+37 }
 0xf88   : > { %v6175_v50 = vmul.f32 %v9487_v44, %v6174_v48 }
 0xf8a   : > { %v6176_v52 = vadd.f32 %v9487_v44, %v6175_v50 }
 0xf8b   : > { %v9489_v53 = vpop.eup %9488 }
 0xf8c   : > { %v6180_v55 = vsel %vm6179_vm5, %v9487_v44, %v6176_v52  ;;  %v6188_v56 = vmul.f32 %v9489_v53, %v6156_v45  ;;  %vm6193_vm4 = vweird.f32 %v9489_v53 }
 0xf8d   : > { %v6185_v57 = vsel %vm6182_vm15, %v6184_v54, %v6180_v55  ;;  %vm6194_vm3 = vmor %vm6192_vm6, %vm6193_vm4  ;;  %vm6676_vm15 = vcmask 195584  }
 0xf8e   : > { %8922 = vmatmul.msk.f32.gmra.mxu1 %vm5850_vm14, %v6185_v57  ;;  %v6189_v58 = vsub.f32 1.0, %v6188_v56 }
 0xf90   : > { %v6190_v61 = vmul.f32 %v9489_v53, %v6189_v58 }
 0xf92   : > { %v6191_v63 = vadd.f32 %v9489_v53, %v6190_v61 }
 0xf94   : > { %v6195_v2 = vsel %vm6194_vm3, %v9489_v53, %v6191_v63 }
 0xf95   : > { %v6200_v3 = vsel %vm6197_vm7, %v6199_v0, %v6195_v2  ;;  %v6496_v0 = vld [vmem:[%s11927_s22 + $0x10] sm:$0xff]  ;;  %v6495_v2 = vld [vmem:[%s11927_s22 + $0x8] sm:$0xff] }
 0xf96   : > { %8923 = vmatmul.msk.f32.gmra.mxu1 %vm5850_vm14, %v6200_v3  ;;  %6524 = vmatpush.msrb.mxu3 %v6496_v0  ;;  %v6494_v3 = vld [vmem:[%s11927_s22] sm:$0xff]  ;;  %s12887_s22 = scalar_lea.vmem %s12883_s17, %s12880_s14 }
 0xf98   : > { %6525 = vmatpush.msrb.mxu3 %v6495_v2 }
 0xf9a   : > { %6526 = vmatpush.msrb.mxu3 %v6494_v3 }
 0xf9e   : > { %8936 = vmatmul.msk.f32.vlgmr.msra.gmra.mxu1 %vm5514_vm0, %v6284_v5  ;;  %v5250_v5 = vld [vmem:[%s12868_s8] sm:$0xff]  ;;  %s12884_s8 = sld [smem:[#allocation189_spill]] }
 0xfa6   : > { %8937 = vmatmul.msk.f32.gmra.mxu1 %vm5514_vm0, %v6285_v6  ;;  %v10759_v6 = vmov 0  }
 0xfa7   : > { %9439 = vset.pattern.permute.xlu0 %v10759_v6 }
 0xfae   : > { %8938 = vmatmul.msk.f32.gmra.mxu1 %vm5514_vm0, %v6286_v7 }
0x1003   : > { %v6272_v1 = vpop.f32.mrf.mxu1 }
0x1004   : > { %v6281_v16 = vmul.f32 %v6272_v1, %v6233_v11 }
0x1006   : > { %8925 = vmatmul.msk.f32.vlgmr.msra.gmra.mxu3 %vm5257_vm12, %v6281_v16 }
0x100b   : > { %v6275_v10 = vpop.f32.mrf.mxu1 }
0x100c   : > { %v6282_v12 = vmul.f32 %v6275_v10, %v6236_v8 }
0x100e   : > { %8926 = vmatmul.msk.f32.gmra.mxu3 %vm5257_vm12, %v6282_v12 }
0x1013   : > { %v6278_v20 = vpop.f32.mrf.mxu1 }
0x1014   : > { %v6283_v21 = vmul.f32 %v6278_v20, %v6239_v19 }
0x1016   : > { %8927 = vmatmul.msk.f32.gmra.mxu3 %vm5257_vm12, %v6283_v21 }
0x101b   : > { %v6478_v7 = vpop.f32.mrf.mxu1 }
0x1023   : > { %v6481_v12 = vpop.f32.mrf.mxu1 }
0x102b   : > { %v6484_v23 = vpop.f32.mrf.mxu1 }
0x1089   : > { %v6318_v25 = vpop.f32.mrf.mxu3 }
0x108a   : > { %v6327_v26 = vmul.f32 %v6318_v25, %v6318_v25 }
0x108c   : > { %8929 = vmatmul.msk.f32.vlgmr.msra.gmra.mxu0 %vm5257_vm12, %v6327_v26 }
0x1091   : > { %v6321_v27 = vpop.f32.mrf.mxu3 }
0x1092   : > { %v6328_v28 = vmul.f32 %v6321_v27, %v6321_v27 }
0x1094   : > { %8930 = vmatmul.msk.f32.gmra.mxu0 %vm5257_vm12, %v6328_v28  ;;  %v9445_v28 = vld [vmem:[%s12872_s7] ss:$0 sm:$0xff]  ;;  %s12888_s7 = scalar_lea.vmem [#allocation39], %s12855_s5 }
0x1099   : > { %v6324_v29 = vpop.f32.mrf.mxu3 }
0x109a   : > { %v6329_v30 = vmul.f32 %v6324_v29, %v6324_v29 }
0x109c   : > { %8931 = vmatmul.msk.f32.gmra.mxu0 %vm5257_vm12, %v6329_v30 }
0x10a4   : > { %8946 = vmatmul.msk.f32.vlgmr.msrb.gmra.mxu0 %vm5257_vm12, %v6318_v25 }
0x10ac   : > { %8947 = vmatmul.msk.f32.gmra.mxu0 %vm5257_vm12, %v6321_v27  ;;  %v12284_v27 = vld [vmem:[%s12870_s2] sm:$0xff]  ;;  %s12886_s2 = sld [smem:[#allocation190_spill]] }
0x10b4   : > { %8948 = vmatmul.msk.f32.gmra.mxu0 %vm5257_vm12, %v6324_v29  ;;  %v6634_v29 = vld [vmem:[%s4270_s11] sm:$0xf]  ;;  %s12873_s11 = sld [smem:[#allocation185_spill]] }
0x10b5   : > { %8949 = vmatpush.msk.msra.mxu2 %vm5261_vm9, %v6634_v29 }
0x1109   : > { %v6361_v32 = vpop.f32.mrf.mxu0 }
0x110a   : > { %v6370_v4 = vmax.f32 %v6361_v32, 1e-08 }
0x110c   : > { %9490 = vrsqrt.f32 %v6370_v4  ;;  %vm6380_vm8 = vcmp.eq.f32.partialorder %v6370_v4, inf  ;;  %v6383_v14 = vand.u32 2147483648, %v6370_v4  ;;  %vm6382_vm11 = vcmp.eq.f32.partialorder %v6370_v4, 0.0 }
0x1111   : > { %v6364_v33 = vpop.f32.mrf.mxu0 }
0x1112   : > { %v9491_v35 = vpop.eup %9490  ;;  %v6371_v36 = vmax.f32 %v6364_v33, 1e-08 }
0x1113   : > { %v6374_v37 = vmul.f32 %v9491_v35, %v6370_v4 }
0x1114   : > { %9492 = vrsqrt.f32 %v6371_v36  ;;  %vm6392_vm1 = vcmp.eq.f32.partialorder %v6371_v36, inf  ;;  %v6395_v54 = vand.u32 2147483648, %v6371_v36  ;;  %vm6394_vm13 = vcmp.eq.f32.partialorder %v6371_v36, 0.0 }
0x1115   : > { %v6375_v13 = vmul.f32 %v9491_v35, %v6374_v37 }
0x1117   : > { %v6376_v38 = vmul.f32 0.5, %v6375_v13 }
0x1119   : > { %v6367_v39 = vpop.f32.mrf.mxu0  ;;  %v6377_v40 = vsub.f32 1.5, %v6376_v38 }
0x111a   : > { %v9493_v15 = vpop.eup %9492  ;;  %v6372_v41 = vmax.f32 %v6367_v39, 1e-08 }
0x111b   : > { %v6378_v42 = vmul.f32 %v9491_v35, %v6377_v40  ;;  %v6386_v43 = vmul.f32 %v9493_v15, %v6371_v36 }
0x111c   : > { %9494 = vrsqrt.f32 %v6372_v41  ;;  %vm6404_vm2 = vcmp.eq.f32.partialorder %v6372_v41, inf  ;;  %v6407_v61 = vand.u32 2147483648, %v6372_v41  ;;  %vm6406_vm5 = vcmp.eq.f32.partialorder %v6372_v41, 0.0 }
0x111d   : > { %v6379_v44 = vmul.f32 %v6378_v42, %v6370_v4  ;;  %v6387_v45 = vmul.f32 %v9493_v15, %v6386_v43  ;;  %9496 = vrcp.f32 %v5250_v5 }
0x111f   : > { %v6381_v17 = vsel %vm6380_vm8, %v6370_v4, %v6379_v44  ;;  %v6388_v46 = vmul.f32 0.5, %v6387_v45 }
0x1120   : > { %v6384_v47 = vsel %vm6382_vm11, %v6383_v14, %v6381_v17 }
0x1121   : > { %8933 = vmatmul.msk.f32.vlgmr.msrb.gmra.mxu2 %vm5850_vm14, %v6384_v47  ;;  %v6389_v48 = vsub.f32 1.5, %v6388_v46 }
0x1122   : > { %v9495_v49 = vpop.eup %9494 }
0x1123   : > { %v6390_v50 = vmul.f32 %v9493_v15, %v6389_v48  ;;  %v6398_v51 = vmul.f32 %v9495_v49, %v6372_v41  ;;  %v9497_v1 = vpop.eup %9496  ;;  %v9534_v15 = vld [vmem:[#allocation2] sm:$0xff] }
0x1124   : > { %v5252_v8 = vmul.f32 %v9497_v1, %v5250_v5 }
0x1125   : > { %v6391_v52 = vmul.f32 %v6390_v50, %v6371_v36  ;;  %v6399_v53 = vmul.f32 %v9495_v49, %v6398_v51 }
0x1126   : > { %v5253_v18 = vsub.f32 2.0, %v5252_v8 }
0x1127   : > { %v6393_v55 = vsel %vm6392_vm1, %v6371_v36, %v6391_v52  ;;  %v6400_v56 = vmul.f32 0.5, %v6399_v53 }
0x1128   : > { %v6396_v57 = vsel %vm6394_vm13, %v6395_v54, %v6393_v55  ;;  %v5254_v19 = vmul.f32 %v9497_v1, %v5253_v18  ;;  %v10760_v18 = vmov 32.0  }
0x1129   : > { %8934 = vmatmul.msk.f32.gmra.mxu2 %vm5850_vm14, %v6396_v57  ;;  %v6401_v58 = vsub.f32 1.5, %v6400_v56 }
0x112a   : > { %6702 = vperm.xlu0 %9439, %v5254_v19  }
0x112b   : > { %v6402_v59 = vmul.f32 %v9495_v49, %v6401_v58 }
0x112d   : > { %v6403_v60 = vmul.f32 %v6402_v59, %v6372_v41 }
0x112f   : > { %v6405_v62 = vsel %vm6404_vm2, %v6372_v41, %v6403_v60 }
0x1130   : > { %v6408_v63 = vsel %vm6406_vm5, %v6407_v61, %v6405_v62 }
0x1131   : > { %8935 = vmatmul.msk.f32.gmra.mxu2 %vm5850_vm14, %v6408_v63 }
0x119c   : > { %v12294_v37 = vpop.permute.xlu0 %6702 }
0x11a4   : > { %v6443_v11 = vpop.f32.mrf.mxu2 }
0x11a5   : > { %v6479_v16 = vadd.f32 %v6478_v7, %v6443_v11 }
0x11a7   : > { %v6491_v10 = vadd.f32 %v9444_v9, %v6479_v16 }
0x11a9   : > { %8939 = vmatmul.msk.f32.vlgmr.msrb.gmra.mxu3 %vm5514_vm0, %v6491_v10 }
0x11ac   : > { %v6446_v20 = vpop.f32.mrf.mxu2 }
0x11ad   : > { %v6482_v21 = vadd.f32 %v6481_v12, %v6446_v20 }
0x11af   : > { %v6492_v22 = vadd.f32 %v9444_v9, %v6482_v21 }
0x11b1   : > { %8940 = vmatmul.msk.f32.gmra.mxu3 %vm5514_vm0, %v6492_v22 }
0x11b4   : > { %v6449_v24 = vpop.f32.mrf.mxu2 }
0x11b5   : > { %v6485_v25 = vadd.f32 %v6484_v23, %v6449_v24 }
0x11b7   : > { %v6493_v26 = vadd.f32 %v9444_v9, %v6485_v25 }
0x11b9   : > { %8941 = vmatmul.msk.f32.gmra.mxu3 %vm5514_vm0, %v6493_v26  ;;  %6693 = vmatpush.msrb.mxu1 %v6493_v26 }
0x11bb   : > { %6694 = vmatpush.msrb.mxu1 %v6492_v22 }
0x11bd   : > { %6695 = vmatpush.msrb.mxu1 %v6491_v10 }
0x11be   : > { %8953 = vmatmul.msk.f32.vlgmr.msrb.gmra.mxu1 %vm6676_vm15, %v12284_v27 }
0x122c   : > { %v6528_v30 = vpop.f32.mrf.mxu3 }
0x122d   : > { %v6529_v31 = vadd.f32 %v9445_v28, %v6528_v30  ;;  %v6625_v30 = vpop.f32.mrf.mxu0 }
0x122f   : > { %v8942_v32 = vmul.f32 -1.442695, %v6529_v31 }
0x1231   : > { %9498 = vpow2.f32 %v8942_v32 }
0x1234   : > { %v6531_v4 = vpop.f32.mrf.mxu3 }
0x1235   : > { %v6532_v33 = vadd.f32 %v9445_v28, %v6531_v4  ;;  %v6628_v32 = vpop.f32.mrf.mxu0 }
0x1237   : > { %v9499_v34 = vpop.eup %9498  ;;  %v8943_v35 = vmul.f32 -1.442695, %v6532_v33 }
0x1238   : > { %v6546_v36 = vadd.f32 1.0, %v9499_v34 }
0x1239   : > { %9500 = vpow2.f32 %v8943_v35 }
0x123a   : > { %9502 = vrcp.f32 %v6546_v36  ;;  %v6560_v47 = vand.u32 2147483648, %v6546_v36  ;;  %v6558_v49 = vand.u32 2147483647, %v6546_v36  ;;  %vm6554_vm6 = vweird.f32 %v6546_v36 }
0x123b   : > { %v6697_v13 = vpop.f32.mrf.mxu1 }
0x123c   : > { %v6534_v38 = vpop.f32.mrf.mxu3  ;;  %v6705_v39 = vmul.f32 %v12294_v37, %v6697_v13  ;;  %v6561_v54 = vor.u32 1.1754944e-38, %v6560_v47  ;;  %vm6559_vm7 = vcmp.eq.f32.partialorder %v6558_v49, 8.507059e+37 }
0x123d   : > { %v6535_v40 = vadd.f32 %v9445_v28, %v6534_v38  ;;  %v6631_v33 = vpop.f32.mrf.mxu0 }
0x123e   : > { %v12297_v41 = vadd.f32 %v9534_v15, %v6705_v39 }
0x123f   : > { %v9501_v42 = vpop.eup %9500  ;;  %v8944_v43 = vmul.f32 -1.442695, %v6535_v40 }
0x1240   : > { %v9503_v44 = vpop.eup %9502  ;;  %v6547_v45 = vadd.f32 1.0, %v9501_v42  ;;  %v6733_v14 = vsel %vm5514_vm0, %v12297_v41, 0.0 }
0x1241   : > { %v6550_v17 = vmul.f32 %v9503_v44, %v6546_v36  ;;  %9504 = vpow2.f32 %v8944_v43  ;;  %6734 = vadd.xlane.f32.xlu1 %v6733_v14  ;;  %vm6555_vm4 = vweird.f32 %v9503_v44 }
0x1242   : > { %9506 = vrcp.f32 %v6547_v45  ;;  %vm6556_vm3 = vmor %vm6554_vm6, %vm6555_vm4  ;;  %v6575_v59 = vand.u32 2147483648, %v6547_v45  ;;  %v6573_v61 = vand.u32 2147483647, %v6547_v45  ;;  %vm6569_vm11 = vweird.f32 %v6547_v45 }
0x1243   : > { %v6551_v46 = vsub.f32 1.0, %v6550_v17  ;;  %v9446_v17 = vld [vmem:[%s12874_s10] ss:$0 sm:$0xff]  ;;  %s12890_s10 = sld [smem:[#allocation133_spill]] }
0x1244   : > { %v6576_v0 = vor.u32 1.1754944e-38, %v6575_v59  ;;  %vm6574_vm13 = vcmp.eq.f32.partialorder %v6573_v61, 8.507059e+37 }
0x1245   : > { %v6552_v48 = vmul.f32 %v9503_v44, %v6551_v46  ;;  %v6891_v46 = vld [vmem:[%s12873_s11 + $0x18] sm:$0xff] }
0x1246   : > { %6931 = vmatpush.msrb.mxu2 %v6891_v46  ;;  %v6947_v46 = vld [vmem:[%s12881_s29 + $0x18] sm:$0xff] }
0x1247   : > { %v9505_v50 = vpop.eup %9504  ;;  %v6553_v51 = vadd.f32 %v9503_v44, %v6552_v48  ;;  %v6890_v48 = vld [vmem:[%s12873_s11 + $0x10] sm:$0xff] }
0x1248   : > { %v9507_v52 = vpop.eup %9506  ;;  %v6548_v53 = vadd.f32 1.0, %v9505_v50  ;;  %v6889_v50 = vld [vmem:[%s12873_s11 + $0x8] sm:$0xff]  ;;  %6932 = vmatpush.msrb.mxu2 %v6890_v48 }
0x1249   : > { %v6557_v55 = vsel %vm6556_vm3, %v9503_v44, %v6553_v51  ;;  %v6565_v56 = vmul.f32 %v9507_v52, %v6547_v45  ;;  %vm6570_vm8 = vweird.f32 %v9507_v52  ;;  %v6732_v45 = vld [vmem:[%s11935_s1 + $0x8] sm:$0xf]  ;;  %v9447_v51 = vld [vmem:[%s12875_s0] ss:$0 sm:$0xff]  ;;  %s12891_s0 = sld [smem:[#allocation192_spill]] }
0x124a   : > { %9508 = vrcp.f32 %v6548_v53  ;;  %v6562_v57 = vsel %vm6559_vm7, %v6561_v54, %v6557_v55  ;;  %vm6571_vm1 = vmor %vm6569_vm11, %vm6570_vm8  ;;  %v6590_v7 = vand.u32 2147483648, %v6548_v53  ;;  %v6588_v11 = vand.u32 2147483647, %v6548_v53  ;;  %8955 = vmatpush.msk.msra.mxu1 %vm5261_vm9, %v6732_v45  ;;  %6933 = vmatpush.msrb.mxu2 %v6889_v50  ;;  %v6949_v45 = vld [vmem:[%s12881_s29 + $0x28] sm:$0xff] }
0x124b   : > { %8950 = vmatmul.msk.f32.vlgmr.msra.gmra.mxu2 %vm5850_vm14, %v6562_v57  ;;  %v6566_v58 = vsub.f32 1.0, %v6565_v56  ;;  %vm6584_vm5 = vweird.f32 %v6548_v53  ;;  %9510 = vrcp.f32 %v10760_v18  ;;  %v9535_v57 = vld [vmem:[#allocation3] sm:$0xff] }
0x124c   : > { %v6591_v16 = vor.u32 1.1754944e-38, %v6590_v7  ;;  %vm6589_vm6 = vcmp.eq.f32.partialorder %v6588_v11, 8.507059e+37  ;;  %v6851_v7 = vld [vmem:[%s12877_s19 + $0x10] sm:$0xff] }
0x124d   : > { %v6567_v60 = vmul.f32 %v9507_v52, %v6566_v58 }
0x124f   : > { %v6568_v62 = vadd.f32 %v9507_v52, %v6567_v60 }
0x1250   : > { %v9509_v63 = vpop.eup %9508 }
0x1251   : > { %v6572_v2 = vsel %vm6571_vm1, %v9507_v52, %v6568_v62  ;;  %v6580_v3 = vmul.f32 %v9509_v63, %v6548_v53  ;;  %vm6585_vm2 = vweird.f32 %v9509_v63  ;;  %v9511_v12 = vpop.eup %9510  ;;  %v6888_v53 = vld [vmem:[%s12873_s11] sm:$0xff]  ;;  %s12889_s11 = sld [smem:[#allocation188_spill]] }
0x1252   : > { %v6577_v5 = vsel %vm6574_vm13, %v6576_v0, %v6572_v2  ;;  %vm6586_vm4 = vmor %vm6584_vm5, %vm6585_vm2  ;;  %v6737_v19 = vmul.f32 32.0, %v9511_v12  ;;  %vm6741_vm3 = vweird.f32 %v9511_v12  ;;  %6934 = vmatpush.msrb.mxu2 %v6888_v53  ;;  %v6946_v53 = vld [vmem:[%s12881_s29 + $0x10] sm:$0xff] }
0x1253   : > { %8951 = vmatmul.msk.f32.gmra.mxu2 %vm5850_vm14, %v6577_v5  ;;  %v6581_v6 = vsub.f32 1.0, %v6580_v3 }
0x1254   : > { %v6738_v20 = vsub.f32 1.0, %v6737_v19 }
0x1255   : > { %v6582_v9 = vmul.f32 %v9509_v63, %v6581_v6 }
0x1256   : > { %v6739_v21 = vmul.f32 %v9511_v12, %v6738_v20 }
0x1257   : > { %v6583_v1 = vadd.f32 %v9509_v63, %v6582_v9 }
0x1258   : > { %v6740_v22 = vadd.f32 %v9511_v12, %v6739_v21 }
0x1259   : > { %v6587_v8 = vsel %vm6586_vm4, %v9509_v63, %v6583_v1  ;;  %v10761_v63 = vmov 4.0  }
0x125a   : > { %v6592_v10 = vsel %vm6589_vm6, %v6591_v16, %v6587_v8  ;;  %v12304_v23 = vsel %vm6741_vm3, %v9511_v12, %v6740_v22 }
0x125b   : > { %8952 = vmatmul.msk.f32.gmra.mxu2 %vm5850_vm14, %v6592_v10 }
0x12b4   : > { %v6735_v24 = vpop.xlane.xlu1 %6734 }
0x12b5   : > { %v6743_v25 = vmul.f32 %v12304_v23, %v6735_v24  ;;  %v6850_v24 = vld [vmem:[%s12877_s19 + $0x8] sm:$0xff] }
0x12b7   : > { %v6744_v26 = vsub.f32 %v12297_v41, %v6743_v25  ;;  %v6849_v25 = vld [vmem:[%s12877_s19] sm:$0xff]  ;;  %s12893_s19 = scalar_lea.vmem %s12890_s10, %s12880_s14 }
0x12b9   : > { %v6745_v28 = vmul.f32 %v6744_v26, %v6744_v26 }
0x12bb   : > { %v6746_v29 = vsel %vm5514_vm0, %v6745_v28, 0.0  ;;  %v7004_v28 = vld [vmem:[%s12878_s6 + $0x8] sm:$0xff] }
0x12bc   : > { %6747 = vadd.xlane.f32.xlu1 %v6746_v29  ;;  %v7003_v29 = vld [vmem:[%s12878_s6] sm:$0xff] }
0x12ce   : > { %v6664_v31 = vpop.f32.mrf.mxu2 }
0x12cf   : > { %v6673_v13 = vmul.f32 %v6664_v31, %v6625_v30 }
0x12d6   : > { %v6667_v4 = vpop.f32.mrf.mxu2 }
0x12d7   : > { %v6674_v36 = vmul.f32 %v6667_v4, %v6628_v32  ;;  %v6892_v32 = vld [vmem:[%s12882_s27] sm:$0xff]  ;;  %v6959_v4 = vld [vmem:[%s12881_s29 + $0x78] sm:$0xff] }
0x12de   : > { %v6670_v34 = vpop.f32.mrf.mxu2 }
0x12df   : > { %v6675_v35 = vmul.f32 %v6670_v34, %v6631_v33  ;;  %v6958_v33 = vld [vmem:[%s12881_s29 + $0x70] sm:$0xff]  ;;  %v6957_v34 = vld [vmem:[%s12881_s29 + $0x68] sm:$0xff] }
0x12e1   : > { %6719 = vmatpush.msra.mxu3 %v6675_v35  ;;  %v6956_v35 = vld [vmem:[%s12881_s29 + $0x60] sm:$0xff] }
0x12e3   : > { %6720 = vmatpush.msra.mxu3 %v6674_v36  ;;  %v6955_v36 = vld [vmem:[%s12881_s29 + $0x58] sm:$0xff] }
0x12e5   : > { %6721 = vmatpush.msra.mxu3 %v6673_v13 }
0x12e6   : > { %8954 = vmatmul.msk.f32.vlgmr.msra.gmra.mxu3 %vm6676_vm15, %v12284_v27  ;;  %v6731_v27 = vld [vmem:[%s11935_s1] sm:$0xff]  ;;  %s12876_s1 = sld [smem:[#allocation184_spill]] }
0x12e7   : > { %6792 = vmatpush.msra.mxu1 %v6731_v27  ;;  %6868 = vmatpush.msrb.mxu3 %v6851_v7  ;;  %v6948_v27 = vld [vmem:[%s12881_s29 + $0x20] sm:$0xff] }
0x12e9   : > { %6869 = vmatpush.msrb.mxu3 %v6850_v24  ;;  %6911 = vmatpush.msrb.mxu1 %v6892_v32 }
0x12eb   : > { %6870 = vmatpush.msrb.mxu3 %v6849_v25  ;;  %v7127_v25 = vld [vmem:[%s12886_s2 + $0x30] sm:$0xff] }
0x12ec   : > { %v6821_v5 = vld [vmem:[%s12876_s1 + $0x8] sm:$0xf] }
0x12ed   : > { %8957 = vmatpush.msk.msra.mxu0 %vm5261_vm9, %v6821_v5 }
0x132f   : > { %v6748_v38 = vpop.xlane.xlu1 %6747 }
0x1330   : > { %v6749_v39 = vmul.f32 %v6748_v38, %v12304_v23  ;;  %v6954_v38 = vld [vmem:[%s12881_s29 + $0x50] sm:$0xff] }
0x1332   : > { %v6750_v40 = vadd.f32 1e-05, %v6749_v39 }
0x1334   : > { %9512 = vrsqrt.f32 %v6750_v40  ;;  %vm6757_vm7 = vweird.f32 %v6750_v40 }
0x1335   : > { %9514 = vrcp.f32 %v10761_v63  ;;  %v9449_v63 = vld [vmem:[%s12888_s7] ss:$0 sm:$0xff] }
0x133a   : > { %v9513_v15 = vpop.eup %9512 }
0x133b   : > { %v6752_v41 = vmul.f32 %v9513_v15, %v6750_v40  ;;  %vm6758_vm8 = vweird.f32 %v9513_v15  ;;  %v9515_v0 = vpop.eup %9514  ;;  %v6953_v40 = vld [vmem:[%s12881_s29 + $0x48] sm:$0xff] }
0x133c   : > { %vm6759_vm11 = vmor %vm6757_vm7, %vm6758_vm8  ;;  %v6802_v2 = vmul.f32 4.0, %v9515_v0  ;;  %vm6806_vm1 = vweird.f32 %v9515_v0 }
0x133d   : > { %v6753_v42 = vmul.f32 %v9513_v15, %v6752_v41  ;;  %v6951_v41 = vld [vmem:[%s12881_s29 + $0x38] sm:$0xff] }
0x133e   : > { %v6803_v3 = vsub.f32 1.0, %v6802_v2  ;;  %v7056_v2 = vld [vmem:[%s12884_s8 + $0x8] sm:$0xff] }
0x133f   : > { %v6754_v43 = vmul.f32 0.5, %v6753_v42  ;;  %v6950_v42 = vld [vmem:[%s12881_s29 + $0x30] sm:$0xff] }
0x1340   : > { %v6804_v6 = vmul.f32 %v9515_v0, %v6803_v3 }
0x1341   : > { %v6755_v44 = vsub.f32 1.5, %v6754_v43 }
0x1342   : > { %v6805_v9 = vadd.f32 %v9515_v0, %v6804_v6  ;;  %v7136_v6 = vld [vmem:[%s12886_s2 + $0x78] sm:$0xff] }
0x1343   : > { %v6756_v14 = vmul.f32 %v9513_v15, %v6755_v44 }
0x1344   : > { %v12334_v11 = vsel %vm6806_vm1, %v9515_v0, %v6805_v9  ;;  %v7057_v0 = vld [vmem:[%s12884_s8 + $0x10] sm:$0xff] }
0x1345   : > { %v6760_v47 = vsel %vm6759_vm11, %v9513_v15, %v6756_v14  ;;  %v6952_v15 = vld [vmem:[%s12881_s29 + $0x40] sm:$0xff]  ;;  %7074 = vmatpush.msra.mxu2 %v7057_v0  ;;  %v7135_v9 = vld [vmem:[%s12886_s2 + $0x70] sm:$0xff] }
0x1346   : > { %v6761_v49 = vmul.f32 %v6760_v47, %v6744_v26  ;;  %v7005_v26 = vld [vmem:[%s12878_s6 + $0x10] sm:$0xff]  ;;  %s12894_s6 = sld [smem:[#allocation127_spill]] }
0x1347   : > { %7022 = vmatpush.msra.mxu3 %v7005_v26  ;;  %7075 = vmatpush.msra.mxu2 %v7056_v2 }
0x1348   : > { %v6765_v52 = vmul.f32 %v9446_v17, %v6761_v49 }
0x1349   : > { %7023 = vmatpush.msra.mxu3 %v7004_v28 }
0x134a   : > { %v12323_v54 = vadd.f32 %v9447_v51, %v6765_v52 }
0x134b   : > { %7024 = vmatpush.msra.mxu3 %v7003_v29 }
0x134c   : > { %8961 = vmatmul.msk.f32.vlgmr.msrb.gmra.mxu2 %vm5514_vm0, %v12323_v54  ;;  %s12896_s14 = scalar_lea.vmem %s12894_s6, %s11823_s9  ;;  %s12898_s9 = scalar_lea.vmem [#allocation55], %s12855_s5 }
0x1369   : > { %v6723_v55 = vpop.f32.mrf.mxu3 }
0x136a   : > { %v6726_v56 = vmul.f32 %v6723_v55, %v12294_v37  ;;  %v6820_v37 = vld [vmem:[%s12876_s1] sm:$0xff]  ;;  %v6945_v55 = vld [vmem:[%s12881_s29 + $0x8] sm:$0xff]  ;;  %s12892_s1 = sld [smem:[#allocation191_spill]] }
0x136b   : > { %6843 = vmatpush.msra.mxu0 %v6820_v37  ;;  %v7055_v37 = vld [vmem:[%s12884_s8] sm:$0xff] }
0x136c   : > { %v6728_v58 = vadd.f32 %v9535_v57, %v6726_v56  ;;  %v6944_v56 = vld [vmem:[%s12881_s29] sm:$0xff]  ;;  %7076 = vmatpush.msra.mxu2 %v7055_v37  ;;  %s12897_s29 = scalar_lea.vmem [#allocation42], %s12855_s5 }
0x136d   : > { %6964 = vmatpush.msrb.mxu0 %v6959_v4  ;;  %v9448_v57 = vld [vmem:[%s12885_s26] ss:$0 sm:$0xff] }
0x136e   : > { %v6770_v59 = vmul.f32 %v6728_v58, %v6728_v58  ;;  %7161 = vmatpush.msrb.mxu2 %v7136_v6 }
0x136f   : > { %6965 = vmatpush.msrb.mxu0 %v6958_v33 }
0x1370   : > { %8956 = vmatmul.msk.f32.vlgmr.msra.gmra.mxu1 %vm5257_vm12, %v6770_v59  ;;  %7162 = vmatpush.msrb.mxu2 %v7135_v9  ;;  %v7188_v0 = vld [vmem:[%s12892_s1 + $0x10] sm:$0xff]  ;;  %v7187_v2 = vld [vmem:[%s12892_s1 + $0x8] sm:$0xff] }
0x1371   : > { %6966 = vmatpush.msrb.mxu0 %v6957_v34 }
0x1373   : > { %6967 = vmatpush.msrb.mxu0 %v6956_v35  ;;  %v7126_v35 = vld [vmem:[%s12886_s2 + $0x28] sm:$0xff] }
0x1375   : > { %6968 = vmatpush.msrb.mxu0 %v6955_v36  ;;  %v7125_v36 = vld [vmem:[%s12886_s2 + $0x20] sm:$0xff] }
0x1377   : > { %6969 = vmatpush.msrb.mxu0 %v6954_v38  ;;  %v7123_v38 = vld [vmem:[%s12886_s2 + $0x10] sm:$0xff] }
0x1379   : > { %6970 = vmatpush.msrb.mxu0 %v6953_v40  ;;  %v7121_v40 = vld [vmem:[%s12886_s2] sm:$0xff] }
0x137b   : > { %6971 = vmatpush.msrb.mxu0 %v6952_v15  ;;  %v7084_v15 = vld [vmem:[%s12889_s11 + $0x10] sm:$0xff] }
0x137d   : > { %6972 = vmatpush.msrb.mxu0 %v6951_v41 }
0x137f   : > { %6973 = vmatpush.msrb.mxu0 %v6950_v42 }
0x1381   : > { %6974 = vmatpush.msrb.mxu0 %v6949_v45  ;;  %v7083_v45 = vld [vmem:[%s12889_s11 + $0x8] sm:$0xff] }
0x1383   : > { %6975 = vmatpush.msrb.mxu0 %v6948_v27 }
0x1385   : > { %6976 = vmatpush.msrb.mxu0 %v6947_v46  ;;  %v7137_v46 = vld [vmem:[%s12893_s19] sm:$0xff] }
0x1387   : > { %6977 = vmatpush.msrb.mxu0 %v6946_v53 }
0x1389   : > { %6978 = vmatpush.msrb.mxu0 %v6945_v55 }
0x138b   : > { %6979 = vmatpush.msrb.mxu0 %v6944_v56 }
0x13ed   : > { %v6794_v60 = vpop.f32.mrf.mxu1 }
0x13ee   : > { %v6797_v61 = vmax.f32 %v6794_v60, 1e-08 }
0x13f0   : > { %v6798_v62 = vsel %vm5850_vm14, %v6797_v61, 0.0 }
0x13f1   : > { %6799 = vadd.xlane.f32.xlu0 %v6798_v62  ;;  %v7029_v62 = vld [vmem:[%s12887_s22] sm:$0xff] }
0x13f2   : > { %7048 = vmatpush.msra.mxu1 %v7029_v62 }
0x1464   : > { %v6800_v1 = vpop.xlane.xlu0 %6799 }
0x1465   : > { %v6808_v16 = vmul.f32 %v12334_v11, %v6800_v1  ;;  %v7134_v1 = vld [vmem:[%s12886_s2 + $0x68] sm:$0xff] }
0x1466   : > { %7163 = vmatpush.msrb.mxu2 %v7134_v1 }
0x1467   : > { %9516 = vrsqrt.f32 %v6808_v16  ;;  %vm6815_vm2 = vweird.f32 %v6808_v16 }
0x146d   : > { %v9517_v8 = vpop.eup %9516 }
0x146e   : > { %v6810_v10 = vmul.f32 %v9517_v8, %v6808_v16  ;;  %vm6816_vm13 = vweird.f32 %v9517_v8  ;;  %v7133_v16 = vld [vmem:[%s12886_s2 + $0x60] sm:$0xff] }
0x146f   : > { %vm6817_vm5 = vmor %vm6815_vm2, %vm6816_vm13  ;;  %7164 = vmatpush.msrb.mxu2 %v7133_v16 }
0x1470   : > { %v6811_v18 = vmul.f32 %v9517_v8, %v6810_v10 }
0x1472   : > { %v6812_v12 = vmul.f32 0.5, %v6811_v18 }
0x1474   : > { %v6813_v19 = vsub.f32 1.5, %v6812_v12  ;;  %v7131_v12 = vld [vmem:[%s12886_s2 + $0x50] sm:$0xff] }
0x1476   : > { %v6814_v20 = vmul.f32 %v9517_v8, %v6813_v19  ;;  %v7130_v19 = vld [vmem:[%s12886_s2 + $0x48] sm:$0xff] }
0x1478   : > { %v6818_v21 = vsel %vm6817_vm5, %v9517_v8, %v6814_v20  ;;  %v7132_v8 = vld [vmem:[%s12886_s2 + $0x58] sm:$0xff]  ;;  %v7129_v20 = vld [vmem:[%s12886_s2 + $0x40] sm:$0xff] }
0x1479   : > { %v12337_v22 = vmul.f32 %v6818_v21, %v6728_v58  ;;  %v6936_v58 = vpop.f32.mrf.mxu2  ;;  %7165 = vmatpush.msrb.mxu2 %v7132_v8  ;;  %v7128_v21 = vld [vmem:[%s12886_s2 + $0x38] sm:$0xff] }
0x147b   : > { %8958 = vmatmul.msk.f32.vlgmr.msra.gmra.mxu0 %vm5257_vm12, %v12337_v22  ;;  %7166 = vmatpush.msrb.mxu2 %v7131_v12  ;;  %v7262_v12 = vld [vmem:[%s12896_s14] sm:$0xf] }
0x147d   : > { %7167 = vmatpush.msrb.mxu2 %v7130_v19 }
0x147f   : > { %7168 = vmatpush.msrb.mxu2 %v7129_v20 }
0x1481   : > { %7169 = vmatpush.msrb.mxu2 %v7128_v21  ;;  %v9451_v21 = vld [vmem:[%s12897_s29] ss:$0 sm:$0xff] }
0x1483   : > { %7170 = vmatpush.msrb.mxu2 %v7127_v25 }
0x1485   : > { %7171 = vmatpush.msrb.mxu2 %v7126_v35 }
0x1487   : > { %7172 = vmatpush.msrb.mxu2 %v7125_v36 }
0x14f8   : > { %v6845_v30 = vpop.f32.mrf.mxu0 }
0x14f9   : > { %v6848_v31 = vmul.f32 %v6845_v30, %v6845_v30 }
0x14fb   : > { %8959 = vmatmul.msk.f32.vlgmr.msrb.gmra.mxu3 %vm6676_vm15, %v6848_v31 }
0x14fc   : > { %7101 = vmatpush.msrb.mxu3 %v7084_v15 }
0x14fe   : > { %7102 = vmatpush.msrb.mxu3 %v7083_v45 }
0x1503   : > { %8963 = vmatmul.msk.f32.vlgmr.msra.gmra.mxu3 %vm6676_vm15, %v6845_v30 }
0x157e   : > { %v6872_v13 = vpop.f32.mrf.mxu3 }
0x157f   : > { %v6875_v39 = vmax.f32 %v6872_v13, 1e-08  ;;  %v7124_v13 = vld [vmem:[%s12886_s2 + $0x18] sm:$0xff] }
0x1580   : > { %7173 = vmatpush.msrb.mxu2 %v7124_v13 }
0x1581   : > { %9518 = vrsqrt.f32 %v6875_v39  ;;  %vm6883_vm4 = vcmp.eq.f32.partialorder %v6875_v39, inf  ;;  %v6886_v50 = vand.u32 2147483648, %v6875_v39  ;;  %vm6885_vm6 = vcmp.eq.f32.partialorder %v6875_v39, 0.0 }
0x1582   : > { %7174 = vmatpush.msrb.mxu2 %v7123_v38 }
0x1586   : > { %v7026_v41 = vpop.f32.mrf.mxu3 }
0x1587   : > { %v9519_v43 = vpop.eup %9518 }
0x1588   : > { %v6877_v44 = vmul.f32 %v9519_v43, %v6875_v39 }
0x158a   : > { %v6878_v14 = vmul.f32 %v9519_v43, %v6877_v44 }
0x158c   : > { %v6879_v17 = vmul.f32 0.5, %v6878_v14  ;;  %v7082_v14 = vld [vmem:[%s12889_s11] sm:$0xff] }
0x158d   : > { %7103 = vmatpush.msrb.mxu3 %v7082_v14  ;;  %v9452_v14 = vld [vmem:[%s3662_s30] ss:$0 sm:$0xff] }
0x158e   : > { %v6880_v47 = vsub.f32 1.5, %v6879_v17 }
0x1590   : > { %v6881_v48 = vmul.f32 %v9519_v43, %v6880_v47  ;;  %v7238_v47 = vld [vmem:[%s12891_s0 + $0x10] sm:$0xff] }
0x1592   : > { %v6882_v49 = vmul.f32 %v6881_v48, %v6875_v39  ;;  %v7237_v48 = vld [vmem:[%s12891_s0 + $0x8] sm:$0xff] }
0x1594   : > { %v6884_v51 = vsel %vm6883_vm4, %v6875_v39, %v6882_v49  ;;  %v7122_v39 = vld [vmem:[%s12886_s2 + $0x8] sm:$0xff]  ;;  %v7236_v49 = vld [vmem:[%s12891_s0] sm:$0xff] }
0x1595   : > { %v6887_v52 = vsel %vm6885_vm6, %v6886_v50, %v6884_v51  ;;  %7175 = vmatpush.msrb.mxu2 %v7122_v39  ;;  %v7189_v51 = vld [vmem:[%s12892_s1 + $0x18] sm:$0xff] }
0x1596   : > { %8960 = vmatmul.msk.f32.vlgmr.msrb.gmra.mxu1 %vm5326_vm10, %v6887_v52  ;;  %7209 = vmatpush.msra.mxu3 %v7189_v51 }
0x1597   : > { %7176 = vmatpush.msrb.mxu2 %v7121_v40  ;;  %7156 = vmatpush.msrb.mxu1 %v7137_v46 }
0x1598   : > { %7210 = vmatpush.msra.mxu3 %v7188_v0 }
0x159a   : > { %7211 = vmatpush.msra.mxu3 %v7187_v2 }
0x1613   : > { %v6913_v59 = vpop.f32.mrf.mxu1 }
0x1614   : > { %v6937_v60 = vadd.f32 %v6936_v58, %v6913_v59 }
0x1616   : > { %v12370_v61 = vadd.f32 %v9448_v57, %v6937_v60 }
0x1618   : > { %6980 = vmatmul.f32.vlgmr.msrb.gmra.mxu0 %v12370_v61  ;;  %v7054_v44 = vmax.f32 %v12370_v61, 0.0 }
0x1695   : > { %v6981_v3 = vpop.f32.mrf.mxu0 }
0x1696   : > { %v6982_v5 = vadd.f32 %v9449_v63, %v6981_v3  ;;  %v7186_v3 = vld [vmem:[%s12892_s1] sm:$0xff] }
0x1697   : > { %7212 = vmatpush.msra.mxu3 %v7186_v3 }
0x1698   : > { %v8962_v7 = vmul.f32 -1.442695, %v6982_v5  ;;  %v9450_v5 = vld [vmem:[%s12895_s20] ss:$0 sm:$0xff] }
0x169a   : > { %9520 = vpow2.f32 %v8962_v7 }
0x16a0   : > { %v9521_v10 = vpop.eup %9520 }
0x16a1   : > { %v6987_v18 = vadd.f32 1.0, %v9521_v10 }
0x16a3   : > { %9522 = vrcp.f32 %v6987_v18  ;;  %v6999_v29 = vand.u32 2147483648, %v6987_v18  ;;  %v6997_v31 = vand.u32 2147483647, %v6987_v18  ;;  %vm6993_vm7 = vweird.f32 %v6987_v18 }
0x16a5   : > { %v7000_v4 = vor.u32 1.1754944e-38, %v6999_v29  ;;  %vm6998_vm11 = vcmp.eq.f32.partialorder %v6997_v31, 8.507059e+37 }
0x16a9   : > { %v9523_v24 = vpop.eup %9522 }
0x16aa   : > { %v6989_v26 = vmul.f32 %v9523_v24, %v6987_v18  ;;  %vm6994_vm3 = vweird.f32 %v9523_v24 }
0x16ab   : > { %vm6995_vm8 = vmor %vm6993_vm7, %vm6994_vm3 }
0x16ac   : > { %v6990_v28 = vsub.f32 1.0, %v6989_v26 }
0x16ae   : > { %v6991_v30 = vmul.f32 %v9523_v24, %v6990_v28 }
0x16b0   : > { %v6992_v32 = vadd.f32 %v9523_v24, %v6991_v30 }
0x16b2   : > { %v6996_v33 = vsel %vm6995_vm8, %v9523_v24, %v6992_v32 }
0x16b3   : > { %v7001_v34 = vsel %vm6998_vm11, %v7000_v4, %v6996_v33 }
0x16b4   : > { %8964 = vmatmul.msk.f32.vlgmr.msra.gmra.mxu1 %vm5326_vm10, %v7001_v34 }
0x16b5   : > { %7255 = vmatpush.msra.mxu1 %v7238_v47  ;;  %v7295_v47 = vld [vmem:[%s11939_s4 + $0x8] sm:$0xf] }
0x16b7   : > { %7256 = vmatpush.msra.mxu1 %v7237_v48 }
0x16b9   : > { %7257 = vmatpush.msra.mxu1 %v7236_v49  ;;  %v7294_v49 = vld [vmem:[%s11939_s4] sm:$0xff]  ;;  %s12899_s4 = sld [smem:[#allocation176_spill]] }
0x16bf   : > { %p8975_p8 = scmp.ne.s32.totalorder %s12899_s4, 2 }
0x16c0   : > { %s12900_s30 = sld [smem:[#allocation107_spill]] (!%p8975_p8) }
0x16c1   : > { %s12901_s5 = sld [smem:[#allocation110_spill]] (!%p8975_p8) }
0x16c2   : > { %s12902_s27 = sld [smem:[#allocation103_spill]] (!%p8975_p8) }
0x16c3   : > { %s12904_s8 = sld [smem:[#allocation111_spill]] (!%p8975_p8) }
0x16c4   : > { %s12905_s26 = sld [smem:[#allocation106_spill]] (!%p8975_p8) }
0x16c8   : > { %s12903_s17 = smov (!%p8975_p8), %s12902_s27 }
0x1731   : > { %v7050_v42 = vpop.f32.mrf.mxu1 }
0x1732   : > { %v7053_v43 = vmul.f32 %v7050_v42, %v7026_v41 }
0x1734   : > { %8965 = vmatmul.msk.f32.vlgmr.msra.gmra.mxu2 %vm6676_vm15, %v7053_v43 }
0x173c   : > { %7177 = vmatmul.f32.vlgmr.msrb.gmra.mxu2 %v7054_v44 }
0x17b7   : > { %v7078_v27 = vpop.f32.mrf.mxu2 }
0x17b8   : > { %v7081_v17 = vmul.f32 %v7078_v27, %v7078_v27 }
0x17ba   : > { %8966 = vmatmul.msk.f32.vlgmr.msrb.gmra.mxu3 %vm6676_vm15, %v7081_v17  ;;  %v9453_v17 = vld [vmem:[%s12898_s9] ss:$0 sm:$0xff] }
0x17bb   : > { %8971 = vmatpush.msk.msrb.mxu3 %vm5261_vm9, %v7262_v12 }
0x17bf   : > { %v7178_v37 = vpop.f32.mrf.mxu2 }
0x183d   : > { %v7105_v50 = vpop.f32.mrf.mxu3 }
0x183e   : > { %v7108_v52 = vmax.f32 %v7105_v50, 1e-08 }
0x1840   : > { %9524 = vrsqrt.f32 %v7108_v52  ;;  %vm7116_vm1 = vcmp.eq.f32.partialorder %v7108_v52, inf  ;;  %v7119_v61 = vand.u32 2147483648, %v7108_v52  ;;  %vm7118_vm13 = vcmp.eq.f32.partialorder %v7108_v52, 0.0 }
0x1846   : > { %v9525_v53 = vpop.eup %9524 }
0x1847   : > { %v7110_v55 = vmul.f32 %v9525_v53, %v7108_v52 }
0x1849   : > { %v7111_v56 = vmul.f32 %v9525_v53, %v7110_v55 }
0x184b   : > { %v7112_v57 = vmul.f32 0.5, %v7111_v56 }
0x184d   : > { %v7113_v58 = vsub.f32 1.5, %v7112_v57 }
0x184f   : > { %v7114_v59 = vmul.f32 %v9525_v53, %v7113_v58 }
0x1851   : > { %v7115_v60 = vmul.f32 %v7114_v59, %v7108_v52 }
0x1853   : > { %v7117_v62 = vsel %vm7116_vm1, %v7108_v52, %v7115_v60 }
0x1854   : > { %v7120_v63 = vsel %vm7118_vm13, %v7119_v61, %v7117_v62 }
0x1855   : > { %8967 = vmatmul.msk.f32.vlgmr.msrb.gmra.mxu1 %vm5326_vm10, %v7120_v63 }
0x1856   : > { %8973 = vmatpush.msk.msrb.mxu1 %vm5261_vm9, %v7295_v47 }
0x1858   : > { %7348 = vmatpush.msrb.mxu1 %v7294_v49 }
0x185d   : > { %8970 = vmatmul.msk.f32.vlgmr.msra.gmra.mxu1 %vm6676_vm15, %v7078_v27 }
0x18d2   : > { %v7158_v6 = vpop.f32.mrf.mxu1 }
0x18d3   : > { %v7179_v7 = vadd.f32 %v7178_v37, %v7158_v6 }
0x18d5   : > { %v7185_v9 = vadd.f32 %v9450_v5, %v7179_v7 }
0x18d7   : > { %8968 = vmatmul.msk.f32.vlgmr.msra.gmra.mxu3 %vm5514_vm0, %v7185_v9  ;;  %v7290_v1 = vadd.f32 %v7185_v9, %v12323_v54 }
0x18d9   : > { %v7296_v16 = vsel %vm5514_vm0, %v7290_v1, 0.0 }
0x18da   : > { %7297 = vadd.xlane.f32.xlu2 %v7296_v16  ;;  %v7259_v51 = vpop.f32.mrf.mxu1 }
0x194d   : > { %v7298_v8 = vpop.xlane.xlu2 %7297 }
0x194e   : > { %v7299_v10 = vmul.f32 %v7298_v8, %v12304_v23 }
0x1950   : > { %v7300_v18 = vsub.f32 %v7290_v1, %v7299_v10 }
0x1952   : > { %v7301_v19 = vmul.f32 %v7300_v18, %v7300_v18 }
0x1954   : > { %v7302_v20 = vsel %vm5514_vm0, %v7301_v19, 0.0 }
0x1955   : > { %7303 = vadd.xlane.f32.xlu2 %v7302_v20 }
0x195a   : > { %v7214_v24 = vpop.f32.mrf.mxu3 }
0x195b   : > { %v7215_v25 = vadd.f32 %v9451_v21, %v7214_v24 }
0x195d   : > { %v8969_v54 = vmul.f32 -1.442695, %v7215_v25 }
0x195f   : > { %9526 = vpow2.f32 %v8969_v54 }
0x1965   : > { %v9527_v26 = vpop.eup %9526 }
0x1966   : > { %v7220_v28 = vadd.f32 1.0, %v9527_v26 }
0x1968   : > { %9528 = vrcp.f32 %v7220_v28  ;;  %v7232_v32 = vand.u32 2147483648, %v7220_v28  ;;  %v7230_v33 = vand.u32 2147483647, %v7220_v28  ;;  %vm7226_vm2 = vweird.f32 %v7220_v28 }
0x196a   : > { %v7233_v35 = vor.u32 1.1754944e-38, %v7232_v32  ;;  %vm7231_vm4 = vcmp.eq.f32.partialorder %v7230_v33, 8.507059e+37 }
0x196e   : > { %v9529_v29 = vpop.eup %9528 }
0x196f   : > { %v7222_v30 = vmul.f32 %v9529_v29, %v7220_v28  ;;  %vm7227_vm15 = vweird.f32 %v9529_v29 }
0x1970   : > { %vm7228_vm5 = vmor %vm7226_vm2, %vm7227_vm15 }
0x1971   : > { %v7223_v31 = vsub.f32 1.0, %v7222_v30 }
0x1973   : > { %v7224_v4 = vmul.f32 %v9529_v29, %v7223_v31 }
0x1975   : > { %v7225_v34 = vadd.f32 %v9529_v29, %v7224_v4 }
0x1977   : > { %v7229_v36 = vsel %vm7228_vm5, %v9529_v29, %v7225_v34 }
0x1978   : > { %v7234_v13 = vsel %vm7231_vm4, %v7233_v35, %v7229_v36 }
0x1979   : > { %8972 = vmatmul.msk.f32.vlgmr.msrb.gmra.mxu3 %vm5850_vm14, %v7234_v13 }
0x19c8   : > { %v7304_v38 = vpop.xlane.xlu2 %7303 }
0x19c9   : > { %v7305_v39 = vmul.f32 %v7304_v38, %v12304_v23 }
0x19cb   : > { %v7306_v40 = vadd.f32 1e-05, %v7305_v39 }
0x19cd   : > { %9530 = vrsqrt.f32 %v7306_v40  ;;  %vm7313_vm3 = vweird.f32 %v7306_v40 }
0x19d3   : > { %v9531_v15 = vpop.eup %9530 }
0x19d4   : > { %v7308_v41 = vmul.f32 %v9531_v15, %v7306_v40  ;;  %vm7314_vm6 = vweird.f32 %v9531_v15 }
0x19d5   : > { %vm7315_vm7 = vmor %vm7313_vm3, %vm7314_vm6 }
0x19d6   : > { %v7309_v42 = vmul.f32 %v9531_v15, %v7308_v41 }
0x19d8   : > { %v7310_v43 = vmul.f32 0.5, %v7309_v42 }
0x19da   : > { %v7311_v44 = vsub.f32 1.5, %v7310_v43 }
0x19dc   : > { %v7312_v45 = vmul.f32 %v9531_v15, %v7311_v44 }
0x19de   : > { %v7316_v27 = vsel %vm7315_vm7, %v9531_v15, %v7312_v45 }
0x19df   : > { %v7317_v46 = vmul.f32 %v7316_v27, %v7300_v18 }
0x19e1   : > { %v7321_v48 = vmul.f32 %v9452_v14, %v7317_v46 }
0x19e3   : > { %v7325_v50 = vadd.f32 %v9453_v17, %v7321_v48 }
0x19e5   : > { %7369 = vst.msk [vmem:[#allocation2] sm:$0xff] %vm5514_vm0, %v7325_v50 }
0x19fc   : > { %v7286_v52 = vpop.f32.mrf.mxu3 }
0x19fd   : > { %v7289_v53 = vmul.f32 %v7286_v52, %v7259_v51 }
0x19ff   : > { %v7291_v55 = vadd.f32 %v7289_v53, %v12337_v22 }
0x1a01   : > { %v7326_v56 = vmul.f32 %v7291_v55, %v7291_v55 }
0x1a03   : > { %8974 = vmatmul.msk.f32.vlgmr.msrb.gmra.mxu1 %vm5257_vm12, %v7326_v56 }
0x1a80   : > { %v7350_v57 = vpop.f32.mrf.mxu1 }
0x1a81   : > { %v7353_v58 = vmax.f32 %v7350_v57, 1e-08 }
0x1a83   : > { %v7354_v59 = vsel %vm5850_vm14, %v7353_v58, 0.0 }
0x1a84   : > { %7355 = vadd.xlane.f32.xlu1 %v7354_v59 }
0x1af7   : > { %v7356_v60 = vpop.xlane.xlu1 %7355 }
0x1af8   : > { %v7357_v61 = vmul.f32 %v7356_v60, %v12334_v11 }
0x1afa   : > { %9532 = vrsqrt.f32 %v7357_v61  ;;  %vm7364_vm11 = vweird.f32 %v7357_v61 }
0x1b00   : > { %v9533_v62 = vpop.eup %9532 }
0x1b01   : > { %v7359_v63 = vmul.f32 %v9533_v62, %v7357_v61  ;;  %vm7365_vm8 = vweird.f32 %v9533_v62 }
0x1b02   : > { %vm7366_vm1 = vmor %vm7364_vm11, %vm7365_vm8 }
0x1b03   : > { %v7360_v0 = vmul.f32 %v9533_v62, %v7359_v63 }
0x1b05   : > { %v7361_v2 = vmul.f32 0.5, %v7360_v0 }
0x1b07   : > { %v7362_v3 = vsub.f32 1.5, %v7361_v2 }
0x1b09   : > { %v7363_v5 = vmul.f32 %v9533_v62, %v7362_v3 }
0x1b0a   : > { %7374 = sbr.rel (%p8975_p8) target bundleno = 7885 (0x1ecd), region = 548 }
0x1b0b   : > { %v7367_v22 = vsel %vm7366_vm1, %v9533_v62, %v7363_v5 }
0x1b0c   : > { %v7368_v37 = vmul.f32 %v7367_v22, %v7291_v55 }
0x1b0e   : > { %7370 = vst.msk [vmem:[#allocation3] sm:$0xff] %vm5257_vm12, %v7368_v37 }
0x1b0f   : > { %v7378_v6 = vld [vmem:[%s12900_s30 + $0x8] sm:$0xf]  ;;  %v7377_v7 = vld [vmem:[%s12900_s30] sm:$0xff]  ;;  %v7409_v9 = vmul.f32 %v7368_v37, %v7368_v37  ;;  %v7379_v10 = vsel %vm5514_vm0, %v7325_v50, 0.0  ;;  %v7525_v41 = vld [vmem:[%s12904_s8 + $0x18] sm:$0xff] }
0x1b10   : > { %8976 = vmatpush.msk.msra.mxu0 %vm5261_vm9, %v7378_v6  ;;  %v7453_v18 = vld [vmem:[%s12901_s5 + $0x8] sm:$0xf]  ;;  %v7452_v12 = vld [vmem:[%s12901_s5] sm:$0xff]  ;;  %v7524_v42 = vld [vmem:[%s12904_s8 + $0x10] sm:$0xff] }
0x1b11   : > { %8978 = vmatpush.msk.msra.mxu1 %vm5261_vm9, %v7453_v18  ;;  %v7482_v34 = vld [vmem:[%s12902_s27 + $0x8] sm:$0xf]  ;;  %v7481_v35 = vld [vmem:[%s12903_s17] sm:$0xff]  ;;  %v7608_v3 = vld [vmem:[%s12905_s26 + $0x18] sm:$0xff] }
0x1b12   : > { %7431 = vmatpush.msra.mxu0 %v7377_v7  ;;  %8980 = vmatpush.msk.msra.mxu2 %vm5261_vm9, %v7482_v34  ;;  %v7526_v38 = vld [vmem:[#allocation34] sm:$0xf]  ;;  %v7522_v45 = vld [vmem:[%s12904_s8] sm:$0xff]  ;;  %v9536_v61 = vld [vmem:[#allocation33] ss:$0 sm:$0xff] }
0x1b13   : > { %8977 = vmatmul.msk.f32.vlgmr.msra.gmra.mxu0 %vm5257_vm12, %v7409_v9  ;;  %7475 = vmatpush.msra.mxu1 %v7452_v12  ;;  %v7523_v43 = vld [vmem:[%s12904_s8 + $0x8] sm:$0xff]  ;;  %v9537_v0 = vld [vmem:[#allocation31] ss:$0 sm:$0xff]  ;;  %v7607_v5 = vld [vmem:[%s12905_s26 + $0x10] sm:$0xff] }
0x1b14   : > { %7504 = vmatpush.msra.mxu2 %v7481_v35  ;;  %8982 = vmatpush.msk.msra.mxu3 %vm5261_vm9, %v7526_v38  ;;  %v7606_v22 = vld [vmem:[%s12905_s26 + $0x8] sm:$0xff]  ;;  %v9538_v7 = vld [vmem:[#allocation28] ss:$0 sm:$0xff]  ;;  %v7609_v12 = vld [vmem:[#allocation30] sm:$0x1] }
0x1b15   : > { %7625 = vmatpush.msrb.mxu1 %v7608_v3 }
0x1b16   : > { %7568 = vmatpush.msrb.mxu3 %v7525_v41 }
0x1b17   : > { %7626 = vmatpush.msrb.mxu1 %v7607_v5 }
0x1b18   : > { %7569 = vmatpush.msrb.mxu3 %v7524_v42 }
0x1b19   : > { %7627 = vmatpush.msrb.mxu1 %v7606_v22 }
0x1b1a   : > { %7570 = vmatpush.msrb.mxu3 %v7523_v43 }
0x1b1c   : > { %7571 = vmatpush.msrb.mxu3 %v7522_v45 }
0x1b90   : > { %v7433_v1 = vpop.f32.mrf.mxu0 }
0x1b91   : > { %v7436_v16 = vmax.f32 %v7433_v1, 1e-08 }
0x1b93   : > { %v7437_v8 = vsel %vm5850_vm14, %v7436_v16, 0.0 }
0x1b94   : > { %7438 = vadd.xlane.f32.xlu0 %v7437_v8 }
0x1b9c   : > { %7380 = vadd.xlane.f32.xlu0 %v7379_v10  ;;  %v10762_v10 = vmov 0.125  }
0x1c07   : > { %v7439_v19 = vpop.xlane.xlu0 %7438 }
0x1c08   : > { %v7440_v20 = vmul.f32 %v7439_v19, %v12334_v11 }
0x1c0a   : > { %9539 = vrsqrt.f32 %v7440_v20  ;;  %vm7447_vm15 = vweird.f32 %v7440_v20 }
0x1c0f   : > { %v7381_v21 = vpop.xlane.xlu0 %7380 }
0x1c10   : > { %v9540_v24 = vpop.eup %9539  ;;  %v7382_v25 = vmul.f32 %v7381_v21, %v12304_v23 }
0x1c11   : > { %v7442_v54 = vmul.f32 %v9540_v24, %v7440_v20  ;;  %vm7448_vm13 = vweird.f32 %v9540_v24 }
0x1c12   : > { %v7383_v26 = vsub.f32 %v7325_v50, %v7382_v25  ;;  %vm7449_vm2 = vmor %vm7447_vm15, %vm7448_vm13 }
0x1c13   : > { %v7443_v28 = vmul.f32 %v9540_v24, %v7442_v54 }
0x1c14   : > { %v7384_v29 = vmul.f32 %v7383_v26, %v7383_v26 }
0x1c15   : > { %v7444_v30 = vmul.f32 0.5, %v7443_v28 }
0x1c16   : > { %v7385_v31 = vsel %vm5514_vm0, %v7384_v29, 0.0 }
0x1c17   : > { %v7445_v32 = vsub.f32 1.5, %v7444_v30  ;;  %7386 = vadd.xlane.f32.xlu1 %v7385_v31 }
0x1c19   : > { %v7446_v4 = vmul.f32 %v9540_v24, %v7445_v32 }
0x1c1b   : > { %v7450_v11 = vsel %vm7449_vm2, %v9540_v24, %v7446_v4 }
0x1c1c   : > { %v7451_v33 = vmul.f32 %v7450_v11, %v7368_v37  ;;  %v7605_v37 = vld [vmem:[%s12905_s26] sm:$0xff] }
0x1c1d   : > { %7628 = vmatpush.msrb.mxu1 %v7605_v37 }
0x1c1e   : > { %8979 = vmatmul.msk.f32.vlgmr.msra.gmra.mxu1 %vm5257_vm12, %v7451_v33 }
0x1c8a   : > { %v7387_v39 = vpop.xlane.xlu1 %7386 }
0x1c8b   : > { %v7388_v40 = vmul.f32 %v7387_v39, %v12304_v23 }
0x1c8d   : > { %v7389_v15 = vadd.f32 1e-05, %v7388_v40 }
0x1c8f   : > { %9541 = vrsqrt.f32 %v7389_v15  ;;  %vm7396_vm9 = vweird.f32 %v7389_v15 }
0x1c95   : > { %v9542_v44 = vpop.eup %9541 }
0x1c96   : > { %v7391_v14 = vmul.f32 %v9542_v44, %v7389_v15 }
0x1c98   : > { %v7392_v46 = vmul.f32 %v9542_v44, %v7391_v14 }
0x1c9a   : > { %v7393_v47 = vmul.f32 0.5, %v7392_v46 }
0x1c9b   : > { %v7477_v36 = vpop.f32.mrf.mxu1 }
0x1c9c   : > { %v7480_v13 = vmul.f32 %v7477_v36, %v7477_v36  ;;  %v7394_v23 = vsub.f32 1.5, %v7393_v47 }
0x1c9e   : > { %8981 = vmatmul.msk.f32.vlgmr.msra.gmra.mxu2 %vm5257_vm12, %v7480_v13  ;;  %vm7397_vm12 = vweird.f32 %v9542_v44  ;;  %v7395_v52 = vmul.f32 %v9542_v44, %v7394_v23 }
0x1c9f   : > { %vm7398_vm5 = vmor %vm7396_vm9, %vm7397_vm12 }
0x1ca0   : > { %v7399_v56 = vsel %vm7398_vm5, %v9542_v44, %v7395_v52 }
0x1ca1   : > { %v7400_v60 = vmul.f32 %v7399_v56, %v7383_v26 }
0x1ca3   : > { %v7404_v63 = vmul.f32 %v9536_v61, %v7400_v60 }
0x1ca5   : > { %v7408_v2 = vadd.f32 %v9537_v0, %v7404_v63 }
0x1d21   : > { %v7506_v27 = vpop.f32.mrf.mxu2 }
0x1d22   : > { %v7509_v17 = vmax.f32 %v7506_v27, 1e-08 }
0x1d24   : > { %9543 = vrsqrt.f32 %v7509_v17  ;;  %vm7517_vm4 = vcmp.eq.f32.partialorder %v7509_v17, inf  ;;  %v7520_v58 = vand.u32 2147483648, %v7509_v17  ;;  %vm7519_vm6 = vcmp.eq.f32.partialorder %v7509_v17, 0.0 }
0x1d2a   : > { %v9544_v48 = vpop.eup %9543 }
0x1d2b   : > { %v7511_v49 = vmul.f32 %v9544_v48, %v7509_v17 }
0x1d2d   : > { %v7512_v50 = vmul.f32 %v9544_v48, %v7511_v49 }
0x1d2f   : > { %v7513_v51 = vmul.f32 0.5, %v7512_v50 }
0x1d31   : > { %v7514_v53 = vsub.f32 1.5, %v7513_v51 }
0x1d33   : > { %v7515_v55 = vmul.f32 %v9544_v48, %v7514_v53 }
0x1d35   : > { %v7516_v57 = vmul.f32 %v7515_v55, %v7509_v17 }
0x1d37   : > { %v7518_v59 = vsel %vm7517_vm4, %v7509_v17, %v7516_v57 }
0x1d38   : > { %v7521_v62 = vsel %vm7519_vm6, %v7520_v58, %v7518_v59 }
0x1d39   : > { %8983 = vmatmul.msk.f32.vlgmr.msra.gmra.mxu3 %vm5850_vm14, %v7521_v62  ;;  %vm7634_vm14 = vcmask 253952  }
0x1d41   : > { %8984 = vmatmul.msk.f32.vlgmr.msrb.gmra.mxu3 %vm5514_vm0, %v7408_v2 }
0x1dbc   : > { %v7550_v6 = vpop.f32.mrf.mxu3 }
0x1dc4   : > { %v7573_v9 = vpop.f32.mrf.mxu3 }
0x1dc5   : > { %v7574_v1 = vadd.f32 %v7573_v9, %v7550_v6 }
0x1dc7   : > { %v7580_v16 = vadd.f32 %v9538_v7, %v7574_v1 }
0x1dc9   : > { %v7581_v8 = vmax.f32 %v7580_v16, 0.0 }
0x1dcb   : > { %7600 = vmatpush.msrb.mxu0 %v7581_v8 }
0x1dcc   : > { %8985 = vmatmul.msk.f32.vlgmr.msrb.gmra.mxu0 %vm5326_vm10, %v10762_v10 }
0x1e49   : > { %v7602_v18 = vpop.f32.mrf.mxu0 }
0x1e4a   : > { %8986 = vmatmul.msk.f32.vlgmr.msrb.gmra.mxu1 %vm5514_vm0, %v7602_v18 }
0x1ec7   : > { %v7630_v19 = vpop.f32.mrf.mxu1 }
0x1ec8   : > { %v7631_v20 = vadd.f32 %v7630_v19, %v7609_v12 }
0x1eca   : > { %v7633_v21 = vmax.f32 %v7631_v20, 0.0 }
0x1ecc   : > { %7635 = vst.msk [vmem:[#allocation58] sm:$0x1] %vm7634_vm14, %v7633_v21 }
0x1ecd PF: > { %s12906_s2 = sld [smem:[#allocation176_spill]]  ;;  %s10763_s7 = smov [#allocation58]  }
0x1ece   : > { %s12907_s22 = sld [smem:[#allocation173_spill]]  ;;  %s7642_s11 = sshll.u32 %s10763_s7, 4  ;;  %s7643_s11 = int_to_ptr.vmem [resolvable:$true] %s7642_s11 }
0x1ed3   : > { %p9223_p10 = scmp.eq.s32.totalorder %s12906_s2, 2 }
0x1ed4   : > { %s7644_s10 = sshll.u32 %s12907_s22, 4  ;;  %s10527_s19 = scalar_lea.hbm %s12907_s22, 1  ;;  %s7645_s10 = int_to_ptr.hbm [resolvable:$true] %s7644_s10 }
0x1ed5   : > { %s10521_s0 = sshra.s32 %s7645_s10, 4  ;;  %s10522_s0 = int_to_ptr.hbm [resolvable:$true] %s10521_s0 }
0x1ed6   : > { %s10523_s1 = scalar_lea.hbm %s10522_s0, 1  ;;  %p10528_p12 = scmp.lt.s32.totalorder %s10522_s0, %s12907_s22 }
0x1ed7   : > { %p10524_p7 = scmp.ne.s32.totalorder %s10522_s0, %s10523_s1  ;;  %p10529_p0 = scmp.lt.s32.totalorder %s10527_s19, %s10523_s1 }
0x1ed9   : > { %p10525_p11 = pnand %p10524_p7, %p9223_p10  ;;  %p10530_p13 = por %p10529_p0, %p10528_p12 }
0x1edb   : > { %p10526_p9 = pneg %p10525_p11 }
0x1edd   : > { %p10531_p1 = pnand %p10530_p13, %p10526_p9 }
0x1edf   : > { %10534 = shalt.err (!%p10531_p1)
}
0x1ee0   : > { %9124 = dma.vmem_to_hbm [thread:$0]  (%p9223_p10), %s7643_s11, 16, %s7645_s10, [#allocation9]  }
0x1ee1   : > { %10620 = dma.done.wait (%p9223_p10), [#allocation9], 16  }
0x1ee2   : > { %10622 = vsyncadd (%p9223_p10), [#allocation9], 4294967280 }
0x1ee3 PF: > { %s12908_s11 = sld [smem:[#allocation177_spill]] }
0x1ee4   : > { %s12909_s0 = sld [smem:[#allocation174_spill]] }
0x1ee5   : > { %s12910_s27 = sld [smem:[#allocation175_spill]] }
0x1ee6   : > { %s12911_s6 = sld [smem:[#allocation178_spill]] }
0x1ee9   : > { %p236_p2 = scmp.ge.s32.totalorder %s12908_s11, 5  }
0x1eeb   :  { %238 = sbr.rel (!%p236_p2) target bundleno = 225 (0xe1), region = 905 }
0x1ef0   :  { %7658 = vsyncpa [#allocation8], 1 }
0x1ef1   :  { %7660 = vsyncpa [#allocation8 + $0x1], 1 }
0x1ef2   :  { %7661 = vsyncpa [#allocation11], 1 }
0x1ef3   :  { %7662 = vsyncpa [#allocation14], 1 }
0x1ef4   :  { %7663 = vsyncpa [#allocation17], 1 }
0x1ef5   :  { %7664 = vsyncpa [#allocation20], 1 }
0x1ef6   :  { %7665 = vsyncpa [#allocation23], 1 }
0x1ef7   :  { %7666 = vsyncpa [#allocation26], 1 }
0x1ef8   :  { %7667 = vsyncpa [#allocation29], 1 }
0x1ef9   :  { %7668 = vsyncpa [#allocation32], 1 }
0x1efa   :  { %7669 = vsyncpa [#allocation35], 1 }
0x1efb   :  { %7670 = vsyncpa [#allocation38], 1 }
0x1efc   :  { %7672 = vsyncpa [#allocation38 + $0x1], 1 }
0x1efd   :  { %7673 = vsyncpa [#allocation41], 1 }
0x1efe   :  { %7675 = vsyncpa [#allocation41 + $0x1], 1 }
0x1eff   :  { %7676 = vsyncpa [#allocation44], 1 }
0x1f00   :  { %7678 = vsyncpa [#allocation44 + $0x1], 1 }
0x1f01   :  { %7679 = vsyncpa [#allocation47], 1 }
0x1f02   :  { %7681 = vsyncpa [#allocation47 + $0x1], 1 }
0x1f03   :  { %7682 = vsyncpa [#allocation50], 1 }
0x1f04   :  { %7684 = vsyncpa [#allocation50 + $0x1], 1 }
0x1f05   :  { %7685 = vsyncpa [#allocation53], 1 }
0x1f06   :  { %7687 = vsyncpa [#allocation53 + $0x1], 1 }
0x1f07   :  { %7688 = vsyncpa [#allocation56], 1 }
0x1f08   :  { %7690 = vsyncpa [#allocation56 + $0x1], 1 }
0x1f09   :  { %7691 = vsyncpa [#allocation9], 1 }
0x1f0a   :  { %7693 = vsyncpa [#allocation9 + $0x1], 1 }

</bundles_post_ra>
